<compile_context>
chip_gen: v7x
topology: tpu7x:2x2x1
jax: 0.10.0
libtpu: 0.0.40
codegen_flags: <defaults>
</compile_context>

<pallas_src>
import math

import jax
import jax.numpy as jnp
from jax.experimental import pallas as pl
from jax.experimental.pallas import tpu as pltpu

_LN_EPS = 1e-5   # nn.LayerNorm default eps
_KSIZE = 5       # Conv1d kernel size (padding = 2)


def _erf(z):
    # Abramowitz & Stegun 7.1.26 polynomial erf (|abs err| < 1.5e-7); only VPU/EUP ops.
    a1, a2, a3, a4, a5 = 0.254829592, -0.284496736, 1.421413741, -1.453152027, 1.061405429
    p = 0.3275911
    sgn = jnp.where(z >= 0.0, 1.0, -1.0)
    za = jnp.abs(z)
    t = 1.0 / (1.0 + p * za)
    poly = ((((a5 * t + a4) * t + a3) * t + a2) * t + a1) * t
    return sgn * (1.0 - poly * jnp.exp(-za * za))


def _gelu_exact(x):
    return 0.5 * x * (1.0 + _erf(x * (1.0 / math.sqrt(2.0))))


def _token_mixer_kernel(x_ref, gamma_ref, beta_ref, w1_ref, b1_ref,
                        w2_ref, b2_ref, out_ref):
    BT, S, D = x_ref.shape                       # block: BT batch elems of (S, D), S == D
    H = w1_ref.shape[1]                          # hidden = expansion * seq_len
    gamma = gamma_ref[...]                       # (1, D) f32
    beta = beta_ref[...]                         # (1, D) f32

    row = jax.lax.broadcasted_iota(jnp.int32, (S, 1), 0)

    def tap_stack(z):
        # z: (S, C) f32 -> (S, K*C): zero-padded shifted copies z[l + k - 2, :]
        parts = []
        for k in range(_KSIZE):
            s_off = k - _KSIZE // 2
            if s_off == 0:
                parts.append(z)
            else:
                # rolled[l] = z[(l + s_off) % S]  (XLU sublane rotate, off the MXU)
                rolled = pltpu.roll(z, (-s_off) % S, 0)
                valid = (row >= -s_off) & (row < S - s_off)   # in-bounds source rows
                parts.append(jnp.where(valid, rolled, jnp.zeros_like(rolled)))
        return jnp.concatenate(parts, axis=-1)

    # ---- LayerNorm over d_model (biased variance, as in PyTorch) + fc1 tap stack ----
    x_stacks = []
    for b in range(BT):
        xb = x_ref[b].astype(jnp.float32)                        # (S, D)
        mu = jnp.mean(xb, axis=-1, keepdims=True)
        xc = xb - mu
        var = jnp.mean(xc * xc, axis=-1, keepdims=True)
        xn = xc * jax.lax.rsqrt(var + _LN_EPS) * gamma + beta    # (S, D)
        x_stacks.append(tap_stack(xn))                           # (S, K*D)
    x_stk = x_stacks[0] if BT == 1 else jnp.concatenate(x_stacks, axis=0)   # (BT*S, K*D)

    # ---- fc1: Conv1d(seq_len -> H, k=5, pad=2) as one bf16 MXU matmul, + bias, GELU ----
    h = jnp.dot(x_stk.astype(jnp.bfloat16), w1_ref[...],
                preferred_element_type=jnp.float32)              # (BT*S, H) f32
    h = _gelu_exact(h + b1_ref[...])
    # TODO(synk): dropout1/dropout2 are stochastic -> identity here (eval mode / p = 0).

    # ---- fc2: Conv1d(H -> seq_len, k=5, pad=2) as one bf16 MXU matmul, + bias ----
    h_stacks = [tap_stack(h[b * S:(b + 1) * S]) for b in range(BT)]          # (S, K*H)
    h_stk = h_stacks[0] if BT == 1 else jnp.concatenate(h_stacks, axis=0)    # (BT*S, K*H)
    y = jnp.dot(h_stk.astype(jnp.bfloat16), w2_ref[...],
                preferred_element_type=jnp.float32) + b2_ref[...]            # (BT*S, D)

    # y is already in (seq, d_model) layout == PyTorch's final transpose; add residual.
    for b in range(BT):
        out_ref[b] = (y[b * S:(b + 1) * S]
                      + x_ref[b].astype(jnp.float32)).astype(out_ref.dtype)


def token_mixer_forward(x, gamma, beta, w1, b1, w2, b2, *, batch_block=None):
    """x: (B, seq_len, d_model); PyTorch Conv1d weights w*: (C_out, C_in, K)."""
    B, S, D = x.shape
    assert D == S, "TokenMixer (as written in PyTorch) requires d_model == seq_len"
    H, c_in, K = w1.shape
    assert c_in == S and K == _KSIZE
    assert w2.shape == (S, H, K)

    # Batch elements per grid step (amortizes ~0.35us per-step overhead); keep >= 2
    # grid steps when possible so the "parallel" batch axis can shard over v7x's 2 TCs.
    if batch_block is None:
        batch_block = 1
        for cand in (8, 4, 2):
            if B % cand == 0 and B // cand >= 2:
                batch_block = cand
                break
    BT = batch_block
    assert B % BT == 0

    # Fold the 5 conv taps into the contraction dim: (C_out, C_in, K) -> (K*C_in, C_out),
    # and feed the MXU bf16 operands (accumulation stays f32 inside the kernel).
    w1_flat = jnp.transpose(w1, (2, 1, 0)).reshape(K * D, H).astype(jnp.bfloat16)
    w2_flat = jnp.transpose(w2, (2, 1, 0)).reshape(K * H, S).astype(jnp.bfloat16)

    # VMEM budget: double-buffered x/out tiles + weights (2 buffers) + live f32/bf16 temps.
    io_bytes = 2 * 2 * BT * S * D * x.dtype.itemsize
    w_bytes = 2 * 2 * (K * D * H + K * H * S)                    # bf16, double-buffered
    tmp_bytes = BT * S * (D * 4 * 3 + K * D * 6 + H * 4 * 2 + K * H * 6)
    vmem_limit = int(min(64 * 1024 * 1024,
                         max(32 * 1024 * 1024, 2 * (io_bytes + w_bytes + tmp_bytes))))

    # TODO(synk): for very large d_model on v7x (64 MiB VMEM) stop double-buffering the
    # grid-constant weights (pipeline_mode=pl.Buffered(1)) or tile H on an "arbitrary" axis.
    return pl.pallas_call(
        _token_mixer_kernel,
        out_shape=jax.ShapeDtypeStruct((B, S, D), x.dtype),
        grid=(B // BT,),
        in_specs=[
            pl.BlockSpec((BT, S, D), lambda b: (b, 0, 0)),       # x
            pl.BlockSpec((1, D), lambda b: (0, 0)),              # LayerNorm gamma
            pl.BlockSpec((1, D), lambda b: (0, 0)),              # LayerNorm beta
            pl.BlockSpec((K * D, H), lambda b: (0, 0)),          # fc1 weight (tap-folded, bf16)
            pl.BlockSpec((1, H), lambda b: (0, 0)),              # fc1 bias
            pl.BlockSpec((K * H, S), lambda b: (0, 0)),          # fc2 weight (tap-folded, bf16)
            pl.BlockSpec((1, S), lambda b: (0, 0)),              # fc2 bias
        ],
        out_specs=pl.BlockSpec((BT, S, D), lambda b: (b, 0, 0)),
        compiler_params=pltpu.CompilerParams(
            dimension_semantics=("parallel",),
            vmem_limit_bytes=vmem_limit,
        ),
    )(x, gamma.reshape(1, D).astype(jnp.float32), beta.reshape(1, D).astype(jnp.float32),
      w1_flat, b1.reshape(1, H).astype(jnp.float32),
      w2_flat, b2.reshape(1, S).astype(jnp.float32))


def _reference(x, gamma, beta, w1, b1, w2, b2, *, operand_dtype=jnp.float32):
    """Plain-JAX mirror of the PyTorch forward (eval mode).

    operand_dtype=bf16 mimics the kernel's MXU operand precision (f32 accumulation),
    which lets the test assert a tight implementation tolerance.
    """
    res = x
    mu = x.mean(-1, keepdims=True)
    var = ((x - mu) ** 2).mean(-1, keepdims=True)
    xn = (x - mu) / jnp.sqrt(var + _LN_EPS) * gamma + beta
    xt = jnp.swapaxes(xn, 1, 2)                      # (B, C = d_model, L = seq_len)

    def conv1d(z, w, b):
        O, C, K = w.shape
        L = z.shape[-1]
        pad = (K - 1) // 2
        zp = jnp.pad(z, ((0, 0), (0, 0), (pad, pad)))
        acc = jnp.zeros((z.shape[0], O, L), jnp.float32)
        for k in range(K):
            acc = acc + jnp.einsum('bcl,oc->bol',
                                   zp[:, :, k:k + L].astype(operand_dtype),
                                   w[:, :, k].astype(operand_dtype),
                                   precision='highest',
                                   preferred_element_type=jnp.float32)
        return acc + b[None, :, None]

    h = jax.nn.gelu(conv1d(xt, w1, b1), approximate=False)
    y = conv1d(h, w2, b2)
    return jnp.swapaxes(y, 1, 2) + res


if __name__ == "__main__":
    B = 4
    d_model = seq_len = 128          # module requires d_model == seq_len; 128 keeps lanes dense
    expansion_factor = 2
    H = expansion_factor * seq_len
    K = _KSIZE

    key = jax.random.PRNGKey(0)
    kx, kg, kb, kw1, kb1, kw2, kb2 = jax.random.split(key, 7)

    s1 = 1.0 / math.sqrt(seq_len * K)   # ~PyTorch Conv1d default init scale (fan_in = C_in*K)
    s2 = 1.0 / math.sqrt(H * K)

    x = jax.random.normal(kx, (B, seq_len, d_model), dtype=jnp.float32)
    gamma = 1.0 + 0.1 * jax.random.normal(kg, (d_model,), dtype=jnp.float32)
    beta = 0.05 * jax.random.normal(kb, (d_model,), dtype=jnp.float32)
    w1 = s1 * jax.random.normal(kw1, (H, seq_len, K), dtype=jnp.float32)     # fc1.weight
    b1 = s1 * jax.random.normal(kb1, (H,), dtype=jnp.float32)                # fc1.bias
    w2 = s2 * jax.random.normal(kw2, (seq_len, H, K), dtype=jnp.float32)     # fc2.weight
    b2 = s2 * jax.random.normal(kb2, (seq_len,), dtype=jnp.float32)          # fc2.bias

    out = jax.block_until_ready(token_mixer_forward(x, gamma, beta, w1, b1, w2, b2))
    assert out.shape == (B, seq_len, d_model)

    # Tight check against a reference that mimics bf16 MXU operands (catches impl bugs).
    ref_bf16 = jax.block_until_ready(
        _reference(x, gamma, beta, w1, b1, w2, b2, operand_dtype=jnp.bfloat16))
    err_impl = float(jnp.max(jnp.abs(out - ref_bf16)))
    assert err_impl < 5e-3, f"implementation max abs err {err_impl}"

    # Sanity check against the full-f32 reference; tolerance covers bf16 operand rounding.
    ref_f32 = jax.block_until_ready(
        _reference(x, gamma, beta, w1, b1, w2, b2, operand_dtype=jnp.float32))
    err_full = float(jnp.max(jnp.abs(out - ref_f32)))
    assert err_full < 5e-2, f"full-precision max abs err {err_full}"

    print("KERNEL_OK")
</pallas_src>

<mosaic_0001>
module attributes {stable_mosaic.version = 11 : i64} {
  func.func @_token_mixer_kernel(%arg0: i32, %arg1: memref<2x128x128xf32, #tpu.memory_space<vmem>>, %arg2: memref<1x128xf32, #tpu.memory_space<vmem>>, %arg3: memref<1x128xf32, #tpu.memory_space<vmem>>, %arg4: memref<640x256xbf16, #tpu.memory_space<vmem>>, %arg5: memref<1x256xf32, #tpu.memory_space<vmem>>, %arg6: memref<1280x128xbf16, #tpu.memory_space<vmem>>, %arg7: memref<1x128xf32, #tpu.memory_space<vmem>>, %arg8: memref<2x128x128xf32, #tpu.memory_space<vmem>>) attributes {dimension_semantics = [#tpu.dimension_semantics<parallel>], iteration_bounds = array<i64: 2>, scalar_prefetch = 0 : i64, scratch_operands = 0 : i64, tpu.core_type = #tpu.core_type<tc>, window_params = [{transform_indices = @transform_0, window_bounds = array<i64: 2, 128, 128>}, {pipeline_mode = #tpu.pipeline_mode<synchronous>, transform_indices = @transform_1, window_bounds = array<i64: 1, 128>}, {pipeline_mode = #tpu.pipeline_mode<synchronous>, transform_indices = @transform_2, window_bounds = array<i64: 1, 128>}, {pipeline_mode = #tpu.pipeline_mode<synchronous>, transform_indices = @transform_3, window_bounds = array<i64: 640, 256>}, {pipeline_mode = #tpu.pipeline_mode<synchronous>, transform_indices = @transform_4, window_bounds = array<i64: 1, 256>}, {pipeline_mode = #tpu.pipeline_mode<synchronous>, transform_indices = @transform_5, window_bounds = array<i64: 1280, 128>}, {pipeline_mode = #tpu.pipeline_mode<synchronous>, transform_indices = @transform_6, window_bounds = array<i64: 1, 128>}, {transform_indices = @transform_7, window_bounds = array<i64: 2, 128, 128>}]} {
    %c0 = arith.constant 0 : index
    %c0_0 = arith.constant 0 : index
    %0 = vector.load %arg2[%c0, %c0_0] : memref<1x128xf32, #tpu.memory_space<vmem>>, vector<1x128xf32>
    %c0_1 = arith.constant 0 : index
    %c0_2 = arith.constant 0 : index
    %1 = vector.load %arg3[%c0_1, %c0_2] : memref<1x128xf32, #tpu.memory_space<vmem>>, vector<1x128xf32>
    %2 = tpu.iota {dimensions = array<i32: 0>} : vector<128x1xi32>
    %c0_3 = arith.constant 0 : index
    %c0_4 = arith.constant 0 : index
    %c0_5 = arith.constant 0 : index
    %3 = vector.load %arg1[%c0_3, %c0_4, %c0_5] : memref<2x128x128xf32, #tpu.memory_space<vmem>>, vector<1x128x128xf32>
    %4 = vector.shape_cast %3 : vector<1x128x128xf32> to vector<128x128xf32>
    %cst = arith.constant dense<0.000000e+00> : vector<128xf32>
    %5 = vector.multi_reduction <add>, %4, %cst [1] : vector<128x128xf32> to vector<128xf32>
    %6 = vector.shape_cast %5 : vector<128xf32> to vector<128x1xf32>
    %cst_6 = arith.constant 1.280000e+02 : f32
    %7 = vector.broadcast %cst_6 : f32 to vector<128x1xf32>
    %8 = arith.divf %6, %7 : vector<128x1xf32>
    %9 = vector.broadcast %8 : vector<128x1xf32> to vector<128x128xf32>
    %10 = arith.subf %4, %9 : vector<128x128xf32>
    %11 = arith.mulf %10, %10 : vector<128x128xf32>
    %cst_7 = arith.constant dense<0.000000e+00> : vector<128xf32>
    %12 = vector.multi_reduction <add>, %11, %cst_7 [1] : vector<128x128xf32> to vector<128xf32>
    %13 = vector.shape_cast %12 : vector<128xf32> to vector<128x1xf32>
    %cst_8 = arith.constant 1.280000e+02 : f32
    %14 = vector.broadcast %cst_8 : f32 to vector<128x1xf32>
    %15 = arith.divf %13, %14 : vector<128x1xf32>
    %cst_9 = arith.constant 9.99999974E-6 : f32
    %16 = vector.broadcast %cst_9 : f32 to vector<128x1xf32>
    %17 = arith.addf %15, %16 : vector<128x1xf32>
    %18 = math.rsqrt %17 : vector<128x1xf32>
    %19 = vector.broadcast %18 : vector<128x1xf32> to vector<128x128xf32>
    %20 = arith.mulf %10, %19 : vector<128x128xf32>
    %21 = vector.broadcast %0 : vector<1x128xf32> to vector<128x128xf32>
    %22 = arith.mulf %20, %21 : vector<128x128xf32>
    %23 = vector.broadcast %1 : vector<1x128xf32> to vector<128x128xf32>
    %24 = arith.addf %22, %23 : vector<128x128xf32>
    %c2_i32 = arith.constant 2 : i32
    %25 = tpu.dynamic_rotate %24 by %c2_i32 dim 0 : vector<128x128xf32>, i32 -> vector<128x128xf32>
    %c2_i32_10 = arith.constant 2 : i32
    %26 = vector.broadcast %c2_i32_10 : i32 to vector<128x1xi32>
    %27 = arith.cmpi sge, %2, %26 : vector<128x1xi32>
    %c130_i32 = arith.constant 130 : i32
    %28 = vector.broadcast %c130_i32 : i32 to vector<128x1xi32>
    %29 = arith.cmpi slt, %2, %28 : vector<128x1xi32>
    %30 = arith.andi %27, %29 : vector<128x1xi1>
    %cst_11 = arith.constant 0.000000e+00 : f32
    %31 = vector.broadcast %cst_11 : f32 to vector<128x128xf32>
    %32 = vector.shape_cast %30 : vector<128x1xi1> to vector<128x1xi1>
    %33 = vector.broadcast %32 : vector<128x1xi1> to vector<128x128xi1>
    %34 = arith.select %33, %25, %31 : vector<128x128xi1>, vector<128x128xf32>
    %c1_i32 = arith.constant 1 : i32
    %35 = tpu.dynamic_rotate %24 by %c1_i32 dim 0 : vector<128x128xf32>, i32 -> vector<128x128xf32>
    %c1_i32_12 = arith.constant 1 : i32
    %36 = vector.broadcast %c1_i32_12 : i32 to vector<128x1xi32>
    %37 = arith.cmpi sge, %2, %36 : vector<128x1xi32>
    %c129_i32 = arith.constant 129 : i32
    %38 = vector.broadcast %c129_i32 : i32 to vector<128x1xi32>
    %39 = arith.cmpi slt, %2, %38 : vector<128x1xi32>
    %40 = arith.andi %37, %39 : vector<128x1xi1>
    %cst_13 = arith.constant 0.000000e+00 : f32
    %41 = vector.broadcast %cst_13 : f32 to vector<128x128xf32>
    %42 = vector.shape_cast %40 : vector<128x1xi1> to vector<128x1xi1>
    %43 = vector.broadcast %42 : vector<128x1xi1> to vector<128x128xi1>
    %44 = arith.select %43, %35, %41 : vector<128x128xi1>, vector<128x128xf32>
    %c127_i32 = arith.constant 127 : i32
    %45 = tpu.dynamic_rotate %24 by %c127_i32 dim 0 : vector<128x128xf32>, i32 -> vector<128x128xf32>
    %c-1_i32 = arith.constant -1 : i32
    %46 = vector.broadcast %c-1_i32 : i32 to vector<128x1xi32>
    %47 = arith.cmpi sge, %2, %46 : vector<128x1xi32>
    %c127_i32_14 = arith.constant 127 : i32
    %48 = vector.broadcast %c127_i32_14 : i32 to vector<128x1xi32>
    %49 = arith.cmpi slt, %2, %48 : vector<128x1xi32>
    %50 = arith.andi %47, %49 : vector<128x1xi1>
    %cst_15 = arith.constant 0.000000e+00 : f32
    %51 = vector.broadcast %cst_15 : f32 to vector<128x128xf32>
    %52 = vector.shape_cast %50 : vector<128x1xi1> to vector<128x1xi1>
    %53 = vector.broadcast %52 : vector<128x1xi1> to vector<128x128xi1>
    %54 = arith.select %53, %45, %51 : vector<128x128xi1>, vector<128x128xf32>
    %c126_i32 = arith.constant 126 : i32
    %55 = tpu.dynamic_rotate %24 by %c126_i32 dim 0 : vector<128x128xf32>, i32 -> vector<128x128xf32>
    %c-2_i32 = arith.constant -2 : i32
    %56 = vector.broadcast %c-2_i32 : i32 to vector<128x1xi32>
    %57 = arith.cmpi sge, %2, %56 : vector<128x1xi32>
    %c126_i32_16 = arith.constant 126 : i32
    %58 = vector.broadcast %c126_i32_16 : i32 to vector<128x1xi32>
    %59 = arith.cmpi slt, %2, %58 : vector<128x1xi32>
    %60 = arith.andi %57, %59 : vector<128x1xi1>
    %cst_17 = arith.constant 0.000000e+00 : f32
    %61 = vector.broadcast %cst_17 : f32 to vector<128x128xf32>
    %62 = vector.shape_cast %60 : vector<128x1xi1> to vector<128x1xi1>
    %63 = vector.broadcast %62 : vector<128x1xi1> to vector<128x128xi1>
    %64 = arith.select %63, %55, %61 : vector<128x128xi1>, vector<128x128xf32>
    %65 = tpu.concatenate %34, %44, %24, %54, %64 in 1 : vector<128x128xf32>, vector<128x128xf32>, vector<128x128xf32>, vector<128x128xf32>, vector<128x128xf32> -> vector<128x640xf32>
    %c1 = arith.constant 1 : index
    %c0_18 = arith.constant 0 : index
    %c0_19 = arith.constant 0 : index
    %66 = vector.load %arg1[%c1, %c0_18, %c0_19] : memref<2x128x128xf32, #tpu.memory_space<vmem>>, vector<1x128x128xf32>
    %67 = vector.shape_cast %66 : vector<1x128x128xf32> to vector<128x128xf32>
    %cst_20 = arith.constant dense<0.000000e+00> : vector<128xf32>
    %68 = vector.multi_reduction <add>, %67, %cst_20 [1] : vector<128x128xf32> to vector<128xf32>
    %69 = vector.shape_cast %68 : vector<128xf32> to vector<128x1xf32>
    %cst_21 = arith.constant 1.280000e+02 : f32
    %70 = vector.broadcast %cst_21 : f32 to vector<128x1xf32>
    %71 = arith.divf %69, %70 : vector<128x1xf32>
    %72 = vector.broadcast %71 : vector<128x1xf32> to vector<128x128xf32>
    %73 = arith.subf %67, %72 : vector<128x128xf32>
    %74 = arith.mulf %73, %73 : vector<128x128xf32>
    %cst_22 = arith.constant dense<0.000000e+00> : vector<128xf32>
    %75 = vector.multi_reduction <add>, %74, %cst_22 [1] : vector<128x128xf32> to vector<128xf32>
    %76 = vector.shape_cast %75 : vector<128xf32> to vector<128x1xf32>
    %cst_23 = arith.constant 1.280000e+02 : f32
    %77 = vector.broadcast %cst_23 : f32 to vector<128x1xf32>
    %78 = arith.divf %76, %77 : vector<128x1xf32>
    %cst_24 = arith.constant 9.99999974E-6 : f32
    %79 = vector.broadcast %cst_24 : f32 to vector<128x1xf32>
    %80 = arith.addf %78, %79 : vector<128x1xf32>
    %81 = math.rsqrt %80 : vector<128x1xf32>
    %82 = vector.broadcast %81 : vector<128x1xf32> to vector<128x128xf32>
    %83 = arith.mulf %73, %82 : vector<128x128xf32>
    %84 = vector.broadcast %0 : vector<1x128xf32> to vector<128x128xf32>
    %85 = arith.mulf %83, %84 : vector<128x128xf32>
    %86 = vector.broadcast %1 : vector<1x128xf32> to vector<128x128xf32>
    %87 = arith.addf %85, %86 : vector<128x128xf32>
    %c2_i32_25 = arith.constant 2 : i32
    %88 = tpu.dynamic_rotate %87 by %c2_i32_25 dim 0 : vector<128x128xf32>, i32 -> vector<128x128xf32>
    %c2_i32_26 = arith.constant 2 : i32
    %89 = vector.broadcast %c2_i32_26 : i32 to vector<128x1xi32>
    %90 = arith.cmpi sge, %2, %89 : vector<128x1xi32>
    %c130_i32_27 = arith.constant 130 : i32
    %91 = vector.broadcast %c130_i32_27 : i32 to vector<128x1xi32>
    %92 = arith.cmpi slt, %2, %91 : vector<128x1xi32>
    %93 = arith.andi %90, %92 : vector<128x1xi1>
    %cst_28 = arith.constant 0.000000e+00 : f32
    %94 = vector.broadcast %cst_28 : f32 to vector<128x128xf32>
    %95 = vector.shape_cast %93 : vector<128x1xi1> to vector<128x1xi1>
    %96 = vector.broadcast %95 : vector<128x1xi1> to vector<128x128xi1>
    %97 = arith.select %96, %88, %94 : vector<128x128xi1>, vector<128x128xf32>
    %c1_i32_29 = arith.constant 1 : i32
    %98 = tpu.dynamic_rotate %87 by %c1_i32_29 dim 0 : vector<128x128xf32>, i32 -> vector<128x128xf32>
    %c1_i32_30 = arith.constant 1 : i32
    %99 = vector.broadcast %c1_i32_30 : i32 to vector<128x1xi32>
    %100 = arith.cmpi sge, %2, %99 : vector<128x1xi32>
    %c129_i32_31 = arith.constant 129 : i32
    %101 = vector.broadcast %c129_i32_31 : i32 to vector<128x1xi32>
    %102 = arith.cmpi slt, %2, %101 : vector<128x1xi32>
    %103 = arith.andi %100, %102 : vector<128x1xi1>
    %cst_32 = arith.constant 0.000000e+00 : f32
    %104 = vector.broadcast %cst_32 : f32 to vector<128x128xf32>
    %105 = vector.shape_cast %103 : vector<128x1xi1> to vector<128x1xi1>
    %106 = vector.broadcast %105 : vector<128x1xi1> to vector<128x128xi1>
    %107 = arith.select %106, %98, %104 : vector<128x128xi1>, vector<128x128xf32>
    %c127_i32_33 = arith.constant 127 : i32
    %108 = tpu.dynamic_rotate %87 by %c127_i32_33 dim 0 : vector<128x128xf32>, i32 -> vector<128x128xf32>
    %c-1_i32_34 = arith.constant -1 : i32
    %109 = vector.broadcast %c-1_i32_34 : i32 to vector<128x1xi32>
    %110 = arith.cmpi sge, %2, %109 : vector<128x1xi32>
    %c127_i32_35 = arith.constant 127 : i32
    %111 = vector.broadcast %c127_i32_35 : i32 to vector<128x1xi32>
    %112 = arith.cmpi slt, %2, %111 : vector<128x1xi32>
    %113 = arith.andi %110, %112 : vector<128x1xi1>
    %cst_36 = arith.constant 0.000000e+00 : f32
    %114 = vector.broadcast %cst_36 : f32 to vector<128x128xf32>
    %115 = vector.shape_cast %113 : vector<128x1xi1> to vector<128x1xi1>
    %116 = vector.broadcast %115 : vector<128x1xi1> to vector<128x128xi1>
    %117 = arith.select %116, %108, %114 : vector<128x128xi1>, vector<128x128xf32>
    %c126_i32_37 = arith.constant 126 : i32
    %118 = tpu.dynamic_rotate %87 by %c126_i32_37 dim 0 : vector<128x128xf32>, i32 -> vector<128x128xf32>
    %c-2_i32_38 = arith.constant -2 : i32
    %119 = vector.broadcast %c-2_i32_38 : i32 to vector<128x1xi32>
    %120 = arith.cmpi sge, %2, %119 : vector<128x1xi32>
    %c126_i32_39 = arith.constant 126 : i32
    %121 = vector.broadcast %c126_i32_39 : i32 to vector<128x1xi32>
    %122 = arith.cmpi slt, %2, %121 : vector<128x1xi32>
    %123 = arith.andi %120, %122 : vector<128x1xi1>
    %cst_40 = arith.constant 0.000000e+00 : f32
    %124 = vector.broadcast %cst_40 : f32 to vector<128x128xf32>
    %125 = vector.shape_cast %123 : vector<128x1xi1> to vector<128x1xi1>
    %126 = vector.broadcast %125 : vector<128x1xi1> to vector<128x128xi1>
    %127 = arith.select %126, %118, %124 : vector<128x128xi1>, vector<128x128xf32>
    %128 = tpu.concatenate %97, %107, %87, %117, %127 in 1 : vector<128x128xf32>, vector<128x128xf32>, vector<128x128xf32>, vector<128x128xf32>, vector<128x128xf32> -> vector<128x640xf32>
    %129 = tpu.concatenate %65, %128 in 0 : vector<128x640xf32>, vector<128x640xf32> -> vector<256x640xf32>
    %130 = arith.truncf %129 : vector<256x640xf32> to vector<256x640xbf16>
    %c0_41 = arith.constant 0 : index
    %c0_42 = arith.constant 0 : index
    %131 = vector.load %arg4[%c0_41, %c0_42] : memref<640x256xbf16, #tpu.memory_space<vmem>>, vector<640x256xbf16>
    %cst_43 = arith.constant dense<0.000000e+00> : vector<256x256xf32>
    %132 = tpu.matmul %130, %131, %cst_43 {dimension_numbers = #tpu.dot_dimension_numbers<[1], [0], [0], [1], [0, 0, 1, 1], [], []>} : vector<256x640xbf16>, vector<640x256xbf16>, vector<256x256xf32> -> vector<256x256xf32>
    %c0_44 = arith.constant 0 : index
    %c0_45 = arith.constant 0 : index
    %133 = vector.load %arg5[%c0_44, %c0_45] : memref<1x256xf32, #tpu.memory_space<vmem>>, vector<1x256xf32>
    %134 = vector.broadcast %133 : vector<1x256xf32> to vector<256x256xf32>
    %135 = arith.addf %132, %134 : vector<256x256xf32>
    %cst_46 = arith.constant 5.000000e-01 : f32
    %136 = vector.broadcast %cst_46 : f32 to vector<256x256xf32>
    %137 = arith.mulf %136, %135 : vector<256x256xf32>
    %cst_47 = arith.constant 0.707106769 : f32
    %138 = vector.broadcast %cst_47 : f32 to vector<256x256xf32>
    %139 = arith.mulf %135, %138 : vector<256x256xf32>
    %cst_48 = arith.constant 0.000000e+00 : f32
    %140 = vector.broadcast %cst_48 : f32 to vector<256x256xf32>
    %141 = arith.cmpf oge, %139, %140 : vector<256x256xf32>
    %cst_49 = arith.constant 1.000000e+00 : f32
    %cst_50 = arith.constant -1.000000e+00 : f32
    %142 = vector.broadcast %cst_49 : f32 to vector<256x256xf32>
    %143 = vector.broadcast %cst_50 : f32 to vector<256x256xf32>
    %144 = arith.select %141, %142, %143 : vector<256x256xi1>, vector<256x256xf32>
    %145 = math.absf %139 : vector<256x256xf32>
    %cst_51 = arith.constant 0.327591091 : f32
    %146 = vector.broadcast %cst_51 : f32 to vector<256x256xf32>
    %147 = arith.mulf %146, %145 : vector<256x256xf32>
    %cst_52 = arith.constant 1.000000e+00 : f32
    %148 = vector.broadcast %cst_52 : f32 to vector<256x256xf32>
    %149 = arith.addf %148, %147 : vector<256x256xf32>
    %cst_53 = arith.constant 1.000000e+00 : f32
    %150 = vector.broadcast %cst_53 : f32 to vector<256x256xf32>
    %151 = arith.divf %150, %149 : vector<256x256xf32>
    %cst_54 = arith.constant 1.06140542 : f32
    %152 = vector.broadcast %cst_54 : f32 to vector<256x256xf32>
    %153 = arith.mulf %152, %151 : vector<256x256xf32>
    %cst_55 = arith.constant -1.45315206 : f32
    %154 = vector.broadcast %cst_55 : f32 to vector<256x256xf32>
    %155 = arith.addf %153, %154 : vector<256x256xf32>
    %156 = arith.mulf %155, %151 : vector<256x256xf32>
    %cst_56 = arith.constant 1.42141378 : f32
    %157 = vector.broadcast %cst_56 : f32 to vector<256x256xf32>
    %158 = arith.addf %156, %157 : vector<256x256xf32>
    %159 = arith.mulf %158, %151 : vector<256x256xf32>
    %cst_57 = arith.constant -0.284496725 : f32
    %160 = vector.broadcast %cst_57 : f32 to vector<256x256xf32>
    %161 = arith.addf %159, %160 : vector<256x256xf32>
    %162 = arith.mulf %161, %151 : vector<256x256xf32>
    %cst_58 = arith.constant 0.254829586 : f32
    %163 = vector.broadcast %cst_58 : f32 to vector<256x256xf32>
    %164 = arith.addf %162, %163 : vector<256x256xf32>
    %165 = arith.mulf %164, %151 : vector<256x256xf32>
    %cst_59 = arith.constant 0.000000e+00 : f32
    %166 = vector.broadcast %cst_59 : f32 to vector<256x256xf32>
    %167 = arith.subf %166, %145 : vector<256x256xf32>
    %168 = arith.mulf %167, %145 : vector<256x256xf32>
    %169 = math.exp %168 : vector<256x256xf32>
    %170 = arith.mulf %165, %169 : vector<256x256xf32>
    %cst_60 = arith.constant 1.000000e+00 : f32
    %171 = vector.broadcast %cst_60 : f32 to vector<256x256xf32>
    %172 = arith.subf %171, %170 : vector<256x256xf32>
    %173 = arith.mulf %144, %172 : vector<256x256xf32>
    %cst_61 = arith.constant 1.000000e+00 : f32
    %174 = vector.broadcast %cst_61 : f32 to vector<256x256xf32>
    %175 = arith.addf %174, %173 : vector<256x256xf32>
    %176 = arith.mulf %137, %175 : vector<256x256xf32>
    %177 = vector.extract_strided_slice %176 {offsets = [0, 0], sizes = [128, 256], strides = [1, 1]} : vector<256x256xf32> to vector<128x256xf32>
    %c2_i32_62 = arith.constant 2 : i32
    %178 = tpu.dynamic_rotate %177 by %c2_i32_62 dim 0 : vector<128x256xf32>, i32 -> vector<128x256xf32>
    %c2_i32_63 = arith.constant 2 : i32
    %179 = vector.broadcast %c2_i32_63 : i32 to vector<128x1xi32>
    %180 = arith.cmpi sge, %2, %179 : vector<128x1xi32>
    %c130_i32_64 = arith.constant 130 : i32
    %181 = vector.broadcast %c130_i32_64 : i32 to vector<128x1xi32>
    %182 = arith.cmpi slt, %2, %181 : vector<128x1xi32>
    %183 = arith.andi %180, %182 : vector<128x1xi1>
    %cst_65 = arith.constant 0.000000e+00 : f32
    %184 = vector.broadcast %cst_65 : f32 to vector<128x256xf32>
    %185 = vector.shape_cast %183 : vector<128x1xi1> to vector<128x1xi1>
    %186 = vector.broadcast %185 : vector<128x1xi1> to vector<128x256xi1>
    %187 = arith.select %186, %178, %184 : vector<128x256xi1>, vector<128x256xf32>
    %c1_i32_66 = arith.constant 1 : i32
    %188 = tpu.dynamic_rotate %177 by %c1_i32_66 dim 0 : vector<128x256xf32>, i32 -> vector<128x256xf32>
    %c1_i32_67 = arith.constant 1 : i32
    %189 = vector.broadcast %c1_i32_67 : i32 to vector<128x1xi32>
    %190 = arith.cmpi sge, %2, %189 : vector<128x1xi32>
    %c129_i32_68 = arith.constant 129 : i32
    %191 = vector.broadcast %c129_i32_68 : i32 to vector<128x1xi32>
    %192 = arith.cmpi slt, %2, %191 : vector<128x1xi32>
    %193 = arith.andi %190, %192 : vector<128x1xi1>
    %cst_69 = arith.constant 0.000000e+00 : f32
    %194 = vector.broadcast %cst_69 : f32 to vector<128x256xf32>
    %195 = vector.shape_cast %193 : vector<128x1xi1> to vector<128x1xi1>
    %196 = vector.broadcast %195 : vector<128x1xi1> to vector<128x256xi1>
    %197 = arith.select %196, %188, %194 : vector<128x256xi1>, vector<128x256xf32>
    %c127_i32_70 = arith.constant 127 : i32
    %198 = tpu.dynamic_rotate %177 by %c127_i32_70 dim 0 : vector<128x256xf32>, i32 -> vector<128x256xf32>
    %c-1_i32_71 = arith.constant -1 : i32
    %199 = vector.broadcast %c-1_i32_71 : i32 to vector<128x1xi32>
    %200 = arith.cmpi sge, %2, %199 : vector<128x1xi32>
    %c127_i32_72 = arith.constant 127 : i32
    %201 = vector.broadcast %c127_i32_72 : i32 to vector<128x1xi32>
    %202 = arith.cmpi slt, %2, %201 : vector<128x1xi32>
    %203 = arith.andi %200, %202 : vector<128x1xi1>
    %cst_73 = arith.constant 0.000000e+00 : f32
    %204 = vector.broadcast %cst_73 : f32 to vector<128x256xf32>
    %205 = vector.shape_cast %203 : vector<128x1xi1> to vector<128x1xi1>
    %206 = vector.broadcast %205 : vector<128x1xi1> to vector<128x256xi1>
    %207 = arith.select %206, %198, %204 : vector<128x256xi1>, vector<128x256xf32>
    %c126_i32_74 = arith.constant 126 : i32
    %208 = tpu.dynamic_rotate %177 by %c126_i32_74 dim 0 : vector<128x256xf32>, i32 -> vector<128x256xf32>
    %c-2_i32_75 = arith.constant -2 : i32
    %209 = vector.broadcast %c-2_i32_75 : i32 to vector<128x1xi32>
    %210 = arith.cmpi sge, %2, %209 : vector<128x1xi32>
    %c126_i32_76 = arith.constant 126 : i32
    %211 = vector.broadcast %c126_i32_76 : i32 to vector<128x1xi32>
    %212 = arith.cmpi slt, %2, %211 : vector<128x1xi32>
    %213 = arith.andi %210, %212 : vector<128x1xi1>
    %cst_77 = arith.constant 0.000000e+00 : f32
    %214 = vector.broadcast %cst_77 : f32 to vector<128x256xf32>
    %215 = vector.shape_cast %213 : vector<128x1xi1> to vector<128x1xi1>
    %216 = vector.broadcast %215 : vector<128x1xi1> to vector<128x256xi1>
    %217 = arith.select %216, %208, %214 : vector<128x256xi1>, vector<128x256xf32>
    %218 = tpu.concatenate %187, %197, %177, %207, %217 in 1 : vector<128x256xf32>, vector<128x256xf32>, vector<128x256xf32>, vector<128x256xf32>, vector<128x256xf32> -> vector<128x1280xf32>
    %219 = vector.extract_strided_slice %176 {offsets = [128, 0], sizes = [128, 256], strides = [1, 1]} : vector<256x256xf32> to vector<128x256xf32>
    %c2_i32_78 = arith.constant 2 : i32
    %220 = tpu.dynamic_rotate %219 by %c2_i32_78 dim 0 : vector<128x256xf32>, i32 -> vector<128x256xf32>
    %c2_i32_79 = arith.constant 2 : i32
    %221 = vector.broadcast %c2_i32_79 : i32 to vector<128x1xi32>
    %222 = arith.cmpi sge, %2, %221 : vector<128x1xi32>
    %c130_i32_80 = arith.constant 130 : i32
    %223 = vector.broadcast %c130_i32_80 : i32 to vector<128x1xi32>
    %224 = arith.cmpi slt, %2, %223 : vector<128x1xi32>
    %225 = arith.andi %222, %224 : vector<128x1xi1>
    %cst_81 = arith.constant 0.000000e+00 : f32
    %226 = vector.broadcast %cst_81 : f32 to vector<128x256xf32>
    %227 = vector.shape_cast %225 : vector<128x1xi1> to vector<128x1xi1>
    %228 = vector.broadcast %227 : vector<128x1xi1> to vector<128x256xi1>
    %229 = arith.select %228, %220, %226 : vector<128x256xi1>, vector<128x256xf32>
    %c1_i32_82 = arith.constant 1 : i32
    %230 = tpu.dynamic_rotate %219 by %c1_i32_82 dim 0 : vector<128x256xf32>, i32 -> vector<128x256xf32>
    %c1_i32_83 = arith.constant 1 : i32
    %231 = vector.broadcast %c1_i32_83 : i32 to vector<128x1xi32>
    %232 = arith.cmpi sge, %2, %231 : vector<128x1xi32>
    %c129_i32_84 = arith.constant 129 : i32
    %233 = vector.broadcast %c129_i32_84 : i32 to vector<128x1xi32>
    %234 = arith.cmpi slt, %2, %233 : vector<128x1xi32>
    %235 = arith.andi %232, %234 : vector<128x1xi1>
    %cst_85 = arith.constant 0.000000e+00 : f32
    %236 = vector.broadcast %cst_85 : f32 to vector<128x256xf32>
    %237 = vector.shape_cast %235 : vector<128x1xi1> to vector<128x1xi1>
    %238 = vector.broadcast %237 : vector<128x1xi1> to vector<128x256xi1>
    %239 = arith.select %238, %230, %236 : vector<128x256xi1>, vector<128x256xf32>
    %c127_i32_86 = arith.constant 127 : i32
    %240 = tpu.dynamic_rotate %219 by %c127_i32_86 dim 0 : vector<128x256xf32>, i32 -> vector<128x256xf32>
    %c-1_i32_87 = arith.constant -1 : i32
    %241 = vector.broadcast %c-1_i32_87 : i32 to vector<128x1xi32>
    %242 = arith.cmpi sge, %2, %241 : vector<128x1xi32>
    %c127_i32_88 = arith.constant 127 : i32
    %243 = vector.broadcast %c127_i32_88 : i32 to vector<128x1xi32>
    %244 = arith.cmpi slt, %2, %243 : vector<128x1xi32>
    %245 = arith.andi %242, %244 : vector<128x1xi1>
    %cst_89 = arith.constant 0.000000e+00 : f32
    %246 = vector.broadcast %cst_89 : f32 to vector<128x256xf32>
    %247 = vector.shape_cast %245 : vector<128x1xi1> to vector<128x1xi1>
    %248 = vector.broadcast %247 : vector<128x1xi1> to vector<128x256xi1>
    %249 = arith.select %248, %240, %246 : vector<128x256xi1>, vector<128x256xf32>
    %c126_i32_90 = arith.constant 126 : i32
    %250 = tpu.dynamic_rotate %219 by %c126_i32_90 dim 0 : vector<128x256xf32>, i32 -> vector<128x256xf32>
    %c-2_i32_91 = arith.constant -2 : i32
    %251 = vector.broadcast %c-2_i32_91 : i32 to vector<128x1xi32>
    %252 = arith.cmpi sge, %2, %251 : vector<128x1xi32>
    %c126_i32_92 = arith.constant 126 : i32
    %253 = vector.broadcast %c126_i32_92 : i32 to vector<128x1xi32>
    %254 = arith.cmpi slt, %2, %253 : vector<128x1xi32>
    %255 = arith.andi %252, %254 : vector<128x1xi1>
    %cst_93 = arith.constant 0.000000e+00 : f32
    %256 = vector.broadcast %cst_93 : f32 to vector<128x256xf32>
    %257 = vector.shape_cast %255 : vector<128x1xi1> to vector<128x1xi1>
    %258 = vector.broadcast %257 : vector<128x1xi1> to vector<128x256xi1>
    %259 = arith.select %258, %250, %256 : vector<128x256xi1>, vector<128x256xf32>
    %260 = tpu.concatenate %229, %239, %219, %249, %259 in 1 : vector<128x256xf32>, vector<128x256xf32>, vector<128x256xf32>, vector<128x256xf32>, vector<128x256xf32> -> vector<128x1280xf32>
    %261 = tpu.concatenate %218, %260 in 0 : vector<128x1280xf32>, vector<128x1280xf32> -> vector<256x1280xf32>
    %262 = arith.truncf %261 : vector<256x1280xf32> to vector<256x1280xbf16>
    %c0_94 = arith.constant 0 : index
    %c0_95 = arith.constant 0 : index
    %263 = vector.load %arg6[%c0_94, %c0_95] : memref<1280x128xbf16, #tpu.memory_space<vmem>>, vector<1280x128xbf16>
    %cst_96 = arith.constant dense<0.000000e+00> : vector<256x128xf32>
    %264 = tpu.matmul %262, %263, %cst_96 {dimension_numbers = #tpu.dot_dimension_numbers<[1], [0], [0], [1], [0, 0, 1, 1], [], []>} : vector<256x1280xbf16>, vector<1280x128xbf16>, vector<256x128xf32> -> vector<256x128xf32>
    %c0_97 = arith.constant 0 : index
    %c0_98 = arith.constant 0 : index
    %265 = vector.load %arg7[%c0_97, %c0_98] : memref<1x128xf32, #tpu.memory_space<vmem>>, vector<1x128xf32>
    %266 = vector.broadcast %265 : vector<1x128xf32> to vector<256x128xf32>
    %267 = arith.addf %264, %266 : vector<256x128xf32>
    %268 = vector.extract_strided_slice %267 {offsets = [0, 0], sizes = [128, 128], strides = [1, 1]} : vector<256x128xf32> to vector<128x128xf32>
    %c0_99 = arith.constant 0 : index
    %c0_100 = arith.constant 0 : index
    %c0_101 = arith.constant 0 : index
    %269 = vector.load %arg1[%c0_99, %c0_100, %c0_101] : memref<2x128x128xf32, #tpu.memory_space<vmem>>, vector<1x128x128xf32>
    %270 = vector.shape_cast %269 : vector<1x128x128xf32> to vector<128x128xf32>
    %271 = arith.addf %268, %270 : vector<128x128xf32>
    %c0_102 = arith.constant 0 : index
    %c0_103 = arith.constant 0 : index
    %c0_104 = arith.constant 0 : index
    %272 = vector.load %arg8[%c0_102, %c0_103, %c0_104] : memref<2x128x128xf32, #tpu.memory_space<vmem>>, vector<1x128x128xf32>
    %273 = vector.shape_cast %272 : vector<1x128x128xf32> to vector<128x128xf32>
    %274 = vector.shape_cast %271 : vector<128x128xf32> to vector<1x128x128xf32>
    tpu.vector_store %arg8[%c0_102, %c0_103, %c0_104], %274 {strides = array<i32>} : memref<2x128x128xf32, #tpu.memory_space<vmem>>, vector<1x128x128xf32>,
    %275 = vector.extract_strided_slice %267 {offsets = [128, 0], sizes = [128, 128], strides = [1, 1]} : vector<256x128xf32> to vector<128x128xf32>
    %c1_105 = arith.constant 1 : index
    %c0_106 = arith.constant 0 : index
    %c0_107 = arith.constant 0 : index
    %276 = vector.load %arg1[%c1_105, %c0_106, %c0_107] : memref<2x128x128xf32, #tpu.memory_space<vmem>>, vector<1x128x128xf32>
    %277 = vector.shape_cast %276 : vector<1x128x128xf32> to vector<128x128xf32>
    %278 = arith.addf %275, %277 : vector<128x128xf32>
    %c1_108 = arith.constant 1 : index
    %c0_109 = arith.constant 0 : index
    %c0_110 = arith.constant 0 : index
    %279 = vector.load %arg8[%c1_108, %c0_109, %c0_110] : memref<2x128x128xf32, #tpu.memory_space<vmem>>, vector<1x128x128xf32>
    %280 = vector.shape_cast %279 : vector<1x128x128xf32> to vector<128x128xf32>
    %281 = vector.shape_cast %278 : vector<128x128xf32> to vector<1x128x128xf32>
    tpu.vector_store %arg8[%c1_108, %c0_109, %c0_110], %281 {strides = array<i32>} : memref<2x128x128xf32, #tpu.memory_space<vmem>>, vector<1x128x128xf32>,
    return
  }
  func.func @transform_0(%arg0: i32) -> (i32, i32, i32) {
    %c0_i32 = arith.constant 0 : i32
    %c0_i32_0 = arith.constant 0 : i32
    %c0_i32_1 = arith.constant 0 : i32
    return %arg0, %c0_i32, %c0_i32_0 : i32, i32, i32
  }
  func.func @transform_1(%arg0: i32) -> (i32, i32) {
    %c0_i32 = arith.constant 0 : i32
    %c0_i32_0 = arith.constant 0 : i32
    %c0_i32_1 = arith.constant 0 : i32
    return %c0_i32, %c0_i32_0 : i32, i32
  }
  func.func @transform_2(%arg0: i32) -> (i32, i32) {
    %c0_i32 = arith.constant 0 : i32
    %c0_i32_0 = arith.constant 0 : i32
    %c0_i32_1 = arith.constant 0 : i32
    return %c0_i32, %c0_i32_0 : i32, i32
  }
  func.func @transform_3(%arg0: i32) -> (i32, i32) {
    %c0_i32 = arith.constant 0 : i32
    %c0_i32_0 = arith.constant 0 : i32
    %c0_i32_1 = arith.constant 0 : i32
    return %c0_i32, %c0_i32_0 : i32, i32
  }
  func.func @transform_4(%arg0: i32) -> (i32, i32) {
    %c0_i32 = arith.constant 0 : i32
    %c0_i32_0 = arith.constant 0 : i32
    %c0_i32_1 = arith.constant 0 : i32
    return %c0_i32, %c0_i32_0 : i32, i32
  }
  func.func @transform_5(%arg0: i32) -> (i32, i32) {
    %c0_i32 = arith.constant 0 : i32
    %c0_i32_0 = arith.constant 0 : i32
    %c0_i32_1 = arith.constant 0 : i32
    return %c0_i32, %c0_i32_0 : i32, i32
  }
  func.func @transform_6(%arg0: i32) -> (i32, i32) {
    %c0_i32 = arith.constant 0 : i32
    %c0_i32_0 = arith.constant 0 : i32
    %c0_i32_1 = arith.constant 0 : i32
    return %c0_i32, %c0_i32_0 : i32, i32
  }
  func.func @transform_7(%arg0: i32) -> (i32, i32, i32) {
    %c0_i32 = arith.constant 0 : i32
    %c0_i32_0 = arith.constant 0 : i32
    %c0_i32_1 = arith.constant 0 : i32
    return %arg0, %c0_i32, %c0_i32_0 : i32, i32, i32
  }
}

</mosaic_0001>

<bundles_post_ra>
// kernel: tpu_custom_call.1
= control target key start
LH: loop header
LB: loop body
LE: loop exit
PB: predicated region body
PF: predicated region fallthrough
CT: control target
= control target key end

     0   :  { %12 = vsyncpa [#allocation3], 0  ;;  %s14237_s0 = inlined_call_operand.hbm [shape: f32[4,128,128], index: 0, kind: input, shape index: {}]   ;;  %s14238_s1 = inlined_call_operand.vmem [shape: f32[1,128], index: 1, kind: input, shape index: {}]   ;;  %s14239_s2 = inlined_call_operand.vmem [shape: f32[1,128], index: 2, kind: input, shape index: {}]   ;;  %s14240_s3 = inlined_call_operand.hbm [shape: bf16[640,256], index: 3, kind: input, shape index: {}]   ;;  %s14241_s4 = inlined_call_operand.vmem [shape: f32[1,256], index: 4, kind: input, shape index: {}]   ;;  %s14242_s5 = inlined_call_operand.hbm [shape: bf16[1280,128], index: 5, kind: input, shape index: {}]   ;;  %s14243_s6 = inlined_call_operand.vmem [shape: f32[1,128], index: 6, kind: input, shape index: {}]   ;;  %s14244_s7 = inlined_call_operand.hbm [shape: f32[4,128,128], index: 7, kind: output, shape index: {}]  }
   0x1   :  { %14 = vsyncpa [#allocation3 + $0x1], 0 }
   0x2   :  { %15 = vsyncpa [#allocation6], 0 }
   0x3   :  { %16 = vsyncpa [#allocation4], 0 }
   0x4   :  { %18 = vsyncpa [#allocation4 + $0x1], 0  ;;  %s8882_s24 = smov 0   ;;  %s8884_s25 = smov 0  }
   0x5   :  { %s8886_s26 = smov 0   ;;  %s8888_s27 = smov 0  }
   0x6 LB: > { %s8903_s28 = sadd.s32 4294967295, %s8827_s27   ;;  %s6966_s29 = sadd.s32 4294967294, %s8827_s27   ;;  %s8827_s27 = sphi %s8888_s27, %s15238_s27   ;;  %s8823_s26 = sphi %s8886_s26, %s15237_s26   ;;  %s8819_s25 = sphi %s8884_s25, %s15236_s25   ;;  %s8815_s24 = sphi %s8882_s24, %s15235_s24  }
   0x7   : > { %p44_p0 = scmp.ne.s32.totalorder %s8819_s25, %s8815_s24  ;;  %p14245_p1 = scmp.eq.s32.totalorder %s8903_s28, 0 }
   0x8   : > { %p200_p3 = scmp.eq.s32.totalorder %s6966_s29, 1  ;;  %p6967_p5 = scmp.ge.s32.totalorder %s8827_s27, 1 }
   0x9   : > { %p8912_p4 = por %p14245_p1, %p44_p0  ;;  %p207_p7 = scmp.lt.s32.totalorder %s8827_s27, 3 }
   0xa   : > { %p8917_p6 = por %p200_p3, %p44_p0  ;;  %s8829_s10 = smov [#allocation5]  }
   0xb   : > { %s14476_s30 = scalar_select %p8912_p4, 1, 0 }
   0xc   : > { %s14477_s8 = scalar_select %p8917_p6, 1, 0 }
   0xd   : > { %p8922_p8 = pnand %p6967_p5, %p207_p7  ;;  %s225_s11 = sshll.u32 %s8829_s10, 4  ;;  %s8926_s11 = int_to_ptr.vmem [resolvable:$true] %s225_s11 }
   0xe   : > { %s8830_s13 = smov [#allocation7]   ;;  %s8671_s17 = scalar_lea.hbm %s14240_s3, 10240 }
   0xf   : > { %p8053_p9 = pneg %p8922_p8  ;;  %s241_s14 = sshll.u32 %s8830_s13, 4  ;;  %s8937_s14 = int_to_ptr.vmem [resolvable:$true] %s241_s14 }
  0x10   : > { %p8672_p12 = scmp.ne.s32.totalorder %s14240_s3, %s8671_s17  ;;  %p8678_p5 = scmp.lt.u32.totalorder %s8671_s17, %s14240_s3 }
  0x11   : > { %p8933_p11 = pnand %p8053_p9, %p14245_p1 }
  0x13   : > { %p8673_p13 = pneg %p8933_p11 }
  0x15   : > { %p8674_p0 = pnand %p8673_p13, %p8672_p12 }
  0x17   : > { %p8675_p3 = pneg %p8674_p0 }
  0x19   : > { %p8680_p7 = pnand %p8678_p5, %p8675_p3 }
  0x1b   : > { %8683 = shalt.err (!%p8680_p7)
}
  0x1c   : > { %s8684_s22 = scalar_lea.vmem %s8926_s11, 10240  ;;  %p8692_p2 = scmp.lt.s32.totalorder %s8926_s11, %s8926_s11 }
  0x1d   : > { %p8685_p9 = scmp.ne.s32.totalorder %s8926_s11, %s8684_s22  ;;  %p8693_p12 = scmp.lt.s32.totalorder %s8684_s22, %s8684_s22 }
  0x1f   : > { %p8687_p10 = pnand %p8685_p9, %p8673_p13  ;;  %p8694_p0 = por %p8693_p12, %p8692_p2 }
  0x21   : > { %p8688_p1 = pneg %p8687_p10 }
  0x23   : > { %p8695_p6 = pnand %p8694_p0, %p8688_p1 }
  0x25   : > { %8698 = shalt.err (!%p8695_p6)
}
  0x26   : > { %s14246_s23 = smov 128   ;;  %s8832_s29 = smov 8  }
  0x27   : > { %8056 = dma.hbm_to_vmem [thread:$0]  (!%p8933_p11), %s14240_s3, 10240, %s8926_s11, [#allocation6], %s14246_s23, %s14246_s23, %s8832_s29  }
  0x28   : > { %s8699_s17 = scalar_lea.hbm %s14242_s5, 10240 }
  0x29   : > { %p8700_p1 = scmp.ne.s32.totalorder %s14242_s5, %s8699_s17  ;;  %p8706_p10 = scmp.lt.u32.totalorder %s8699_s17, %s14242_s5 }
  0x2b   : > { %p8702_p2 = pnand %p8700_p1, %p8673_p13 }
  0x2d   : > { %p8703_p6 = pneg %p8702_p2 }
  0x2f   : > { %p8708_p3 = pnand %p8706_p10, %p8703_p6 }
  0x31   : > { %8711 = shalt.err (!%p8708_p3)
}
  0x32   : > { %s8712_s11 = scalar_lea.vmem %s8937_s14, 10240  ;;  %p8720_p12 = scmp.lt.s32.totalorder %s8937_s14, %s8937_s14 }
  0x33   : > { %p8713_p5 = scmp.ne.s32.totalorder %s8937_s14, %s8712_s11  ;;  %p8721_p0 = scmp.lt.s32.totalorder %s8712_s11, %s8712_s11 }
  0x35   : > { %p8715_p7 = pnand %p8713_p5, %p8673_p13  ;;  %p8722_p1 = por %p8721_p0, %p8720_p12 }
  0x37   : > { %p8716_p9 = pneg %p8715_p7 }
  0x39   : > { %p8723_p2 = pnand %p8722_p1, %p8716_p9 }
  0x3b   : > { %8726 = shalt.err (!%p8723_p2)
}
  0x3c   : > { %s8833_s22 = smov 64   ;;  %s8834_s10 = smov 4  }
  0x3d   : > { %8059 = dma.hbm_to_vmem [thread:$0]  (!%p8933_p11), %s14242_s5, 10240, %s8937_s14, [#allocation6], %s8833_s22, %s8833_s22, %s8834_s10  }
  0x3e   : > { %s8995_s16 = sadd.s32 1, %s8827_s27   ;;  %s31_s18 = sadd.s32 1, %s8823_s26 }
  0x3f   : > { %s28_s17 = ssub.s32 %s8827_s27, %s8995_s16  ;;  %p38_p6 = scmp.ne.s32.totalorder %s8823_s26, %s8819_s25 }
  0x40   : > { %p29_p13 = scmp.eq.s32.totalorder %s28_s17, 0  ;;  %p39_p10 = scmp.eq.s32.totalorder %s8827_s27, 0 }
  0x41   : > { %p14480_p5 = scmp.eq.s32.totalorder %s8903_s28, 1  ;;  %p8070_p9 = scmp.lt.s32.totalorder %s8827_s27, 2 }
  0x42   : > { %s9004_s19 = scalar_select %p29_p13, %s8823_s26, %s31_s18  }
  0x43   : > { %p40_p3 = por %p39_p10, %p38_p6  ;;  %p9008_p7 = por %p14480_p5, %p38_p6 }
  0x44   : > { %s258_s12 = sand.u32 1, %s8823_s26   ;;  %s7270_s14 = sshll.u32 %s8827_s27, 12 }
  0x45   : > { %s14481_s20 = scalar_select %p9008_p7, 1, 0 }
  0x46   : > { %s6971_s21 = sshll.u32 %s258_s12, 8  ;;  %s9018_s10 = scalar_lea.hbm %s14237_s0, %s7270_s14 }
  0x47   : > { %s262_s13 = scalar_lea.vmem [#allocation2], %s6971_s21  ;;  %p9022_p11 = pnand %p8070_p9, %p40_p3 }
  0x48   : > { %s270_s15 = sshll.u32 %s262_s13, 4  ;;  %s9026_s18 = scalar_lea.sflag [#allocation3], %s258_s12  ;;  %s9020_s15 = int_to_ptr.vmem [resolvable:$true] %s270_s15 }
  0x49   : > { %s8727_s23 = scalar_lea.hbm %s9018_s10, 4096  ;;  %p8729_p0 = pneg %p9022_p11 }
  0x4a   : > { %p8728_p12 = scmp.ne.s32.totalorder %s9018_s10, %s8727_s23  ;;  %s8732_s11 = scalar_lea.hbm %s14237_s0, 8192 }
  0x4b   : > { %p8733_p13 = scmp.lt.u32.totalorder %s9018_s10, %s14237_s0  ;;  %p8734_p6 = scmp.lt.u32.totalorder %s8732_s11, %s8727_s23 }
  0x4c   : > { %p8730_p1 = pnand %p8729_p0, %p8728_p12  ;;  %p8736_p3 = scmp.lt.u32.totalorder %s8727_s23, %s9018_s10 }
  0x4d   : > { %p8735_p10 = por %p8734_p6, %p8733_p13 }
  0x4e   : > { %p8731_p2 = pneg %p8730_p1 }
  0x4f   : > { %p8737_p5 = por %p8736_p3, %p8735_p10 }
  0x51   : > { %p8738_p9 = pnand %p8737_p5, %p8731_p2 }
  0x53   : > { %8741 = shalt.err (!%p8738_p9)
}
  0x54   : > { %s8742_s12 = scalar_lea.vmem %s9020_s15, 4096  ;;  %s8835_s21 = smov [#allocation2]  }
  0x55   : > { %p8743_p12 = scmp.ne.s32.totalorder %s9020_s15, %s8742_s12  ;;  %s8747_s14 = sshll.u32 %s8835_s21, 4  ;;  %s8748_s14 = int_to_ptr.vmem [resolvable:$false] %s8747_s14 }
  0x56   : > { %s8749_s22 = scalar_lea.vmem %s8748_s14, 8192  ;;  %p8750_p4 = scmp.lt.s32.totalorder %s9020_s15, %s8748_s14 }
  0x57   : > { %p8745_p1 = pnand %p8743_p12, %p8729_p0  ;;  %p8751_p13 = scmp.lt.s32.totalorder %s8749_s22, %s8742_s12 }
  0x59   : > { %p8746_p7 = pneg %p8745_p1  ;;  %p8752_p6 = por %p8751_p13, %p8750_p4 }
  0x5b   : > { %p8753_p10 = pnand %p8752_p6, %p8746_p7 }
  0x5d   : > { %8756 = shalt.err (!%p8753_p10)
}
  0x5e   : > { %s14483_s23 = smov 128   ;;  %282 = sbr.rel (%p8922_p8) target bundleno = 2171 (0x87b), region = 48 }
  0x5f   : > { %8063 = dma.hbm_to_vmem [thread:$0]  (!%p9022_p11), %s9018_s10, 4096, %s9020_s15, %s9026_s18, %s14483_s23, %s14483_s23, %s8832_s29  }
  0x65   : > { %s9060_s11 = sand.u32 1, %s8819_s25   ;;  %p14484_p4 = scmp.ne.s32.totalorder %s14476_s30, 0 }
  0x66   : > { %s6976_s13 = sshll.u32 %s9060_s11, 8  ;;  %s285_s12 = scalar_lea.sflag [#allocation3], %s9060_s11 }
  0x67   : > { %s9066_s17 = scalar_lea.vmem [#allocation2], %s6976_s13 }
  0x68   : > { %8802 = dma.done.wait (%p14484_p4), %s285_s12, 4096  }
  0x69   : > { %8804 = vsyncadd (%p14484_p4), %s285_s12, 4294963200  ;;  %p14485_p7 = scmp.eq.s32.totalorder %s8903_s28, 0 }
  0x6b   : > { %8806 = dma.done.wait (%p14485_p7), [#allocation6], 20480   ;;  %p14486_p8 = pmov %p14485_p7 }
  0x6c   : > { %v9077_v0 = vld [vmem:[%s9066_s17] sm:$0xff]  ;;  %v9080_v1 = vld [vmem:[%s9066_s17 + $0x78] sm:$0xff]  ;;  %v9085_v2 = vld [vmem:[%s9066_s17 + $0x8] sm:$0xff]  ;;  %vm8836_vm5 = vmmov 1   ;;  %s14065_s9 = scalar_lea.vmem [#allocation8], %s6976_s13  ;;  %s7272_s13 = sshll.u32 %s8903_s28, 12 }
  0x6d   : > { %8808 = vsyncadd (%p14486_p8), [#allocation6], 4294946816  ;;  %365 = vadd.xlane.f32.xlu0 %v9077_v0  ;;  %395 = vadd.xlane.f32.xlu1 %v9080_v1  ;;  %v9088_v3 = vld [vmem:[%s9066_s17 + $0x10] sm:$0xff]  ;;  %v9093_v4 = vld [vmem:[%s9066_s17 + $0x18] sm:$0xff]  ;;  %s6874_s29 = sshll.u32 %s14065_s9, 4  ;;  %s14189_s18 = scalar_lea.hbm %s14244_s7, %s7272_s13  ;;  %s14191_s29 = int_to_ptr.vmem [resolvable:$true] %s6874_s29 }
  0x6e   : > { %v9096_v5 = vld [vmem:[%s9066_s17 + $0x20] sm:$0xff]  ;;  %v9099_v6 = vld [vmem:[%s9066_s17 + $0x28] sm:$0xff]  ;;  %v9102_v7 = vld [vmem:[%s9066_s17 + $0x30] sm:$0xff]  ;;  %s6860_s21 = scalar_lea.sflag [#allocation4], %s9060_s11  ;;  %s8757_s14 = scalar_lea.vmem %s14191_s29, 4096 }
  0x6f   : > { %v9107_v8 = vld [vmem:[%s9066_s17 + $0x38] sm:$0xff]  ;;  %v9110_v9 = vld [vmem:[%s9066_s17 + $0x40] sm:$0xff]  ;;  %v9115_v10 = vld [vmem:[%s9066_s17 + $0x48] sm:$0xff]  ;;  %p8758_p11 = scmp.ne.s32.totalorder %s14191_s29, %s8757_s14  ;;  %p15232_p0 = scmp.ne.s32.totalorder %s14481_s20, 0 }
  0x70   : > { %v9118_v11 = vld [vmem:[%s9066_s17 + $0x50] sm:$0xff]  ;;  %v9123_v12 = vld [vmem:[%s9066_s17 + $0x58] sm:$0xff]  ;;  %v9126_v13 = vld [vmem:[%s9066_s17 + $0x60] sm:$0xff]  ;;  %s8839_s28 = smov [#allocation8]  }
  0x71   : > { %367 = vadd.xlane.f32.xlu0 %v9085_v2  ;;  %369 = vadd.xlane.f32.xlu1 %v9088_v3  ;;  %v9131_v14 = vld [vmem:[%s9066_s17 + $0x70] sm:$0xff]  ;;  %v9136_v15 = vld [vmem:[%s9066_s17 + $0x68] sm:$0xff]  ;;  %v9142_v17 = vld [vmem:[%s9066_s17 + $0x80] sm:$0xff]  ;;  %p8759_p2 = pnand %p8758_p11, %p15232_p0 }
  0x72   : > { %v9139_v16 = vld [vmem:[%s9066_s17 + $0x88] sm:$0xff]  ;;  %v9147_v18 = vld [vmem:[%s9066_s17 + $0x90] sm:$0xff]  ;;  %v9152_v19 = vld [vmem:[%s9066_s17 + $0xf8] sm:$0xff] }
  0x73   : > { %v9155_v20 = vld [vmem:[%s9066_s17 + $0x98] sm:$0xff]  ;;  %v8117_v21 = vld [vmem:[#allocation5 + $0x4] ss:$8 sps:$4 sm:$0xff]   ;;  %v8119_v22 = vld [vmem:[#allocation5] ss:$8 sps:$4 sm:$0xff]   ;;  %p8760_p3 = pneg %p8759_p2 }
  0x74   : > { %v8120_v23 = vld [vmem:[#allocation5 + $0x14] ss:$8 sps:$4 sm:$0xff]   ;;  %2091 = vmatprep.subr.bf16.mxu0 %v8117_v21  ;;  %v8122_v24 = vld [vmem:[#allocation5 + $0x10] ss:$8 sps:$4 sm:$0xff]   ;;  %v8123_v25 = vld [vmem:[#allocation5 + $0x24] ss:$8 sps:$4 sm:$0xff]  }
  0x75   : > { %371 = vadd.xlane.f32.xlu0 %v9093_v4  ;;  %373 = vadd.xlane.f32.xlu1 %v9096_v5  ;;  %v8125_v26 = vld [vmem:[#allocation5 + $0x20] ss:$8 sps:$4 sm:$0xff]   ;;  %v8126_v27 = vld [vmem:[#allocation5 + $0x34] ss:$8 sps:$4 sm:$0xff]   ;;  %v8128_v28 = vld [vmem:[#allocation5 + $0x30] ss:$8 sps:$4 sm:$0xff]  }
  0x76   : > { %2092 = vmatpush1.bf16.msra.mxu0 %v8119_v22  ;;  %v8129_v29 = vld [vmem:[#allocation5 + $0x44] ss:$8 sps:$4 sm:$0xff]   ;;  %v8131_v30 = vld [vmem:[#allocation5 + $0x40] ss:$8 sps:$4 sm:$0xff]   ;;  %v8132_v31 = vld [vmem:[#allocation5 + $0x54] ss:$8 sps:$4 sm:$0xff]  }
  0x77   : > { %2093 = vmatprep.subr.bf16.mxu0 %v8120_v23  ;;  %v8134_v32 = vld [vmem:[#allocation5 + $0x50] ss:$8 sps:$4 sm:$0xff]   ;;  %v8135_v33 = vld [vmem:[#allocation5 + $0x64] ss:$8 sps:$4 sm:$0xff]   ;;  %v8137_v34 = vld [vmem:[#allocation5 + $0x60] ss:$8 sps:$4 sm:$0xff]  }
  0x78   : > { %v8138_v35 = vld [vmem:[#allocation5 + $0x74] ss:$8 sps:$4 sm:$0xff]   ;;  %v8140_v36 = vld [vmem:[#allocation5 + $0x70] ss:$8 sps:$4 sm:$0xff]   ;;  %v8141_v37 = vld [vmem:[#allocation5 + $0x84] ss:$8 sps:$4 sm:$0xff]  }
  0x79   : > { %375 = vadd.xlane.f32.xlu0 %v9099_v6  ;;  %377 = vadd.xlane.f32.xlu1 %v9102_v7  ;;  %v9182_v56 = vld [vmem:[%s9066_s17 + $0xa8] sm:$0xff]  ;;  %v9185_v57 = vld [vmem:[%s9066_s17 + $0xa0] sm:$0xff]  ;;  %v8144_v23 = vld [vmem:[#allocation5 + $0x94] ss:$8 sps:$4 sm:$0xff]  }
  0x7a   : > { %2094 = vmatpush1.bf16.msra.mxu0 %v8122_v24 }
  0x7b   : > { %2095 = vmatprep.subr.bf16.mxu0 %v8123_v25 }
  0x7d   : > { %379 = vadd.xlane.f32.xlu0 %v9107_v8  ;;  %381 = vadd.xlane.f32.xlu1 %v9110_v9 }
  0x7e   : > { %2096 = vmatpush1.bf16.msra.mxu0 %v8125_v26 }
  0x7f   : > { %2097 = vmatprep.subr.bf16.mxu0 %v8126_v27  ;;  %v8146_v27 = vld [vmem:[#allocation5 + $0x90] ss:$8 sps:$4 sm:$0xff]  }
  0x81   : > { %383 = vadd.xlane.f32.xlu0 %v9115_v10  ;;  %385 = vadd.xlane.f32.xlu1 %v9118_v11 }
  0x82   : > { %2098 = vmatpush1.bf16.msra.mxu0 %v8128_v28 }
  0x83   : > { %2099 = vmatprep.subr.bf16.mxu0 %v8129_v29 }
  0x85   : > { %387 = vadd.xlane.f32.xlu0 %v9123_v12  ;;  %389 = vadd.xlane.f32.xlu1 %v9126_v13 }
  0x86   : > { %2100 = vmatpush1.bf16.msra.mxu0 %v8131_v30  ;;  %v8147_v30 = vld [vmem:[#allocation5 + $0xa4] ss:$8 sps:$4 sm:$0xff]  }
  0x87   : > { %2101 = vmatprep.subr.bf16.mxu0 %v8132_v31  ;;  %v9218_v31 = vld [vmem:[%s9066_s17 + $0xc0] sm:$0xff] }
  0x89   : > { %393 = vadd.xlane.f32.xlu1 %v9131_v14  ;;  %391 = vadd.xlane.f32.xlu0 %v9136_v15 }
  0x8a   : > { %2102 = vmatpush1.bf16.msra.mxu0 %v8134_v32  ;;  %v9221_v32 = vld [vmem:[%s9066_s17 + $0xc8] sm:$0xff] }
  0x8b   : > { %2103 = vmatprep.subr.bf16.mxu0 %v8135_v33 }
  0x8d   : > { %1121 = vadd.xlane.f32.xlu1 %v9139_v16  ;;  %1119 = vadd.xlane.f32.xlu0 %v9142_v17 }
  0x8e   : > { %2104 = vmatpush1.bf16.msra.mxu0 %v8137_v34 }
  0x8f   : > { %2105 = vmatprep.subr.bf16.mxu0 %v8138_v35  ;;  %v8149_v35 = vld [vmem:[#allocation5 + $0xa0] ss:$8 sps:$4 sm:$0xff]  }
  0x91   : > { %1123 = vadd.xlane.f32.xlu1 %v9147_v18  ;;  %1149 = vadd.xlane.f32.xlu0 %v9152_v19 }
  0x92   : > { %2106 = vmatpush1.bf16.msra.mxu0 %v8140_v36 }
  0x93   : > { %2107 = vmatprep.subr.bf16.mxu0 %v8141_v37 }
  0x95   : > { %1125 = vadd.xlane.f32.xlu0 %v9155_v20 }
  0xfa   : > { %v366_v38 = vpop.xlane.xlu0 %365  ;;  %v396_v39 = vpop.xlane.xlu1 %395 }
  0xfb   : > { %v398_v40 = vmul.f32 0.0078125, %v366_v38  ;;  %v413_v41 = vmul.f32 0.0078125, %v396_v39  ;;  %v8150_v38 = vld [vmem:[#allocation5 + $0xb4] ss:$8 sps:$4 sm:$0xff]   ;;  %v8152_v39 = vld [vmem:[#allocation5 + $0xb0] ss:$8 sps:$4 sm:$0xff]  }
  0xfd   : > { %v9161_v42 = vsub.f32 %v9077_v0, %v398_v40  ;;  %v9164_v43 = vsub.f32 %v9080_v1, %v413_v41 }
  0xfe   : > { %v368_v44 = vpop.xlane.xlu0 %367  ;;  %v370_v45 = vpop.xlane.xlu1 %369 }
  0xff   : > { %v399_v46 = vmul.f32 0.0078125, %v368_v44  ;;  %v430_v47 = vmul.f32 %v9161_v42, %v9161_v42  ;;  %v445_v49 = vmul.f32 %v9164_v43, %v9164_v43  ;;  %v400_v50 = vmul.f32 0.0078125, %v370_v45 }
 0x101   : > { %v9169_v48 = vsub.f32 %v9085_v2, %v399_v46  ;;  %446 = vadd.xlane.f32.xlu1 %v430_v47  ;;  %v9176_v54 = vsub.f32 %v9088_v3, %v400_v50  ;;  %v8143_v2 = vld [vmem:[#allocation5 + $0x80] ss:$8 sps:$4 sm:$0xff]   ;;  %v9200_v3 = vld [vmem:[%s9066_s17 + $0xb0] sm:$0xff]  ;;  %v8153_v46 = vld [vmem:[#allocation5 + $0xc4] ss:$8 sps:$4 sm:$0xff]  }
 0x102   : > { %v372_v51 = vpop.xlane.xlu0 %371  ;;  %v374_v58 = vpop.xlane.xlu1 %373  ;;  %2108 = vmatpush1.bf16.msra.mxu0 %v8143_v2  ;;  %v9236_v47 = vld [vmem:[%s9066_s17 + $0xd0] sm:$0xff]  ;;  %v8155_v50 = vld [vmem:[#allocation5 + $0xc0] ss:$8 sps:$4 sm:$0xff]   ;;  %v8159_v2 = vld [vmem:[#allocation5 + $0xe4] ss:$8 sps:$4 sm:$0xff]  }
 0x103   : > { %v431_v52 = vmul.f32 %v9169_v48, %v9169_v48  ;;  %v401_v53 = vmul.f32 0.0078125, %v372_v51  ;;  %v432_v60 = vmul.f32 %v9176_v54, %v9176_v54  ;;  %v402_v62 = vmul.f32 0.0078125, %v374_v58  ;;  %2109 = vmatprep.subr.bf16.mxu0 %v8144_v23  ;;  %v8156_v58 = vld [vmem:[#allocation5 + $0xd4] ss:$8 sps:$4 sm:$0xff]  }
 0x105   : > { %476 = vadd.xlane.f32.xlu1 %v445_v49  ;;  %448 = vadd.xlane.f32.xlu0 %v431_v52  ;;  %v9179_v55 = vsub.f32 %v9093_v4, %v401_v53  ;;  %v9194_v0 = vsub.f32 %v9096_v5, %v402_v62  ;;  %v9203_v4 = vld [vmem:[%s9066_s17 + $0xb8] sm:$0xff] }
 0x106   : > { %v376_v59 = vpop.xlane.xlu0 %375  ;;  %v378_v21 = vpop.xlane.xlu1 %377  ;;  %2110 = vmatpush1.bf16.msra.mxu0 %v8146_v27  ;;  %v9239_v49 = vld [vmem:[%s9066_s17 + $0xd8] sm:$0xff] }
 0x107   : > { %v433_v61 = vmul.f32 %v9179_v55, %v9179_v55  ;;  %v403_v63 = vmul.f32 0.0078125, %v376_v59  ;;  %v434_v5 = vmul.f32 %v9194_v0, %v9194_v0  ;;  %v404_v24 = vmul.f32 0.0078125, %v378_v21  ;;  %2111 = vmatprep.subr.bf16.mxu0 %v8147_v30  ;;  %v9254_v21 = vld [vmem:[%s9066_s17 + $0xe0] sm:$0xff]  ;;  %v8162_v27 = vld [vmem:[#allocation5 + $0xf4] ss:$8 sps:$4 sm:$0xff]  }
 0x108   : > { %v8164_v30 = vld [vmem:[#allocation5 + $0xf0] ss:$8 sps:$4 sm:$0xff]  }
 0x109   : > { %1129 = vadd.xlane.f32.xlu1 %v9182_v56  ;;  %1127 = vadd.xlane.f32.xlu0 %v9185_v57  ;;  %v9197_v1 = vsub.f32 %v9099_v6, %v403_v63  ;;  %v9212_v28 = vsub.f32 %v9102_v7, %v404_v24 }
 0x10a   : > { %v380_v22 = vpop.xlane.xlu0 %379  ;;  %v382_v26 = vpop.xlane.xlu1 %381  ;;  %2112 = vmatpush1.bf16.msra.mxu0 %v8149_v35 }
 0x10b   : > { %v435_v6 = vmul.f32 %v9197_v1, %v9197_v1  ;;  %v405_v25 = vmul.f32 0.0078125, %v380_v22  ;;  %v436_v7 = vmul.f32 %v9212_v28, %v9212_v28  ;;  %v406_v36 = vmul.f32 0.0078125, %v382_v26  ;;  %2113 = vmatprep.subr.bf16.mxu0 %v8150_v38  ;;  %v9257_v22 = vld [vmem:[%s9066_s17 + $0xe8] sm:$0xff] }
 0x10d   : > { %450 = vadd.xlane.f32.xlu0 %v432_v60  ;;  %452 = vadd.xlane.f32.xlu1 %v433_v61  ;;  %v9215_v29 = vsub.f32 %v9107_v8, %v405_v25  ;;  %v9230_v44 = vsub.f32 %v9110_v9, %v406_v36  ;;  %v8158_v60 = vld [vmem:[#allocation5 + $0xd0] ss:$8 sps:$4 sm:$0xff]  }
 0x10e   : > { %v384_v33 = vpop.xlane.xlu0 %383  ;;  %v386_v34 = vpop.xlane.xlu1 %385  ;;  %2114 = vmatpush1.bf16.msra.mxu0 %v8152_v39  ;;  %v9277_v36 = vld [vmem:[%s9066_s17 + $0xf0] sm:$0xff] }
 0x10f   : > { %v437_v8 = vmul.f32 %v9215_v29, %v9215_v29  ;;  %v407_v37 = vmul.f32 0.0078125, %v384_v33  ;;  %2115 = vmatprep.subr.bf16.mxu0 %v8153_v46  ;;  %v438_v9 = vmul.f32 %v9230_v44, %v9230_v44  ;;  %v408_v52 = vmul.f32 0.0078125, %v386_v34 }
 0x111   : > { %1131 = vadd.xlane.f32.xlu0 %v9200_v3  ;;  %1133 = vadd.xlane.f32.xlu1 %v9203_v4  ;;  %v9233_v45 = vsub.f32 %v9115_v10, %v407_v37  ;;  %v9248_v61 = vsub.f32 %v9118_v11, %v408_v52 }
 0x112   : > { %v388_v40 = vpop.xlane.xlu0 %387  ;;  %v390_v41 = vpop.xlane.xlu1 %389  ;;  %2116 = vmatpush1.bf16.msra.mxu0 %v8155_v50 }
 0x113   : > { %v439_v10 = vmul.f32 %v9233_v45, %v9233_v45  ;;  %v409_v53 = vmul.f32 0.0078125, %v388_v40  ;;  %2117 = vmatprep.subr.bf16.mxu0 %v8156_v58  ;;  %v410_v63 = vmul.f32 0.0078125, %v390_v41 }
 0x115   : > { %454 = vadd.xlane.f32.xlu0 %v434_v5  ;;  %456 = vadd.xlane.f32.xlu1 %v435_v6  ;;  %v9251_v62 = vsub.f32 %v9123_v12, %v409_v53  ;;  %v8161_v5 = vld [vmem:[#allocation5 + $0xe0] ss:$8 sps:$4 sm:$0xff]   ;;  %v9262_v11 = vsub.f32 %v9126_v13, %v410_v63  ;;  %v440_v12 = vmul.f32 %v9248_v61, %v9248_v61 }
 0x116   : > { %v392_v51 = vpop.xlane.xlu0 %391  ;;  %v394_v59 = vpop.xlane.xlu1 %393  ;;  %2118 = vmatpush1.bf16.msra.mxu0 %v8158_v60 }
 0x117   : > { %2119 = vmatprep.subr.bf16.mxu0 %v8159_v2  ;;  %v412_v6 = vmul.f32 0.0078125, %v394_v59  ;;  %v441_v25 = vmul.f32 %v9251_v62, %v9251_v62  ;;  %v411_v26 = vmul.f32 0.0078125, %v392_v51 }
 0x119   : > { %1135 = vadd.xlane.f32.xlu0 %v9218_v31  ;;  %1137 = vadd.xlane.f32.xlu1 %v9221_v32  ;;  %v9269_v33 = vsub.f32 %v9131_v14, %v412_v6  ;;  %v9272_v13 = vsub.f32 %v9136_v15, %v411_v26 }
 0x11a   : > { %v1120_v23 = vpop.xlane.xlu0 %1119  ;;  %v1122_v24 = vpop.xlane.xlu1 %1121  ;;  %2120 = vmatpush1.bf16.msra.mxu0 %v8161_v5 }
 0x11b   : > { %2121 = vmatprep.subr.bf16.mxu0 %v8162_v27  ;;  %v1152_v34 = vmul.f32 0.0078125, %v1122_v24  ;;  %v444_v14 = vmul.f32 %v9269_v33, %v9269_v33  ;;  %v443_v15 = vmul.f32 %v9272_v13, %v9272_v13 }
 0x11d   : > { %458 = vadd.xlane.f32.xlu0 %v436_v7  ;;  %460 = vadd.xlane.f32.xlu1 %v437_v8  ;;  %v442_v7 = vmul.f32 %v9262_v11, %v9262_v11  ;;  %v1151_v8 = vmul.f32 0.0078125, %v1120_v23  ;;  %v9280_v38 = vsub.f32 %v9139_v16, %v1152_v34 }
 0x11e   : > { %v1150_v35 = vpop.xlane.xlu0 %1149  ;;  %2122 = vmatpush1.bf16.msra.mxu0 %v8164_v30  ;;  %v1124_v37 = vpop.xlane.xlu1 %1123 }
 0x11f   : > { %v9286_v39 = vsub.f32 %v9142_v17, %v1151_v8  ;;  %v1153_v40 = vmul.f32 0.0078125, %v1124_v37  ;;  %v1166_v41 = vmul.f32 0.0078125, %v1150_v35  ;;  %v1184_v50 = vmul.f32 %v9280_v38, %v9280_v38 }
 0x121   : > { %1139 = vadd.xlane.f32.xlu0 %v9236_v47  ;;  %1141 = vadd.xlane.f32.xlu1 %v9239_v49  ;;  %v9293_v16 = vsub.f32 %v9147_v18, %v1153_v40  ;;  %v9296_v51 = vsub.f32 %v9152_v19, %v1166_v41  ;;  %v1183_v17 = vmul.f32 %v9286_v39, %v9286_v39  ;;  %v8167_v19 = vld [vmem:[#allocation5 + $0x104] ss:$8 sps:$4 sm:$0xff]  }
 0x122   : > { %v1126_v46 = vpop.xlane.xlu0 %1125  ;;  %2284 = vmatprep.subr.bf16.mxu0 %v8167_v19 }
 0x123   : > { %v1185_v52 = vmul.f32 %v9293_v16, %v9293_v16  ;;  %v1198_v53 = vmul.f32 %v9296_v51, %v9296_v51 }
 0x125   : > { %462 = vadd.xlane.f32.xlu0 %v438_v9  ;;  %464 = vadd.xlane.f32.xlu1 %v439_v10  ;;  %v1154_v9 = vmul.f32 0.0078125, %v1126_v46 }
 0x127   : > { %v9301_v10 = vsub.f32 %v9155_v20, %v1154_v9 }
 0x129   : > { %1143 = vadd.xlane.f32.xlu0 %v9254_v21  ;;  %1145 = vadd.xlane.f32.xlu1 %v9257_v22  ;;  %v1186_v18 = vmul.f32 %v9301_v10, %v9301_v10 }
 0x12d   : > { %466 = vadd.xlane.f32.xlu0 %v440_v12  ;;  %468 = vadd.xlane.f32.xlu1 %v441_v25 }
 0x131   : > { %1147 = vadd.xlane.f32.xlu0 %v9277_v36  ;;  %470 = vadd.xlane.f32.xlu1 %v442_v7  ;;  %v332_v7 = vlaneseq }
 0x133   : > { %v9325_v9 = vshrl.u32 %v332_v7, 7 }
 0x135   : > { %474 = vadd.xlane.f32.xlu1 %v444_v14  ;;  %472 = vadd.xlane.f32.xlu0 %v443_v15  ;;  %14487 = vst [vmem:[#allocation12_spill] sm:$0xff] %v9325_v9  ;;  %vm602_vm0 = vcmp.lt.s32.totalorder %v9325_v9, 2  ;;  %vm731_vm1 = vcmp.lt.s32.totalorder %v9325_v9, 1  ;;  %vm748_vm2 = vcmp.ge.s32.totalorder %v9325_v9, 1  ;;  %vm860_vm3 = vcmp.lt.s32.totalorder %v9325_v9, 7 }
 0x136   : > { %vm619_vm4 = vcmp.ge.s32.totalorder %v9325_v9, 2  ;;  %vm9397_vm6 = vmpackc.low %vm8836_vm5, %vm748_vm2  ;;  %vm989_vm8 = vcmp.lt.s32.totalorder %v9325_v9, 6 }
 0x137   : > { %vm9409_vm7 = vmpackc.low %vm8836_vm5, %vm619_vm4 }
 0x139   : > { %1201 = vadd.xlane.f32.xlu1 %v1184_v50  ;;  %1199 = vadd.xlane.f32.xlu0 %v1183_v17 }
 0x13d   : > { %1203 = vadd.xlane.f32.xlu1 %v1185_v52  ;;  %1229 = vadd.xlane.f32.xlu0 %v1198_v53  ;;  %v9330_v52 = vld [vmem:[%s14239_s2] ss:$0 sm:$0xff] }
 0x141   : > { %1205 = vadd.xlane.f32.xlu0 %v1186_v18 }
 0x18e   : > { %v447_v58 = vpop.xlane.xlu1 %446 }
 0x18f   : > { %v478_v59 = vmul.f32 0.0078125, %v447_v58 }
 0x191   : > { %v494_v60 = vadd.f32 1e-05, %v478_v59 }
 0x192   : > { %v477_v63 = vpop.xlane.xlu1 %476  ;;  %v449_v20 = vpop.xlane.xlu0 %448 }
 0x193   : > { %8317 = vrsqrt.f32 %v494_v60  ;;  %v493_v2 = vmul.f32 0.0078125, %v477_v63  ;;  %v479_v23 = vmul.f32 0.0078125, %v449_v20 }
 0x195   : > { %v509_v5 = vadd.f32 1e-05, %v493_v2  ;;  %v495_v6 = vadd.f32 1e-05, %v479_v23 }
 0x196   : > { %v1130_v24 = vpop.xlane.xlu1 %1129  ;;  %v1128_v12 = vpop.xlane.xlu0 %1127 }
 0x197   : > { %8319 = vrsqrt.f32 %v509_v5  ;;  %v1156_v25 = vmul.f32 0.0078125, %v1130_v24  ;;  %v1155_v26 = vmul.f32 0.0078125, %v1128_v12 }
 0x198   : > { %8321 = vrsqrt.f32 %v495_v6 }
 0x199   : > { %v9310_v27 = vsub.f32 %v9182_v56, %v1156_v25  ;;  %v9313_v30 = vsub.f32 %v9185_v57, %v1155_v26  ;;  %v9322_v56 = vld [vmem:[%s14238_s1] ss:$0 sm:$0xff] }
 0x19a   : > { %v453_v34 = vpop.xlane.xlu1 %452  ;;  %v451_v35 = vpop.xlane.xlu0 %450 }
 0x19b   : > { %v481_v8 = vmul.f32 0.0078125, %v453_v34  ;;  %v480_v37 = vmul.f32 0.0078125, %v451_v35  ;;  %v1188_v14 = vmul.f32 %v9310_v27, %v9310_v27  ;;  %v1187_v15 = vmul.f32 %v9313_v30, %v9313_v30 }
 0x19d   : > { %v8318_v40 = vpop.eup %8317  ;;  %v497_v41 = vadd.f32 1e-05, %v481_v8  ;;  %v496_v57 = vadd.f32 1e-05, %v480_v37  ;;  %1209 = vadd.xlane.f32.xlu0 %v1188_v14  ;;  %1207 = vadd.xlane.f32.xlu1 %v1187_v15 }
 0x19e   : > { %v526_v46 = vmul.f32 %v8318_v40, %v9161_v42  ;;  %v1134_v50 = vpop.xlane.xlu1 %1133  ;;  %v1132_v17 = vpop.xlane.xlu0 %1131 }
 0x19f   : > { %8323 = vrsqrt.f32 %v497_v41  ;;  %v1158_v53 = vmul.f32 0.0078125, %v1134_v50  ;;  %v1157_v18 = vmul.f32 0.0078125, %v1132_v17 }
 0x1a0   : > { %v548_v19 = vmul.f32 %v9322_v56, %v526_v46  ;;  %8325 = vrsqrt.f32 %v496_v57 }
 0x1a1   : > { %v8320_v58 = vpop.eup %8319  ;;  %v9334_v59 = vsub.f32 %v9203_v4, %v1158_v53  ;;  %v9337_v42 = vsub.f32 %v9200_v3, %v1157_v18 }
 0x1a2   : > { %v8322_v60 = vpop.eup %8321  ;;  %v9340_v63 = vadd.f32 %v9330_v52, %v548_v19  ;;  %v541_v20 = vmul.f32 %v8320_v58, %v9164_v43  ;;  %v457_v2 = vpop.xlane.xlu1 %456 }
 0x1a3   : > { %v455_v23 = vpop.xlane.xlu0 %454  ;;  %v527_v5 = vmul.f32 %v8322_v60, %v9169_v48  ;;  %v483_v6 = vmul.f32 0.0078125, %v457_v2  ;;  %v1190_v3 = vmul.f32 %v9334_v59, %v9334_v59  ;;  %v1189_v12 = vmul.f32 %v9337_v42, %v9337_v42 }
 0x1a4   : > { %v482_v4 = vmul.f32 0.0078125, %v455_v23  ;;  %v563_v24 = vmul.f32 %v9322_v56, %v541_v20  ;;  %v715_v7 = vrot.slane %v9340_v63, 7  ;;  %v586_v8 = vrot.slane %v9340_v63, 6 }
 0x1a5   : > { %v549_v43 = vmul.f32 %v9322_v56, %v527_v5  ;;  %v499_v25 = vadd.f32 1e-05, %v483_v6  ;;  %1213 = vadd.xlane.f32.xlu0 %v1190_v3  ;;  %1211 = vadd.xlane.f32.xlu1 %v1189_v12  ;;  %v14249_v57 = vrot.slane %v9340_v63, 1 }
 0x1a6   : > { %v498_v26 = vadd.f32 1e-05, %v482_v4  ;;  %v9355_v48 = vadd.f32 %v9330_v52, %v563_v24  ;;  %v1138_v34 = vpop.xlane.xlu1 %1137 }
 0x1a7   : > { %v1136_v35 = vpop.xlane.xlu0 %1135  ;;  %v9361_v37 = vadd.f32 %v9330_v52, %v549_v43  ;;  %8327 = vrsqrt.f32 %v499_v25  ;;  %v1160_v14 = vmul.f32 0.0078125, %v1138_v34 }
 0x1a8   : > { %14488 = vst [vmem:[#allocation13_spill] sm:$0xff] %v9355_v48  ;;  %v1159_v15 = vmul.f32 0.0078125, %v1136_v35  ;;  %8329 = vrsqrt.f32 %v498_v26  ;;  %v14251_v40 = vrot.slane %v9355_v48, 7  ;;  %v14250_v41 = vrot.slane %v9355_v48, 6 }
 0x1a9   : > { %v8324_v46 = vpop.eup %8323  ;;  %v9367_v50 = vsub.f32 %v9221_v32, %v1160_v14  ;;  %v716_v53 = vrot.slane %v9361_v37, 7  ;;  %v587_v18 = vrot.slane %v9361_v37, 6  ;;  %v845_v32 = vrot.slane %v9361_v37, 1 }
 0x1aa   : > { %v9370_v17 = vsub.f32 %v9218_v31, %v1159_v15  ;;  %v8326_v19 = vpop.eup %8325  ;;  %v529_v58 = vmul.f32 %v8324_v46, %v9179_v55  ;;  %v461_v60 = vpop.xlane.xlu1 %460  ;;  %v747_v2 = vsel %vm731_vm1, %v14251_v40, %v715_v7  ;;  %v618_v31 = vsel %vm602_vm0, %v14250_v41, %v586_v8 }
 0x1ab   : > { %v459_v20 = vpop.xlane.xlu0 %458  ;;  %v528_v23 = vmul.f32 %v8326_v19, %v9176_v54  ;;  %v485_v5 = vmul.f32 0.0078125, %v461_v60  ;;  %v1192_v55 = vmul.f32 %v9367_v50, %v9367_v50  ;;  %v746_v24 = vsel %vm731_vm1, %v715_v7, %v716_v53  ;;  %v8165_v7 = vld [vmem:[#allocation5 + $0x100] ss:$8 sps:$4 sm:$0xff]   ;;  %v8170_v19 = vld [vmem:[#allocation5 + $0x114] ss:$8 sps:$4 sm:$0xff]  }
 0x1ac   : > { %v484_v6 = vmul.f32 0.0078125, %v459_v20  ;;  %v551_v4 = vmul.f32 %v9322_v56, %v529_v58  ;;  %v1191_v3 = vmul.f32 %v9370_v17, %v9370_v17  ;;  %v14489_v54 = vmov 0 }
 0x1ad   : > { %v14490_v54 = vsel %vm9397_vm6, 4294967295, %v14489_v54  ;;  %v617_v12 = vsel %vm602_vm0, %v586_v8, %v587_v18  ;;  %v550_v43 = vmul.f32 %v9322_v56, %v528_v23  ;;  %v501_v25 = vadd.f32 1e-05, %v485_v5  ;;  %1217 = vadd.xlane.f32.xlu0 %v1192_v55 }
 0x1ae   : > { %14491 = vst [vmem:[#allocation14_spill] sm:$0xff] %v14490_v54  ;;  %v500_v26 = vadd.f32 1e-05, %v484_v6  ;;  %v7079_v34 = vpack.c.bf16 %v746_v24, %v747_v2  ;;  %v14492_v35 = vmov 0  ;;  %v9414_v14 = vadd.f32 %v9330_v52, %v551_v4  ;;  %1215 = vadd.xlane.f32.xlu1 %v1191_v3  ;;  %v1142_v15 = vpop.xlane.xlu1 %1141  ;;  %v8168_v24 = vld [vmem:[#allocation5 + $0x110] ss:$8 sps:$4 sm:$0xff]  }
 0x1af   : > { %v14493_v35 = vsel %vm9409_vm7, 4294967295, %v14492_v35  ;;  %v1140_v8 = vpop.xlane.xlu0 %1139  ;;  %v7082_v46 = vpack.c.bf16 %v617_v12, %v618_v31  ;;  %v9422_v58 = vsel %vm860_vm3, %v14249_v57, %v845_v32  ;;  %v9427_v20 = vadd.f32 %v9330_v52, %v550_v43 }
 0x1b0   : > { %14494 = vst [vmem:[#allocation15_spill] sm:$0xff] %v14493_v35  ;;  %8331 = vrsqrt.f32 %v501_v25  ;;  %7080 = vmatprep.mubr.msk.bf16.mxu0 %vm9397_vm6, %v7079_v34  ;;  %v1162_v2 = vmul.f32 0.0078125, %v1142_v15  ;;  %v1161_v31 = vmul.f32 0.0078125, %v1140_v8  ;;  %v718_v23 = vrot.slane %v9414_v14, 7  ;;  %v8173_v15 = vld [vmem:[#allocation5 + $0x124] ss:$8 sps:$4 sm:$0xff]  }
 0x1b1   : > { %8333 = vrsqrt.f32 %v500_v26  ;;  %7083 = vmatmul.mubr.msk.bf16.vlgmr.msra.gmra.mrb[0].mxu0 %vm9409_vm7, %v7082_v46  ;;  %v8328_v5 = vpop.eup %8327  ;;  %v717_v4 = vrot.slane %v9427_v20, 7  ;;  %v589_v3 = vrot.slane %v9414_v14, 6  ;;  %v588_v34 = vrot.slane %v9427_v20, 6  ;;  %v8215_v35 = vld [vmem:[#allocation5 + $0x204] ss:$8 sps:$4 sm:$0xff]  }
 0x1b2   : > { %v9435_v6 = vsub.f32 %v9239_v49, %v1162_v2  ;;  %v9438_v55 = vsub.f32 %v9236_v47, %v1161_v31  ;;  %2285 = vmatpush1.bf16.msra.mxu0 %v8165_v7  ;;  %v8330_v12 = vpop.eup %8329  ;;  %v531_v43 = vmul.f32 %v8328_v5, %v9197_v1  ;;  %v465_v25 = vpop.xlane.xlu1 %464  ;;  %v847_v49 = vrot.slane %v9414_v14, 1 }
 0x1b3   : > { %v463_v26 = vpop.xlane.xlu0 %462  ;;  %2286 = vmatprep.subr.bf16.mxu0 %v8170_v19  ;;  %v530_v8 = vmul.f32 %v8330_v12, %v9194_v0  ;;  %v487_v46 = vmul.f32 0.0078125, %v465_v25  ;;  %v744_v19 = vsel %vm731_vm1, %v717_v4, %v718_v23  ;;  %v745_v0 = vsel %vm731_vm1, %v716_v53, %v717_v4  ;;  %v8176_v4 = vld [vmem:[#allocation5 + $0x134] ss:$8 sps:$4 sm:$0xff]  }
 0x1b4   : > { %v486_v2 = vmul.f32 0.0078125, %v463_v26  ;;  %v1194_v7 = vmul.f32 %v9435_v6, %v9435_v6  ;;  %v553_v1 = vmul.f32 %v9322_v56, %v531_v43  ;;  %v1193_v31 = vmul.f32 %v9438_v55, %v9438_v55  ;;  %v8171_v43 = vld [vmem:[#allocation5 + $0x120] ss:$8 sps:$4 sm:$0xff]  }
 0x1b5   : > { %v552_v5 = vmul.f32 %v9322_v56, %v530_v8  ;;  %v503_v12 = vadd.f32 1e-05, %v487_v46  ;;  %v1525_v26 = vpack.c.bf16 %v744_v19, %v745_v0  ;;  %v615_v41 = vsel %vm602_vm0, %v588_v34, %v589_v3 }
 0x1b6   : > { %v502_v25 = vadd.f32 1e-05, %v486_v2  ;;  %1221 = vadd.xlane.f32.xlu0 %v1194_v7  ;;  %2287 = vmatpush1.bf16.msra.mxu0 %v8168_v24  ;;  %v9463_v47 = vadd.f32 %v9330_v52, %v553_v1  ;;  %v1146_v60 = vpop.xlane.xlu1 %1145  ;;  %v616_v53 = vsel %vm602_vm0, %v587_v18, %v588_v34  ;;  %v846_v24 = vrot.slane %v9427_v20, 1 }
 0x1b7   : > { %1219 = vadd.xlane.f32.xlu1 %v1193_v31  ;;  %v1144_v57 = vpop.xlane.xlu0 %1143  ;;  %2288 = vmatprep.subr.bf16.mxu0 %v8173_v15  ;;  %v9475_v8 = vadd.f32 %v9330_v52, %v552_v5  ;;  %8335 = vrsqrt.f32 %v503_v12  ;;  %v1164_v46 = vmul.f32 0.0078125, %v1146_v60  ;;  %v1524_v7 = vpack.c.bf16 %v615_v41, %v616_v53  ;;  %v8174_v60 = vld [vmem:[#allocation5 + $0x130] ss:$8 sps:$4 sm:$0xff]  }
 0x1b8   : > { %2133 = vmatprep.mubr.bf16.mxu0 %v1525_v26  ;;  %v1163_v2 = vmul.f32 0.0078125, %v1144_v57  ;;  %8337 = vrsqrt.f32 %v502_v25  ;;  %v720_v1 = vrot.slane %v9463_v47, 7  ;;  %v591_v0 = vrot.slane %v9463_v47, 6 }
 0x1b9   : > { %v9480_v18 = vsub.f32 %v9257_v22, %v1164_v46  ;;  %v719_v15 = vrot.slane %v9475_v8, 7  ;;  %2134 = vmatmul.mubr.bf16.gmra.mrb[4].mxu0 %v1524_v7  ;;  %v590_v25 = vrot.slane %v9475_v8, 6  ;;  %v8179_v22 = vld [vmem:[#allocation5 + $0x144] ss:$8 sps:$4 sm:$0xff]   ;;  %v9499_v26 = vsel %vm860_vm3, %v846_v24, %v847_v49 }
 0x1ba   : > { %v8332_v19 = vpop.eup %8331  ;;  %v9483_v34 = vsub.f32 %v9254_v21, %v1163_v2  ;;  %2289 = vmatpush1.bf16.msra.mxu0 %v8171_v43  ;;  %v469_v5 = vpop.xlane.xlu1 %468  ;;  %v9493_v21 = vsel %vm860_vm3, %v845_v32, %v846_v24 }
 0x1bb   : > { %v8334_v57 = vpop.eup %8333  ;;  %v533_v41 = vmul.f32 %v8332_v19, %v9215_v29  ;;  %v467_v12 = vpop.xlane.xlu0 %466  ;;  %2290 = vmatprep.subr.bf16.mxu0 %v8176_v4  ;;  %v489_v43 = vmul.f32 0.0078125, %v469_v5  ;;  %v1196_v4 = vmul.f32 %v9480_v18, %v9480_v18  ;;  %v742_v32 = vsel %vm731_vm1, %v719_v15, %v720_v1 }
 0x1bc   : > { %v532_v29 = vmul.f32 %v8334_v57, %v9212_v28  ;;  %v488_v53 = vmul.f32 0.0078125, %v467_v12  ;;  %v1195_v2 = vmul.f32 %v9483_v34, %v9483_v34  ;;  %v743_v28 = vsel %vm731_vm1, %v718_v23, %v719_v15  ;;  %v8182_v15 = vld [vmem:[#allocation5 + $0x154] ss:$8 sps:$4 sm:$0xff]  }
 0x1bd   : > { %v555_v46 = vmul.f32 %v9322_v56, %v533_v41  ;;  %v505_v7 = vadd.f32 1e-05, %v489_v43  ;;  %1225 = vadd.xlane.f32.xlu0 %v1196_v4  ;;  %v1530_v57 = vpack.c.bf16 %v742_v32, %v743_v28  ;;  %v8177_v41 = vld [vmem:[#allocation5 + $0x140] ss:$8 sps:$4 sm:$0xff]   ;;  %v613_v40 = vsel %vm602_vm0, %v590_v25, %v591_v0 }
 0x1be   : > { %v554_v24 = vmul.f32 %v9322_v56, %v532_v29  ;;  %v504_v19 = vadd.f32 1e-05, %v488_v53  ;;  %2291 = vmatpush1.bf16.msra.mxu0 %v8174_v60  ;;  %1223 = vadd.xlane.f32.xlu1 %v1195_v2  ;;  %v471_v12 = vpop.xlane.xlu1 %470  ;;  %v614_v23 = vsel %vm602_vm0, %v589_v3, %v590_v25  ;;  %v14252_v60 = vrot.slane %v9475_v8, 1 }
 0x1bf   : > { %v9517_v5 = vadd.f32 %v9330_v52, %v555_v46  ;;  %v1148_v31 = vpop.xlane.xlu0 %1147  ;;  %2292 = vmatprep.subr.bf16.mxu0 %v8179_v22  ;;  %8339 = vrsqrt.f32 %v505_v7  ;;  %2143 = vmatprep.mubr.bf16.mxu0 %v1530_v57  ;;  %v490_v43 = vmul.f32 0.0078125, %v471_v12  ;;  %v1529_v4 = vpack.c.bf16 %v613_v40, %v614_v23  ;;  %v8185_v12 = vld [vmem:[#allocation5 + $0x164] ss:$8 sps:$4 sm:$0xff]  }
 0x1c0   : > { %v9529_v29 = vadd.f32 %v9330_v52, %v554_v24  ;;  %v1165_v53 = vmul.f32 0.0078125, %v1148_v31  ;;  %8341 = vrsqrt.f32 %v504_v19  ;;  %v849_v2 = vrot.slane %v9463_v47, 1  ;;  %v8180_v24 = vld [vmem:[#allocation5 + $0x150] ss:$8 sps:$4 sm:$0xff]  }
 0x1c1   : > { %v14254_v46 = vrot.slane %v9517_v5, 7  ;;  %v8336_v32 = vpop.eup %8335  ;;  %v506_v28 = vadd.f32 1e-05, %v490_v43  ;;  %v14253_v22 = vrot.slane %v9517_v5, 6  ;;  %2144 = vmatmul.mubr.bf16.gmra.mrb[8].mxu0 %v1529_v4 }
 0x1c2   : > { %v9534_v3 = vsub.f32 %v9277_v36, %v1165_v53  ;;  %v721_v25 = vrot.slane %v9529_v29, 7  ;;  %2293 = vmatpush1.bf16.msra.mxu0 %v8177_v41  ;;  %v8338_v7 = vpop.eup %8337  ;;  %v535_v31 = vmul.f32 %v8336_v32, %v9233_v45  ;;  %v475_v40 = vpop.xlane.xlu1 %474  ;;  %v592_v57 = vrot.slane %v9529_v29, 6 }
 0x1c3   : > { %v473_v19 = vpop.xlane.xlu0 %472  ;;  %2294 = vmatprep.subr.bf16.mxu0 %v8182_v15  ;;  %v9548_v41 = vsel %vm860_vm3, %v847_v49, %v14252_v60  ;;  %v534_v45 = vmul.f32 %v8338_v7, %v9230_v44  ;;  %8343 = vrsqrt.f32 %v506_v28  ;;  %v492_v23 = vmul.f32 0.0078125, %v475_v40 }
 0x1c4   : > { %v491_v43 = vmul.f32 0.0078125, %v473_v19  ;;  %v557_v53 = vmul.f32 %v9322_v56, %v535_v31  ;;  %v1197_v15 = vmul.f32 %v9534_v3, %v9534_v3  ;;  %v740_v4 = vsel %vm731_vm1, %v721_v25, %v14254_v46  ;;  %v8183_v31 = vld [vmem:[#allocation5 + $0x160] ss:$8 sps:$4 sm:$0xff]  }
 0x1c5   : > { %v741_v49 = vsel %vm731_vm1, %v720_v1, %v721_v25  ;;  %v556_v44 = vmul.f32 %v9322_v56, %v534_v45  ;;  %v508_v32 = vadd.f32 1e-05, %v492_v23  ;;  %v611_v60 = vsel %vm602_vm0, %v592_v57, %v14253_v22  ;;  %v8188_v25 = vld [vmem:[#allocation5 + $0x174] ss:$8 sps:$4 sm:$0xff]  }
 0x1c6   : > { %v507_v28 = vadd.f32 1e-05, %v491_v43  ;;  %v1535_v7 = vpack.c.bf16 %v740_v4, %v741_v49  ;;  %2295 = vmatpush1.bf16.msra.mxu0 %v8180_v24  ;;  %v9564_v40 = vadd.f32 %v9330_v52, %v557_v53  ;;  %1227 = vadd.xlane.f32.xlu1 %v1197_v15  ;;  %v1202_v19 = vpop.xlane.xlu1 %1201  ;;  %v612_v1 = vsel %vm602_vm0, %v591_v0, %v592_v57  ;;  %v8186_v4 = vld [vmem:[#allocation5 + $0x170] ss:$8 sps:$4 sm:$0xff]  }
 0x1c7   : > { %v1200_v36 = vpop.xlane.xlu0 %1199  ;;  %2296 = vmatprep.subr.bf16.mxu0 %v8185_v12  ;;  %v14255_v24 = vrot.slane %v9529_v29, 1  ;;  %v9576_v45 = vadd.f32 %v9330_v52, %v556_v44  ;;  %8345 = vrsqrt.f32 %v508_v32  ;;  %v1232_v23 = vmul.f32 0.0078125, %v1202_v19 }
 0x1c8   : > { %2153 = vmatprep.mubr.bf16.mxu0 %v1535_v7  ;;  %v1231_v43 = vmul.f32 0.0078125, %v1200_v36  ;;  %8347 = vrsqrt.f32 %v507_v28  ;;  %v1534_v53 = vpack.c.bf16 %v611_v60, %v612_v1  ;;  %v724_v15 = vrot.slane %v9564_v40, 7  ;;  %v8191_v7 = vld [vmem:[#allocation5 + $0x184] ss:$8 sps:$4 sm:$0xff]  }
 0x1c9   : > { %v8340_v22 = vpop.eup %8339  ;;  %v1248_v0 = vadd.f32 1e-05, %v1232_v23  ;;  %v723_v12 = vrot.slane %v9576_v45, 7  ;;  %v595_v46 = vrot.slane %v9564_v40, 6  ;;  %v594_v60 = vrot.slane %v9576_v45, 6 }
 0x1ca   : > { %v1247_v57 = vadd.f32 1e-05, %v1231_v43  ;;  %2297 = vmatpush1.bf16.msra.mxu0 %v8183_v31  ;;  %v8342_v44 = vpop.eup %8341  ;;  %v537_v32 = vmul.f32 %v8340_v22, %v9251_v62  ;;  %v1204_v36 = vpop.xlane.xlu1 %1203  ;;  %v9592_v31 = vsel %vm860_vm3, %v849_v2, %v14255_v24  ;;  %v14495_v43 = vrot.slane %v9517_v5, 7 }
 0x1cb   : > { %2154 = vmatmul.mubr.bf16.gmra.mrb[12].mxu0 %v1534_v53  ;;  %v1230_v28 = vpop.xlane.xlu0 %1229  ;;  %2298 = vmatprep.subr.bf16.mxu0 %v8188_v25  ;;  %v536_v62 = vmul.f32 %v8342_v44, %v9248_v61  ;;  %8349 = vrsqrt.f32 %v1248_v0  ;;  %v1233_v22 = vmul.f32 0.0078125, %v1204_v36  ;;  %v738_v25 = vsel %vm731_vm1, %v723_v12, %v724_v15  ;;  %v8189_v36 = vld [vmem:[#allocation5 + $0x180] ss:$8 sps:$4 sm:$0xff]  }
 0x1cc   : > { %v1246_v1 = vmul.f32 0.0078125, %v1230_v28  ;;  %v559_v23 = vmul.f32 %v9322_v56, %v537_v32  ;;  %8351 = vrsqrt.f32 %v1247_v57  ;;  %v739_v53 = vsel %vm731_vm1, %v14495_v43, %v723_v12 }
 0x1cd   : > { %v8344_v19 = vpop.eup %8343  ;;  %v558_v24 = vmul.f32 %v9322_v56, %v536_v62  ;;  %v1249_v61 = vadd.f32 1e-05, %v1233_v22  ;;  %v1540_v44 = vpack.c.bf16 %v738_v25, %v739_v53  ;;  %v609_v49 = vsel %vm602_vm0, %v594_v60, %v595_v46 }
 0x1ce   : > { %v1262_v0 = vadd.f32 1e-05, %v1246_v1  ;;  %2299 = vmatpush1.bf16.msra.mxu0 %v8186_v4  ;;  %v9606_v57 = vadd.f32 %v9330_v52, %v559_v23  ;;  %v538_v32 = vmul.f32 %v8344_v19, %v9262_v11  ;;  %v14496_v12 = vrot.slane %v9517_v5, 6  ;;  %v8194_v11 = vld [vmem:[#allocation5 + $0x194] ss:$8 sps:$4 sm:$0xff]  }
 0x1cf   : > { %v1206_v28 = vpop.xlane.xlu0 %1205  ;;  %2300 = vmatprep.subr.bf16.mxu0 %v8191_v7  ;;  %v9618_v4 = vadd.f32 %v9330_v52, %v558_v24  ;;  %8353 = vrsqrt.f32 %v1249_v61  ;;  %2163 = vmatprep.mubr.bf16.mxu0 %v1540_v44  ;;  %v8192_v24 = vld [vmem:[#allocation5 + $0x190] ss:$8 sps:$4 sm:$0xff]  }
 0x1d0   : > { %v610_v62 = vsel %vm602_vm0, %v14496_v12, %v594_v60  ;;  %v1234_v22 = vmul.f32 0.0078125, %v1206_v28  ;;  %v560_v19 = vmul.f32 %v9322_v56, %v538_v32  ;;  %8355 = vrsqrt.f32 %v1262_v0 }
 0x1d1   : > { %v1539_v1 = vpack.c.bf16 %v609_v49, %v610_v62  ;;  %v726_v23 = vrot.slane %v9606_v57, 7  ;;  %v597_v25 = vrot.slane %v9606_v57, 6  ;;  %v8346_v43 = vpop.eup %8345  ;;  %v725_v60 = vrot.slane %v9618_v4, 7 }
 0x1d2   : > { %v1250_v53 = vadd.f32 1e-05, %v1234_v22  ;;  %v596_v7 = vrot.slane %v9618_v4, 6  ;;  %2301 = vmatpush1.bf16.msra.mxu0 %v8189_v36  ;;  %v14497_v49 = vrot.slane %v9475_v8, 1  ;;  %v8348_v0 = vpop.eup %8347  ;;  %v9634_v44 = vadd.f32 %v9330_v52, %v560_v19 }
 0x1d3   : > { %v540_v32 = vmul.f32 %v8346_v43, %v9269_v33  ;;  %2164 = vmatmul.mubr.bf16.gmra.mrb[16].mxu0 %v1539_v1  ;;  %2302 = vmatprep.subr.bf16.mxu0 %v8194_v11  ;;  %v14256_v28 = vrot.slane %v9576_v45, 1  ;;  %v539_v12 = vmul.f32 %v8348_v0, %v9272_v13  ;;  %v737_v62 = vsel %vm731_vm1, %v724_v15, %v725_v60 }
 0x1d4   : > { %v9631_v61 = vsel %vm860_vm3, %v14497_v49, %v849_v2  ;;  %8357 = vrsqrt.f32 %v1250_v53  ;;  %v736_v2 = vsel %vm731_vm1, %v725_v60, %v726_v23  ;;  %v607_v1 = vsel %vm602_vm0, %v596_v7, %v597_v25 }
 0x1d5   : > { %v562_v33 = vmul.f32 %v9322_v56, %v540_v32  ;;  %v1545_v22 = vpack.c.bf16 %v736_v2, %v737_v62  ;;  %v608_v13 = vsel %vm602_vm0, %v595_v46, %v596_v7  ;;  %v8350_v11 = vpop.eup %8349  ;;  %v561_v19 = vmul.f32 %v9322_v56, %v539_v12  ;;  %v8195_v2 = vld [vmem:[#allocation5 + $0x1a0] ss:$8 sps:$4 sm:$0xff]   ;;  %v8197_v62 = vld [vmem:[#allocation5 + $0x1a4] ss:$8 sps:$4 sm:$0xff]  }
 0x1d6   : > { %v1544_v43 = vpack.c.bf16 %v607_v1, %v608_v13  ;;  %v727_v53 = vrot.slane %v9634_v44, 7  ;;  %v598_v49 = vrot.slane %v9634_v44, 6  ;;  %2303 = vmatpush1.bf16.msra.mxu0 %v8192_v24  ;;  %v8352_v15 = vpop.eup %8351  ;;  %v1280_v0 = vmul.f32 %v8350_v11, %v9280_v38 }
 0x1d7   : > { %v9658_v60 = vadd.f32 %v9330_v52, %v562_v33  ;;  %2173 = vmatprep.mubr.bf16.mxu0 %v1545_v22  ;;  %v14499_v46 = vrot.slane %v9517_v5, 1  ;;  %v9672_v24 = vadd.f32 %v9330_v52, %v561_v19  ;;  %v1279_v12 = vmul.f32 %v8352_v15, %v9286_v39  ;;  %2304 = vmatprep.subr.bf16.mxu0 %v8197_v62 }
 0x1d8   : > { %v1296_v22 = vmul.f32 %v9322_v56, %v1280_v0 }
 0x1d9   : > { %14498 = vst [vmem:[#allocation16_spill] sm:$0xff] %v9658_v60  ;;  %v9669_v7 = vsel %vm860_vm3, %v14499_v46, %v14256_v28  ;;  %v729_v1 = vrot.slane %v9658_v60, 7  ;;  %v600_v13 = vrot.slane %v9658_v60, 6  ;;  %v14501_v11 = vmov %v14499_v46  ;;  %v8354_v39 = vpop.eup %8353 }
 0x1da   : > { %14500 = vst [vmem:[#allocation17_spill] sm:$0xff] %v9669_v7  ;;  %v14502_v46 = vrot.slane %v9529_v29, 1  ;;  %v1295_v15 = vmul.f32 %v9322_v56, %v1279_v12  ;;  %v728_v32 = vrot.slane %v9672_v24, 7  ;;  %v599_v36 = vrot.slane %v9672_v24, 6  ;;  %v8356_v28 = vpop.eup %8355  ;;  %2305 = vmatpush1.bf16.msra.mxu0 %v8195_v2 }
 0x1db   : > { %v9694_v38 = vadd.f32 %v9330_v52, %v1296_v22  ;;  %v1281_v33 = vmul.f32 %v8354_v39, %v9293_v16  ;;  %2174 = vmatmul.mubr.bf16.gmra.mrb[20].mxu0 %v1544_v43  ;;  %v606_v12 = vsel %vm602_vm0, %v597_v25, %v598_v49  ;;  %v1294_v62 = vmul.f32 %v8356_v28, %v9296_v51 }
 0x1dc   : > { %v9686_v19 = vsel %vm860_vm3, %v14502_v46, %v14501_v11  ;;  %v735_v11 = vsel %vm731_vm1, %v726_v23, %v727_v53  ;;  %v9702_v46 = vadd.f32 %v9330_v52, %v1295_v15  ;;  %v734_v0 = vsel %vm731_vm1, %v727_v53, %v728_v32 }
 0x1dd   : > { %14503 = vst [vmem:[#allocation18_spill] sm:$0xff] %v9686_v19  ;;  %14504 = vst [vmem:[#allocation19_spill] sm:$0xff] %v9694_v38  ;;  %v605_v22 = vsel %vm602_vm0, %v598_v49, %v599_v36  ;;  %v1297_v16 = vmul.f32 %v9322_v56, %v1281_v33  ;;  %v1550_v43 = vpack.c.bf16 %v734_v0, %v735_v11  ;;  %v14505_v23 = vrot.slane %v9355_v48, 7 }
 0x1de   : > { %v14506_v39 = vrot.slane %v9355_v48, 6  ;;  %v8358_v28 = vpop.eup %8357  ;;  %v1310_v53 = vmul.f32 %v9322_v56, %v1294_v62  ;;  %v1549_v15 = vpack.c.bf16 %v605_v22, %v606_v12  ;;  %v733_v49 = vsel %vm731_vm1, %v728_v32, %v729_v1  ;;  %v8200_v62 = vld [vmem:[#allocation5 + $0x1b4] ss:$8 sps:$4 sm:$0xff]  }
 0x1df   : > { %v732_v25 = vsel %vm731_vm1, %v729_v1, %v14505_v23  ;;  %v604_v2 = vsel %vm602_vm0, %v599_v36, %v600_v13  ;;  %v9726_v33 = vadd.f32 %v9330_v52, %v1297_v16  ;;  %v1282_v0 = vmul.f32 %v8358_v28, %v9301_v10  ;;  %2183 = vmatprep.mubr.bf16.mxu0 %v1550_v43  ;;  %v8198_v1 = vld [vmem:[#allocation5 + $0x1b0] ss:$8 sps:$4 sm:$0xff]  }
 0x1e0   : > { %v9718_v51 = vsel %vm602_vm0, %v600_v13, %v14506_v39  ;;  %v1375_v11 = vrot.slane %v9702_v46, 7  ;;  %v1376_v23 = vrot.slane %v9694_v38, 7  ;;  %v9732_v39 = vadd.f32 %v9330_v52, %v1310_v53  ;;  %2306 = vmatprep.subr.bf16.mxu0 %v8200_v62 }
 0x1e1   : > { %14507 = vst [vmem:[#allocation20_spill] sm:$0xff] %v9726_v33  ;;  %v1327_v12 = vrot.slane %v9702_v46, 6  ;;  %v1328_v32 = vrot.slane %v9694_v38, 6  ;;  %v1298_v13 = vmul.f32 %v9322_v56, %v1282_v0  ;;  %v1377_v10 = vrot.slane %v9726_v33, 7  ;;  %2307 = vmatpush1.bf16.msra.mxu0 %v8198_v1  ;;  %v8201_v1 = vld [vmem:[#allocation5 + $0x1c0] ss:$8 sps:$4 sm:$0xff]  }
 0x1e2   : > { %v14508_v22 = vrot.slane %v9340_v63, 1  ;;  %v14509_v16 = vrot.slane %v9355_v48, 1  ;;  %v1555_v53 = vpack.c.bf16 %v732_v25, %v733_v49  ;;  %v14259_v19 = vrot.slane %v9732_v39, 7 }
 0x1e3   : > { %v14260_v7 = vrot.slane %v9732_v39, 6  ;;  %v854_v56 = vrot.slane %v9618_v4, 1  ;;  %v9754_v0 = vadd.f32 %v9330_v52, %v1298_v13  ;;  %2184 = vmatmul.mubr.bf16.gmra.mrb[24].mxu0 %v1549_v15  ;;  %v1554_v36 = vpack.c.bf16 %v9718_v51, %v604_v2 }
 0x1e4   : > { %v9746_v43 = vsel %vm860_vm3, %v14509_v16, %v14508_v22  ;;  %v1329_v22 = vrot.slane %v9726_v33, 6  ;;  %v14512_v16 = vrot.slane %v9564_v40, 1  ;;  %v14513_v25 = vrot.slane %v9576_v45, 1  ;;  %2193 = vmatprep.mubr.bf16.mxu0 %v1555_v53 }
 0x1e5   : > { %14510 = vst [vmem:[#allocation21_spill] sm:$0xff] %v9746_v43  ;;  %14511 = vst [vmem:[#allocation22_spill] sm:$0xff] %v9754_v0  ;;  %v1405_v62 = vsel %vm731_vm1, %v1375_v11, %v1376_v23  ;;  %v9770_v52 = vsel %vm602_vm0, %v1327_v12, %v1328_v32  ;;  %v855_v2 = vrot.slane %v9606_v57, 1  ;;  %v1406_v13 = vsel %vm731_vm1, %v14259_v19, %v1375_v11 }
 0x1e6   : > { %v9764_v49 = vsel %vm860_vm3, %v14513_v25, %v14512_v16  ;;  %v14515_v51 = vmov %v14512_v16  ;;  %v9787_v53 = vsel %vm602_vm0, %v14260_v7, %v1327_v12  ;;  %v9792_v16 = vsel %vm731_vm1, %v1376_v23, %v1377_v10 }
 0x1e7   : > { %14514 = vst [vmem:[#allocation23_spill] sm:$0xff] %v9764_v49  ;;  %v9776_v15 = vsel %vm860_vm3, %v14515_v51, %v854_v56  ;;  %v856_v11 = vrot.slane %v9634_v44, 1  ;;  %v9801_v19 = vsel %vm860_vm3, %v854_v56, %v855_v2  ;;  %v9806_v7 = vsel %vm602_vm0, %v1328_v32, %v1329_v22  ;;  %v8203_v49 = vld [vmem:[#allocation5 + $0x1c4] ss:$8 sps:$4 sm:$0xff]  }
 0x1e8   : > { %14516 = vst [vmem:[#allocation24_spill] sm:$0xff] %v9776_v15  ;;  %14517 = vst [vmem:[#allocation25_spill] sm:$0xff] %v9801_v19  ;;  %v857_v25 = vrot.slane %v9672_v24, 1  ;;  %v7085_v28 = vpack.c.bf16 %v1405_v62, %v1406_v13  ;;  %v7088_v51 = vpack.c.bf16 %v9770_v52, %v9787_v53  ;;  %v14518_v32 = vrot.slane %v9754_v0, 7  ;;  %v8206_v15 = vld [vmem:[#allocation5 + $0x1d4] ss:$8 sps:$4 sm:$0xff]   ;;  %2308 = vmatprep.subr.bf16.mxu0 %v8203_v49 }
 0x1e9   : > { %v9815_v56 = vsel %vm860_vm3, %v855_v2, %v856_v11  ;;  %v858_v13 = vrot.slane %v9658_v60, 1  ;;  %v1424_v12 = vrot.slane %v9694_v38, 1  ;;  %v975_v2 = vrot.slane %v9427_v20, 2  ;;  %2309 = vmatpush1.bf16.msra.mxu0 %v8201_v1  ;;  %v8204_v53 = vld [vmem:[#allocation5 + $0x1d0] ss:$8 sps:$4 sm:$0xff]  }
 0x1ea   : > { %v1403_v23 = vsel %vm731_vm1, %v1377_v10, %v14518_v32  ;;  %v9827_v52 = vsel %vm860_vm3, %v856_v11, %v857_v25  ;;  %v1425_v10 = vrot.slane %v9726_v33, 1  ;;  %v14520_v32 = vrot.slane %v9754_v0, 6  ;;  %2310 = vmatprep.subr.bf16.mxu0 %v8206_v15 }
 0x1eb   : > { %14519 = vst [vmem:[#allocation26_spill] sm:$0xff] %v9827_v52  ;;  %2194 = vmatmul.mubr.bf16.gmra.mrb[28].mxu0 %v1554_v36  ;;  %v9849_v36 = vsel %vm860_vm3, %v857_v25, %v858_v13  ;;  %v14521_v19 = vrot.slane %v9355_v48, 1  ;;  %v976_v49 = vrot.slane %v9414_v14, 2  ;;  %v14524_v11 = vrot.slane %v9702_v46, 1 }
 0x1ec   : > { %v9839_v62 = vsel %vm602_vm0, %v1329_v22, %v14520_v32  ;;  %7086 = vmatprep.mubr.msk.bf16.mxu0 %vm9397_vm6, %v7085_v28  ;;  %v9859_v32 = vsel %vm860_vm3, %v1424_v12, %v1425_v10  ;;  %v8209_v28 = vld [vmem:[#allocation5 + $0x1e4] ss:$8 sps:$4 sm:$0xff]   ;;  %v1565_v15 = vpack.c.bf16 %v1403_v23, %v9792_v16  ;;  %v14528_v52 = vrot.slane %v9361_v37, 2  ;;  %v8212_v16 = vld [vmem:[#allocation5 + $0x1f4] ss:$8 sps:$4 sm:$0xff]  }
 0x1ed   : > { %v9855_v22 = vsel %vm860_vm3, %v858_v13, %v14521_v19  ;;  %14523 = vst [vmem:[#allocation28_spill] sm:$0xff] %v9859_v32  ;;  %v9870_v19 = vsel %vm860_vm3, %v14524_v11, %v1424_v12  ;;  %v14526_v13 = vrot.slane %v9754_v0, 1  ;;  %v14531_v11 = vrot.slane %v9340_v63, 2  ;;  %2311 = vmatpush1.bf16.msra.mxu0 %v8204_v53 }
 0x1ee   : > { %14522 = vst [vmem:[#allocation27_spill] sm:$0xff] %v9855_v22  ;;  %14525 = vst [vmem:[#allocation29_spill] sm:$0xff] %v9870_v19  ;;  %v9885_v25 = vsel %vm989_vm8, %v14528_v52, %v975_v2  ;;  %v14530_v12 = vmov %v14528_v52  ;;  %v977_v23 = vrot.slane %v9475_v8, 2  ;;  %v978_v52 = vrot.slane %v9463_v47, 2  ;;  %2312 = vmatprep.subr.bf16.mxu0 %v8209_v28 }
 0x1ef   : > { %v9876_v54 = vsel %vm860_vm3, %v1425_v10, %v14526_v13  ;;  %14529 = vst [vmem:[#allocation31_spill] sm:$0xff] %v9885_v25  ;;  %v9893_v22 = vsel %vm989_vm8, %v14531_v11, %v14530_v12  ;;  %v9900_v10 = vsel %vm989_vm8, %v975_v2, %v976_v49  ;;  %v8207_v13 = vld [vmem:[#allocation5 + $0x1e0] ss:$8 sps:$4 sm:$0xff]   ;;  %v979_v1 = vrot.slane %v9529_v29, 2 }
 0x1f0   : > { %14527 = vst [vmem:[#allocation30_spill] sm:$0xff] %v9876_v54  ;;  %14532 = vst [vmem:[#allocation32_spill] sm:$0xff] %v9893_v22  ;;  %v980_v19 = vrot.slane %v9517_v5, 2  ;;  %v981_v12 = vrot.slane %v9576_v45, 2  ;;  %v982_v11 = vrot.slane %v9564_v40, 2  ;;  %v9909_v22 = vsel %vm989_vm8, %v976_v49, %v977_v23 }
 0x1f1   : > { %14533 = vst [vmem:[#allocation33_spill] sm:$0xff] %v9900_v10  ;;  %14534 = vst [vmem:[#allocation34_spill] sm:$0xff] %v9909_v22  ;;  %v9913_v2 = vsel %vm989_vm8, %v977_v23, %v978_v52  ;;  %v983_v53 = vrot.slane %v9618_v4, 2  ;;  %v984_v25 = vrot.slane %v9606_v57, 2  ;;  %v9921_v43 = vsel %vm989_vm8, %v978_v52, %v979_v1  ;;  %2313 = vmatpush1.bf16.msra.mxu0 %v8207_v13 }
 0x1f2   : > { %14535 = vst [vmem:[#allocation35_spill] sm:$0xff] %v9913_v2  ;;  %14536 = vst [vmem:[#allocation36_spill] sm:$0xff] %v9921_v43  ;;  %v9925_v28 = vsel %vm989_vm8, %v980_v19, %v981_v12  ;;  %v9929_v49 = vsel %vm989_vm8, %v979_v1, %v980_v19  ;;  %v9943_v10 = vsel %vm989_vm8, %v981_v12, %v982_v11  ;;  %v8210_v1 = vld [vmem:[#allocation5 + $0x1f0] ss:$8 sps:$4 sm:$0xff]   ;;  %v985_v19 = vrot.slane %v9634_v44, 2 }
 0x1f3   : > { %14537 = vst [vmem:[#allocation37_spill] sm:$0xff] %v9925_v28  ;;  %14538 = vst [vmem:[#allocation38_spill] sm:$0xff] %v9929_v49  ;;  %7089 = vmatmul.mubr.msk.bf16.gmra.mrb[32].mxu0 %vm9409_vm7, %v7088_v51  ;;  %v9939_v52 = vsel %vm989_vm8, %v982_v11, %v983_v53  ;;  %v9950_v23 = vsel %vm989_vm8, %v983_v53, %v984_v25  ;;  %v986_v32 = vrot.slane %v9672_v24, 2  ;;  %2314 = vmatprep.subr.bf16.mxu0 %v8212_v16 }
 0x1f4   : > { %14539 = vst [vmem:[#allocation39_spill] sm:$0xff] %v9939_v52  ;;  %14540 = vst [vmem:[#allocation40_spill] sm:$0xff] %v9943_v10  ;;  %2213 = vmatprep.mubr.bf16.mxu0 %v1565_v15  ;;  %v987_v49 = vrot.slane %v9658_v60, 2  ;;  %v988_v12 = vrot.slane %v9355_v48, 2  ;;  %v1472_v13 = vrot.slane %v9694_v38, 2  ;;  %v9959_v11 = vsel %vm989_vm8, %v984_v25, %v985_v19 }
 0x1f5   : > { %14541 = vst [vmem:[#allocation41_spill] sm:$0xff] %v9950_v23  ;;  %14542 = vst [vmem:[#allocation42_spill] sm:$0xff] %v9959_v11  ;;  %v9963_v53 = vsel %vm989_vm8, %v985_v19, %v986_v32  ;;  %v1473_v51 = vrot.slane %v9726_v33, 2  ;;  %v14546_v25 = vrot.slane %v9340_v63, 2  ;;  %2315 = vmatpush1.bf16.msra.mxu0 %v8210_v1  ;;  %v14557_v28 = vrot.slane %v9754_v0, 1 }
 0x1f6   : > { %14543 = vst [vmem:[#allocation43_spill] sm:$0xff] %v9963_v53  ;;  %v9971_v15 = vsel %vm989_vm8, %v986_v32, %v987_v49  ;;  %v9975_v52 = vsel %vm989_vm8, %v987_v49, %v988_v12  ;;  %v14549_v49 = vrot.slane %v9702_v46, 2  ;;  %2477 = vmatprep.subr.bf16.mxu0 %v8215_v35 }
 0x1f7   : > { %14544 = vst [vmem:[#allocation44_spill] sm:$0xff] %v9971_v15  ;;  %14545 = vst [vmem:[#allocation45_spill] sm:$0xff] %v9975_v52  ;;  %v9981_v19 = vsel %vm989_vm8, %v988_v12, %v14546_v25  ;;  %v9989_v32 = vsel %vm989_vm8, %v1472_v13, %v1473_v51  ;;  %v1564_v12 = vpack.c.bf16 %v9839_v62, %v9806_v7  ;;  %v14551_v25 = vrot.slane %v9754_v0, 2 }
 0x1f8   : > { %14547 = vst [vmem:[#allocation46_spill] sm:$0xff] %v9981_v19  ;;  %14548 = vst [vmem:[#allocation47_spill] sm:$0xff] %v9989_v32  ;;  %v9995_v23 = vsel %vm989_vm8, %v14549_v49, %v1472_v13 }
 0x1f9   : > { %14550 = vst [vmem:[#allocation48_spill] sm:$0xff] %v9995_v23  ;;  %v10005_v10 = vsel %vm989_vm8, %v1473_v51, %v14551_v25 }
 0x1fa   : > { %14552 = vst [vmem:[#allocation49_spill] sm:$0xff] %v10005_v10 }
 0x1fb   : > { %2214 = vmatmul.mubr.bf16.gmra.mrb[36].mxu0 %v1564_v12 }
 0x22a   : > { %v1208_v16 = vpop.xlane.xlu1 %1207  ;;  %v1210_v52 = vpop.xlane.xlu0 %1209 }
 0x22b   : > { %v1235_v19 = vmul.f32 0.0078125, %v1208_v16  ;;  %v1236_v53 = vmul.f32 0.0078125, %v1210_v52 }
 0x22d   : > { %v1251_v13 = vadd.f32 1e-05, %v1235_v19  ;;  %v1252_v49 = vadd.f32 1e-05, %v1236_v53  ;;  %v10012_v53 = vld [vmem:[%s14238_s1] ss:$0 sm:$0xff] }
 0x22f   : > { %8359 = vrsqrt.f32 %v1251_v13 }
 0x230   : > { %8361 = vrsqrt.f32 %v1252_v49 }
 0x232   : > { %v1214_v7 = vpop.xlane.xlu0 %1213  ;;  %v1212_v35 = vpop.xlane.xlu1 %1211 }
 0x233   : > { %v1238_v62 = vmul.f32 0.0078125, %v1214_v7  ;;  %v1237_v15 = vmul.f32 0.0078125, %v1212_v35 }
 0x235   : > { %v1254_v1 = vadd.f32 1e-05, %v1238_v62  ;;  %v1253_v23 = vadd.f32 1e-05, %v1237_v15 }
 0x237   : > { %8363 = vrsqrt.f32 %v1254_v1 }
 0x238   : > { %8365 = vrsqrt.f32 %v1253_v23 }
 0x239   : > { %v8360_v32 = vpop.eup %8359 }
 0x23a   : > { %v8362_v51 = vpop.eup %8361  ;;  %v1283_v12 = vmul.f32 %v8360_v32, %v9313_v30  ;;  %v1218_v25 = vpop.xlane.xlu0 %1217  ;;  %v10019_v30 = vld [vmem:[%s14239_s2] ss:$0 sm:$0xff] }
 0x23b   : > { %v1284_v16 = vmul.f32 %v8362_v51, %v9310_v27  ;;  %v1216_v52 = vpop.xlane.xlu1 %1215  ;;  %v1240_v19 = vmul.f32 0.0078125, %v1218_v25 }
 0x23c   : > { %v1299_v13 = vmul.f32 %v10012_v53, %v1283_v12  ;;  %v1239_v49 = vmul.f32 0.0078125, %v1216_v52 }
 0x23d   : > { %v1300_v15 = vmul.f32 %v10012_v53, %v1284_v16  ;;  %v1256_v23 = vadd.f32 1e-05, %v1240_v19 }
 0x23e   : > { %v10022_v27 = vadd.f32 %v10019_v30, %v1299_v13  ;;  %v1255_v32 = vadd.f32 1e-05, %v1239_v49 }
 0x23f   : > { %v10025_v1 = vadd.f32 %v10019_v30, %v1300_v15  ;;  %8367 = vrsqrt.f32 %v1256_v23  ;;  %v14555_v15 = vrot.slane %v9754_v0, 7 }
 0x240   : > { %14553 = vst [vmem:[#allocation50_spill] sm:$0xff] %v10022_v27  ;;  %8369 = vrsqrt.f32 %v1255_v32  ;;  %v1379_v7 = vrot.slane %v10022_v27, 7  ;;  %v1331_v35 = vrot.slane %v10022_v27, 6  ;;  %v1427_v62 = vrot.slane %v10022_v27, 1 }
 0x241   : > { %14554 = vst [vmem:[#allocation51_spill] sm:$0xff] %v10025_v1  ;;  %v8364_v51 = vpop.eup %8363  ;;  %v1380_v12 = vrot.slane %v10025_v1, 7  ;;  %v1332_v25 = vrot.slane %v10025_v1, 6  ;;  %v1428_v16 = vrot.slane %v10025_v1, 1  ;;  %v14556_v32 = vrot.slane %v9754_v0, 6 }
 0x242   : > { %v8366_v19 = vpop.eup %8365  ;;  %v1286_v13 = vmul.f32 %v8364_v51, %v9334_v59  ;;  %v1402_v23 = vsel %vm731_vm1, %v14555_v15, %v1379_v7  ;;  %v10048_v2 = vsel %vm860_vm3, %v14557_v28, %v1427_v62 }
 0x243   : > { %v1222_v49 = vpop.xlane.xlu0 %1221  ;;  %v1354_v11 = vsel %vm602_vm0, %v14556_v32, %v1331_v35  ;;  %v1285_v52 = vmul.f32 %v8366_v19, %v9337_v42  ;;  %v1401_v43 = vsel %vm731_vm1, %v1379_v7, %v1380_v12  ;;  %v1353_v15 = vsel %vm602_vm0, %v1331_v35, %v1332_v25 }
 0x244   : > { %v1220_v59 = vpop.xlane.xlu1 %1219  ;;  %v1242_v51 = vmul.f32 0.0078125, %v1222_v49  ;;  %v1302_v22 = vmul.f32 %v10012_v53, %v1286_v13  ;;  %v1570_v32 = vpack.c.bf16 %v1401_v43, %v1402_v23  ;;  %v1569_v38 = vpack.c.bf16 %v1353_v15, %v1354_v11 }
 0x245   : > { %v1241_v33 = vmul.f32 0.0078125, %v1220_v59  ;;  %v1301_v48 = vmul.f32 %v10012_v53, %v1285_v52  ;;  %v10061_v42 = vsel %vm860_vm3, %v1427_v62, %v1428_v16  ;;  %v1475_v35 = vrot.slane %v10022_v27, 2 }
 0x246   : > { %v1258_v60 = vadd.f32 1e-05, %v1242_v51  ;;  %v10064_v7 = vadd.f32 %v10019_v30, %v1302_v22  ;;  %2223 = vmatprep.mubr.bf16.mxu0 %v1570_v32  ;;  %v1476_v43 = vrot.slane %v10025_v1, 2  ;;  %v14559_v51 = vrot.slane %v9754_v0, 2 }
 0x247   : > { %v1257_v19 = vadd.f32 1e-05, %v1241_v33  ;;  %v10069_v11 = vadd.f32 %v10019_v30, %v1301_v48  ;;  %2224 = vmatmul.mubr.bf16.gmra.mrb[40].mxu0 %v1569_v38 }
 0x248   : > { %8371 = vrsqrt.f32 %v1258_v60  ;;  %v1382_v52 = vrot.slane %v10064_v7, 7  ;;  %v1334_v62 = vrot.slane %v10064_v7, 6  ;;  %v1430_v13 = vrot.slane %v10064_v7, 1 }
 0x249   : > { %14558 = vst [vmem:[#allocation52_spill] sm:$0xff] %v10069_v11  ;;  %8373 = vrsqrt.f32 %v1257_v19  ;;  %v8368_v22 = vpop.eup %8367  ;;  %v1381_v33 = vrot.slane %v10069_v11, 7  ;;  %v1333_v49 = vrot.slane %v10069_v11, 6  ;;  %v1429_v23 = vrot.slane %v10069_v11, 1 }
 0x24a   : > { %v8370_v59 = vpop.eup %8369  ;;  %v1288_v60 = vmul.f32 %v8368_v22, %v9367_v50  ;;  %v1226_v38 = vpop.xlane.xlu0 %1225  ;;  %v10084_v15 = vsel %vm989_vm8, %v14559_v51, %v1475_v35  ;;  %v1477_v32 = vrot.slane %v10069_v11, 2  ;;  %v10089_v19 = vsel %vm989_vm8, %v1475_v35, %v1476_v43 }
 0x24b   : > { %14560 = vst [vmem:[#allocation53_spill] sm:$0xff] %v10084_v15  ;;  %14561 = vst [vmem:[#allocation54_spill] sm:$0xff] %v10089_v19  ;;  %v1287_v28 = vmul.f32 %v8370_v59, %v9370_v17  ;;  %v1224_v27 = vpop.xlane.xlu1 %1223  ;;  %v1244_v48 = vmul.f32 0.0078125, %v1226_v38  ;;  %v1399_v50 = vsel %vm731_vm1, %v1381_v33, %v1382_v52  ;;  %v1400_v22 = vsel %vm731_vm1, %v1380_v12, %v1381_v33 }
 0x24c   : > { %v1304_v1 = vmul.f32 %v10012_v53, %v1288_v60  ;;  %v1243_v51 = vmul.f32 0.0078125, %v1224_v27  ;;  %v1575_v0 = vpack.c.bf16 %v1399_v50, %v1400_v22  ;;  %v1351_v11 = vsel %vm602_vm0, %v1333_v49, %v1334_v62 }
 0x24d   : > { %v1303_v35 = vmul.f32 %v10012_v53, %v1287_v28  ;;  %v1260_v54 = vadd.f32 1e-05, %v1244_v48  ;;  %v1352_v17 = vsel %vm602_vm0, %v1332_v25, %v1333_v49  ;;  %v10104_v59 = vsel %vm860_vm3, %v1428_v16, %v1429_v23 }
 0x24e   : > { %v10107_v38 = vadd.f32 %v10019_v30, %v1304_v1  ;;  %v1259_v12 = vadd.f32 1e-05, %v1243_v51  ;;  %2233 = vmatprep.mubr.bf16.mxu0 %v1575_v0  ;;  %v1574_v27 = vpack.c.bf16 %v1351_v11, %v1352_v17  ;;  %v10116_v25 = vsel %vm860_vm3, %v1429_v23, %v1430_v13 }
 0x24f   : > { %v10112_v60 = vadd.f32 %v10019_v30, %v1303_v35  ;;  %8375 = vrsqrt.f32 %v1260_v54  ;;  %v10131_v51 = vsel %vm989_vm8, %v1476_v43, %v1477_v32  ;;  %v1478_v35 = vrot.slane %v10064_v7, 2 }
 0x250   : > { %8377 = vrsqrt.f32 %v1259_v12  ;;  %2234 = vmatmul.mubr.bf16.gmra.mrb[44].mxu0 %v1574_v27  ;;  %v1384_v1 = vrot.slane %v10107_v38, 7  ;;  %v1336_v0 = vrot.slane %v10107_v38, 6  ;;  %v1432_v28 = vrot.slane %v10107_v38, 1  ;;  %14562 = vst [vmem:[#allocation55_spill] sm:$0xff] %v10131_v51 }
 0x251   : > { %v1383_v49 = vrot.slane %v10112_v60, 7  ;;  %v1335_v54 = vrot.slane %v10112_v60, 6  ;;  %v1431_v48 = vrot.slane %v10112_v60, 1  ;;  %v1479_v17 = vrot.slane %v10112_v60, 2 }
 0x252   : > { %v8372_v11 = vpop.eup %8371 }
 0x253   : > { %v8374_v50 = vpop.eup %8373  ;;  %v1290_v22 = vmul.f32 %v8372_v11, %v9435_v6  ;;  %v1228_v27 = vpop.xlane.xlu1 %1227  ;;  %v1397_v16 = vsel %vm731_vm1, %v1383_v49, %v1384_v1  ;;  %v1398_v23 = vsel %vm731_vm1, %v1382_v52, %v1383_v49  ;;  %v1349_v6 = vsel %vm602_vm0, %v1335_v54, %v1336_v0 }
 0x254   : > { %v1289_v12 = vmul.f32 %v8374_v50, %v9438_v55  ;;  %v1245_v43 = vmul.f32 0.0078125, %v1228_v27  ;;  %v1580_v33 = vpack.c.bf16 %v1397_v16, %v1398_v23  ;;  %v1350_v10 = vsel %vm602_vm0, %v1334_v62, %v1335_v54 }
 0x255   : > { %v1306_v11 = vmul.f32 %v10012_v53, %v1290_v22  ;;  %v1579_v55 = vpack.c.bf16 %v1349_v6, %v1350_v10  ;;  %v10148_v50 = vsel %vm860_vm3, %v1430_v13, %v1431_v48  ;;  %v10152_v52 = vsel %vm860_vm3, %v1431_v48, %v1432_v28 }
 0x256   : > { %v1305_v15 = vmul.f32 %v10012_v53, %v1289_v12  ;;  %v1261_v22 = vadd.f32 1e-05, %v1245_v43  ;;  %2243 = vmatprep.mubr.bf16.mxu0 %v1580_v33  ;;  %v10166_v13 = vsel %vm989_vm8, %v1478_v35, %v1479_v17  ;;  %v10170_v54 = vsel %vm989_vm8, %v1477_v32, %v1478_v35 }
 0x257   : > { %v10155_v49 = vadd.f32 %v10019_v30, %v1306_v11  ;;  %14563 = vst [vmem:[#allocation56_spill] sm:$0xff] %v10166_v13  ;;  %14564 = vst [vmem:[#allocation57_spill] sm:$0xff] %v10170_v54  ;;  %v1480_v48 = vrot.slane %v10107_v38, 2 }
 0x258   : > { %v10162_v10 = vadd.f32 %v10019_v30, %v1305_v15  ;;  %8379 = vrsqrt.f32 %v1261_v22  ;;  %2244 = vmatmul.mubr.bf16.gmra.mrb[48].mxu0 %v1579_v55 }
 0x259   : > { %v1386_v33 = vrot.slane %v10155_v49, 7  ;;  %v1338_v23 = vrot.slane %v10155_v49, 6  ;;  %v1434_v12 = vrot.slane %v10155_v49, 1  ;;  %v8376_v15 = vpop.eup %8375  ;;  %v10187_v62 = vsel %vm989_vm8, %v1479_v17, %v1480_v48 }
 0x25a   : > { %v1385_v27 = vrot.slane %v10162_v10, 7  ;;  %v1337_v6 = vrot.slane %v10162_v10, 6  ;;  %v1433_v11 = vrot.slane %v10162_v10, 1  ;;  %v8378_v35 = vpop.eup %8377  ;;  %v1292_v43 = vmul.f32 %v8376_v15, %v9480_v18  ;;  %14565 = vst [vmem:[#allocation58_spill] sm:$0xff] %v10187_v62 }
 0x25b   : > { %v1481_v22 = vrot.slane %v10162_v10, 2  ;;  %v1291_v16 = vmul.f32 %v8378_v35, %v9483_v34 }
 0x25c   : > { %v1395_v19 = vsel %vm731_vm1, %v1385_v27, %v1386_v33  ;;  %v1396_v32 = vsel %vm731_vm1, %v1384_v1, %v1385_v27  ;;  %v1347_v18 = vsel %vm602_vm0, %v1337_v6, %v1338_v23  ;;  %v1308_v15 = vmul.f32 %v10012_v53, %v1292_v43 }
 0x25d   : > { %v1585_v55 = vpack.c.bf16 %v1395_v19, %v1396_v32  ;;  %v1348_v54 = vsel %vm602_vm0, %v1336_v0, %v1337_v6  ;;  %v10201_v17 = vsel %vm860_vm3, %v1432_v28, %v1433_v11  ;;  %v1307_v34 = vmul.f32 %v10012_v53, %v1291_v16 }
 0x25e   : > { %v1584_v35 = vpack.c.bf16 %v1347_v18, %v1348_v54  ;;  %v10208_v1 = vsel %vm860_vm3, %v1433_v11, %v1434_v12  ;;  %v10211_v27 = vadd.f32 %v10019_v30, %v1308_v15  ;;  %v10215_v19 = vsel %vm989_vm8, %v1480_v48, %v1481_v22 }
 0x25f   : > { %2253 = vmatprep.mubr.bf16.mxu0 %v1585_v55  ;;  %14566 = vst [vmem:[#allocation59_spill] sm:$0xff] %v10215_v19  ;;  %v1482_v0 = vrot.slane %v10155_v49, 2  ;;  %v10219_v28 = vadd.f32 %v10019_v30, %v1307_v34 }
 0x260   : > { %2254 = vmatmul.mubr.bf16.gmra.mrb[52].mxu0 %v1584_v35  ;;  %v1388_v54 = vrot.slane %v10211_v27, 7  ;;  %v1340_v6 = vrot.slane %v10211_v27, 6  ;;  %v1436_v11 = vrot.slane %v10211_v27, 1  ;;  %v1484_v35 = vrot.slane %v10211_v27, 2 }
 0x261   : > { %14567 = vst [vmem:[#allocation60_spill] sm:$0xff] %v10219_v28  ;;  %v10228_v32 = vsel %vm989_vm8, %v1481_v22, %v1482_v0  ;;  %v1387_v48 = vrot.slane %v10219_v28, 7  ;;  %v1339_v43 = vrot.slane %v10219_v28, 6  ;;  %v1435_v55 = vrot.slane %v10219_v28, 1 }
 0x262   : > { %14568 = vst [vmem:[#allocation61_spill] sm:$0xff] %v10228_v32  ;;  %v8380_v15 = vpop.eup %8379  ;;  %v1483_v34 = vrot.slane %v10219_v28, 2 }
 0x263   : > { %v1293_v16 = vmul.f32 %v8380_v15, %v9534_v3  ;;  %v1393_v22 = vsel %vm731_vm1, %v1387_v48, %v1388_v54  ;;  %v1394_v13 = vsel %vm731_vm1, %v1386_v33, %v1387_v48  ;;  %v1345_v62 = vsel %vm602_vm0, %v1339_v43, %v1340_v6 }
 0x264   : > { %v1590_v19 = vpack.c.bf16 %v1393_v22, %v1394_v13  ;;  %v1346_v18 = vsel %vm602_vm0, %v1338_v23, %v1339_v43  ;;  %v10248_v51 = vsel %vm860_vm3, %v1434_v12, %v1435_v55  ;;  %v10252_v3 = vsel %vm860_vm3, %v1435_v55, %v1436_v11 }
 0x265   : > { %v1309_v15 = vmul.f32 %v10012_v53, %v1293_v16  ;;  %v1589_v28 = vpack.c.bf16 %v1345_v62, %v1346_v18  ;;  %v10259_v13 = vsel %vm989_vm8, %v1482_v0, %v1483_v34  ;;  %v1438_v23 = vrot.slane %v9732_v39, 1 }
 0x266   : > { %14569 = vst [vmem:[#allocation62_spill] sm:$0xff] %v10259_v13  ;;  %2263 = vmatprep.mubr.bf16.mxu0 %v1590_v19  ;;  %v10266_v48 = vsel %vm989_vm8, %v1483_v34, %v1484_v35  ;;  %v1486_v53 = vrot.slane %v9732_v39, 2  ;;  %v14570_v43 = vrot.slane %v9702_v46, 1  ;;  %v14571_v34 = vrot.slane %v9702_v46, 2 }
 0x267   : > { %v10270_v62 = vadd.f32 %v10019_v30, %v1309_v15  ;;  %v14573_v12 = vrot.slane %v9732_v39, 6 }
 0x268   : > { %2264 = vmatmul.mubr.bf16.gmra.mrb[56].mxu0 %v1589_v28  ;;  %v10279_v55 = vsel %vm860_vm3, %v1438_v23, %v14570_v43  ;;  %v10286_v30 = vsel %vm989_vm8, %v1486_v53, %v14571_v34  ;;  %v14572_v28 = vrot.slane %v9732_v39, 7 }
 0x269   : > { %v1389_v16 = vrot.slane %v10270_v62, 7  ;;  %v1341_v0 = vrot.slane %v10270_v62, 6  ;;  %v1437_v19 = vrot.slane %v10270_v62, 1  ;;  %v1485_v18 = vrot.slane %v10270_v62, 2 }
 0x26b   : > { %v1391_v22 = vsel %vm731_vm1, %v1389_v16, %v14572_v28  ;;  %v1392_v15 = vsel %vm731_vm1, %v1388_v54, %v1389_v16  ;;  %v1343_v43 = vsel %vm602_vm0, %v1341_v0, %v14573_v12  ;;  %v1344_v33 = vsel %vm602_vm0, %v1340_v6, %v1341_v0  ;;  %v8213_v0 = vld [vmem:[#allocation5 + $0x200] ss:$8 sps:$4 sm:$0xff]  }
 0x26c   : > { %v1595_v32 = vpack.c.bf16 %v1391_v22, %v1392_v15  ;;  %v1594_v13 = vpack.c.bf16 %v1343_v43, %v1344_v33  ;;  %v10302_v34 = vsel %vm860_vm3, %v1436_v11, %v1437_v19  ;;  %v10306_v28 = vsel %vm860_vm3, %v1437_v19, %v1438_v23  ;;  %v8218_v19 = vld [vmem:[#allocation5 + $0x214] ss:$8 sps:$4 sm:$0xff]   ;;  %v14580_v43 = vld [vmem:[#allocation17_spill] sm:$0xff] }
 0x26d   : > { %v1592_v54 = vpack.c.bf16 %v10302_v34, %v10252_v3  ;;  %v7094_v16 = vpack.c.bf16 %v10279_v55, %v10306_v28  ;;  %v10314_v12 = vsel %vm989_vm8, %v1484_v35, %v1485_v18  ;;  %v10318_v6 = vsel %vm989_vm8, %v1485_v18, %v1486_v53  ;;  %v8216_v53 = vld [vmem:[#allocation5 + $0x210] ss:$8 sps:$4 sm:$0xff]   ;;  %v8221_v18 = vld [vmem:[#allocation5 + $0x224] ss:$8 sps:$4 sm:$0xff]   ;;  %v8224_v22 = vld [vmem:[#allocation5 + $0x234] ss:$8 sps:$4 sm:$0xff]  }
 0x26e   : > { %2273 = vmatprep.mubr.bf16.mxu0 %v1595_v32  ;;  %v1593_v11 = vpack.c.bf16 %v10314_v12, %v10266_v48  ;;  %v7100_v33 = vpack.c.bf16 %v10286_v30, %v10318_v6  ;;  %v14574_v23 = vpack.c.bf16 %v9493_v21, %v9422_v58  ;;  %v14575_v35 = vpack.c.bf16 %v9361_v37, %v9340_v63  ;;  %v8222_v37 = vld [vmem:[#allocation5 + $0x230] ss:$8 sps:$4 sm:$0xff]   ;;  %v8227_v21 = vld [vmem:[#allocation5 + $0x244] ss:$8 sps:$4 sm:$0xff]   ;;  %v1679_v48 = vld [vmem:[%s14241_s4] sm:$0x3] }
 0x26f   : > { %v14576_v32 = vpack.c.bf16 %v9548_v41, %v9499_v26  ;;  %v14577_v58 = vpack.c.bf16 %v9414_v14, %v9427_v20  ;;  %v14578_v63 = vpack.c.bf16 %v9592_v31, %v9631_v61  ;;  %v8225_v26 = vld [vmem:[#allocation5 + $0x240] ss:$8 sps:$4 sm:$0xff]   ;;  %v8230_v41 = vld [vmem:[#allocation5 + $0x254] ss:$8 sps:$4 sm:$0xff]   ;;  %v14579_v15 = vpack.c.bf16 %v9463_v47, %v9475_v8  ;;  %v8228_v20 = vld [vmem:[#allocation5 + $0x250] ss:$8 sps:$4 sm:$0xff]  }
 0x270   : > { %2274 = vmatmul.mubr.bf16.gmra.mrb[60].mxu0 %v1594_v13  ;;  %v8219_v13 = vld [vmem:[#allocation5 + $0x220] ss:$8 sps:$4 sm:$0xff]   ;;  %v8233_v31 = vld [vmem:[#allocation5 + $0x264] ss:$8 sps:$4 sm:$0xff]   ;;  %v8234_v8 = vld [vmem:[#allocation5 + $0x270] ss:$8 sps:$4 sm:$0xff]  }
 0x271   : > { %2316 = vmatprep.mubr.bf16.mxu0 %v14574_v23  ;;  %v14581_v23 = vld [vmem:[#allocation18_spill] sm:$0xff]  ;;  %v8231_v61 = vld [vmem:[#allocation5 + $0x260] ss:$8 sps:$4 sm:$0xff]   ;;  %v14632_v3 = vld [vmem:[#allocation35_spill] sm:$0xff]  ;;  %v1687_v12 = vsub.s32 1, %v9325_v9 }
 0x272   : > { %v14582_v14 = vpack.c.bf16 %v14580_v43, %v14581_v23  ;;  %v14609_v23 = vld [vmem:[#allocation22_spill] sm:$0xff]  ;;  %v14634_v34 = vld [vmem:[#allocation37_spill] sm:$0xff]  ;;  %v14637_v28 = vld [vmem:[#allocation39_spill] sm:$0xff] }
 0x273   : > { %v8241_v6 = vld [vmem:[#allocation7 + $0x250] sm:$0xff]  }
 0x278   : > { %2317 = vmatmul.mubr.bf16.vlgmr.msra.gmra.mrb[0].mxu0 %v14575_v35  ;;  %v14584_v35 = vld [vmem:[#allocation24_spill] sm:$0xff] }
 0x279   : > { %2478 = vmatpush1.bf16.msra.mxu0 %v8213_v0  ;;  %2326 = vmatprep.mubr.bf16.mxu0 %v14576_v32  ;;  %v8236_v0 = vld [vmem:[#allocation5 + $0x274] ss:$8 sps:$4 sm:$0xff]  }
 0x27a   : > { %2479 = vmatprep.subr.bf16.mxu0 %v8218_v19  ;;  %v14583_v19 = vpack.c.bf16 %v9517_v5, %v9529_v29  ;;  %v14585_v32 = vld [vmem:[#allocation23_spill] sm:$0xff]  ;;  %v14590_v5 = vpack.c.bf16 %v9606_v57, %v9618_v4  ;;  %v14591_v29 = vld [vmem:[#allocation26_spill] sm:$0xff]  ;;  %v14600_v57 = vld [vmem:[#allocation16_spill] sm:$0xff] }
 0x27b   : > { %v14586_v47 = vpack.c.bf16 %v14584_v35, %v14585_v32  ;;  %v14601_v4 = vld [vmem:[#allocation13_spill] sm:$0xff]  ;;  %v14617_v35 = vld [vmem:[#allocation52_spill] sm:$0xff]  ;;  %v14619_v32 = vpack.c.bf16 %v10201_v17, %v10152_v52 }
 0x27c   : > { %v14626_v52 = vld [vmem:[#allocation32_spill] sm:$0xff]  ;;  %v14629_v17 = vld [vmem:[#allocation33_spill] sm:$0xff] }
 0x27d   : > { %2480 = vmatpush1.bf16.msra.mxu0 %v8216_v53  ;;  %v14587_v53 = vpack.c.bf16 %v9564_v40, %v9576_v45  ;;  %v14596_v40 = vpack.c.bf16 %v9672_v24, %v9634_v44  ;;  %v14597_v45 = vld [vmem:[#allocation21_spill] sm:$0xff]  ;;  %v14607_v44 = vld [vmem:[#allocation30_spill] sm:$0xff] }
 0x27e   : > { %2481 = vmatprep.subr.bf16.mxu0 %v8221_v18  ;;  %v14588_v18 = vld [vmem:[#allocation25_spill] sm:$0xff]  ;;  %v14608_v24 = vpack.c.bf16 %v10048_v2, %v14607_v44  ;;  %v14618_v2 = vpack.c.bf16 %v10064_v7, %v14617_v35  ;;  %v14623_v7 = vld [vmem:[#allocation60_spill] sm:$0xff] }
 0x27f   : > { %v8240_v35 = vld [vmem:[#allocation7 + $0x208] sm:$0xff]  }
 0x280   : > { %2327 = vmatmul.mubr.bf16.gmra.mrb[4].mxu0 %v14577_v58  ;;  %v14592_v58 = vpack.c.bf16 %v9849_v36, %v14591_v29  ;;  %v1556_v36 = vpack.c.bf16 %v14601_v4, %v14600_v57  ;;  %v14646_v29 = vmov 0  ;;  %v14655_v4 = vld [vmem:[#allocation53_spill] sm:$0xff] }
 0x281   : > { %2336 = vmatprep.mubr.bf16.mxu0 %v14578_v63  ;;  %2482 = vmatpush1.bf16.msra.mxu0 %v8219_v13  ;;  %v14589_v13 = vpack.c.bf16 %v9815_v56, %v14588_v18  ;;  %v14593_v63 = vmov 0  ;;  %v14598_v56 = vld [vmem:[#allocation27_spill] sm:$0xff]  ;;  %v14643_v18 = vld [vmem:[#allocation44_spill] sm:$0xff] }
 0x282   : > { %2483 = vmatprep.subr.bf16.mxu0 %v8224_v22  ;;  %v348_v22 = vadd.s32 120, %v9325_v9 }
 0x284   : > { %vm908_vm9 = vcmp.lt.s32.totalorder %v348_v22, 127  ;;  %vm1037_vm11 = vcmp.lt.s32.totalorder %v348_v22, 126 }
 0x285   : > { %2484 = vmatpush1.bf16.msra.mxu0 %v8222_v37  ;;  %vm10365_vm10 = vmpackc.low %vm908_vm9, %vm8836_vm5  ;;  %v14599_v37 = vpack.c.bf16 %v14597_v45, %v14598_v56  ;;  %v14652_v56 = vld [vmem:[#allocation47_spill] sm:$0xff] }
 0x286   : > { %2485 = vmatprep.subr.bf16.mxu0 %v8227_v21  ;;  %v14594_v63 = vsel %vm10365_vm10, 4294967295, %v14593_v63  ;;  %v14602_v21 = vld [vmem:[#allocation28_spill] sm:$0xff]  ;;  %vm10450_vm12 = vmpackc.low %vm1037_vm11, %vm8836_vm5 }
 0x287   : > { %14595 = vst [vmem:[#allocation17_spill] sm:$0xff] %v14594_v63  ;;  %v14647_v29 = vsel %vm10450_vm12, 4294967295, %v14646_v29 }
 0x288   : > { %2337 = vmatmul.mubr.bf16.gmra.mrb[8].mxu0 %v14579_v15  ;;  %v14605_v15 = vld [vmem:[#allocation19_spill] sm:$0xff]  ;;  %14648 = vst [vmem:[#allocation18_spill] sm:$0xff] %v14647_v29 }
 0x289   : > { %2346 = vmatprep.mubr.bf16.mxu0 %v14582_v14  ;;  %2486 = vmatpush1.bf16.msra.mxu0 %v8225_v26  ;;  %v14603_v26 = vld [vmem:[#allocation29_spill] sm:$0xff]  ;;  %v14606_v43 = vpack.c.bf16 %v14605_v15, %v9702_v46  ;;  %v14610_v14 = vld [vmem:[#allocation20_spill] sm:$0xff]  ;;  %v14616_v46 = vpack.c.bf16 %v10148_v50, %v10116_v25  ;;  %v14622_v25 = vpack.c.bf16 %v10155_v49, %v10162_v10  ;;  %v14628_v10 = vld [vmem:[#allocation34_spill] sm:$0xff] }
 0x28a   : > { %2487 = vmatprep.subr.bf16.mxu0 %v8230_v41  ;;  %v14604_v41 = vpack.c.bf16 %v14602_v21, %v14603_v26  ;;  %v14624_v50 = vpack.c.bf16 %v10211_v27, %v14623_v7  ;;  %v14631_v27 = vld [vmem:[#allocation36_spill] sm:$0xff]  ;;  %v14658_v21 = vld [vmem:[#allocation55_spill] sm:$0xff]  ;;  %v14659_v26 = vld [vmem:[#allocation54_spill] sm:$0xff] }
 0x28b   : > { %v14633_v55 = vpack.c.bf16 %v14631_v27, %v14632_v3  ;;  %v14661_v15 = vld [vmem:[#allocation56_spill] sm:$0xff]  ;;  %v8243_v3 = vld [vmem:[#allocation7 + $0x258] sm:$0xff]  }
 0x28d   : > { %2488 = vmatpush1.bf16.msra.mxu0 %v8228_v20  ;;  %v14611_v20 = vpack.c.bf16 %v14609_v23, %v14610_v14  ;;  %v14665_v23 = vld [vmem:[#allocation58_spill] sm:$0xff] }
 0x28e   : > { %2489 = vmatprep.subr.bf16.mxu0 %v8233_v31  ;;  %v14612_v31 = vpack.c.bf16 %v10104_v59, %v10061_v42  ;;  %v14620_v42 = vpack.c.bf16 %v10107_v38, %v10112_v60  ;;  %v14621_v59 = vpack.c.bf16 %v10248_v51, %v10208_v1  ;;  %v1596_v38 = vpack.c.bf16 %v9732_v39, %v10270_v62  ;;  %v14625_v51 = vld [vmem:[#allocation31_spill] sm:$0xff]  ;;  %v14635_v39 = vld [vmem:[#allocation38_spill] sm:$0xff] }
 0x28f   : > { %v8837_v60 = vmov 0   ;;  %v14627_v49 = vpack.c.bf16 %v14625_v51, %v14626_v52  ;;  %v14630_v1 = vpack.c.bf16 %v14628_v10, %v14629_v17  ;;  %v14636_v62 = vpack.c.bf16 %v14634_v34, %v14635_v39  ;;  %v8244_v34 = vld [vmem:[#allocation7 + $0x218] sm:$0xff]  }
 0x290   : > { %2347 = vmatmul.mubr.bf16.gmra.mrb[12].mxu0 %v14583_v19 }
 0x291   : > { %2356 = vmatprep.mubr.bf16.mxu0 %v14586_v47  ;;  %2490 = vmatpush1.bf16.msra.mxu0 %v8231_v61  ;;  %v14613_v61 = vld [vmem:[#allocation51_spill] sm:$0xff]  ;;  %v14640_v47 = vld [vmem:[#allocation42_spill] sm:$0xff] }
 0x292   : > { %2491 = vmatprep.subr.bf16.mxu0 %v8236_v0  ;;  %v14614_v0 = vld [vmem:[#allocation50_spill] sm:$0xff] }
 0x293   : > { %v14615_v19 = vpack.c.bf16 %v14613_v61, %v14614_v0  ;;  %v8237_v0 = vld [vmem:[#allocation7 + $0x240] sm:$0xff]  }
 0x295   : > { %2492 = vmatpush1.bf16.msra.mxu0 %v8234_v8  ;;  %v14641_v8 = vld [vmem:[#allocation41_spill] sm:$0xff] }
 0x296   : > { %7721 = vmatprep.subr.bf16.mxu0 %v8237_v0 }
 0x298   : > { %2357 = vmatmul.mubr.bf16.gmra.mrb[16].mxu0 %v14587_v53  ;;  %v14642_v53 = vpack.c.bf16 %v14640_v47, %v14641_v8 }
 0x299   : > { %2366 = vmatprep.mubr.bf16.mxu0 %v14589_v13  ;;  %v14644_v13 = vld [vmem:[#allocation43_spill] sm:$0xff] }
 0x2a0   : > { %2367 = vmatmul.mubr.bf16.gmra.mrb[20].mxu0 %v14590_v5  ;;  %v14645_v5 = vpack.c.bf16 %v14643_v18, %v14644_v13 }
 0x2a1   : > { %2376 = vmatprep.mubr.bf16.mxu0 %v14592_v58  ;;  %v14649_v58 = vld [vmem:[#allocation46_spill] sm:$0xff] }
 0x2a8   : > { %2377 = vmatmul.mubr.bf16.gmra.mrb[24].mxu0 %v14596_v40  ;;  %v14650_v40 = vld [vmem:[#allocation45_spill] sm:$0xff] }
 0x2a9   : > { %7092 = vmatprep.mubr.msk.bf16.mxu0 %vm10365_vm10, %v14599_v37  ;;  %v14651_v45 = vpack.c.bf16 %v14649_v58, %v14650_v40  ;;  %v14653_v37 = vld [vmem:[#allocation48_spill] sm:$0xff] }
 0x2aa   : > { %v14654_v57 = vpack.c.bf16 %v14652_v56, %v14653_v37 }
 0x2b0   : > { %2387 = vmatmul.mubr.bf16.gmra.mrb[28].mxu0 %v1556_v36  ;;  %v14656_v36 = vld [vmem:[#allocation49_spill] sm:$0xff] }
 0x2b1   : > { %2396 = vmatprep.mubr.bf16.mxu0 %v14604_v41  ;;  %v14657_v22 = vpack.c.bf16 %v14655_v4, %v14656_v36  ;;  %v14660_v41 = vpack.c.bf16 %v14658_v21, %v14659_v26 }
 0x2b8   : > { %2397 = vmatmul.mubr.bf16.gmra.mrb[32].mxu0 %v14606_v43  ;;  %v14662_v43 = vld [vmem:[#allocation57_spill] sm:$0xff] }
 0x2b9   : > { %2406 = vmatprep.mubr.bf16.mxu0 %v14608_v24  ;;  %v14663_v44 = vpack.c.bf16 %v14661_v15, %v14662_v43  ;;  %v14664_v24 = vld [vmem:[#allocation59_spill] sm:$0xff] }
 0x2ba   : > { %v14666_v14 = vpack.c.bf16 %v14664_v24, %v14665_v23 }
 0x2c0   : > { %2407 = vmatmul.mubr.bf16.gmra.mrb[36].mxu0 %v14611_v20  ;;  %v14667_v20 = vld [vmem:[#allocation62_spill] sm:$0xff] }
 0x2c1   : > { %2416 = vmatprep.mubr.bf16.mxu0 %v14612_v31  ;;  %v14668_v31 = vld [vmem:[#allocation61_spill] sm:$0xff] }
 0x2c2   : > { %v14669_v61 = vpack.c.bf16 %v14667_v20, %v14668_v31 }
 0x2c8   : > { %2417 = vmatmul.mubr.bf16.gmra.mrb[40].mxu0 %v14615_v19  ;;  %v8238_v19 = vld [vmem:[#allocation7 + $0x200] sm:$0xff]  }
 0x2c9   : > { %2426 = vmatprep.mubr.bf16.mxu0 %v14616_v46  ;;  %v8239_v46 = vld [vmem:[#allocation7 + $0x248] sm:$0xff]  }
 0x2d0   : > { %2427 = vmatmul.mubr.bf16.gmra.mrb[44].mxu0 %v14618_v2  ;;  %v1683_v2 = vsub.s32 0, %v9325_v9  ;;  %v14317_v9 = vmov -1.0  }
 0x2d1   : > { %2436 = vmatprep.mubr.bf16.mxu0 %v14619_v32 }
 0x2d2   : > { %v10490_v30 = vrot.slane %v1679_v48, %v1683_v2 }
 0x2d8   : > { %2437 = vmatmul.mubr.bf16.gmra.mrb[48].mxu0 %v14620_v42 }
 0x2d9   : > { %2446 = vmatprep.mubr.bf16.mxu0 %v14621_v59 }
 0x2e0   : > { %2447 = vmatmul.mubr.bf16.gmra.mrb[52].mxu0 %v14622_v25 }
 0x2e1   : > { %2456 = vmatprep.mubr.bf16.mxu0 %v1592_v54  ;;  %v14638_v54 = vld [vmem:[#allocation40_spill] sm:$0xff] }
 0x2e8   : > { %2457 = vmatmul.mubr.bf16.gmra.mrb[56].mxu0 %v14624_v50 }
 0x2e9   : > { %7095 = vmatprep.mubr.msk.bf16.mxu0 %vm10365_vm10, %v7094_v16  ;;  %v14639_v16 = vpack.c.bf16 %v14637_v28, %v14638_v54 }
 0x2f0   : > { %2467 = vmatmul.mubr.bf16.gmra.mrb[60].mxu0 %v1596_v38 }
 0x2f1   : > { %2509 = vmatprep.mubr.bf16.mxu0 %v8837_v60 }
 0x2f8   : > { %2510 = vmatmul.mubr.bf16.vlgmr.msra.gmra.mrb[0].mxu0 %v14627_v49 }
 0x2f9   : > { %2519 = vmatprep.mubr.bf16.mxu0 %v8837_v60  ;;  %7722 = vmatpush3.bf16.msra.mxu0 %v8238_v19 }
 0x2fa   : > { %7723 = vmatprep.subr.bf16.mxu0 %v8239_v46 }
 0x2fd   : > { %7724 = vmatpush3.bf16.msra.mxu0 %v8240_v35 }
 0x2fe   : > { %7725 = vmatprep.subr.bf16.mxu0 %v8241_v6 }
 0x300   : > { %2520 = vmatmul.mubr.bf16.gmra.mrb[4].mxu0 %v14630_v1 }
 0x301   : > { %2529 = vmatprep.mubr.bf16.mxu0 %v8837_v60 }
 0x308   : > { %2530 = vmatmul.mubr.bf16.gmra.mrb[8].mxu0 %v14633_v55 }
 0x309   : > { %2539 = vmatprep.mubr.bf16.mxu0 %v8837_v60 }
 0x310   : > { %2540 = vmatmul.mubr.bf16.gmra.mrb[12].mxu0 %v14636_v62 }
 0x311   : > { %2549 = vmatprep.mubr.bf16.mxu0 %v8837_v60 }
 0x318   : > { %2550 = vmatmul.mubr.bf16.gmra.mrb[16].mxu0 %v14639_v16 }
 0x319   : > { %2559 = vmatprep.mubr.bf16.mxu0 %v8837_v60 }
 0x320   : > { %2560 = vmatmul.mubr.bf16.gmra.mrb[20].mxu0 %v14642_v53 }
 0x321   : > { %2569 = vmatprep.mubr.bf16.mxu0 %v8837_v60 }
 0x328   : > { %2570 = vmatmul.mubr.bf16.gmra.mrb[24].mxu0 %v14645_v5 }
 0x329   : > { %2579 = vmatprep.mubr.bf16.mxu0 %v8837_v60 }
 0x330   : > { %7098 = vmatmul.mubr.msk.bf16.gmra.mrb[28].mxu0 %vm10450_vm12, %v14651_v45 }
 0x331   : > { %2589 = vmatprep.mubr.bf16.mxu0 %v8837_v60 }
 0x338   : > { %2590 = vmatmul.mubr.bf16.gmra.mrb[32].mxu0 %v14654_v57 }
 0x339   : > { %2599 = vmatprep.mubr.bf16.mxu0 %v8837_v60 }
 0x340   : > { %2600 = vmatmul.mubr.bf16.gmra.mrb[36].mxu0 %v14657_v22 }
 0x341   : > { %2609 = vmatprep.mubr.bf16.mxu0 %v8837_v60 }
 0x348   : > { %2610 = vmatmul.mubr.bf16.gmra.mrb[40].mxu0 %v14660_v41 }
 0x349   : > { %2619 = vmatprep.mubr.bf16.mxu0 %v8837_v60 }
 0x350   : > { %2620 = vmatmul.mubr.bf16.gmra.mrb[44].mxu0 %v14663_v44 }
 0x351   : > { %2629 = vmatprep.mubr.bf16.mxu0 %v8837_v60 }
 0x358   : > { %2630 = vmatmul.mubr.bf16.gmra.mrb[48].mxu0 %v14666_v14  ;;  %v8245_v14 = vld [vmem:[#allocation7 + $0x260] sm:$0xff]  }
 0x359   : > { %2639 = vmatprep.mubr.bf16.mxu0 %v8837_v60 }
 0x360   : > { %2640 = vmatmul.mubr.bf16.gmra.mrb[52].mxu0 %v14669_v61 }
 0x361   : > { %2649 = vmatprep.mubr.bf16.mxu0 %v8837_v60 }
 0x368   : > { %2650 = vmatmul.mubr.bf16.gmra.mrb[56].mxu0 %v1593_v11 }
 0x369   : > { %2659 = vmatprep.mubr.bf16.mxu0 %v8837_v60  ;;  %v8242_v60 = vld [vmem:[#allocation7 + $0x210] sm:$0xff]  }
 0x36a   : > { %7726 = vmatpush3.bf16.msra.mxu0 %v8242_v60 }
 0x36b   : > { %7727 = vmatprep.subr.bf16.mxu0 %v8243_v3 }
 0x36e   : > { %7728 = vmatpush3.bf16.msra.mxu0 %v8244_v34 }
 0x36f   : > { %7729 = vmatprep.subr.bf16.mxu0 %v8245_v14 }
 0x370   : > { %7101 = vmatmul.mubr.msk.bf16.gmra.mrb[60].mxu0 %vm10450_vm12, %v7100_v33  ;;  %v10492_v33 = vrot.slane %v1679_v48, %v1687_v12 }
 0x372   : > { %14670 = vst [vmem:[#allocation24_spill] sm:$0xff] %v10492_v33 }
 0x3cb   : > { %v2511_v11 = vpop.f32.mrb[0].mxu0 }
 0x3cc   : > { %v2513_v32 = vpop.f32.mrb[1].mxu0  ;;  %v10495_v42 = vadd.f32 %v2511_v11, %v10490_v30 }
 0x3cd   : > { %v2515_v59 = vpop.f32.mrb[2].mxu0  ;;  %v10498_v7 = vadd.f32 %v2513_v32, %v10492_v33  ;;  %v8246_v32 = vld [vmem:[#allocation7 + $0x220] sm:$0xff]  }
 0x3ce   : > { %v2517_v25 = vpop.f32.mrb[3].mxu0  ;;  %v10501_v50 = vmul.f32 0.70710677, %v10495_v42  ;;  %v10504_v38 = vadd.f32 %v2515_v59, %v10490_v30  ;;  %7730 = vmatpush3.bf16.msra.mxu0 %v8246_v32  ;;  %v10635_v29 = vmul.f32 0.5, %v10495_v42 }
 0x3cf   : > { %v10507_v51 = vmul.f32 0.70710677, %v10498_v7  ;;  %v10523_v28 = vadd.f32 %v2517_v25, %v10492_v33 }
 0x3d0   : > { %v10510_v49 = vand.u32 2147483647, %v10501_v50  ;;  %v10513_v10 = vmul.f32 0.70710677, %v10504_v38  ;;  %vm2798_vm13 = vcmp.ge.f32.partialorder %v10501_v50, 0.0  ;;  %v10650_v42 = vmul.f32 0.5, %v10504_v38 }
 0x3d1   : > { %v10516_v55 = vand.u32 2147483647, %v10507_v51  ;;  %v10542_v40 = vmul.f32 0.70710677, %v10523_v28  ;;  %vm2799_vm14 = vcmp.ge.f32.partialorder %v10507_v51, 0.0 }
 0x3d2   : > { %v2990_v39 = vmul.f32 0.3275911, %v10510_v49  ;;  %v10520_v62 = vand.u32 2147483647, %v10513_v10  ;;  %vm2800_vm15 = vcmp.ge.f32.partialorder %v10513_v10, 0.0 }
 0x3d3   : > { %v2521_v52 = vpop.f32.mrb[4].mxu0  ;;  %v2991_v18 = vmul.f32 0.3275911, %v10516_v55  ;;  %v10558_v21 = vand.u32 2147483647, %v10542_v40  ;;  %vm2801_vm2 = vcmp.ge.f32.partialorder %v10542_v40, 0.0 }
 0x3d4   : > { %v2523_v17 = vpop.f32.mrb[5].mxu0  ;;  %v10526_v54 = vadd.f32 %v2521_v52, %v10490_v30  ;;  %v3054_v5 = vadd.f32 1.0, %v2990_v39  ;;  %v2992_v58 = vmul.f32 0.3275911, %v10520_v62 }
 0x3d5   : > { %v2525_v1 = vpop.f32.mrb[6].mxu0  ;;  %v10529_v16 = vadd.f32 %v2523_v17, %v10492_v33  ;;  %v3055_v36 = vadd.f32 1.0, %v2991_v18  ;;  %v2993_v24 = vmul.f32 0.3275911, %v10558_v21 }
 0x3d6   : > { %v2527_v27 = vpop.f32.mrb[7].mxu0  ;;  %v10532_v47 = vmul.f32 0.70710677, %v10526_v54  ;;  %v10535_v8 = vadd.f32 %v2525_v1, %v10490_v30  ;;  %8381 = vrcp.f32 %v3054_v5  ;;  %v3056_v22 = vadd.f32 1.0, %v2992_v58 }
 0x3d7   : > { %v10547_v56 = vmul.f32 0.70710677, %v10529_v16  ;;  %8383 = vrcp.f32 %v3055_v36  ;;  %v10579_v19 = vadd.f32 %v2527_v27, %v10492_v33  ;;  %v3057_v46 = vadd.f32 1.0, %v2993_v24 }
 0x3d8   : > { %v10552_v57 = vand.u32 2147483647, %v10532_v47  ;;  %v10555_v4 = vmul.f32 0.70710677, %v10535_v8  ;;  %8385 = vrcp.f32 %v3056_v22  ;;  %v3822_v27 = vsub.f32 0.0, %v10510_v49 }
 0x3d9   : > { %v10561_v26 = vand.u32 2147483647, %v10547_v56  ;;  %v10584_v12 = vmul.f32 0.70710677, %v10579_v19  ;;  %v3824_v24 = vsub.f32 0.0, %v10520_v62  ;;  %v10695_v51 = vmul.f32 0.5, %v10526_v54 }
 0x3da   : > { %v2994_v41 = vmul.f32 0.3275911, %v10552_v57  ;;  %v10565_v15 = vand.u32 2147483647, %v10555_v4  ;;  %vm2802_vm4 = vcmp.ge.f32.partialorder %v10532_v47, 0.0  ;;  %vm2803_vm5 = vcmp.ge.f32.partialorder %v10547_v56, 0.0 }
 0x3db   : > { %v2531_v53 = vpop.f32.mrb[8].mxu0  ;;  %v2995_v20 = vmul.f32 0.3275911, %v10561_v26  ;;  %v10598_v17 = vand.u32 2147483647, %v10584_v12  ;;  %vm2804_vm9 = vcmp.ge.f32.partialorder %v10555_v4, 0.0 }
 0x3dc   : > { %v10538_v13 = vpop.f32.mrb[9].mxu0  ;;  %v3058_v61 = vadd.f32 1.0, %v2994_v41  ;;  %v2996_v0 = vmul.f32 0.3275911, %v10565_v15  ;;  %v10601_v1 = vadd.f32 %v2531_v53, %v10490_v30  ;;  %v3823_v53 = vsub.f32 0.0, %v10516_v55 }
 0x3dd   : > { %v10544_v45 = vpop.f32.mrb[10].mxu0  ;;  %v3059_v35 = vadd.f32 1.0, %v2995_v20  ;;  %v2997_v5 = vmul.f32 0.3275911, %v10598_v17  ;;  %v3886_v41 = vmul.f32 %v3822_v27, %v10510_v49  ;;  %v8248_v49 = vld [vmem:[#allocation7 + $0x228] sm:$0xff]   ;;  %v3829_v47 = vsub.f32 0.0, %v10598_v17 }
 0x3de   : > { %v10549_v37 = vpop.f32.mrb[11].mxu0  ;;  %8387 = vrcp.f32 %v3058_v61  ;;  %v3060_v48 = vadd.f32 1.0, %v2996_v0  ;;  %v10610_v58 = vmul.f32 0.70710677, %v10601_v1  ;;  %vm2805_vm11 = vcmp.ge.f32.partialorder %v10584_v12, 0.0 }
 0x3df   : > { %8389 = vrcp.f32 %v3057_v46  ;;  %v3061_v32 = vadd.f32 1.0, %v2997_v5 }
 0x3e0   : > { %v10581_v2 = vpop.eup %8381  ;;  %8391 = vrcp.f32 %v3059_v35  ;;  %v8247_v35 = vld [vmem:[#allocation7 + $0x268] sm:$0xff]  }
 0x3e1   : > { %v10590_v59 = vpop.eup %8383  ;;  %v3246_v25 = vmul.f32 1.0614054, %v10581_v2  ;;  %8393 = vrcp.f32 %v3060_v48  ;;  %7731 = vmatprep.subr.bf16.mxu0 %v8247_v35  ;;  %v3825_v35 = vsub.f32 0.0, %v10558_v21 }
 0x3e2   : > { %v10595_v52 = vpop.eup %8385  ;;  %v3247_v39 = vmul.f32 1.0614054, %v10590_v59  ;;  %7732 = vmatpush3.bf16.msra.mxu0 %v8248_v49  ;;  %8395 = vrcp.f32 %v3061_v32 }
 0x3e3   : > { %v10567_v43 = vpop.f32.mrb[12].mxu0  ;;  %v3310_v34 = vadd.f32 -1.4531521, %v3246_v25  ;;  %v3248_v18 = vmul.f32 1.0614054, %v10595_v52  ;;  %v3889_v32 = vmul.f32 %v3825_v35, %v10558_v21 }
 0x3e4   : > { %v10569_v44 = vpop.f32.mrb[13].mxu0  ;;  %v3311_v61 = vadd.f32 -1.4531521, %v3247_v39  ;;  %v10628_v25 = vand.u32 2147483647, %v10610_v58  ;;  %v3887_v39 = vmul.f32 %v3823_v53, %v10516_v55 }
 0x3e5   : > { %v10572_v23 = vpop.f32.mrb[14].mxu0  ;;  %v3374_v20 = vmul.f32 %v10581_v2, %v3310_v34  ;;  %v3312_v0 = vadd.f32 -1.4531521, %v3248_v18  ;;  %v10638_v34 = vmul.f32 0.5, %v10498_v7  ;;  %v3888_v7 = vmul.f32 %v3824_v24, %v10520_v62 }
 0x3e6   : > { %v10575_v31 = vpop.f32.mrb[15].mxu0  ;;  %v3375_v55 = vmul.f32 %v10590_v59, %v3311_v61  ;;  %v3952_v38 = vmul.f32 1.442695, %v3887_v39  ;;  %v3956_v35 = vmul.f32 1.442695, %v3889_v32 }
 0x3e7   : > { %v3954_v24 = vmul.f32 1.442695, %v3888_v7  ;;  %v10674_v7 = vmul.f32 0.5, %v10523_v28 }
 0x3e8   : > { %v10615_v22 = vpop.eup %8387  ;;  %v3439_v61 = vadd.f32 1.4214138, %v3375_v55  ;;  %v8249_v55 = vld [vmem:[#allocation7 + $0x270] sm:$0xff]  }
 0x3e9   : > { %v10625_v48 = vpop.eup %8389  ;;  %v3250_v18 = vmul.f32 1.0614054, %v10615_v22  ;;  %14682 = vst [vmem:[#allocation22_spill] sm:$0xff] %v10674_v7  ;;  %7733 = vmatprep.subr.bf16.mxu0 %v8249_v55 }
 0x3ea   : > { %v10632_v27 = vpop.eup %8391  ;;  %v3249_v53 = vmul.f32 1.0614054, %v10625_v48 }
 0x3eb   : > { %v10586_v6 = vpop.f32.mrb[16].mxu0  ;;  %v10642_v5 = vpop.eup %8393  ;;  %v3251_v50 = vmul.f32 1.0614054, %v10632_v27 }
 0x3ec   : > { %v10588_v11 = vpop.f32.mrb[17].mxu0  ;;  %v3252_v62 = vmul.f32 1.0614054, %v10642_v5 }
 0x3ed   : > { %14671 = vst [vmem:[#allocation23_spill] sm:$0xff] %v10588_v11  ;;  %v10593_v60 = vpop.f32.mrb[18].mxu0 }
 0x3ee   : > { %14672 = vst [vmem:[#allocation25_spill] sm:$0xff] %v10593_v60  ;;  %v10604_v3 = vpop.f32.mrb[19].mxu0 }
 0x3ef   : > { %14673 = vst [vmem:[#allocation26_spill] sm:$0xff] %v10604_v3  ;;  %v3314_v3 = vadd.f32 -1.4531521, %v3250_v18 }
 0x3f3   : > { %v10612_v36 = vpop.f32.mrb[20].mxu0 }
 0x3f4   : > { %14674 = vst [vmem:[#allocation21_spill] sm:$0xff] %v10612_v36  ;;  %v10620_v14 = vpop.f32.mrb[21].mxu0  ;;  %v3376_v36 = vmul.f32 %v10595_v52, %v3312_v0  ;;  %v3313_v0 = vadd.f32 -1.4531521, %v3249_v53  ;;  %v14683_v53 = vmov -1.0  }
 0x3f5   : > { %14675 = vst [vmem:[#allocation27_spill] sm:$0xff] %v10620_v14  ;;  %v10623_v46 = vpop.f32.mrb[22].mxu0  ;;  %v3438_v14 = vadd.f32 1.4214138, %v3374_v20  ;;  %v10680_v21 = vsel %vm2799_vm14, 1.0, %v14683_v53  ;;  %v10690_v28 = vsel %vm2801_vm2, 1.0, %v14683_v53 }
 0x3f6   : > { %14676 = vst [vmem:[#allocation16_spill] sm:$0xff] %v10623_v46  ;;  %v10630_v63 = vpop.f32.mrb[23].mxu0  ;;  %v3950_v46 = vmul.f32 1.442695, %v3886_v41  ;;  %v2998_v41 = vmul.f32 0.3275911, %v10628_v25 }
 0x3f7   : > { %14677 = vst [vmem:[#allocation13_spill] sm:$0xff] %v10630_v63  ;;  %v10647_v63 = vsel %vm2798_vm13, 1.0, %v14317_v9  ;;  %v3502_v39 = vmul.f32 %v10581_v2, %v3438_v14  ;;  %v3440_v18 = vadd.f32 1.4214138, %v3376_v36  ;;  %v10685_v36 = vsel %vm2800_vm15, 1.0, %v14683_v53 }
 0x3f8   : > { %8397 = vpow2.f32 %v3950_v46  ;;  %v3062_v60 = vadd.f32 1.0, %v2998_v41  ;;  %v3316_v46 = vadd.f32 -1.4531521, %v3252_v62  ;;  %v3377_v14 = vmul.f32 %v10625_v48, %v3313_v0  ;;  %v10710_v0 = vpop.eup %8395 }
 0x3f9   : > { %8399 = vpow2.f32 %v3952_v38  ;;  %v3504_v10 = vmul.f32 %v10595_v52, %v3440_v18  ;;  %v10702_v62 = vmul.f32 0.5, %v10529_v16  ;;  %vm2806_vm13 = vcmp.ge.f32.partialorder %v10610_v58, 0.0 }
 0x3fa   : > { %8401 = vpow2.f32 %v3954_v24  ;;  %v10705_v24 = vmul.f32 0.5, %v10535_v8  ;;  %v3441_v32 = vadd.f32 1.4214138, %v3377_v14  ;;  %v3828_v8 = vsub.f32 0.0, %v10565_v15 }
 0x3fb   : > { %v10659_v9 = vpop.f32.mrb[24].mxu0  ;;  %8403 = vrcp.f32 %v3062_v60  ;;  %14685 = vst [vmem:[#allocation51_spill] sm:$0xff] %v10702_v62  ;;  %v3827_v60 = vsub.f32 0.0, %v10561_v26  ;;  %v10867_v12 = vsel %vm2806_vm13, 1.0, %v14683_v53 }
 0x3fc   : > { %14678 = vst [vmem:[#allocation28_spill] sm:$0xff] %v10659_v9  ;;  %v10665_v20 = vpop.f32.mrb[25].mxu0  ;;  %v3315_v9 = vadd.f32 -1.4531521, %v3251_v50  ;;  %v3566_v50 = vadd.f32 -0.28449672, %v3502_v39  ;;  %8405 = vpow2.f32 %v3956_v35 }
 0x3fd   : > { %14679 = vst [vmem:[#allocation29_spill] sm:$0xff] %v10665_v20  ;;  %v10668_v49 = vpop.f32.mrb[26].mxu0  ;;  %v3378_v20 = vmul.f32 %v10615_v22, %v3314_v3  ;;  %v3503_v3 = vmul.f32 %v10590_v59, %v3439_v61  ;;  %14686 = vst [vmem:[#allocation50_spill] sm:$0xff] %v10705_v24  ;;  %v3380_v61 = vmul.f32 %v10642_v5, %v3316_v46  ;;  %v8250_v39 = vld [vmem:[#allocation7 + $0x230] sm:$0xff]   ;;  %v3568_v46 = vadd.f32 -0.28449672, %v3504_v10 }
 0x3fe   : > { %14680 = vst [vmem:[#allocation19_spill] sm:$0xff] %v10668_v49  ;;  %v10671_v11 = vpop.f32.mrb[27].mxu0  ;;  %v3379_v41 = vmul.f32 %v10632_v27, %v3315_v9  ;;  %v3826_v9 = vsub.f32 0.0, %v10552_v57  ;;  %v3630_v18 = vmul.f32 %v10581_v2, %v3566_v50  ;;  %7734 = vmatpush3.bf16.msra.mxu0 %v8250_v39  ;;  %v3891_v35 = vmul.f32 %v3827_v60, %v10561_v26 }
 0x3ff   : > { %14681 = vst [vmem:[#allocation30_spill] sm:$0xff] %v10671_v11  ;;  %v3442_v40 = vadd.f32 1.4214138, %v3378_v20  ;;  %v3567_v16 = vadd.f32 -0.28449672, %v3503_v3  ;;  %v10731_v50 = vadd.f32 %v10538_v13, %v10492_v33  ;;  %v3893_v60 = vmul.f32 %v3829_v47, %v10598_v17 }
 0x400   : > { %v3443_v55 = vadd.f32 1.4214138, %v3379_v41  ;;  %v3444_v49 = vadd.f32 1.4214138, %v3380_v61  ;;  %v3253_v3 = vmul.f32 1.0614054, %v10710_v0  ;;  %v3890_v14 = vmul.f32 %v3826_v9, %v10552_v57 }
 0x401   : > { %v3506_v11 = vmul.f32 %v10615_v22, %v3442_v40  ;;  %v3505_v40 = vmul.f32 %v10625_v48, %v3441_v32  ;;  %v10740_v61 = vsel %vm2803_vm5, 1.0, %v14683_v53  ;;  %v3892_v57 = vmul.f32 %v3828_v8, %v10565_v15 }
 0x402   : > { %v3694_v4 = vadd.f32 0.2548296, %v3630_v18  ;;  %v3632_v9 = vmul.f32 %v10595_v52, %v3568_v46  ;;  %v3507_v13 = vmul.f32 %v10632_v27, %v3443_v55  ;;  %v3508_v32 = vmul.f32 %v10642_v5, %v3444_v49 }
 0x403   : > { %v10699_v38 = vpop.f32.mrb[28].mxu0  ;;  %v3570_v39 = vadd.f32 -0.28449672, %v3506_v11  ;;  %v3958_v24 = vmul.f32 1.442695, %v3890_v14  ;;  %v10757_v8 = vadd.f32 %v10544_v45, %v10490_v30  ;;  %v10761_v46 = vadd.f32 %v10549_v37, %v10492_v33 }
 0x404   : > { %14684 = vst [vmem:[#allocation20_spill] sm:$0xff] %v10699_v38  ;;  %v10708_v54 = vpop.f32.mrb[29].mxu0  ;;  %v10722_v38 = vsel %vm2802_vm4, 1.0, %v14683_v53  ;;  %v3960_v62 = vmul.f32 1.442695, %v3891_v35  ;;  %v3758_v49 = vmul.f32 %v10581_v2, %v3694_v4  ;;  %v8251_v2 = vld [vmem:[#allocation7 + $0x278] sm:$0xff]  }
 0x405   : > { %14687 = vst [vmem:[#allocation52_spill] sm:$0xff] %v10708_v54  ;;  %v10716_v20 = vpop.f32.mrb[30].mxu0  ;;  %v8398_v54 = vpop.eup %8397  ;;  %v10753_v15 = vmul.f32 0.70710677, %v10731_v50  ;;  %v3569_v17 = vadd.f32 -0.28449672, %v3505_v40  ;;  %v3634_v35 = vmul.f32 %v10615_v22, %v3570_v39  ;;  %8407 = vpow2.f32 %v3958_v24  ;;  %7735 = vmatprep.subr.bf16.mxu0 %v8251_v2 }
 0x406   : > { %14688 = vst [vmem:[#allocation60_spill] sm:$0xff] %v10716_v20  ;;  %v10733_v10 = vpop.f32.mrb[31].mxu0  ;;  %v8400_v41 = vpop.eup %8399  ;;  %v3631_v20 = vmul.f32 %v10590_v59, %v3567_v16  ;;  %v10747_v16 = vsel %vm2804_vm9, 1.0, %v14683_v53  ;;  %v3962_v11 = vmul.f32 1.442695, %v3892_v57  ;;  %14690 = vst [vmem:[#allocation32_spill] sm:$0xff] %v10761_v46  ;;  %v4078_v24 = vmul.f32 %v8398_v54, %v3758_v49 }
 0x407   : > { %14689 = vst [vmem:[#allocation31_spill] sm:$0xff] %v10733_v10  ;;  %v8402_v26 = vpop.eup %8401  ;;  %v3317_v10 = vadd.f32 -1.4531521, %v3253_v3  ;;  %v3696_v55 = vadd.f32 0.2548296, %v3632_v9  ;;  %v8252_v57 = vld [vmem:[#allocation7 + $0x238] sm:$0xff]   ;;  %v3633_v9 = vmul.f32 %v10625_v48, %v3569_v17  ;;  %8409 = vpow2.f32 %v3960_v62 }
 0x408   : > { %v10750_v56 = vpop.eup %8403  ;;  %v3695_v18 = vadd.f32 0.2548296, %v3631_v20  ;;  %v3571_v47 = vadd.f32 -0.28449672, %v3507_v13  ;;  %v3964_v3 = vmul.f32 1.442695, %v3893_v60  ;;  %7736 = vmatpush3.bf16.msra.mxu0 %v8252_v57  ;;  %8411 = vpow2.f32 %v3962_v11 }
 0x409   : > { %v10764_v14 = vpop.eup %8405  ;;  %v3572_v7 = vadd.f32 -0.28449672, %v3508_v32  ;;  %v3381_v45 = vmul.f32 %v10710_v0, %v3317_v10  ;;  %v3254_v20 = vmul.f32 1.0614054, %v10750_v56  ;;  %v10770_v40 = vand.u32 2147483647, %v10753_v15 }
 0x40a   : > { %v10773_v37 = vmul.f32 0.70710677, %v10757_v8  ;;  %v3759_v4 = vmul.f32 %v10590_v59, %v3695_v18  ;;  %v10778_v13 = vmul.f32 0.70710677, %v10761_v46  ;;  %v10782_v10 = vadd.f32 %v10567_v43, %v10490_v30 }
 0x40b   : > { %v3760_v60 = vmul.f32 %v10595_v52, %v3696_v55  ;;  %v3635_v39 = vmul.f32 %v10632_v27, %v3571_v47  ;;  %v10788_v32 = vadd.f32 %v10569_v44, %v10492_v33  ;;  %v3698_v59 = vadd.f32 0.2548296, %v3634_v35  ;;  %v10798_v49 = vpop.f32.mrb[32].mxu0 }
 0x40c   : > { %v3636_v18 = vmul.f32 %v10642_v5, %v3572_v7  ;;  %v3445_v17 = vadd.f32 1.4214138, %v3381_v45  ;;  %v3318_v46 = vadd.f32 -1.4531521, %v3254_v20  ;;  %v10792_v43 = vmul.f32 0.5, %v10579_v19  ;;  %14692 = vst [vmem:[#allocation33_spill] sm:$0xff] %v10798_v49 }
 0x40d   : > { %v2999_v54 = vmul.f32 0.3275911, %v10770_v40  ;;  %v10796_v52 = vand.u32 2147483647, %v10773_v37  ;;  %v3697_v44 = vadd.f32 0.2548296, %v3633_v9  ;;  %v4079_v62 = vmul.f32 %v8400_v41, %v3759_v4 }
 0x40e   : > { %14691 = vst [vmem:[#allocation34_spill] sm:$0xff] %v10792_v43  ;;  %v10801_v55 = vand.u32 2147483647, %v10778_v13  ;;  %v10804_v7 = vmul.f32 0.70710677, %v10782_v10  ;;  %v4142_v47 = vsub.f32 1.0, %v4078_v24  ;;  %v4080_v45 = vmul.f32 %v8402_v26, %v3760_v60 }
 0x40f   : > { %v10807_v19 = vmul.f32 0.5, %v10601_v1  ;;  %v10810_v35 = vmul.f32 0.70710677, %v10788_v32  ;;  %v3762_v20 = vmul.f32 %v10615_v22, %v3698_v59  ;;  %v3699_v2 = vadd.f32 0.2548296, %v3635_v39  ;;  %v8408_v4 = vpop.eup %8407 }
 0x410   : > { %v3700_v57 = vadd.f32 0.2548296, %v3636_v18  ;;  %v3509_v11 = vmul.f32 %v10710_v0, %v3445_v17  ;;  %v3382_v9 = vmul.f32 %v10750_v56, %v3318_v46  ;;  %v3063_v49 = vadd.f32 1.0, %v2999_v54 }
 0x411   : > { %14693 = vst [vmem:[#allocation36_spill] sm:$0xff] %v10807_v19  ;;  %v3000_v41 = vmul.f32 0.3275911, %v10796_v52  ;;  %v3761_v1 = vmul.f32 %v10625_v48, %v3697_v44  ;;  %8413 = vpow2.f32 %v3964_v3  ;;  %v3001_v26 = vmul.f32 0.3275911, %v10801_v55  ;;  %v8410_v43 = vpop.eup %8409 }
 0x412   : > { %v10821_v22 = vand.u32 2147483647, %v10804_v7  ;;  %v4206_v24 = vmul.f32 %v4142_v47, %v10647_v63  ;;  %v4143_v60 = vsub.f32 1.0, %v4079_v62  ;;  %v10825_v39 = vand.u32 2147483647, %v10810_v35 }
 0x413   : > { %v10829_v46 = vadd.f32 %v10572_v23, %v10490_v30  ;;  %v4144_v48 = vsub.f32 1.0, %v4080_v45  ;;  %v4082_v3 = vmul.f32 %v8408_v4, %v3762_v20  ;;  %v3763_v59 = vmul.f32 %v10632_v27, %v3699_v2 }
 0x414   : > { %v3764_v18 = vmul.f32 %v10642_v5, %v3700_v57  ;;  %v3573_v17 = vadd.f32 -0.28449672, %v3509_v11  ;;  %v3446_v54 = vadd.f32 1.4214138, %v3382_v9  ;;  %8415 = vrcp.f32 %v3063_v49  ;;  %v8412_v49 = vpop.eup %8411 }
 0x415   : > { %v3064_v44 = vadd.f32 1.0, %v3000_v41  ;;  %v4081_v63 = vmul.f32 %v10764_v14, %v3761_v1  ;;  %v3830_v47 = vsub.f32 0.0, %v10628_v25  ;;  %v3065_v62 = vadd.f32 1.0, %v3001_v26 }
 0x416   : > { %v3002_v19 = vmul.f32 0.3275911, %v10821_v22  ;;  %v4207_v23 = vmul.f32 %v4143_v60, %v10680_v21  ;;  %v3003_v45 = vmul.f32 0.3275911, %v10825_v39  ;;  %v10839_v27 = vmul.f32 0.70710677, %v10829_v46 }
 0x417   : > { %v10843_v5 = vadd.f32 %v10575_v31, %v10492_v33  ;;  %v4270_v20 = vadd.f32 1.0, %v4206_v24  ;;  %v4208_v14 = vmul.f32 %v4144_v48, %v10685_v36  ;;  %v4146_v2 = vsub.f32 1.0, %v4082_v3 }
 0x418   : > { %v4083_v57 = vmul.f32 %v8410_v43, %v3763_v59  ;;  %v4084_v11 = vmul.f32 %v8412_v49, %v3764_v18  ;;  %v3637_v9 = vmul.f32 %v10710_v0, %v3573_v17  ;;  %v3510_v21 = vmul.f32 %v10750_v56, %v3446_v54 }
 0x419   : > { %8417 = vrcp.f32 %v3064_v44  ;;  %v4145_v41 = vsub.f32 1.0, %v4081_v63  ;;  %v3894_v1 = vmul.f32 %v3830_v47, %v10628_v25  ;;  %v3066_v26 = vadd.f32 1.0, %v3002_v19 }
 0x41a   : > { %8419 = vrcp.f32 %v3065_v62  ;;  %v10852_v31 = vsel %vm2805_vm11, 1.0, %v14683_v53  ;;  %v3067_v4 = vadd.f32 1.0, %v3003_v45  ;;  %v10855_v36 = vand.u32 2147483647, %v10839_v27 }
 0x41b   : > { %v10858_v43 = vmul.f32 0.70710677, %v10843_v5  ;;  %v8414_v24 = vpop.eup %8413  ;;  %v10861_v60 = vmul.f32 %v4270_v20, %v10635_v29  ;;  %v4272_v48 = vadd.f32 1.0, %v4208_v14  ;;  %v4210_v25 = vmul.f32 %v4146_v2, %v10722_v38 }
 0x41c   : > { %v4147_v19 = vsub.f32 1.0, %v4083_v57  ;;  %v4148_v3 = vsub.f32 1.0, %v4084_v11  ;;  %v3701_v59 = vadd.f32 0.2548296, %v3637_v9  ;;  %v3574_v18 = vadd.f32 -0.28449672, %v3510_v21 }
 0x41d   : > { %14694 = vst [vmem:[#allocation35_spill] sm:$0xff] %v10861_v60  ;;  %v4271_v17 = vadd.f32 1.0, %v4207_v23  ;;  %v4209_v54 = vmul.f32 %v4145_v41, %v10690_v28  ;;  %v3966_v44 = vmul.f32 1.442695, %v3894_v1  ;;  %8421 = vrcp.f32 %v3066_v26  ;;  %v10900_v11 = vpop.f32.mrb[33].mxu0 }
 0x41e   : > { %v10870_v63 = vpop.eup %8415  ;;  %8423 = vrcp.f32 %v3067_v4  ;;  %v3004_v29 = vmul.f32 0.3275911, %v10855_v36  ;;  %v10874_v38 = vand.u32 2147483647, %v10858_v43  ;;  %v10878_v47 = vadd.f32 %v10586_v6, %v10490_v30  ;;  %14697 = vst [vmem:[#allocation39_spill] sm:$0xff] %v10900_v11 }
 0x41f   : > { %v10882_v62 = vmul.f32 %v4272_v48, %v10650_v42  ;;  %v4274_v28 = vadd.f32 1.0, %v4210_v25  ;;  %v4211_v23 = vmul.f32 %v4147_v19, %v10740_v61  ;;  %v4212_v45 = vmul.f32 %v4148_v3, %v10747_v16  ;;  %v14699_v19 = vld [vmem:[#allocation22_spill] sm:$0xff] }
 0x420   : > { %v3765_v49 = vmul.f32 %v10710_v0, %v3701_v59  ;;  %v3638_v20 = vmul.f32 %v10750_v56, %v3574_v18  ;;  %v3831_v14 = vsub.f32 0.0, %v10770_v40  ;;  %v4273_v2 = vadd.f32 1.0, %v4209_v54 }
 0x421   : > { %14695 = vst [vmem:[#allocation37_spill] sm:$0xff] %v10882_v62  ;;  %8425 = vpow2.f32 %v3966_v44  ;;  %vm2807_vm14 = vcmp.ge.f32.partialorder %v10753_v15, 0.0  ;;  %v3255_v6 = vmul.f32 1.0614054, %v10870_v63  ;;  %v10894_v42 = vmul.f32 %v4271_v17, %v10638_v34  ;;  %v14701_v44 = vld [vmem:[#allocation51_spill] sm:$0xff] }
 0x422   : > { %v3068_v61 = vadd.f32 1.0, %v3004_v29  ;;  %v3005_v16 = vmul.f32 0.3275911, %v10874_v38  ;;  %v10898_v0 = vmul.f32 0.70710677, %v10878_v47  ;;  %v10906_v41 = vmul.f32 %v4274_v28, %v10695_v51 }
 0x423   : > { %v10891_v57 = vpop.eup %8417  ;;  %14696 = vst [vmem:[#allocation38_spill] sm:$0xff] %v10894_v42  ;;  %v4275_v1 = vadd.f32 1.0, %v4211_v23  ;;  %v10909_v26 = vmul.f32 0.5, %v10731_v50  ;;  %v4276_v34 = vadd.f32 1.0, %v4212_v45  ;;  %v4085_v4 = vmul.f32 %v8414_v24, %v3765_v49  ;;  %v10935_v23 = vpop.f32.mrb[34].mxu0  ;;  %v14704_v49 = vld [vmem:[#allocation50_spill] sm:$0xff] }
 0x424   : > { %v10902_v9 = vpop.eup %8419  ;;  %14698 = vst [vmem:[#allocation40_spill] sm:$0xff] %v10906_v41  ;;  %v3702_v48 = vadd.f32 0.2548296, %v3638_v20  ;;  %v3895_v25 = vmul.f32 %v3831_v14, %v10770_v40  ;;  %v10913_v3 = vmul.f32 %v4273_v2, %v14699_v19  ;;  %v10918_v59 = vsel %vm2807_vm14, 1.0, %v14683_v53  ;;  %14703 = vst [vmem:[#allocation44_spill] sm:$0xff] %v10935_v23 }
 0x425   : > { %v3319_v18 = vadd.f32 -1.4531521, %v3255_v6  ;;  %v3256_v51 = vmul.f32 1.0614054, %v10891_v57  ;;  %v3257_v17 = vmul.f32 1.0614054, %v10902_v9  ;;  %8427 = vrcp.f32 %v3068_v61 }
 0x426   : > { %14700 = vst [vmem:[#allocation42_spill] sm:$0xff] %v10913_v3  ;;  %v3069_v50 = vadd.f32 1.0, %v3005_v16  ;;  %v10923_v24 = vand.u32 2147483647, %v10898_v0  ;;  %v10929_v29 = vmul.f32 %v4275_v1, %v14701_v44  ;;  %v10932_v15 = vmul.f32 0.5, %v10757_v8  ;;  %v10946_v1 = vpop.f32.mrb[35].mxu0 }
 0x427   : > { %v10925_v54 = vpop.eup %8421  ;;  %v3832_v28 = vsub.f32 0.0, %v10796_v52  ;;  %v10940_v20 = vmul.f32 %v4276_v34, %v14704_v49  ;;  %v4149_v14 = vsub.f32 1.0, %v4085_v4  ;;  %v3766_v2 = vmul.f32 %v10750_v56, %v3702_v48  ;;  %14706 = vst [vmem:[#allocation46_spill] sm:$0xff] %v10946_v1  ;;  %v14707_v56 = vld [vmem:[#allocation32_spill] sm:$0xff]  ;;  %v10968_v21 = vpop.f32.mrb[36].mxu0 }
 0x428   : > { %14702 = vst [vmem:[#allocation41_spill] sm:$0xff] %v10929_v29  ;;  %v10937_v45 = vpop.eup %8423  ;;  %v3968_v6 = vmul.f32 1.442695, %v3895_v25  ;;  %v3383_v61 = vmul.f32 %v10870_v63, %v3319_v18  ;;  %vm2808_vm15 = vcmp.ge.f32.partialorder %v10773_v37, 0.0  ;;  %v3320_v16 = vadd.f32 -1.4531521, %v3256_v51 }
 0x429   : > { %14705 = vst [vmem:[#allocation43_spill] sm:$0xff] %v10940_v20  ;;  %v3833_v8 = vsub.f32 0.0, %v10801_v55  ;;  %v3321_v19 = vadd.f32 -1.4531521, %v3257_v17  ;;  %v3258_v44 = vmul.f32 1.0614054, %v10925_v54  ;;  %8429 = vrcp.f32 %v3069_v50 }
 0x42a   : > { %v3006_v34 = vmul.f32 0.3275911, %v10923_v24  ;;  %v3896_v4 = vmul.f32 %v3832_v28, %v10796_v52  ;;  %v10952_v48 = vmul.f32 0.5, %v14707_v56  ;;  %vm2809_vm2 = vcmp.ge.f32.partialorder %v10778_v13, 0.0  ;;  %v14708_v17 = vld [vmem:[#allocation23_spill] sm:$0xff]  ;;  %14709 = vst [vmem:[#allocation45_spill] sm:$0xff] %v10968_v21 }
 0x42b   : > { %v8426_v49 = vpop.eup %8425  ;;  %v3259_v25 = vmul.f32 1.0614054, %v10937_v45  ;;  %v4213_v18 = vmul.f32 %v4149_v14, %v10852_v31  ;;  %8431 = vpow2.f32 %v3968_v6  ;;  %v10959_v58 = vadd.f32 %v14708_v17, %v10492_v33 }
 0x42c   : > { %v4086_v51 = vmul.f32 %v8426_v49, %v3766_v2  ;;  %v3447_v50 = vadd.f32 1.4214138, %v3383_v61  ;;  %v10964_v52 = vsel %vm2808_vm15, 1.0, %v14683_v53  ;;  %v3384_v28 = vmul.f32 %v10891_v57, %v3320_v16 }
 0x42d   : > { %v3897_v56 = vmul.f32 %v3833_v8, %v10801_v55  ;;  %v3385_v31 = vmul.f32 %v10902_v9, %v3321_v19  ;;  %v3322_v14 = vadd.f32 -1.4531521, %v3258_v44  ;;  %v3834_v2 = vsub.f32 0.0, %v10821_v22 }
 0x42e   : > { %v3070_v6 = vadd.f32 1.0, %v3006_v34  ;;  %v3970_v49 = vmul.f32 1.442695, %v3896_v4  ;;  %v10975_v61 = vsel %vm2809_vm2, 1.0, %v14683_v53  ;;  %v10978_v37 = vmul.f32 0.5, %v10782_v10 }
 0x42f   : > { %v3323_v16 = vadd.f32 -1.4531521, %v3259_v25  ;;  %v10980_v17 = vpop.eup %8427  ;;  %v4277_v55 = vadd.f32 1.0, %v4213_v18  ;;  %v4150_v8 = vsub.f32 1.0, %v4086_v51  ;;  %v10983_v19 = vmul.f32 0.5, %v10788_v32 }
 0x430   : > { %v10986_v44 = vmul.f32 0.70710677, %v10959_v58  ;;  %v3511_v34 = vmul.f32 %v10870_v63, %v3447_v50  ;;  %v3448_v4 = vadd.f32 1.4214138, %v3384_v28  ;;  %v3972_v13 = vmul.f32 1.442695, %v3897_v56 }
 0x431   : > { %vm2810_vm4 = vcmp.ge.f32.partialorder %v10804_v7, 0.0  ;;  %v3449_v40 = vadd.f32 1.4214138, %v3385_v31  ;;  %v3386_v10 = vmul.f32 %v10925_v54, %v3322_v14  ;;  %v3898_v25 = vmul.f32 %v3834_v2, %v10821_v22  ;;  %v14710_v50 = vld [vmem:[#allocation34_spill] sm:$0xff]  ;;  %v14712_v22 = vld [vmem:[#allocation25_spill] sm:$0xff] }
 0x432   : > { %8433 = vrcp.f32 %v3070_v6  ;;  %vm2811_vm5 = vcmp.ge.f32.partialorder %v10810_v35, 0.0  ;;  %v3387_v32 = vmul.f32 %v10937_v45, %v3323_v16  ;;  %v3260_v18 = vmul.f32 1.0614054, %v10980_v17 }
 0x433   : > { %8435 = vpow2.f32 %v3970_v49  ;;  %v10995_v51 = vpop.eup %8429  ;;  %v10998_v28 = vmul.f32 %v4277_v55, %v14710_v50  ;;  %v4214_v56 = vmul.f32 %v4150_v8, %v10867_v12  ;;  %v11002_v31 = vand.u32 2147483647, %v10986_v44 }
 0x434   : > { %v11006_v14 = vadd.f32 %v14712_v22, %v10490_v30  ;;  %v3575_v2 = vadd.f32 -0.28449672, %v3511_v34  ;;  %v3512_v6 = vmul.f32 %v10891_v57, %v3448_v4  ;;  %v11012_v49 = vsel %vm2810_vm4, 1.0, %v14683_v53 }
 0x435   : > { %14711 = vst [vmem:[#allocation47_spill] sm:$0xff] %v10998_v28  ;;  %v3835_v16 = vsub.f32 0.0, %v10825_v39  ;;  %v11015_v55 = vpop.eup %8431  ;;  %v3513_v12 = vmul.f32 %v10902_v9, %v3449_v40  ;;  %v3450_v8 = vadd.f32 1.4214138, %v3386_v10  ;;  %v3974_v50 = vmul.f32 1.442695, %v3898_v25 }
 0x436   : > { %v11021_v22 = vsel %vm2811_vm5, 1.0, %v14683_v53  ;;  %8437 = vpow2.f32 %v3972_v13  ;;  %v3451_v34 = vadd.f32 1.4214138, %v3387_v32  ;;  %v3324_v4 = vadd.f32 -1.4531521, %v3260_v18 }
 0x437   : > { %v3261_v7 = vmul.f32 1.0614054, %v10995_v51  ;;  %v4278_v20 = vadd.f32 1.0, %v4214_v56  ;;  %v11025_v28 = vmul.f32 0.5, %v10829_v46  ;;  %v3007_v21 = vmul.f32 0.3275911, %v11002_v31 }
 0x438   : > { %v11029_v40 = vmul.f32 0.70710677, %v11006_v14  ;;  %v3639_v10 = vmul.f32 %v10870_v63, %v3575_v2  ;;  %v3576_v25 = vadd.f32 -0.28449672, %v3512_v6  ;;  %v3899_v35 = vmul.f32 %v3835_v16, %v10825_v39  ;;  %v14715_v46 = vld [vmem:[#allocation26_spill] sm:$0xff]  ;;  %v14716_v39 = vld [vmem:[#allocation36_spill] sm:$0xff] }
 0x439   : > { %14713 = vst [vmem:[#allocation48_spill] sm:$0xff] %v11025_v28  ;;  %v11034_v13 = vmul.f32 0.5, %v10843_v5  ;;  %v3577_v32 = vadd.f32 -0.28449672, %v3513_v12  ;;  %v3514_v18 = vmul.f32 %v10925_v54, %v3450_v8  ;;  %8439 = vpow2.f32 %v3974_v50  ;;  %v14718_v8 = vld [vmem:[#allocation21_spill] sm:$0xff] }
 0x43a   : > { %v11039_v56 = vadd.f32 %v14715_v46, %v10492_v33  ;;  %v3515_v1 = vmul.f32 %v10937_v45, %v3451_v34  ;;  %vm2812_vm9 = vcmp.ge.f32.partialorder %v10839_v27, 0.0  ;;  %v3388_v2 = vmul.f32 %v10980_v17, %v3324_v4 }
 0x43b   : > { %14714 = vst [vmem:[#allocation53_spill] sm:$0xff] %v11034_v13  ;;  %v3325_v6 = vadd.f32 -1.4531521, %v3261_v7  ;;  %v11047_v5 = vmul.f32 %v4278_v20, %v14716_v39  ;;  %v3071_v16 = vadd.f32 1.0, %v3007_v21  ;;  %v11050_v12 = vand.u32 2147483647, %v11029_v40 }
 0x43c   : > { %v11044_v23 = vpop.eup %8433  ;;  %v11054_v50 = vadd.f32 %v14718_v8, %v10490_v30  ;;  %v3703_v34 = vadd.f32 0.2548296, %v3639_v10  ;;  %v3640_v60 = vmul.f32 %v10891_v57, %v3576_v25  ;;  %v3836_v4 = vsub.f32 0.0, %v10855_v36  ;;  %v11067_v8 = vpop.f32.mrb[37].mxu0 }
 0x43d   : > { %14717 = vst [vmem:[#allocation49_spill] sm:$0xff] %v11047_v5  ;;  %v8436_v46 = vpop.eup %8435  ;;  %v11059_v7 = vmul.f32 0.70710677, %v11039_v56  ;;  %v3641_v20 = vmul.f32 %v10902_v9, %v3577_v32  ;;  %v3578_v39 = vadd.f32 -0.28449672, %v3514_v18  ;;  %v11065_v5 = vsel %vm2812_vm9, 1.0, %v14683_v53 }
 0x43e   : > { %v3976_v21 = vmul.f32 1.442695, %v3899_v35  ;;  %14720 = vst [vmem:[#allocation54_spill] sm:$0xff] %v11067_v8  ;;  %v3579_v62 = vadd.f32 -0.28449672, %v3515_v1  ;;  %v3389_v25 = vmul.f32 %v10995_v51, %v3325_v6  ;;  %8441 = vrcp.f32 %v3071_v16 }
 0x43f   : > { %14719 = vst [vmem:[#allocation55_spill] sm:$0xff] %v11059_v7  ;;  %v3452_v10 = vadd.f32 1.4214138, %v3388_v2  ;;  %v3262_v41 = vmul.f32 1.0614054, %v11044_v23  ;;  %v3767_v18 = vmul.f32 %v10870_v63, %v3703_v34  ;;  %v3900_v1 = vmul.f32 %v3836_v4, %v10855_v36  ;;  %v14722_v2 = vld [vmem:[#allocation27_spill] sm:$0xff] }
 0x440   : > { %v3008_v11 = vmul.f32 0.3275911, %v11050_v12  ;;  %v11073_v32 = vand.u32 2147483647, %v11059_v7  ;;  %v11076_v35 = vmul.f32 0.70710677, %v11054_v50  ;;  %v8438_v27 = vpop.eup %8437  ;;  %v11082_v6 = vadd.f32 %v14722_v2, %v10492_v33 }
 0x441   : > { %v3704_v29 = vadd.f32 0.2548296, %v3640_v60  ;;  %v3705_v8 = vadd.f32 0.2548296, %v3641_v20  ;;  %v3642_v16 = vmul.f32 %v10925_v54, %v3578_v39  ;;  %vm2813_vm11 = vcmp.ge.f32.partialorder %v10858_v43, 0.0 }
 0x442   : > { %14721 = vst [vmem:[#allocation56_spill] sm:$0xff] %v11076_v35  ;;  %14723 = vst [vmem:[#allocation57_spill] sm:$0xff] %v11082_v6  ;;  %v3837_v42 = vsub.f32 0.0, %v10874_v38  ;;  %v3643_v3 = vmul.f32 %v10937_v45, %v3579_v62  ;;  %v3516_v13 = vmul.f32 %v10980_v17, %v3452_v10  ;;  %v3453_v28 = vadd.f32 1.4214138, %v3389_v25  ;;  %v11101_v10 = vpop.f32.mrb[38].mxu0 }
 0x443   : > { %v3326_v63 = vadd.f32 -1.4531521, %v3262_v41  ;;  %v8440_v60 = vpop.eup %8439  ;;  %8443 = vpow2.f32 %v3976_v21  ;;  %v3072_v36 = vadd.f32 1.0, %v3008_v11  ;;  %v3009_v34 = vmul.f32 0.3275911, %v11073_v32  ;;  %14724 = vst [vmem:[#allocation59_spill] sm:$0xff] %v11101_v10 }
 0x444   : > { %v11091_v4 = vand.u32 2147483647, %v11076_v35  ;;  %v4087_v20 = vmul.f32 %v11015_v55, %v3767_v18  ;;  %v3768_v43 = vmul.f32 %v10891_v57, %v3704_v29  ;;  %v11096_v39 = vsel %vm2813_vm11, 1.0, %v14683_v53  ;;  %v11106_v2 = vpop.f32.mrb[39].mxu0 }
 0x445   : > { %v11099_v62 = vmul.f32 0.70710677, %v11082_v6  ;;  %v3769_v41 = vmul.f32 %v10902_v9, %v3705_v8  ;;  %v3978_v11 = vmul.f32 1.442695, %v3900_v1  ;;  %v3901_v21 = vmul.f32 %v3837_v42, %v10874_v38  ;;  %14725 = vst [vmem:[#allocation58_spill] sm:$0xff] %v11106_v2 }
 0x446   : > { %v3838_v25 = vsub.f32 0.0, %v10923_v24  ;;  %v3706_v55 = vadd.f32 0.2548296, %v3642_v16  ;;  %v3707_v18 = vadd.f32 0.2548296, %v3643_v3  ;;  %v3390_v29 = vmul.f32 %v11044_v23, %v3326_v63  ;;  %v11123_v63 = vpop.f32.mrb[40].mxu0 }
 0x447   : > { %v3580_v57 = vadd.f32 -0.28449672, %v3516_v13  ;;  %v3517_v35 = vmul.f32 %v10995_v51, %v3453_v28  ;;  %8445 = vrcp.f32 %v3072_v36  ;;  %v3073_v6 = vadd.f32 1.0, %v3009_v34  ;;  %14726 = vst [vmem:[#allocation62_spill] sm:$0xff] %v11123_v63 }
 0x448   : > { %v3010_v10 = vmul.f32 0.3275911, %v11091_v4  ;;  %v4151_v7 = vsub.f32 1.0, %v4087_v20  ;;  %v4088_v9 = vmul.f32 %v8436_v46, %v3768_v43  ;;  %v11112_v8 = vmul.f32 0.5, %v10878_v47  ;;  %v11117_v42 = vpop.eup %8441 }
 0x449   : > { %v11115_v38 = vand.u32 2147483647, %v11099_v62  ;;  %v4089_v3 = vmul.f32 %v8438_v27, %v3769_v41  ;;  %8447 = vpow2.f32 %v3978_v11  ;;  %v3980_v13 = vmul.f32 1.442695, %v3901_v21  ;;  %v14727_v21 = vld [vmem:[#allocation16_spill] sm:$0xff] }
 0x44a   : > { %v3902_v1 = vmul.f32 %v3838_v25, %v10923_v24  ;;  %v3770_v28 = vmul.f32 %v10925_v54, %v3706_v55  ;;  %v3771_v16 = vmul.f32 %v10937_v45, %v3707_v18  ;;  %vm2814_vm13 = vcmp.ge.f32.partialorder %v10898_v0, 0.0 }
 0x44b   : > { %v3454_v46 = vadd.f32 1.4214138, %v3390_v29  ;;  %v3644_v47 = vmul.f32 %v10980_v17, %v3580_v57  ;;  %v3581_v36 = vadd.f32 -0.28449672, %v3517_v35  ;;  %8449 = vrcp.f32 %v3073_v6 }
 0x44c   : > { %v3074_v34 = vadd.f32 1.0, %v3010_v10  ;;  %v4215_v27 = vmul.f32 %v4151_v7, %v10918_v59  ;;  %v4152_v20 = vsub.f32 1.0, %v4088_v9  ;;  %v3263_v43 = vmul.f32 1.0614054, %v11117_v42 }
 0x44d   : > { %v3011_v24 = vmul.f32 0.3275911, %v11115_v38  ;;  %v8444_v54 = vpop.eup %8443  ;;  %v4153_v41 = vsub.f32 1.0, %v4089_v3  ;;  %v3982_v45 = vmul.f32 1.442695, %v3902_v1  ;;  %v11130_v11 = vmul.f32 0.5, %v10959_v58 }
 0x44e   : > { %v11134_v25 = vadd.f32 %v14727_v21, %v10490_v30  ;;  %v4090_v35 = vmul.f32 %v8440_v60, %v3770_v28  ;;  %8451 = vpow2.f32 %v3980_v13  ;;  %v11139_v59 = vsel %vm2814_vm13, 1.0, %v14683_v53  ;;  %v14728_v3 = vld [vmem:[#allocation13_spill] sm:$0xff] }
 0x44f   : > { %v3518_v7 = vmul.f32 %v11044_v23, %v3454_v46  ;;  %v4091_v6 = vmul.f32 %v8444_v54, %v3771_v16  ;;  %v3708_v10 = vadd.f32 0.2548296, %v3644_v47  ;;  %v3645_v55 = vmul.f32 %v10995_v51, %v3581_v36 }
 0x450   : > { %8453 = vrcp.f32 %v3074_v34  ;;  %v4279_v58 = vadd.f32 1.0, %v4215_v27  ;;  %v4216_v18 = vmul.f32 %v4152_v20, %v10964_v52  ;;  %v3327_v57 = vadd.f32 -1.4531521, %v3263_v43 }
 0x451   : > { %v3075_v29 = vadd.f32 1.0, %v3011_v24  ;;  %v11144_v9 = vpop.eup %8445  ;;  %v4217_v60 = vmul.f32 %v4153_v41, %v10975_v61  ;;  %8455 = vpow2.f32 %v3982_v45  ;;  %v11148_v0 = vmul.f32 0.70710677, %v11134_v25 }
 0x452   : > { %v11152_v13 = vadd.f32 %v14728_v3, %v10492_v33  ;;  %v4154_v1 = vsub.f32 1.0, %v4090_v35  ;;  %v3582_v28 = vadd.f32 -0.28449672, %v3518_v7  ;;  %v3839_v16 = vsub.f32 0.0, %v11002_v31 }
 0x453   : > { %v11156_v52 = vmul.f32 0.5, %v11006_v14  ;;  %v8448_v46 = vpop.eup %8447  ;;  %v4155_v47 = vsub.f32 1.0, %v4091_v6  ;;  %v3772_v36 = vmul.f32 %v10980_v17, %v3708_v10  ;;  %v3709_v61 = vadd.f32 0.2548296, %v3645_v55  ;;  %v14729_v17 = vld [vmem:[#allocation28_spill] sm:$0xff] }
 0x454   : > { %vm2815_vm14 = vcmp.ge.f32.partialorder %v10986_v44, 0.0  ;;  %v4280_v34 = vadd.f32 1.0, %v4216_v18  ;;  %v3391_v27 = vmul.f32 %v11117_v42, %v3327_v57  ;;  %v3264_v20 = vmul.f32 1.0614054, %v11144_v9 }
 0x455   : > { %8457 = vrcp.f32 %v3075_v29  ;;  %v11162_v43 = vpop.eup %8449  ;;  %v4281_v24 = vadd.f32 1.0, %v4217_v60  ;;  %v11165_v54 = vand.u32 2147483647, %v11148_v0  ;;  %v11168_v14 = vmul.f32 0.70710677, %v11152_v13 }
 0x456   : > { %v11172_v41 = vadd.f32 %v14729_v17, %v10490_v30  ;;  %v4218_v44 = vmul.f32 %v4154_v1, %v11012_v49  ;;  %v3646_v45 = vmul.f32 %v11044_v23, %v3582_v28  ;;  %v11177_v21 = vsel %vm2815_vm14, 1.0, %v14683_v53 }
 0x457   : > { %v3903_v35 = vmul.f32 %v3839_v16, %v11002_v31  ;;  %v4219_v7 = vmul.f32 %v4155_v47, %v11021_v22  ;;  %v4092_v6 = vmul.f32 %v8448_v46, %v3772_v36  ;;  %v3773_v10 = vmul.f32 %v10995_v51, %v3709_v61  ;;  %v11203_v61 = vpop.f32.mrb[41].mxu0 }
 0x458   : > { %vm2816_vm15 = vcmp.ge.f32.partialorder %v11029_v40, 0.0  ;;  %v8452_v55 = vpop.eup %8451  ;;  %v11184_v18 = vmul.f32 %v4279_v58, %v10909_v26  ;;  %v3455_v57 = vadd.f32 1.4214138, %v3391_v27  ;;  %v3328_v49 = vadd.f32 -1.4531521, %v3264_v20  ;;  %14733 = vst [vmem:[#allocation50_spill] sm:$0xff] %v11203_v61 }
 0x459   : > { %v3265_v29 = vmul.f32 1.0614054, %v11162_v43  ;;  %v11190_v3 = vmul.f32 %v4280_v34, %v10932_v15  ;;  %v3012_v31 = vmul.f32 0.3275911, %v11165_v54  ;;  %v11194_v22 = vand.u32 2147483647, %v11168_v14 }
 0x45a   : > { %14730 = vst [vmem:[#allocation61_spill] sm:$0xff] %v11184_v18  ;;  %v11187_v60 = vpop.eup %8453  ;;  %v11197_v51 = vmul.f32 0.70710677, %v11172_v41  ;;  %v4282_v1 = vadd.f32 1.0, %v4218_v44  ;;  %v3710_v26 = vadd.f32 0.2548296, %v3646_v45  ;;  %v11201_v46 = vmul.f32 %v4281_v24, %v10952_v48 }
 0x45b   : > { %14731 = vst [vmem:[#allocation22_spill] sm:$0xff] %v11190_v3  ;;  %v3984_v58 = vmul.f32 1.442695, %v3903_v35  ;;  %v3840_v28 = vsub.f32 0.0, %v11050_v12  ;;  %v8456_v16 = vpop.eup %8455  ;;  %v4283_v47 = vadd.f32 1.0, %v4219_v7  ;;  %v4156_v15 = vsub.f32 1.0, %v4092_v6 }
 0x45c   : > { %14732 = vst [vmem:[#allocation51_spill] sm:$0xff] %v11201_v46  ;;  %v4093_v36 = vmul.f32 %v8452_v55, %v3773_v10  ;;  %v3519_v34 = vmul.f32 %v11117_v42, %v3455_v57  ;;  %v3392_v27 = vmul.f32 %v11144_v9, %v3328_v49  ;;  %v3329_v20 = vadd.f32 -1.4531521, %v3265_v29 }
 0x45d   : > { %v3266_v17 = vmul.f32 1.0614054, %v11187_v60  ;;  %v11211_v44 = vsel %vm2816_vm15, 1.0, %v14683_v53  ;;  %v3076_v45 = vadd.f32 1.0, %v3012_v31  ;;  %v3013_v48 = vmul.f32 0.3275911, %v11194_v22 }
 0x45e   : > { %v11215_v24 = vand.u32 2147483647, %v11197_v51  ;;  %v11220_v7 = vmul.f32 %v4282_v1, %v10978_v37  ;;  %v3774_v6 = vmul.f32 %v11044_v23, %v3710_v26  ;;  %8459 = vpow2.f32 %v3984_v58  ;;  %v14737_v58 = vld [vmem:[#allocation29_spill] sm:$0xff] }
 0x45f   : > { %v11217_v35 = vpop.eup %8457  ;;  %v3904_v10 = vmul.f32 %v3840_v28, %v11050_v12  ;;  %v11225_v40 = vmul.f32 %v4283_v47, %v10983_v19  ;;  %v4220_v55 = vmul.f32 %v4156_v15, %v11065_v5  ;;  %v4157_v57 = vsub.f32 1.0, %v4093_v36  ;;  %v11232_v12 = vpop.f32.mrb[42].mxu0  ;;  %v8253_v47 = vld [vmem:[#allocation7 + $0x40] sm:$0xff]  }
 0x460   : > { %14734 = vst [vmem:[#allocation32_spill] sm:$0xff] %v11220_v7  ;;  %v3841_v49 = vsub.f32 0.0, %v11073_v32  ;;  %v3583_v29 = vadd.f32 -0.28449672, %v3519_v34  ;;  %v3456_v31 = vadd.f32 1.4214138, %v3392_v27  ;;  %v3393_v3 = vmul.f32 %v11162_v43, %v3329_v20  ;;  %7273 = vmatprep.subr.bf16.mxu1 %v8253_v47 }
 0x461   : > { %14735 = vst [vmem:[#allocation23_spill] sm:$0xff] %v11225_v40  ;;  %v3330_v61 = vadd.f32 -1.4531521, %v3266_v17  ;;  %v3267_v37 = vmul.f32 1.0614054, %v11217_v35  ;;  %8461 = vrcp.f32 %v3076_v45  ;;  %v3077_v23 = vadd.f32 1.0, %v3013_v48 }
 0x462   : > { %v3014_v1 = vmul.f32 0.3275911, %v11215_v24  ;;  %14736 = vst [vmem:[#allocation34_spill] sm:$0xff] %v11232_v12  ;;  %v4094_v19 = vmul.f32 %v8456_v16, %v3774_v6  ;;  %v3986_v26 = vmul.f32 1.442695, %v3904_v10  ;;  %v11235_v5 = vmul.f32 0.5, %v11039_v56 }
 0x463   : > { %v11239_v28 = vadd.f32 %v14737_v58, %v10492_v33  ;;  %v11241_v15 = vpop.f32.mrb[43].mxu0  ;;  %v8254_v36 = vld [vmem:[#allocation7] sm:$0xff]   ;;  %v4284_v34 = vadd.f32 1.0, %v4220_v55  ;;  %v4221_v27 = vmul.f32 %v4157_v57, %v11096_v39  ;;  %v11245_v20 = vmul.f32 0.5, %v11054_v50  ;;  %v8255_v6 = vld [vmem:[#allocation7 + $0x48] sm:$0xff]   ;;  %v14739_v57 = vld [vmem:[#allocation55_spill] sm:$0xff] }
 0x464   : > { %14738 = vst [vmem:[#allocation25_spill] sm:$0xff] %v11241_v15  ;;  %v3842_v16 = vsub.f32 0.0, %v11091_v4  ;;  %v3647_v17 = vmul.f32 %v11117_v42, %v3583_v29  ;;  %v3520_v56 = vmul.f32 %v11144_v9, %v3456_v31  ;;  %v3905_v45 = vmul.f32 %v3841_v49, %v11073_v32  ;;  %7274 = vmatpush3.bf16.msra.mxu1 %v8254_v36  ;;  %v8256_v39 = vld [vmem:[#allocation7 + $0x8] sm:$0xff]   ;;  %v14740_v32 = vld [vmem:[#allocation56_spill] sm:$0xff]  ;;  %v11259_v49 = vpop.f32.mrb[44].mxu0 }
 0x465   : > { %v3394_v48 = vmul.f32 %v11187_v60, %v3330_v61  ;;  %v3457_v10 = vadd.f32 1.4214138, %v3393_v3  ;;  %v3331_v58 = vadd.f32 -1.4531521, %v3267_v37  ;;  %8463 = vrcp.f32 %v3077_v23  ;;  %7275 = vmatprep.subr.bf16.mxu1 %v8255_v6  ;;  %14741 = vst [vmem:[#allocation26_spill] sm:$0xff] %v11259_v49  ;;  %v14742_v23 = vld [vmem:[#allocation48_spill] sm:$0xff] }
 0x466   : > { %v3078_v55 = vadd.f32 1.0, %v3014_v1  ;;  %v4158_v50 = vsub.f32 1.0, %v4094_v19  ;;  %8465 = vpow2.f32 %v3986_v26  ;;  %vm2817_vm2 = vcmp.ge.f32.partialorder %v14739_v57, 0.0  ;;  %v11342_v12 = vpop.f32.mrb[45].mxu0 }
 0x467   : > { %v11254_v29 = vmul.f32 0.70710677, %v11239_v28  ;;  %v4285_v31 = vadd.f32 1.0, %v4221_v27  ;;  %vm2818_vm4 = vcmp.ge.f32.partialorder %v14740_v32, 0.0  ;;  %v3906_v61 = vmul.f32 %v3842_v16, %v11091_v4  ;;  %14751 = vst [vmem:[#allocation16_spill] sm:$0xff] %v11342_v12 }
 0x468   : > { %v3843_v3 = vsub.f32 0.0, %v11115_v38  ;;  %v8460_v37 = vpop.eup %8459  ;;  %v11262_v1 = vmul.f32 %v4284_v34, %v14742_v23  ;;  %v3584_v19 = vadd.f32 -0.28449672, %v3520_v56  ;;  %v3988_v26 = vmul.f32 1.442695, %v3905_v45  ;;  %7276 = vmatpush3.bf16.msra.mxu1 %v8256_v39 }
 0x469   : > { %v3458_v47 = vadd.f32 1.4214138, %v3394_v48  ;;  %v3711_v36 = vadd.f32 0.2548296, %v3647_v17  ;;  %v3521_v15 = vmul.f32 %v11162_v43, %v3457_v10  ;;  %v3395_v27 = vmul.f32 %v11217_v35, %v3331_v58  ;;  %v14744_v48 = vld [vmem:[#allocation19_spill] sm:$0xff]  ;;  %v14745_v10 = vld [vmem:[#allocation53_spill] sm:$0xff] }
 0x46a   : > { %14743 = vst [vmem:[#allocation36_spill] sm:$0xff] %v11262_v1  ;;  %8467 = vrcp.f32 %v3078_v55  ;;  %v4222_v4 = vmul.f32 %v4158_v50, %v11139_v59  ;;  %v11270_v16 = vsel %vm2817_vm2, 1.0, %v14683_v53  ;;  %v11275_v34 = vsel %vm2818_vm4, 1.0, %v14683_v53  ;;  %v14747_v50 = vld [vmem:[#allocation57_spill] sm:$0xff] }
 0x46b   : > { %v11278_v17 = vand.u32 2147483647, %v11254_v29  ;;  %v11280_v56 = vpop.eup %8461  ;;  %v3990_v45 = vmul.f32 1.442695, %v3906_v61  ;;  %vm2819_vm5 = vcmp.ge.f32.partialorder %v11099_v62, 0.0  ;;  %v3907_v59 = vmul.f32 %v3843_v3, %v11115_v38 }
 0x46c   : > { %v11286_v6 = vadd.f32 %v14744_v48, %v10490_v30  ;;  %v11289_v58 = vmul.f32 %v4285_v31, %v14745_v10  ;;  %v3648_v55 = vmul.f32 %v11144_v9, %v3584_v19  ;;  %v3522_v39 = vmul.f32 %v11187_v60, %v3458_v47 }
 0x46d   : > { %v11294_v57 = vmul.f32 0.5, %v14747_v50  ;;  %v3775_v32 = vmul.f32 %v11117_v42, %v3711_v36  ;;  %v3585_v61 = vadd.f32 -0.28449672, %v3521_v15  ;;  %8469 = vpow2.f32 %v3988_v26  ;;  %v14748_v42 = vld [vmem:[#allocation30_spill] sm:$0xff] }
 0x46e   : > { %14746 = vst [vmem:[#allocation21_spill] sm:$0xff] %v11289_v58  ;;  %v3459_v62 = vadd.f32 1.4214138, %v3395_v27  ;;  %v4286_v38 = vadd.f32 1.0, %v4222_v4  ;;  %v11298_v3 = vsel %vm2819_vm5, 1.0, %v14683_v53  ;;  %8471 = vpow2.f32 %v3990_v45 }
 0x46f   : > { %v3268_v23 = vmul.f32 1.0614054, %v11280_v56  ;;  %v3015_v31 = vmul.f32 0.3275911, %v11278_v17  ;;  %v11302_v48 = vpop.eup %8463  ;;  %v3992_v19 = vmul.f32 1.442695, %v3907_v59  ;;  %v11309_v15 = vadd.f32 %v14748_v42, %v10492_v33 }
 0x470   : > { %v11305_v47 = vmul.f32 0.70710677, %v11286_v6  ;;  %v8466_v26 = vpop.eup %8465  ;;  %v3712_v36 = vadd.f32 0.2548296, %v3648_v55  ;;  %v3586_v27 = vadd.f32 -0.28449672, %v3522_v39  ;;  %v4095_v10 = vmul.f32 %v8460_v37, %v3775_v32 }
 0x471   : > { %v11312_v4 = vmul.f32 0.5, %v11134_v25  ;;  %vm2820_vm9 = vcmp.ge.f32.partialorder %v11148_v0, 0.0  ;;  %v3649_v50 = vmul.f32 %v11162_v43, %v3585_v61  ;;  %v3523_v45 = vmul.f32 %v11217_v35, %v3459_v62  ;;  %v14750_v32 = vld [vmem:[#allocation20_spill] sm:$0xff] }
 0x472   : > { %v3844_v59 = vsub.f32 0.0, %v11165_v54  ;;  %v11319_v1 = vmul.f32 %v4286_v38, %v11112_v8  ;;  %v3332_v42 = vadd.f32 -1.4531521, %v3268_v23  ;;  %v3269_v49 = vmul.f32 1.0614054, %v11302_v48 }
 0x473   : > { %v3079_v55 = vadd.f32 1.0, %v3015_v31  ;;  %v11325_v25 = vsel %vm2820_vm9, 1.0, %v14683_v53  ;;  %v11328_v0 = vand.u32 2147483647, %v11305_v47  ;;  %v11331_v37 = vmul.f32 0.70710677, %v11309_v15 }
 0x474   : > { %14749 = vst [vmem:[#allocation27_spill] sm:$0xff] %v11319_v1  ;;  %v11322_v39 = vpop.eup %8467  ;;  %v11335_v61 = vadd.f32 %v14750_v32, %v10490_v30  ;;  %v3776_v8 = vmul.f32 %v11144_v9, %v3712_v36  ;;  %v3650_v62 = vmul.f32 %v11187_v60, %v3586_v27  ;;  %vm2821_vm11 = vcmp.ge.f32.partialorder %v11168_v14, 0.0 }
 0x475   : > { %v3845_v38 = vsub.f32 0.0, %v11194_v22  ;;  %v4159_v23 = vsub.f32 1.0, %v4095_v10  ;;  %v3713_v31 = vadd.f32 0.2548296, %v3649_v50  ;;  %v3587_v1 = vadd.f32 -0.28449672, %v3523_v45 }
 0x476   : > { %v3908_v58 = vmul.f32 %v3844_v59, %v11165_v54  ;;  %v3396_v7 = vmul.f32 %v11280_v56, %v3332_v42  ;;  %v3333_v46 = vadd.f32 -1.4531521, %v3269_v49  ;;  %v3270_v32 = vmul.f32 1.0614054, %v11322_v39  ;;  %v14752_v49 = vld [vmem:[#allocation52_spill] sm:$0xff] }
 0x477   : > { %8473 = vrcp.f32 %v3079_v55  ;;  %v8470_v9 = vpop.eup %8469  ;;  %v3016_v36 = vmul.f32 0.3275911, %v11328_v0  ;;  %v11348_v27 = vand.u32 2147483647, %v11331_v37  ;;  %v11351_v10 = vmul.f32 0.70710677, %v11335_v61 }
 0x478   : > { %8475 = vpow2.f32 %v3992_v19  ;;  %v4096_v50 = vmul.f32 %v8466_v26, %v3776_v8  ;;  %v3714_v54 = vadd.f32 0.2548296, %v3650_v62  ;;  %v11354_v45 = vmul.f32 0.5, %v11152_v13  ;;  %v8472_v42 = vpop.eup %8471 }
 0x479   : > { %v11358_v59 = vadd.f32 %v14752_v49, %v10492_v33  ;;  %v4223_v19 = vmul.f32 %v4159_v23, %v11177_v21  ;;  %v3777_v55 = vmul.f32 %v11162_v43, %v3713_v31  ;;  %v3994_v12 = vmul.f32 1.442695, %v3908_v58 }
 0x47a   : > { %v11365_v40 = vsel %vm2821_vm11, 1.0, %v14683_v53  ;;  %v3651_v26 = vmul.f32 %v11217_v35, %v3587_v1  ;;  %v3460_v8 = vadd.f32 1.4214138, %v3396_v7  ;;  %v3397_v13 = vmul.f32 %v11302_v48, %v3333_v46 }
 0x47b   : > { %v3334_v62 = vadd.f32 -1.4531521, %v3270_v32  ;;  %v3909_v49 = vmul.f32 %v3845_v38, %v11194_v22  ;;  %v3080_v63 = vadd.f32 1.0, %v3016_v36  ;;  %v3017_v2 = vmul.f32 0.3275911, %v11348_v27 }
 0x47c   : > { %v11372_v21 = vand.u32 2147483647, %v11351_v10  ;;  %v4160_v43 = vsub.f32 1.0, %v4096_v50  ;;  %v3778_v58 = vmul.f32 %v11187_v60, %v3714_v54  ;;  %v11376_v14 = vmul.f32 0.5, %v11172_v41 }
 0x47d   : > { %v11379_v1 = vmul.f32 0.70710677, %v11358_v59  ;;  %v4287_v7 = vadd.f32 1.0, %v4223_v19  ;;  %v4097_v46 = vmul.f32 %v8470_v9, %v3777_v55  ;;  %8477 = vpow2.f32 %v3994_v12 }
 0x47e   : > { %v3846_v22 = vsub.f32 0.0, %v11215_v24  ;;  %v3715_v38 = vadd.f32 0.2548296, %v3651_v26  ;;  %v3524_v23 = vmul.f32 %v11280_v56, %v3460_v8  ;;  %v3461_v31 = vadd.f32 1.4214138, %v3397_v13  ;;  %v8257_v8 = vld [vmem:[#allocation7 + $0x50] sm:$0xff]  }
 0x47f   : > { %vm2822_vm13 = vcmp.ge.f32.partialorder %v11197_v51, 0.0  ;;  %v3398_v32 = vmul.f32 %v11322_v39, %v3334_v62  ;;  %8479 = vrcp.f32 %v3080_v63  ;;  %v3081_v60 = vadd.f32 1.0, %v3017_v2  ;;  %v14753_v2 = vld [vmem:[#allocation60_spill] sm:$0xff]  ;;  %7277 = vmatprep.subr.bf16.mxu1 %v8257_v8 }
 0x480   : > { %v3018_v41 = vmul.f32 0.3275911, %v11372_v21  ;;  %v4224_v50 = vmul.f32 %v4160_v43, %v11211_v44  ;;  %v4098_v9 = vmul.f32 %v8472_v42, %v3778_v58  ;;  %v3996_v12 = vmul.f32 1.442695, %v3909_v49  ;;  %v11403_v49 = vpop.f32.mrb[46].mxu0  ;;  %v8258_v43 = vld [vmem:[#allocation7 + $0x10] sm:$0xff]  }
 0x481   : > { %v11386_v36 = vpop.eup %8473  ;;  %v11390_v54 = vand.u32 2147483647, %v11379_v1  ;;  %v4161_v55 = vsub.f32 1.0, %v4097_v46  ;;  %v11393_v26 = vsel %vm2822_vm13, 1.0, %v14683_v53  ;;  %v3910_v51 = vmul.f32 %v3846_v22, %v11215_v24  ;;  %14754 = vst [vmem:[#allocation13_spill] sm:$0xff] %v11403_v49  ;;  %7278 = vmatpush3.bf16.msra.mxu1 %v8258_v43 }
 0x482   : > { %v8476_v19 = vpop.eup %8475  ;;  %v11398_v63 = vadd.f32 %v14753_v2, %v10490_v30  ;;  %v3779_v13 = vmul.f32 %v11217_v35, %v3715_v38  ;;  %v3588_v44 = vadd.f32 -0.28449672, %v3524_v23  ;;  %v3525_v42 = vmul.f32 %v11302_v48, %v3461_v31  ;;  %v11410_v38 = vpop.f32.mrb[47].mxu0 }
 0x483   : > { %v3847_v62 = vsub.f32 0.0, %v11278_v17  ;;  %v3462_v58 = vadd.f32 1.4214138, %v3398_v32  ;;  %v3271_v46 = vmul.f32 1.0614054, %v11386_v36  ;;  %8481 = vrcp.f32 %v3081_v60  ;;  %14756 = vst [vmem:[#allocation29_spill] sm:$0xff] %v11410_v38 }
 0x484   : > { %v3082_v24 = vadd.f32 1.0, %v3018_v41  ;;  %v11407_v22 = vmul.f32 %v4287_v7, %v11130_v11  ;;  %v4288_v2 = vadd.f32 1.0, %v4224_v50  ;;  %v4162_v18 = vsub.f32 1.0, %v4098_v9  ;;  %v8259_v32 = vld [vmem:[#allocation7 + $0x58] sm:$0xff]  }
 0x485   : > { %v3019_v35 = vmul.f32 0.3275911, %v11390_v54  ;;  %8483 = vpow2.f32 %v3996_v12  ;;  %v3998_v23 = vmul.f32 1.442695, %v3910_v51  ;;  %vm2823_vm14 = vcmp.ge.f32.partialorder %v11254_v29, 0.0  ;;  %v8260_v50 = vld [vmem:[#allocation7 + $0x18] sm:$0xff]   ;;  %7279 = vmatprep.subr.bf16.mxu1 %v8259_v32 }
 0x486   : > { %14755 = vst [vmem:[#allocation28_spill] sm:$0xff] %v11407_v22  ;;  %v11414_v31 = vmul.f32 0.70710677, %v11398_v63  ;;  %v4225_v60 = vmul.f32 %v4161_v55, %v11270_v16  ;;  %v4099_v41 = vmul.f32 %v8476_v19, %v3779_v13  ;;  %v3652_v11 = vmul.f32 %v11280_v56, %v3588_v44  ;;  %7280 = vmatpush3.bf16.msra.mxu1 %v8260_v50  ;;  %v11427_v55 = vpop.f32.mrb[48].mxu0 }
 0x487   : > { %v3589_v7 = vadd.f32 -0.28449672, %v3525_v42  ;;  %v8478_v9 = vpop.eup %8477  ;;  %v3526_v8 = vmul.f32 %v11322_v39, %v3462_v58  ;;  %v3335_v38 = vadd.f32 -1.4531521, %v3271_v46  ;;  %v3911_v12 = vmul.f32 %v3847_v62, %v11278_v17  ;;  %14759 = vst [vmem:[#allocation48_spill] sm:$0xff] %v11427_v55 }
 0x488   : > { %8485 = vrcp.f32 %v3082_v24  ;;  %v11421_v51 = vmul.f32 %v4288_v2, %v11156_v52  ;;  %v4226_v43 = vmul.f32 %v4162_v18, %v11275_v34  ;;  %v11425_v16 = vmul.f32 0.5, %v11239_v28  ;;  %v14760_v18 = vld [vmem:[#allocation31_spill] sm:$0xff] }
 0x489   : > { %v3083_v19 = vadd.f32 1.0, %v3019_v35  ;;  %v11429_v13 = vpop.eup %8479  ;;  %8487 = vpow2.f32 %v3998_v23  ;;  %v11434_v17 = vsel %vm2823_vm14, 1.0, %v14683_v53  ;;  %v11437_v52 = vand.u32 2147483647, %v11414_v31 }
 0x48a   : > { %14757 = vst [vmem:[#allocation55_spill] sm:$0xff] %v11421_v51  ;;  %14758 = vst [vmem:[#allocation56_spill] sm:$0xff] %v11425_v16  ;;  %v11441_v34 = vadd.f32 %v14760_v18, %v10492_v33  ;;  %v4163_v28 = vsub.f32 1.0, %v4099_v41  ;;  %v3716_v44 = vadd.f32 0.2548296, %v3652_v11  ;;  %v3653_v42 = vmul.f32 %v11302_v48, %v3589_v7 }
 0x48b   : > { %v3848_v62 = vsub.f32 0.0, %v11328_v0  ;;  %v4289_v58 = vadd.f32 1.0, %v4225_v60  ;;  %v3590_v46 = vadd.f32 -0.28449672, %v3526_v8  ;;  %v3399_v24 = vmul.f32 %v11386_v36, %v3335_v38  ;;  %v14762_v60 = vld [vmem:[#allocation33_spill] sm:$0xff] }
 0x48c   : > { %v4000_v29 = vmul.f32 1.442695, %v3911_v12  ;;  %v4290_v2 = vadd.f32 1.0, %v4226_v43  ;;  %v11447_v35 = vmul.f32 0.5, %v11286_v6  ;;  %v3272_v23 = vmul.f32 1.0614054, %v11429_v13 }
 0x48d   : > { %8489 = vrcp.f32 %v3083_v19  ;;  %v11450_v32 = vpop.eup %8481  ;;  %vm2824_vm15 = vcmp.ge.f32.partialorder %v11305_v47, 0.0  ;;  %v3020_v41 = vmul.f32 0.3275911, %v11437_v52  ;;  %v11455_v11 = vmul.f32 0.70710677, %v11441_v34 }
 0x48e   : > { %14761 = vst [vmem:[#allocation19_spill] sm:$0xff] %v11447_v35  ;;  %v11459_v38 = vadd.f32 %v14762_v60, %v10490_v30  ;;  %v4227_v7 = vmul.f32 %v4163_v28, %v11298_v3  ;;  %v3780_v6 = vmul.f32 %v11280_v56, %v3716_v44  ;;  %v3717_v50 = vadd.f32 0.2548296, %v3653_v42  ;;  %v8261_v35 = vld [vmem:[#allocation7 + $0x60] sm:$0xff]  }
 0x48f   : > { %v3912_v8 = vmul.f32 %v3848_v62, %v11328_v0  ;;  %v8484_v12 = vpop.eup %8483  ;;  %v11465_v43 = vmul.f32 %v4289_v58, %v11235_v5  ;;  %v3654_v47 = vmul.f32 %v11322_v39, %v3590_v46  ;;  %v3463_v19 = vadd.f32 1.4214138, %v3399_v24  ;;  %7281 = vmatprep.subr.bf16.mxu1 %v8261_v35 }
 0x490   : > { %8491 = vpow2.f32 %v4000_v29  ;;  %v11469_v18 = vmul.f32 %v4290_v2, %v11245_v20  ;;  %v11472_v60 = vsel %vm2824_vm15, 1.0, %v14683_v53  ;;  %v3336_v3 = vadd.f32 -1.4531521, %v3272_v23 }
 0x491   : > { %14763 = vst [vmem:[#allocation53_spill] sm:$0xff] %v11465_v43  ;;  %v3273_v56 = vmul.f32 1.0614054, %v11450_v32  ;;  %v11478_v0 = vmul.f32 0.5, %v11309_v15  ;;  %v3084_v5 = vadd.f32 1.0, %v3020_v41  ;;  %v4291_v20 = vadd.f32 1.0, %v4227_v7 }
 0x492   : > { %14764 = vst [vmem:[#allocation57_spill] sm:$0xff] %v11469_v18  ;;  %v11475_v28 = vpop.eup %8485  ;;  %v11481_v44 = vand.u32 2147483647, %v11455_v11  ;;  %v11484_v42 = vmul.f32 0.70710677, %v11459_v38  ;;  %v4100_v62 = vmul.f32 %v8478_v9, %v3780_v6  ;;  %v3781_v58 = vmul.f32 %v11302_v48, %v3717_v50  ;;  %v14766_v15 = vld [vmem:[#allocation42_spill] sm:$0xff] }
 0x493   : > { %14765 = vst [vmem:[#allocation30_spill] sm:$0xff] %v11478_v0  ;;  %v4002_v46 = vmul.f32 1.442695, %v3912_v8  ;;  %v8488_v24 = vpop.eup %8487  ;;  %v3718_v29 = vadd.f32 0.2548296, %v3654_v47  ;;  %v3527_v2 = vmul.f32 %v11386_v36, %v3463_v19  ;;  %vm2825_vm2 = vcmp.ge.f32.partialorder %v11331_v37, 0.0 }
 0x494   : > { %v4689_v23 = vrot.slane %v14766_v15, 2  ;;  %v3400_v41 = vmul.f32 %v11429_v13, %v3336_v3  ;;  %v3337_v18 = vadd.f32 -1.4531521, %v3273_v56  ;;  %v3274_v51 = vmul.f32 1.0614054, %v11475_v28  ;;  %v14767_v43 = vld [vmem:[#allocation38_spill] sm:$0xff] }
 0x495   : > { %8493 = vrcp.f32 %v3084_v5  ;;  %v3021_v9 = vmul.f32 0.3275911, %v11481_v44  ;;  %v11495_v48 = vand.u32 2147483647, %v11484_v42  ;;  %v14768_v7 = vld [vmem:[#allocation41_spill] sm:$0xff]  ;;  %v11501_v8 = vmul.f32 %v4291_v20, %v11294_v57  ;;  %v11504_v56 = vpop.f32.mrb[49].mxu0 }
 0x496   : > { %v14350_v6 = vrot.slane %v14768_v7, 2  ;;  %v4164_v47 = vsub.f32 1.0, %v4100_v62  ;;  %v4101_v19 = vmul.f32 %v8484_v12, %v3781_v58  ;;  %v3849_v3 = vsub.f32 0.0, %v11348_v27  ;;  %14770 = vst [vmem:[#allocation52_spill] sm:$0xff] %v11504_v56  ;;  %v14776_v56 = vld [vmem:[#allocation37_spill] sm:$0xff] }
 0x497   : > { %v11498_v50 = vpop.eup %8489  ;;  %14769 = vst [vmem:[#allocation20_spill] sm:$0xff] %v11501_v8  ;;  %v3782_v5 = vmul.f32 %v11322_v39, %v3718_v29  ;;  %v3591_v55 = vadd.f32 -0.28449672, %v3527_v2  ;;  %v14772_v22 = vrot.slane %v14767_v43, 2  ;;  %v3464_v20 = vadd.f32 1.4214138, %v3400_v41 }
 0x498   : > { %v4745_v49 = vsel %vm989_vm8, %v4689_v23, %v14350_v6  ;;  %v3401_v12 = vmul.f32 %v11450_v32, %v3337_v18  ;;  %v3338_v62 = vadd.f32 -1.4531521, %v3274_v51  ;;  %v11521_v39 = vsel %vm2825_vm2, 1.0, %v14683_v53  ;;  %v14773_v51 = vld [vmem:[#allocation39_spill] sm:$0xff]  ;;  %v14774_v41 = vld [vmem:[#allocation40_spill] sm:$0xff] }
 0x499   : > { %v4747_v57 = vsel %vm989_vm8, %v14772_v22, %v4689_v23  ;;  %v3275_v29 = vmul.f32 1.0614054, %v11498_v50  ;;  %v3085_v2 = vadd.f32 1.0, %v3021_v9  ;;  %v3022_v6 = vmul.f32 0.3275911, %v11495_v48 }
 0x49a   : > { %v5175_v58 = vpack.c.bf16 %v4745_v49, %v4747_v57  ;;  %v11516_v8 = vpop.eup %8491  ;;  %v4228_v43 = vmul.f32 %v4164_v47, %v11325_v25  ;;  %v4165_v22 = vsub.f32 1.0, %v4101_v19  ;;  %8495 = vpow2.f32 %v4002_v46 }
 0x49b   : > { %v11528_v49 = vadd.f32 %v14773_v51, %v10492_v33  ;;  %v4102_v18 = vmul.f32 %v8488_v24, %v3782_v5  ;;  %v3913_v23 = vmul.f32 %v3849_v3, %v11348_v27  ;;  %v3850_v37 = vsub.f32 0.0, %v11372_v21  ;;  %v14779_v3 = vld [vmem:[#allocation35_spill] sm:$0xff] }
 0x49c   : > { %6649 = vmatprep.mubr.bf16.mxu0 %v5175_v58  ;;  %v14775_v57 = vrot.slane %v14774_v41, 2  ;;  %v14777_v9 = vrot.slane %v14776_v56, 2  ;;  %v3655_v25 = vmul.f32 %v11386_v36, %v3591_v55  ;;  %v3528_v46 = vmul.f32 %v11429_v13, %v3464_v20 }
 0x49d   : > { %v3465_v47 = vadd.f32 1.4214138, %v3401_v12  ;;  %v3402_v19 = vmul.f32 %v11475_v28, %v3338_v62  ;;  %v3339_v58 = vadd.f32 -1.4531521, %v3275_v29  ;;  %8497 = vrcp.f32 %v3085_v2  ;;  %v11551_v12 = vpop.f32.mrb[50].mxu0  ;;  %v8262_v62 = vld [vmem:[#allocation7 + $0x20] sm:$0xff]  }
 0x49e   : > { %v4744_v0 = vsel %vm989_vm8, %v14777_v9, %v14775_v57  ;;  %v3086_v24 = vadd.f32 1.0, %v3022_v6  ;;  %v14778_v27 = vmov %v14777_v9  ;;  %v14780_v5 = vrot.slane %v14779_v3, 2  ;;  %14781 = vst [vmem:[#allocation60_spill] sm:$0xff] %v11551_v12  ;;  %7282 = vmatpush3.bf16.msra.mxu1 %v8262_v62 }
 0x49f   : > { %v4292_v16 = vadd.f32 1.0, %v4228_v43  ;;  %v4229_v57 = vmul.f32 %v4165_v22, %v11365_v40  ;;  %v11549_v55 = vmul.f32 0.70710677, %v11528_v49  ;;  %v11553_v29 = vpop.eup %8493  ;;  %v4166_v6 = vsub.f32 1.0, %v4102_v18 }
 0x4a0   : > { %v4746_v51 = vsel %vm989_vm8, %v14780_v5, %v14778_v27  ;;  %v4004_v2 = vmul.f32 1.442695, %v3913_v23  ;;  %vm2826_vm4 = vcmp.ge.f32.partialorder %v11351_v10, 0.0  ;;  %v3914_v9 = vmul.f32 %v3850_v37, %v11372_v21  ;;  %v11557_v27 = vpop.f32.mrb[51].mxu0 }
 0x4a1   : > { %v5174_v20 = vpack.c.bf16 %v4744_v0, %v4746_v51  ;;  %14782 = vst [vmem:[#allocation31_spill] sm:$0xff] %v11557_v27  ;;  %v3719_v43 = vadd.f32 0.2548296, %v3655_v25  ;;  %v3592_v40 = vadd.f32 -0.28449672, %v3528_v46  ;;  %v11560_v22 = vmul.f32 0.5, %v11335_v61 }
 0x4a2   : > { %v3851_v0 = vsub.f32 0.0, %v11390_v54  ;;  %v3529_v5 = vmul.f32 %v11450_v32, %v3465_v47  ;;  %v3466_v18 = vadd.f32 1.4214138, %v3402_v19  ;;  %v3403_v23 = vmul.f32 %v11498_v50, %v3339_v58  ;;  %v8263_v51 = vld [vmem:[#allocation7 + $0x68] sm:$0xff]   ;;  %v14784_v19 = vld [vmem:[#allocation44_spill] sm:$0xff]  ;;  %v11585_v62 = vpop.f32.mrb[52].mxu0 }
 0x4a3   : > { %6650 = vmatmul.mubr.bf16.vlgmr.msra.gmra.mrb[64].mxu0 %v5174_v20  ;;  %8499 = vrcp.f32 %v3086_v24  ;;  %v4293_v21 = vadd.f32 1.0, %v4229_v57  ;;  %v11568_v35 = vsel %vm2826_vm4, 1.0, %v14683_v53  ;;  %v3276_v61 = vmul.f32 1.0614054, %v11553_v29  ;;  %7283 = vmatprep.subr.bf16.mxu1 %v8263_v51  ;;  %v8264_v24 = vld [vmem:[#allocation7 + $0x28] sm:$0xff]   ;;  %14785 = vst [vmem:[#allocation12_spill] sm:$0xff] %v11585_v62 }
 0x4a4   : > { %v11572_v37 = vand.u32 2147483647, %v11549_v55  ;;  %v11575_v25 = vmul.f32 %v4292_v16, %v11312_v4  ;;  %v4230_v46 = vmul.f32 %v4166_v6, %v11393_v26  ;;  %v4006_v47 = vmul.f32 1.442695, %v3914_v9  ;;  %v8496_v10 = vpop.eup %8495  ;;  %7284 = vmatpush3.bf16.msra.mxu1 %v8264_v24 }
 0x4a5   : > { %v11580_v58 = vadd.f32 %v14784_v19, %v10490_v30  ;;  %v3783_v57 = vmul.f32 %v11386_v36, %v3719_v43  ;;  %8501 = vpow2.f32 %v4004_v2  ;;  %vm2827_vm5 = vcmp.ge.f32.partialorder %v11379_v1, 0.0 }
 0x4a6   : > { %14783 = vst [vmem:[#allocation33_spill] sm:$0xff] %v11575_v25  ;;  %v3915_v20 = vmul.f32 %v3851_v0, %v11390_v54  ;;  %v3656_v4 = vmul.f32 %v11429_v13, %v3592_v40  ;;  %v3593_v26 = vadd.f32 -0.28449672, %v3529_v5  ;;  %v3530_v16 = vmul.f32 %v11475_v28, %v3466_v18 }
 0x4a7   : > { %v3467_v6 = vadd.f32 1.4214138, %v3403_v23  ;;  %v11590_v9 = vmul.f32 %v4293_v21, %v11354_v45  ;;  %v11593_v51 = vmul.f32 0.5, %v11358_v59  ;;  %v3340_v36 = vadd.f32 -1.4531521, %v3276_v61  ;;  %v11596_v2 = vpop.eup %8497 }
 0x4a8   : > { %v3023_v1 = vmul.f32 0.3275911, %v11572_v37  ;;  %v4294_v54 = vadd.f32 1.0, %v4230_v46  ;;  %8503 = vpow2.f32 %v4006_v47  ;;  %v11599_v43 = vsel %vm2827_vm5, 1.0, %v14683_v53 }
 0x4a9   : > { %14786 = vst [vmem:[#allocation39_spill] sm:$0xff] %v11590_v9  ;;  %v11602_v40 = vmul.f32 0.70710677, %v11580_v58  ;;  %v4103_v0 = vmul.f32 %v11516_v8, %v3783_v57  ;;  %v4008_v45 = vmul.f32 1.442695, %v3915_v20  ;;  %vm2828_vm9 = vcmp.ge.f32.partialorder %v11414_v31, 0.0 }
 0x4aa   : > { %v3852_v59 = vsub.f32 0.0, %v11437_v52  ;;  %v3720_v5 = vadd.f32 0.2548296, %v3656_v4  ;;  %v3657_v18 = vmul.f32 %v11450_v32, %v3593_v26  ;;  %v3594_v23 = vadd.f32 -0.28449672, %v3530_v16  ;;  %v14788_v20 = vld [vmem:[#allocation46_spill] sm:$0xff] }
 0x4ab   : > { %v3531_v21 = vmul.f32 %v11498_v50, %v3467_v6  ;;  %v11610_v61 = vmul.f32 0.5, %v11398_v63  ;;  %v3404_v46 = vmul.f32 %v11553_v29, %v3340_v36  ;;  %v3277_v47 = vmul.f32 1.0614054, %v11596_v2  ;;  %v14789_v16 = vld [vmem:[#allocation45_spill] sm:$0xff] }
 0x4ac   : > { %v3087_v19 = vadd.f32 1.0, %v3023_v1  ;;  %v11617_v31 = vmul.f32 %v4294_v54, %v11376_v14  ;;  %v11620_v24 = vsel %vm2828_vm9, 1.0, %v14683_v53  ;;  %v11623_v57 = vand.u32 2147483647, %v11602_v40 }
 0x4ad   : > { %v11614_v8 = vpop.eup %8499  ;;  %v11627_v63 = vadd.f32 %v14788_v20, %v10492_v33  ;;  %v4167_v4 = vsub.f32 1.0, %v4103_v0  ;;  %8505 = vpow2.f32 %v4008_v45  ;;  %v3916_v26 = vmul.f32 %v3852_v59, %v11437_v52  ;;  %v14791_v59 = vld [vmem:[#allocation47_spill] sm:$0xff] }
 0x4ae   : > { %14787 = vst [vmem:[#allocation44_spill] sm:$0xff] %v11617_v31  ;;  %v11632_v6 = vadd.f32 %v14789_v16, %v10490_v30  ;;  %v3784_v14 = vmul.f32 %v11429_v13, %v3720_v5  ;;  %v3721_v36 = vadd.f32 0.2548296, %v3657_v18  ;;  %v3658_v1 = vmul.f32 %v11475_v28, %v3594_v23 }
 0x4af   : > { %v3595_v54 = vadd.f32 -0.28449672, %v3531_v21  ;;  %v8502_v3 = vpop.eup %8501  ;;  %v3468_v56 = vadd.f32 1.4214138, %v3404_v46  ;;  %v3341_v31 = vadd.f32 -1.4531521, %v3277_v47  ;;  %8507 = vrcp.f32 %v3087_v19 }
 0x4b0   : > { %v3278_v20 = vmul.f32 1.0614054, %v11614_v8  ;;  %v11638_v0 = vmul.f32 0.5, %v11441_v34  ;;  %v3024_v52 = vmul.f32 0.3275911, %v11623_v57  ;;  %v4693_v13 = vrot.slane %v14791_v59, 2 }
 0x4b1   : > { %v11642_v45 = vmul.f32 0.70710677, %v11627_v63  ;;  %v4231_v5 = vmul.f32 %v4167_v4, %v11434_v17  ;;  %v4010_v18 = vmul.f32 1.442695, %v3916_v26  ;;  %v11647_v23 = vmul.f32 0.70710677, %v11632_v6 }
 0x4b2   : > { %14790 = vst [vmem:[#allocation46_spill] sm:$0xff] %v11638_v0  ;;  %v14792_v21 = vld [vmem:[#allocation61_spill] sm:$0xff]  ;;  %v8504_v47 = vpop.eup %8503  ;;  %v4104_v19 = vmul.f32 %v8496_v10, %v3784_v14  ;;  %v3785_v34 = vmul.f32 %v11450_v32, %v3721_v36  ;;  %v3722_v16 = vadd.f32 0.2548296, %v3658_v1  ;;  %vm2829_vm11 = vcmp.ge.f32.partialorder %v11455_v11, 0.0  ;;  %v11666_v14 = vpop.f32.mrb[53].mxu0 }
 0x4b3   : > { %v14355_v46 = vrot.slane %v14792_v21, 2  ;;  %v3659_v25 = vmul.f32 %v11498_v50, %v3595_v54  ;;  %v3532_v62 = vmul.f32 %v11553_v29, %v3468_v56  ;;  %v3405_v59 = vmul.f32 %v11596_v2, %v3341_v31  ;;  %14794 = vst [vmem:[#allocation45_spill] sm:$0xff] %v11666_v14 }
 0x4b4   : > { %v3342_v4 = vadd.f32 -1.4531521, %v3278_v20  ;;  %v3088_v26 = vadd.f32 1.0, %v3024_v52  ;;  %v11660_v10 = vand.u32 2147483647, %v11642_v45  ;;  %v14793_v32 = vrot.slane %v14768_v7, 2 }
 0x4b5   : > { %v4741_v17 = vsel %vm989_vm8, %v4693_v13, %v14355_v46  ;;  %v11668_v56 = vadd.f32 1.0, %v4231_v5  ;;  %v11671_v31 = vsel %vm2829_vm11, 1.0, %v14683_v53  ;;  %v11674_v36 = vand.u32 2147483647, %v11647_v23 }
 0x4b6   : > { %v4743_v11 = vsel %vm989_vm8, %v14793_v32, %v4693_v13  ;;  %v4168_v54 = vsub.f32 1.0, %v4104_v19  ;;  %v3786_v20 = vmul.f32 %v11475_v28, %v3722_v16  ;;  %8509 = vpow2.f32 %v4010_v18  ;;  %v14796_v18 = vld [vmem:[#allocation54_spill] sm:$0xff] }
 0x4b7   : > { %v5185_v1 = vpack.c.bf16 %v4741_v17, %v4743_v11  ;;  %v3853_v52 = vsub.f32 0.0, %v11481_v44  ;;  %v8506_v46 = vpop.eup %8505  ;;  %v4105_v7 = vmul.f32 %v8502_v3, %v3785_v34  ;;  %v3723_v13 = vadd.f32 0.2548296, %v3659_v25  ;;  %v14798_v3 = vld [vmem:[#allocation43_spill] sm:$0xff] }
 0x4b8   : > { %v3596_v32 = vadd.f32 -0.28449672, %v3532_v62  ;;  %v11679_v5 = vmul.f32 0.5, %v11459_v38  ;;  %v3469_v14 = vadd.f32 1.4214138, %v3405_v59  ;;  %v3406_v9 = vmul.f32 %v11614_v8, %v3342_v4  ;;  %v14799_v62 = vld [vmem:[#allocation49_spill] sm:$0xff] }
 0x4b9   : > { %6657 = vmatprep.mubr.bf16.mxu0 %v5185_v1  ;;  %8511 = vrcp.f32 %v3088_v26  ;;  %v3025_v17 = vmul.f32 0.3275911, %v11660_v10  ;;  %v11683_v19 = vpop.eup %8507  ;;  %v3026_v28 = vmul.f32 0.3275911, %v11674_v36  ;;  %v11688_v16 = vadd.f32 %v14796_v18, %v10492_v33 }
 0x4ba   : > { %14795 = vst [vmem:[#allocation63_spill] sm:$0xff] %v11679_v5  ;;  %v4692_v25 = vrot.slane %v14798_v3, 2  ;;  %v14358_v38 = vrot.slane %v14799_v62, 2  ;;  %v4232_v34 = vmul.f32 %v4168_v54, %v11472_v60  ;;  %v4106_v59 = vmul.f32 %v8504_v47, %v3786_v20 }
 0x4bb   : > { %14797 = vst [vmem:[#allocation54_spill] sm:$0xff] %v11688_v16  ;;  %v3917_v4 = vmul.f32 %v3853_v52, %v11481_v44  ;;  %vm2830_vm13 = vcmp.ge.f32.partialorder %v11484_v42, 0.0  ;;  %v4169_v26 = vsub.f32 1.0, %v4105_v7  ;;  %v3787_v11 = vmul.f32 %v11498_v50, %v3723_v13  ;;  %v8265_v44 = vld [vmem:[#allocation7 + $0x70] sm:$0xff]  }
 0x4bc   : > { %v3660_v1 = vmul.f32 %v11553_v29, %v3596_v32  ;;  %v3854_v27 = vsub.f32 0.0, %v11495_v48  ;;  %v3533_v18 = vmul.f32 %v11596_v2, %v3469_v14  ;;  %v3279_v3 = vmul.f32 1.0614054, %v11683_v19  ;;  %v11711_v14 = vpop.f32.mrb[54].mxu0  ;;  %7285 = vmatprep.subr.bf16.mxu1 %v8265_v44 }
 0x4bd   : > { %v3089_v12 = vadd.f32 1.0, %v3025_v17  ;;  %v4740_v60 = vsel %vm989_vm8, %v4692_v25, %v14358_v38  ;;  %v3470_v47 = vadd.f32 1.4214138, %v3406_v9  ;;  %v3090_v54 = vadd.f32 1.0, %v3026_v28  ;;  %14801 = vst [vmem:[#allocation64_spill] sm:$0xff] %v11711_v14  ;;  %v11714_v38 = vpop.f32.mrb[55].mxu0 }
 0x4be   : > { %v11705_v7 = vmul.f32 0.70710677, %v11688_v16  ;;  %v14800_v50 = vrot.slane %v14774_v41, 2  ;;  %v4170_v52 = vsub.f32 1.0, %v4106_v59  ;;  %v4012_v13 = vmul.f32 1.442695, %v3917_v4 }
 0x4bf   : > { %v3855_v32 = vsub.f32 0.0, %v11572_v37  ;;  %14802 = vst [vmem:[#allocation65_spill] sm:$0xff] %v11714_v38  ;;  %v8266_v9 = vld [vmem:[#allocation7 + $0x30] sm:$0xff]   ;;  %v4296_v28 = vadd.f32 1.0, %v4232_v34  ;;  %v4107_v5 = vmul.f32 %v8506_v46, %v3787_v11  ;;  %v3918_v16 = vmul.f32 %v3854_v27, %v11495_v48  ;;  %v14803_v41 = vld [vmem:[#allocation59_spill] sm:$0xff] }
 0x4c0   : > { %v4742_v20 = vsel %vm989_vm8, %v14800_v50, %v4692_v25  ;;  %v11719_v0 = vadd.f32 %v14803_v41, %v10490_v30  ;;  %v8510_v25 = vpop.eup %8509  ;;  %v4233_v50 = vmul.f32 %v4169_v26, %v11521_v39  ;;  %v3724_v59 = vadd.f32 0.2548296, %v3660_v1  ;;  %7286 = vmatpush3.bf16.msra.mxu1 %v8266_v9  ;;  %v8267_v48 = vld [vmem:[#allocation7 + $0x78] sm:$0xff]   ;;  %v14804_v41 = vld [vmem:[#allocation56_spill] sm:$0xff] }
 0x4c1   : > { %v5184_v17 = vpack.c.bf16 %v4740_v60, %v4742_v20  ;;  %v3343_v4 = vadd.f32 -1.4531521, %v3279_v3  ;;  %8513 = vrcp.f32 %v3089_v12  ;;  %v3597_v60 = vadd.f32 -0.28449672, %v3533_v18  ;;  %v8268_v26 = vld [vmem:[#allocation7 + $0x38] sm:$0xff]   ;;  %7287 = vmatprep.subr.bf16.mxu1 %v8267_v48 }
 0x4c2   : > { %v3534_v44 = vmul.f32 %v11614_v8, %v3470_v47  ;;  %8515 = vrcp.f32 %v3090_v54  ;;  %v11724_v46 = vand.u32 2147483647, %v11705_v7  ;;  %v11730_v34 = vmul.f32 %v11668_v56, %v14804_v41  ;;  %v11742_v47 = vpop.f32.mrb[56].mxu0  ;;  %v14807_v56 = vld [vmem:[#allocation19_spill] sm:$0xff] }
 0x4c3   : > { %6658 = vmatmul.mubr.bf16.gmra.mrb[68].mxu0 %v5184_v17  ;;  %v11726_v27 = vpop.eup %8511  ;;  %v4234_v39 = vmul.f32 %v4170_v52, %v11568_v35  ;;  %v11736_v12 = vsel %vm2830_vm13, 1.0, %v14683_v53  ;;  %v3919_v3 = vmul.f32 %v3855_v32, %v11572_v37  ;;  %v4171_v11 = vsub.f32 1.0, %v4107_v5  ;;  %14806 = vst [vmem:[#allocation56_spill] sm:$0xff] %v11742_v47 }
 0x4c4   : > { %14805 = vst [vmem:[#allocation59_spill] sm:$0xff] %v11730_v34  ;;  %8517 = vpow2.f32 %v4012_v13  ;;  %v4014_v1 = vmul.f32 1.442695, %v3918_v16  ;;  %v11740_v18 = vmul.f32 0.70710677, %v11719_v0  ;;  %v11745_v54 = vmul.f32 %v4296_v28, %v14807_v56  ;;  %7288 = vmatpush3.bf16.msra.mxu1 %v8268_v26 }
 0x4c5   : > { %v4297_v35 = vadd.f32 1.0, %v4233_v50  ;;  %vm2831_vm14 = vcmp.ge.f32.partialorder %v11549_v55, 0.0  ;;  %v3407_v42 = vmul.f32 %v11683_v19, %v3343_v4  ;;  %v3788_v37 = vmul.f32 %v11553_v29, %v3724_v59  ;;  %v14809_v29 = vld [vmem:[#allocation58_spill] sm:$0xff] }
 0x4c6   : > { %14808 = vst [vmem:[#allocation19_spill] sm:$0xff] %v11745_v54  ;;  %v3661_v5 = vmul.f32 %v11596_v2, %v3597_v60  ;;  %v3598_v16 = vadd.f32 -0.28449672, %v3534_v44  ;;  %v3027_v20 = vmul.f32 0.3275911, %v11724_v46  ;;  %v4298_v52 = vadd.f32 1.0, %v4234_v39 }
 0x4c7   : > { %v11753_v13 = vmul.f32 0.5, %v11528_v49  ;;  %v4016_v32 = vmul.f32 1.442695, %v3919_v3  ;;  %v3280_v17 = vmul.f32 1.0614054, %v11726_v27  ;;  %v4235_v9 = vmul.f32 %v4171_v11, %v11599_v43  ;;  %v14810_v59 = vld [vmem:[#allocation30_spill] sm:$0xff] }
 0x4c8   : > { %8519 = vpow2.f32 %v4014_v1  ;;  %v11758_v28 = vand.u32 2147483647, %v11740_v18  ;;  %v11762_v50 = vadd.f32 %v14809_v29, %v10492_v33  ;;  %v11765_v4 = vmul.f32 %v4297_v35, %v14810_v59  ;;  %v14815_v59 = vld [vmem:[#allocation51_spill] sm:$0xff] }
 0x4c9   : > { %v11770_v49 = vsel %vm2831_vm14, 1.0, %v14683_v53  ;;  %v3471_v60 = vadd.f32 1.4214138, %v3407_v42  ;;  %v11773_v44 = vmul.f32 0.5, %v11580_v58  ;;  %v4108_v43 = vmul.f32 %v8510_v25, %v3788_v37  ;;  %v14813_v42 = vld [vmem:[#allocation62_spill] sm:$0xff] }
 0x4ca   : > { %14811 = vst [vmem:[#allocation58_spill] sm:$0xff] %v11765_v4  ;;  %v3725_v48 = vadd.f32 0.2548296, %v3661_v5  ;;  %v3662_v41 = vmul.f32 %v11614_v8, %v3598_v16  ;;  %v3091_v39 = vadd.f32 1.0, %v3027_v20  ;;  %v11779_v26 = vmul.f32 %v4298_v52, %v11560_v22  ;;  %v11823_v4 = vpop.f32.mrb[57].mxu0 }
 0x4cb   : > { %v11776_v3 = vpop.eup %8513  ;;  %8521 = vpow2.f32 %v4016_v32  ;;  %v3344_v11 = vadd.f32 -1.4531521, %v3280_v17  ;;  %v11782_v55 = vmul.f32 0.5, %v11627_v63  ;;  %v4299_v56 = vadd.f32 1.0, %v4235_v9  ;;  %v14814_v63 = vld [vmem:[#allocation23_spill] sm:$0xff]  ;;  %14816 = vst [vmem:[#allocation62_spill] sm:$0xff] %v11823_v4 }
 0x4cc   : > { %14812 = vst [vmem:[#allocation30_spill] sm:$0xff] %v11779_v26  ;;  %v11784_v1 = vpop.eup %8515  ;;  %vm2832_vm15 = vcmp.ge.f32.partialorder %v11602_v40, 0.0  ;;  %v3028_v58 = vmul.f32 0.3275911, %v11758_v28  ;;  %v11789_v25 = vmul.f32 0.70710677, %v11762_v50  ;;  %v3535_v35 = vmul.f32 %v11683_v19, %v3471_v60 }
 0x4cd   : > { %v3856_v22 = vsub.f32 0.0, %v11623_v57  ;;  %v11795_v37 = vadd.f32 %v14813_v42, %v10490_v30  ;;  %v14364_v5 = vrot.slane %v14814_v63, 2  ;;  %v4172_v20 = vsub.f32 1.0, %v4108_v43 }
 0x4ce   : > { %v8518_v16 = vpop.eup %8517  ;;  %v3789_v52 = vmul.f32 %v11596_v2, %v3725_v48  ;;  %v3726_v32 = vadd.f32 0.2548296, %v3662_v41  ;;  %8523 = vrcp.f32 %v3091_v39  ;;  %v3408_v17 = vmul.f32 %v11726_v27, %v3344_v11 }
 0x4cf   : > { %v3281_v9 = vmul.f32 1.0614054, %v11776_v3  ;;  %v3282_v29 = vmul.f32 1.0614054, %v11784_v1  ;;  %v4697_v60 = vrot.slane %v14815_v59, 2  ;;  %v11806_v42 = vsel %vm2832_vm15, 1.0, %v14683_v53 }
 0x4d0   : > { %vm2833_vm2 = vcmp.ge.f32.partialorder %v11642_v45, 0.0  ;;  %v3092_v43 = vadd.f32 1.0, %v3028_v58  ;;  %v11810_v2 = vand.u32 2147483647, %v11789_v25  ;;  %v3599_v48 = vadd.f32 -0.28449672, %v3535_v35 }
 0x4d1   : > { %v3920_v41 = vmul.f32 %v3856_v22, %v11623_v57  ;;  %v11814_v39 = vmul.f32 0.70710677, %v11795_v37  ;;  %v4737_v11 = vsel %vm989_vm8, %v4697_v60, %v14364_v5  ;;  %v4236_v59 = vmul.f32 %v4172_v20, %v11620_v24  ;;  %v14818_v24 = vld [vmem:[#allocation50_spill] sm:$0xff] }
 0x4d2   : > { %v8520_v40 = vpop.eup %8519  ;;  %v4109_v54 = vmul.f32 %v8518_v16, %v3789_v52  ;;  %v3790_v58 = vmul.f32 %v11614_v8, %v3726_v32  ;;  %v3857_v26 = vsub.f32 0.0, %v11660_v10  ;;  %v3472_v35 = vadd.f32 1.4214138, %v3408_v17 }
 0x4d3   : > { %v3345_v57 = vadd.f32 -1.4531521, %v3281_v9  ;;  %v3346_v22 = vadd.f32 -1.4531521, %v3282_v29  ;;  %v14817_v47 = vrot.slane %v14792_v21, 2  ;;  %8525 = vrcp.f32 %v3092_v43  ;;  %v14820_v29 = vld [vmem:[#allocation22_spill] sm:$0xff] }
 0x4d4   : > { %v3029_v5 = vmul.f32 0.3275911, %v11810_v2  ;;  %v11832_v16 = vadd.f32 %v14818_v24, %v10492_v33  ;;  %v11835_v20 = vmul.f32 %v4299_v56, %v11593_v51  ;;  %v3663_v52 = vmul.f32 %v11683_v19, %v3599_v48  ;;  %v14821_v48 = vld [vmem:[#allocation32_spill] sm:$0xff] }
 0x4d5   : > { %v4739_v38 = vsel %vm989_vm8, %v14817_v47, %v4697_v60  ;;  %v8522_v8 = vpop.eup %8521  ;;  %v11841_v32 = vsel %vm2833_vm2, 1.0, %v14683_v53  ;;  %v11844_v47 = vand.u32 2147483647, %v11814_v39  ;;  %v4110_v17 = vmul.f32 %v8520_v40, %v3790_v58 }
 0x4d6   : > { %v5195_v14 = vpack.c.bf16 %v4737_v11, %v4739_v38  ;;  %14819 = vst [vmem:[#allocation50_spill] sm:$0xff] %v11835_v20  ;;  %v4018_v38 = vmul.f32 1.442695, %v3920_v41  ;;  %v11847_v9 = vmul.f32 0.70710677, %v11832_v16  ;;  %v4696_v60 = vrot.slane %v14820_v29, 2 }
 0x4d7   : > { %v4300_v51 = vadd.f32 1.0, %v4236_v59  ;;  %v4173_v56 = vsub.f32 1.0, %v4109_v54  ;;  %v3921_v43 = vmul.f32 %v3857_v26, %v11660_v10  ;;  %v14368_v11 = vrot.slane %v14821_v48, 2 }
 0x4d8   : > { %6665 = vmatprep.mubr.bf16.mxu0 %v5195_v14  ;;  %v11852_v45 = vpop.eup %8523  ;;  %v3536_v24 = vmul.f32 %v11726_v27, %v3472_v35  ;;  %v3409_v21 = vmul.f32 %v11776_v3, %v3345_v57  ;;  %v3410_v41 = vmul.f32 %v11784_v1, %v3346_v22  ;;  %v3093_v14 = vadd.f32 1.0, %v3029_v5 }
 0x4d9   : > { %v3727_v40 = vadd.f32 0.2548296, %v3663_v52  ;;  %v3030_v58 = vmul.f32 0.3275911, %v11844_v47  ;;  %v11859_v29 = vand.u32 2147483647, %v11847_v9  ;;  %v4736_v10 = vsel %vm989_vm8, %v4696_v60, %v14368_v11 }
 0x4da   : > { %v4174_v54 = vsub.f32 1.0, %v4110_v17  ;;  %8527 = vpow2.f32 %v4018_v38  ;;  %v3858_v26 = vsub.f32 0.0, %v11674_v36  ;;  %v14822_v59 = vrot.slane %v14799_v62, 2 }
 0x4db   : > { %v4237_v35 = vmul.f32 %v4173_v56, %v11671_v31  ;;  %v4020_v57 = vmul.f32 1.442695, %v3921_v43  ;;  %v3283_v22 = vmul.f32 1.0614054, %v11852_v45  ;;  %v3600_v4 = vadd.f32 -0.28449672, %v3536_v24 }
 0x4dc   : > { %v4738_v5 = vsel %vm989_vm8, %v14822_v59, %v4696_v60  ;;  %v3473_v20 = vadd.f32 1.4214138, %v3409_v21  ;;  %v3474_v34 = vadd.f32 1.4214138, %v3410_v41  ;;  %8529 = vrcp.f32 %v3093_v14  ;;  %v11877_v60 = vpop.f32.mrb[58].mxu0 }
 0x4dd   : > { %v5194_v52 = vpack.c.bf16 %v4736_v10, %v4738_v5  ;;  %v3791_v17 = vmul.f32 %v11683_v19, %v3727_v40  ;;  %v11874_v38 = vmul.f32 0.5, %v11632_v6  ;;  %v3094_v11 = vadd.f32 1.0, %v3030_v58  ;;  %14823 = vst [vmem:[#allocation66_spill] sm:$0xff] %v11877_v60  ;;  %v11879_v31 = vpop.eup %8525  ;;  %v14825_v19 = vld [vmem:[#allocation34_spill] sm:$0xff] }
 0x4de   : > { %v3031_v62 = vmul.f32 0.3275911, %v11859_v29  ;;  %v11882_v56 = vmul.f32 %v4300_v51, %v11610_v61  ;;  %v4238_v21 = vmul.f32 %v4174_v54, %v11736_v12  ;;  %v3922_v43 = vmul.f32 %v3858_v26, %v11674_v36 }
 0x4df   : > { %6666 = vmatmul.mubr.bf16.gmra.mrb[72].mxu0 %v5194_v52  ;;  %v11888_v24 = vadd.f32 %v14825_v19, %v10490_v30  ;;  %8531 = vpow2.f32 %v4020_v57  ;;  %vm2834_vm4 = vcmp.ge.f32.partialorder %v11647_v23, 0.0  ;;  %v3347_v6 = vadd.f32 -1.4531521, %v3283_v22  ;;  %v14831_v19 = vld [vmem:[#allocation63_spill] sm:$0xff] }
 0x4e0   : > { %14824 = vst [vmem:[#allocation67_spill] sm:$0xff] %v11882_v56  ;;  %v3859_v41 = vsub.f32 0.0, %v11724_v46  ;;  %v4301_v14 = vadd.f32 1.0, %v4237_v35  ;;  %v3664_v40 = vmul.f32 %v11726_v27, %v3600_v4  ;;  %v3537_v61 = vmul.f32 %v11776_v3, %v3473_v20 }
 0x4e1   : > { %v3538_v51 = vmul.f32 %v11784_v1, %v3474_v34  ;;  %v4111_v12 = vmul.f32 %v8522_v8, %v3791_v17  ;;  %v3284_v36 = vmul.f32 1.0614054, %v11879_v31  ;;  %8533 = vrcp.f32 %v3094_v11  ;;  %v14826_v34 = vld [vmem:[#allocation25_spill] sm:$0xff]  ;;  %v14829_v17 = vld [vmem:[#allocation54_spill] sm:$0xff] }
 0x4e2   : > { %v3095_v58 = vadd.f32 1.0, %v3031_v62  ;;  %v4302_v10 = vadd.f32 1.0, %v4238_v21  ;;  %v11897_v54 = vsel %vm2834_vm4, 1.0, %v14683_v53  ;;  %v4022_v23 = vmul.f32 1.442695, %v3922_v43  ;;  %v14827_v62 = vld [vmem:[#allocation46_spill] sm:$0xff] }
 0x4e3   : > { %v11900_v26 = vmul.f32 0.70710677, %v11888_v24  ;;  %v3411_v59 = vmul.f32 %v11852_v45, %v3347_v6  ;;  %v3923_v4 = vmul.f32 %v3859_v41, %v11724_v46  ;;  %v3860_v20 = vsub.f32 0.0, %v11758_v28 }
 0x4e4   : > { %v11907_v8 = vadd.f32 %v14826_v34, %v10492_v33  ;;  %v8528_v11 = vpop.eup %8527  ;;  %v11910_v5 = vmul.f32 %v4301_v14, %v14827_v62  ;;  %v3728_v35 = vadd.f32 0.2548296, %v3664_v40  ;;  %v3601_v57 = vadd.f32 -0.28449672, %v3537_v61 }
 0x4e5   : > { %v3602_v22 = vadd.f32 -0.28449672, %v3538_v51  ;;  %v4175_v52 = vsub.f32 1.0, %v4111_v12  ;;  %v11913_v21 = vmul.f32 0.5, %v14829_v17  ;;  %v3348_v43 = vadd.f32 -1.4531521, %v3284_v36 }
 0x4e6   : > { %14828 = vst [vmem:[#allocation34_spill] sm:$0xff] %v11910_v5  ;;  %8535 = vrcp.f32 %v3095_v58  ;;  %v11915_v46 = vpop.eup %8529  ;;  %v11918_v6 = vmul.f32 %v4302_v10, %v14831_v19  ;;  %vm2835_vm5 = vcmp.ge.f32.partialorder %v11705_v7, 0.0  ;;  %vm2836_vm9 = vcmp.ge.f32.partialorder %v11740_v18, 0.0 }
 0x4e7   : > { %14830 = vst [vmem:[#allocation25_spill] sm:$0xff] %v11913_v21  ;;  %v11923_v41 = vand.u32 2147483647, %v11900_v26  ;;  %8537 = vpow2.f32 %v4022_v23  ;;  %v3475_v14 = vadd.f32 1.4214138, %v3411_v59  ;;  %v3792_v51 = vmul.f32 %v11726_v27, %v3728_v35 }
 0x4e8   : > { %14832 = vst [vmem:[#allocation46_spill] sm:$0xff] %v11918_v6  ;;  %v4024_v40 = vmul.f32 1.442695, %v3923_v4  ;;  %v11926_v61 = vmul.f32 0.70710677, %v11907_v8  ;;  %v3665_v12 = vmul.f32 %v11776_v3, %v3601_v57  ;;  %v3666_v36 = vmul.f32 %v11784_v1, %v3602_v22  ;;  %v14836_v6 = vld [vmem:[#allocation28_spill] sm:$0xff] }
 0x4e9   : > { %v3924_v58 = vmul.f32 %v3860_v20, %v11758_v28  ;;  %v8532_v7 = vpop.eup %8531  ;;  %v4239_v10 = vmul.f32 %v4175_v52, %v11770_v49  ;;  %v11934_v34 = vsel %vm2835_vm5, 1.0, %v14683_v53  ;;  %v3412_v23 = vmul.f32 %v11879_v31, %v3348_v43 }
 0x4ea   : > { %v3285_v59 = vmul.f32 1.0614054, %v11915_v46  ;;  %v11939_v4 = vmul.f32 0.5, %v11719_v0  ;;  %v11944_v27 = vsel %vm2836_vm9, 1.0, %v14683_v53  ;;  %v11947_v28 = vmul.f32 0.5, %v11762_v50  ;;  %v14835_v0 = vld [vmem:[#allocation21_spill] sm:$0xff] }
 0x4eb   : > { %v3032_v49 = vmul.f32 0.3275911, %v11923_v41  ;;  %v11950_v20 = vpop.eup %8533  ;;  %v3539_v62 = vmul.f32 %v11852_v45, %v3475_v14  ;;  %8539 = vpow2.f32 %v4024_v40  ;;  %v11954_v35 = vand.u32 2147483647, %v11926_v61  ;;  %v14837_v40 = vld [vmem:[#allocation26_spill] sm:$0xff] }
 0x4ec   : > { %14833 = vst [vmem:[#allocation54_spill] sm:$0xff] %v11939_v4  ;;  %14834 = vst [vmem:[#allocation63_spill] sm:$0xff] %v11947_v28  ;;  %v4701_v57 = vrot.slane %v14835_v0, 2  ;;  %v4112_v22 = vmul.f32 %v8528_v11, %v3792_v51  ;;  %v3729_v52 = vadd.f32 0.2548296, %v3665_v12  ;;  %v4303_v43 = vadd.f32 1.0, %v4239_v10 }
 0x4ed   : > { %v3730_v18 = vadd.f32 0.2548296, %v3666_v36  ;;  %v4026_v17 = vmul.f32 1.442695, %v3924_v58  ;;  %v3476_v19 = vadd.f32 1.4214138, %v3412_v23  ;;  %v11962_v5 = vadd.f32 %v14837_v40, %v10490_v30 }
 0x4ee   : > { %v3349_v50 = vadd.f32 -1.4531521, %v3285_v59  ;;  %v14373_v60 = vrot.slane %v14836_v6, 2  ;;  %vm2837_vm11 = vcmp.ge.f32.partialorder %v11789_v25, 0.0  ;;  %v3286_v56 = vmul.f32 1.0614054, %v11950_v20 }
 0x4ef   : > { %v3096_v14 = vadd.f32 1.0, %v3032_v49  ;;  %v3603_v11 = vadd.f32 -0.28449672, %v3539_v62  ;;  %v3033_v51 = vmul.f32 0.3275911, %v11954_v35  ;;  %v14838_v36 = vrot.slane %v14814_v63, 2 }
 0x4f0   : > { %v11964_v28 = vpop.eup %8535  ;;  %v4733_v12 = vsel %vm989_vm8, %v4701_v57, %v14373_v60  ;;  %v4176_v10 = vsub.f32 1.0, %v4112_v22  ;;  %v3793_v23 = vmul.f32 %v11776_v3, %v3729_v52  ;;  %v3861_v59 = vsub.f32 0.0, %v11810_v2  ;;  %v14840_v22 = vld [vmem:[#allocation16_spill] sm:$0xff] }
 0x4f1   : > { %v4735_v58 = vsel %vm989_vm8, %v14838_v36, %v4701_v57  ;;  %v8538_v40 = vpop.eup %8537  ;;  %v11978_v62 = vmul.f32 %v4303_v43, %v11753_v13  ;;  %v3794_v0 = vmul.f32 %v11784_v1, %v3730_v18  ;;  %v3540_v4 = vmul.f32 %v11879_v31, %v3476_v19 }
 0x4f2   : > { %v5205_v49 = vpack.c.bf16 %v4733_v12, %v4735_v58  ;;  %v3413_v60 = vmul.f32 %v11915_v46, %v3349_v50  ;;  %v3350_v63 = vadd.f32 -1.4531521, %v3286_v56  ;;  %v3287_v21 = vmul.f32 1.0614054, %v11964_v28 }
 0x4f3   : > { %14839 = vst [vmem:[#allocation26_spill] sm:$0xff] %v11978_v62  ;;  %8541 = vrcp.f32 %v3096_v14  ;;  %v11985_v57 = vmul.f32 0.70710677, %v11962_v5  ;;  %v3667_v3 = vmul.f32 %v11852_v45, %v3603_v11  ;;  %v11991_v13 = vsel %vm2837_vm11, 1.0, %v14683_v53  ;;  %v14841_v11 = vld [vmem:[#allocation36_spill] sm:$0xff] }
 0x4f4   : > { %6673 = vmatprep.mubr.bf16.mxu0 %v5205_v49  ;;  %v3097_v1 = vadd.f32 1.0, %v3033_v51  ;;  %v11995_v52 = vadd.f32 %v14840_v22, %v10492_v33  ;;  %v4240_v56 = vmul.f32 %v4176_v10, %v11806_v42  ;;  %v4113_v18 = vmul.f32 %v8532_v7, %v3793_v23 }
 0x4f5   : > { %8543 = vpow2.f32 %v4026_v17  ;;  %v3925_v43 = vmul.f32 %v3861_v59, %v11810_v2  ;;  %v8540_v19 = vpop.eup %8539  ;;  %v3604_v50 = vadd.f32 -0.28449672, %v3540_v4  ;;  %v3477_v14 = vadd.f32 1.4214138, %v3413_v60  ;;  %v14842_v2 = vld [vmem:[#allocation27_spill] sm:$0xff] }
 0x4f6   : > { %vm2838_vm13 = vcmp.ge.f32.partialorder %v11814_v39, 0.0  ;;  %v4700_v25 = vrot.slane %v14841_v11, 2  ;;  %v4114_v12 = vmul.f32 %v8538_v40, %v3794_v0  ;;  %v3414_v51 = vmul.f32 %v11950_v20, %v3350_v63 }
 0x4f7   : > { %v3351_v36 = vadd.f32 -1.4531521, %v3287_v21  ;;  %v12003_v58 = vand.u32 2147483647, %v11985_v57  ;;  %v3731_v49 = vadd.f32 0.2548296, %v3667_v3  ;;  %8545 = vrcp.f32 %v3097_v1 }
 0x4f8   : > { %v12006_v42 = vmul.f32 0.70710677, %v11995_v52  ;;  %v14375_v7 = vrot.slane %v14842_v2, 2  ;;  %v4304_v4 = vadd.f32 1.0, %v4240_v56  ;;  %v4177_v60 = vsub.f32 1.0, %v4113_v18 }
 0x4f9   : > { %v4028_v17 = vmul.f32 1.442695, %v3925_v43  ;;  %v3862_v10 = vsub.f32 0.0, %v11844_v47  ;;  %v3668_v0 = vmul.f32 %v11879_v31, %v3604_v50  ;;  %v3541_v63 = vmul.f32 %v11915_v46, %v3477_v14 }
 0x4fa   : > { %v4732_v21 = vsel %vm989_vm8, %v4700_v25, %v14375_v7  ;;  %v14843_v23 = vrot.slane %v14821_v48, 2  ;;  %v3478_v40 = vadd.f32 1.4214138, %v3414_v51  ;;  %v3415_v3 = vmul.f32 %v11964_v28, %v3351_v36 }
 0x4fb   : > { %v3034_v1 = vmul.f32 0.3275911, %v12003_v58  ;;  %v4178_v56 = vsub.f32 1.0, %v4114_v12  ;;  %v3795_v18 = vmul.f32 %v11852_v45, %v3731_v49  ;;  %v12024_v43 = vmul.f32 0.5, %v11795_v37  ;;  %v14844_v45 = vld [vmem:[#allocation13_spill] sm:$0xff] }
 0x4fc   : > { %v4734_v59 = vsel %vm989_vm8, %v14843_v23, %v4700_v25  ;;  %v12027_v50 = vand.u32 2147483647, %v12006_v42  ;;  %v4241_v7 = vmul.f32 %v4177_v60, %v11841_v32  ;;  %v12035_v25 = vsel %vm2838_vm13, 1.0, %v14683_v53 }
 0x4fd   : > { %v5204_v22 = vpack.c.bf16 %v4732_v21, %v4734_v59  ;;  %v12029_v14 = vpop.eup %8541  ;;  %v3926_v51 = vmul.f32 %v3862_v10, %v11844_v47  ;;  %v12040_v12 = vadd.f32 %v14844_v45, %v10490_v30  ;;  %v12043_v37 = vmul.f32 %v4304_v4, %v11773_v44 }
 0x4fe   : > { %v3732_v36 = vadd.f32 0.2548296, %v3668_v0  ;;  %8547 = vpow2.f32 %v4028_v17  ;;  %v3863_v49 = vsub.f32 0.0, %v11859_v29  ;;  %v3605_v60 = vadd.f32 -0.28449672, %v3541_v63  ;;  %v14846_v17 = vld [vmem:[#allocation29_spill] sm:$0xff] }
 0x4ff   : > { %6674 = vmatmul.mubr.bf16.gmra.mrb[76].mxu0 %v5204_v22  ;;  %14845 = vst [vmem:[#allocation16_spill] sm:$0xff] %v12043_v37  ;;  %v8544_v32 = vpop.eup %8543  ;;  %v3542_v39 = vmul.f32 %v11950_v20, %v3478_v40  ;;  %v3479_v21 = vadd.f32 1.4214138, %v3415_v3  ;;  %v3098_v23 = vadd.f32 1.0, %v3034_v1  ;;  %v4242_v47 = vmul.f32 %v4178_v56, %v11897_v54 }
 0x500   : > { %v4115_v10 = vmul.f32 %v8540_v19, %v3795_v18  ;;  %v3288_v59 = vmul.f32 1.0614054, %v12029_v14  ;;  %v3035_v22 = vmul.f32 0.3275911, %v12027_v50  ;;  %v4305_v45 = vadd.f32 1.0, %v4241_v7 }
 0x501   : > { %v4030_v44 = vmul.f32 1.442695, %v3926_v51  ;;  %v12051_v4 = vmul.f32 0.70710677, %v12040_v12  ;;  %v12055_v0 = vadd.f32 %v14846_v17, %v10492_v33  ;;  %v12057_v63 = vpop.eup %8545  ;;  %v3796_v40 = vmul.f32 %v11879_v31, %v3732_v36 }
 0x502   : > { %v12061_v54 = vmul.f32 0.5, %v11832_v16  ;;  %vm2839_vm14 = vcmp.ge.f32.partialorder %v11847_v9, 0.0  ;;  %v3927_v19 = vmul.f32 %v3863_v49, %v11859_v29  ;;  %v3669_v7 = vmul.f32 %v11915_v46, %v3605_v60  ;;  %v8269_v49 = vld [vmem:[#allocation7 + $0xc0] sm:$0xff]   ;;  %v12081_v60 = vpop.f32.mrb[59].mxu0 }
 0x503   : > { %v3606_v3 = vadd.f32 -0.28449672, %v3542_v39  ;;  %v3543_v1 = vmul.f32 %v11964_v28, %v3479_v21  ;;  %8549 = vrcp.f32 %v3098_v23  ;;  %v4306_v56 = vadd.f32 1.0, %v4242_v47  ;;  %14848 = vst [vmem:[#allocation29_spill] sm:$0xff] %v12081_v60  ;;  %7385 = vmatprep.subr.bf16.mxu1 %v8269_v49 }
 0x504   : > { %v4179_v18 = vsub.f32 1.0, %v4115_v10  ;;  %v3352_v51 = vadd.f32 -1.4531521, %v3288_v59  ;;  %v3099_v17 = vadd.f32 1.0, %v3035_v22  ;;  %v12068_v11 = vmul.f32 %v4305_v45, %v11782_v55 }
 0x505   : > { %v3289_v16 = vmul.f32 1.0614054, %v12057_v63  ;;  %v12072_v31 = vand.u32 2147483647, %v12051_v4  ;;  %v12075_v9 = vmul.f32 0.70710677, %v12055_v0  ;;  %8551 = vpow2.f32 %v4030_v44 }
 0x506   : > { %14847 = vst [vmem:[#allocation13_spill] sm:$0xff] %v12068_v11  ;;  %v12078_v29 = vsel %vm2839_vm14, 1.0, %v14683_v53  ;;  %v4032_v36 = vmul.f32 1.442695, %v3927_v19  ;;  %vm2840_vm15 = vcmp.ge.f32.partialorder %v11900_v26, 0.0  ;;  %v4116_v55 = vmul.f32 %v8544_v32, %v3796_v40  ;;  %v14850_v19 = vld [vmem:[#allocation48_spill] sm:$0xff] }
 0x507   : > { %v3733_v39 = vadd.f32 0.2548296, %v3669_v7  ;;  %v3670_v21 = vmul.f32 %v11950_v20, %v3606_v3  ;;  %v3607_v23 = vadd.f32 -0.28449672, %v3543_v1  ;;  %v12085_v10 = vmul.f32 %v4306_v56, %v11874_v38  ;;  %v14851_v26 = vld [vmem:[#allocation53_spill] sm:$0xff] }
 0x508   : > { %v8548_v47 = vpop.eup %8547  ;;  %v12088_v59 = vmul.f32 0.5, %v11888_v24  ;;  %v3416_v22 = vmul.f32 %v12029_v14, %v3352_v51  ;;  %8553 = vrcp.f32 %v3099_v17  ;;  %v4243_v45 = vmul.f32 %v4179_v18, %v11934_v34  ;;  %v14856_v11 = vld [vmem:[#allocation57_spill] sm:$0xff] }
 0x509   : > { %14849 = vst [vmem:[#allocation68_spill] sm:$0xff] %v12085_v10  ;;  %v3353_v44 = vadd.f32 -1.4531521, %v3289_v16  ;;  %v3036_v32 = vmul.f32 0.3275911, %v12072_v31  ;;  %8555 = vpow2.f32 %v4032_v36  ;;  %v12099_v38 = vsel %vm2840_vm15, 1.0, %v14683_v53 }
 0x50a   : > { %v12094_v40 = vand.u32 2147483647, %v12075_v9  ;;  %v3864_v24 = vsub.f32 0.0, %v11923_v41  ;;  %v12104_v7 = vadd.f32 %v14850_v19, %v10490_v30  ;;  %v4180_v3 = vsub.f32 1.0, %v4116_v55 }
 0x50b   : > { %v3797_v34 = vmul.f32 %v11915_v46, %v3733_v39  ;;  %v3734_v1 = vadd.f32 0.2548296, %v3670_v21  ;;  %v3671_v56 = vmul.f32 %v11964_v28, %v3607_v23  ;;  %v3480_v18 = vadd.f32 1.4214138, %v3416_v22 }
 0x50c   : > { %v12109_v51 = vmul.f32 0.5, %v11907_v8  ;;  %vm2841_vm2 = vcmp.ge.f32.partialorder %v11926_v61, 0.0  ;;  %v4705_v17 = vrot.slane %v14851_v26, 2  ;;  %v4307_v36 = vadd.f32 1.0, %v4243_v45  ;;  %v14852_v8 = vld [vmem:[#allocation20_spill] sm:$0xff] }
 0x50d   : > { %v12113_v16 = vpop.eup %8549  ;;  %v3417_v49 = vmul.f32 %v12057_v63, %v3353_v44  ;;  %v3100_v19 = vadd.f32 1.0, %v3036_v32  ;;  %v3037_v55 = vmul.f32 0.3275911, %v12094_v40  ;;  %v3928_v46 = vmul.f32 %v3864_v24, %v11923_v41 }
 0x50e   : > { %v3865_v39 = vsub.f32 0.0, %v11954_v35  ;;  %v12120_v21 = vmul.f32 0.70710677, %v12104_v7  ;;  %v14379_v23 = vrot.slane %v14852_v8, 2  ;;  %v4244_v22 = vmul.f32 %v4180_v3, %v11944_v27  ;;  %v12135_v27 = vpop.f32.mrb[60].mxu0 }
 0x50f   : > { %v4117_v26 = vmul.f32 %v8548_v47, %v3797_v34  ;;  %v3798_v48 = vmul.f32 %v11950_v20, %v3734_v1  ;;  %v3735_v45 = vadd.f32 0.2548296, %v3671_v56  ;;  %v8552_v10 = vpop.eup %8551  ;;  %v3544_v44 = vmul.f32 %v12029_v14, %v3480_v18  ;;  %14854 = vst [vmem:[#allocation48_spill] sm:$0xff] %v12135_v27  ;;  %v14855_v18 = vld [vmem:[#allocation55_spill] sm:$0xff] }
 0x510   : > { %v3290_v32 = vmul.f32 1.0614054, %v12113_v16  ;;  %v4729_v41 = vsel %vm989_vm8, %v4705_v17, %v14379_v23  ;;  %v14853_v24 = vrot.slane %v14836_v6, 2  ;;  %v3481_v47 = vadd.f32 1.4214138, %v3417_v49 }
 0x511   : > { %8557 = vrcp.f32 %v3100_v19  ;;  %v3101_v20 = vadd.f32 1.0, %v3037_v55  ;;  %v3929_v1 = vmul.f32 %v3865_v39, %v11954_v35  ;;  %v12141_v56 = vand.u32 2147483647, %v12120_v21 }
 0x512   : > { %v4731_v37 = vsel %vm989_vm8, %v14853_v24, %v4705_v17  ;;  %v12137_v34 = vpop.eup %8553  ;;  %v4704_v23 = vrot.slane %v14855_v18, 2  ;;  %v14383_v6 = vrot.slane %v14856_v11, 2  ;;  %v4181_v62 = vsub.f32 1.0, %v4117_v26 }
 0x513   : > { %v5215_v3 = vpack.c.bf16 %v4729_v41, %v4731_v37  ;;  %v4118_v60 = vmul.f32 %v8552_v10, %v3798_v48  ;;  %v4034_v17 = vmul.f32 1.442695, %v3928_v46  ;;  %v12148_v49 = vsel %vm2841_vm2, 1.0, %v14683_v53  ;;  %v8556_v37 = vpop.eup %8555 }
 0x514   : > { %v4308_v19 = vadd.f32 1.0, %v4244_v22  ;;  %v3799_v35 = vmul.f32 %v11964_v28, %v3735_v45  ;;  %v3354_v55 = vadd.f32 -1.4531521, %v3290_v32  ;;  %v4728_v39 = vsel %vm989_vm8, %v4704_v23, %v14383_v6 }
 0x515   : > { %6681 = vmatprep.mubr.bf16.mxu0 %v5215_v3  ;;  %v3608_v41 = vadd.f32 -0.28449672, %v3544_v44  ;;  %v3545_v48 = vmul.f32 %v12057_v63, %v3481_v47  ;;  %v3291_v10 = vmul.f32 1.0614054, %v12137_v34  ;;  %8559 = vrcp.f32 %v3101_v20  ;;  %v14858_v47 = vld [vmem:[#allocation25_spill] sm:$0xff] }
 0x516   : > { %v4036_v61 = vmul.f32 1.442695, %v3929_v1  ;;  %v3866_v26 = vsub.f32 0.0, %v12003_v58  ;;  %v3038_v46 = vmul.f32 0.3275911, %v12141_v56  ;;  %v14857_v22 = vrot.slane %v14842_v2, 2 }
 0x517   : > { %v4245_v45 = vmul.f32 %v4181_v62, %v11991_v13  ;;  %v4182_v32 = vsub.f32 1.0, %v4118_v60  ;;  %v3867_v44 = vsub.f32 0.0, %v12027_v50  ;;  %v12166_v3 = vmul.f32 %v4307_v36, %v14858_v47 }
 0x518   : > { %v4730_v28 = vsel %vm989_vm8, %v14857_v22, %v4704_v23  ;;  %v4119_v20 = vmul.f32 %v8556_v37, %v3799_v35  ;;  %8561 = vpow2.f32 %v4034_v17  ;;  %v3418_v1 = vmul.f32 %v12113_v16, %v3354_v55  ;;  %v14860_v23 = vld [vmem:[#allocation54_spill] sm:$0xff]  ;;  %v14864_v22 = vld [vmem:[#allocation63_spill] sm:$0xff] }
 0x519   : > { %v5214_v24 = vpack.c.bf16 %v4728_v39, %v4730_v28  ;;  %14859 = vst [vmem:[#allocation25_spill] sm:$0xff] %v12166_v3  ;;  %v3672_v6 = vmul.f32 %v12029_v14, %v3608_v41  ;;  %v3609_v18 = vadd.f32 -0.28449672, %v3545_v48  ;;  %vm2842_vm4 = vcmp.ge.f32.partialorder %v11985_v57, 0.0 }
 0x51a   : > { %v3355_v2 = vadd.f32 -1.4531521, %v3291_v10  ;;  %v12172_v62 = vmul.f32 %v4308_v19, %v14860_v23  ;;  %v12175_v13 = vmul.f32 0.5, %v11962_v5  ;;  %v3930_v60 = vmul.f32 %v3866_v26, %v12003_v58  ;;  %v12188_v5 = vpop.f32.mrb[61].mxu0  ;;  %v14863_v26 = vld [vmem:[#allocation52_spill] sm:$0xff] }
 0x51b   : > { %6682 = vmatmul.mubr.bf16.gmra.mrb[80].mxu0 %v5214_v24  ;;  %v3102_v36 = vadd.f32 1.0, %v3038_v46  ;;  %v12178_v37 = vpop.eup %8557  ;;  %v4309_v17 = vadd.f32 1.0, %v4245_v45  ;;  %v4246_v35 = vmul.f32 %v4182_v32, %v12035_v25  ;;  %8563 = vpow2.f32 %v4036_v61  ;;  %14862 = vst [vmem:[#allocation69_spill] sm:$0xff] %v12188_v5  ;;  %v12193_v10 = vpop.f32.mrb[62].mxu0 }
 0x51c   : > { %14861 = vst [vmem:[#allocation54_spill] sm:$0xff] %v12172_v62  ;;  %v3931_v55 = vmul.f32 %v3867_v44, %v12027_v50  ;;  %v4183_v57 = vsub.f32 1.0, %v4119_v20  ;;  %v12183_v39 = vsel %vm2842_vm4, 1.0, %v14683_v53  ;;  %v3482_v19 = vadd.f32 1.4214138, %v3418_v1 }
 0x51d   : > { %v12186_v41 = vmul.f32 0.5, %v11995_v52  ;;  %v3736_v58 = vadd.f32 0.2548296, %v3672_v6  ;;  %v3673_v48 = vmul.f32 %v12057_v63, %v3609_v18  ;;  %vm2843_vm5 = vcmp.ge.f32.partialorder %v12006_v42, 0.0  ;;  %v14866_v42 = vld [vmem:[#allocation60_spill] sm:$0xff] }
 0x51e   : > { %v3419_v25 = vmul.f32 %v12137_v34, %v3355_v2  ;;  %v4038_v50 = vmul.f32 1.442695, %v3930_v60  ;;  %v3292_v61 = vmul.f32 1.0614054, %v12178_v37  ;;  %8565 = vrcp.f32 %v3102_v36 }
 0x51f   : > { %v12198_v46 = vadd.f32 %v14863_v26, %v10492_v33  ;;  %v12200_v52 = vpop.eup %8559  ;;  %v12203_v6 = vmul.f32 %v4309_v17, %v14864_v22  ;;  %v4310_v18 = vadd.f32 1.0, %v4246_v35  ;;  %v4040_v28 = vmul.f32 1.442695, %v3931_v55 }
 0x520   : > { %v12207_v2 = vadd.f32 %v14866_v42, %v10490_v30  ;;  %v4247_v45 = vmul.f32 %v4183_v57, %v12078_v29  ;;  %v3546_v32 = vmul.f32 %v12113_v16, %v3482_v19  ;;  %v12212_v44 = vsel %vm2843_vm5, 1.0, %v14683_v53 }
 0x521   : > { %14865 = vst [vmem:[#allocation52_spill] sm:$0xff] %v12203_v6  ;;  %vm2844_vm9 = vcmp.ge.f32.partialorder %v12051_v4, 0.0  ;;  %v3800_v24 = vmul.f32 %v12029_v14, %v3736_v58  ;;  %v3737_v47 = vadd.f32 0.2548296, %v3673_v48  ;;  %v3483_v20 = vadd.f32 1.4214138, %v3419_v25 }
 0x522   : > { %v3868_v1 = vsub.f32 0.0, %v12072_v31  ;;  %v8562_v23 = vpop.eup %8561  ;;  %8567 = vpow2.f32 %v4038_v50  ;;  %v3356_v60 = vadd.f32 -1.4531521, %v3292_v61  ;;  %v3293_v36 = vmul.f32 1.0614054, %v12200_v52  ;;  %v14868_v58 = vld [vmem:[#allocation31_spill] sm:$0xff] }
 0x523   : > { %v12219_v29 = vmul.f32 0.70710677, %v12198_v46  ;;  %v12222_v17 = vmul.f32 %v4310_v18, %v12024_v43  ;;  %8569 = vpow2.f32 %v4040_v28  ;;  %v12225_v35 = vmul.f32 0.5, %v12040_v12  ;;  %v12242_v61 = vpop.f32.mrb[63].mxu0 }
 0x524   : > { %v12228_v14 = vmul.f32 0.70710677, %v12207_v2  ;;  %v4311_v55 = vadd.f32 1.0, %v4247_v45  ;;  %v3610_v57 = vadd.f32 -0.28449672, %v3546_v32  ;;  %v12233_v19 = vsel %vm2844_vm9, 1.0, %v14683_v53 }
 0x525   : > { %14867 = vst [vmem:[#allocation63_spill] sm:$0xff] %v12222_v17  ;;  %v12237_v48 = vadd.f32 %v14868_v58, %v10492_v33  ;;  %v8564_v43 = vpop.eup %8563  ;;  %v4120_v25 = vmul.f32 %v8562_v23, %v3800_v24  ;;  %v3801_v50 = vmul.f32 %v12057_v63, %v3737_v47  ;;  %v3932_v12 = vmul.f32 %v3868_v1, %v12072_v31  ;;  %v14870_v31 = vld [vmem:[#allocation59_spill] sm:$0xff] }
 0x526   : > { %vm2845_vm11 = vcmp.ge.f32.partialorder %v12075_v9, 0.0  ;;  %14869 = vst [vmem:[#allocation60_spill] sm:$0xff] %v12242_v61  ;;  %v3547_v26 = vmul.f32 %v12137_v34, %v3483_v20  ;;  %v3420_v4 = vmul.f32 %v12178_v37, %v3356_v60  ;;  %v3357_v22 = vadd.f32 -1.4531521, %v3293_v36  ;;  %v14872_v1 = vld [vmem:[#allocation39_spill] sm:$0xff] }
 0x527   : > { %v12247_v18 = vand.u32 2147483647, %v12219_v29  ;;  %v12250_v28 = vmul.f32 0.5, %v12055_v0  ;;  %v3869_v42 = vsub.f32 0.0, %v12094_v40  ;;  %v12254_v63 = vand.u32 2147483647, %v12228_v14 }
 0x528   : > { %v12257_v32 = vpop.eup %8565  ;;  %v12260_v24 = vmul.f32 %v4311_v55, %v12061_v54  ;;  %v3674_v47 = vmul.f32 %v12113_v16, %v3610_v57  ;;  %v12264_v20 = vmul.f32 0.70710677, %v12237_v48  ;;  %v4709_v0 = vrot.slane %v14872_v1, 2 }
 0x529   : > { %v4184_v23 = vsub.f32 1.0, %v4120_v25  ;;  %v4121_v60 = vmul.f32 %v8564_v43, %v3801_v50  ;;  %v4042_v36 = vmul.f32 1.442695, %v3932_v12  ;;  %v12270_v58 = vsel %vm2845_vm11, 1.0, %v14683_v53 }
 0x52a   : > { %14871 = vst [vmem:[#allocation31_spill] sm:$0xff] %v12260_v24  ;;  %v3611_v45 = vadd.f32 -0.28449672, %v3547_v26  ;;  %v3484_v17 = vadd.f32 1.4214138, %v3420_v4  ;;  %v3421_v54 = vmul.f32 %v12200_v52, %v3357_v22  ;;  %v3933_v57 = vmul.f32 %v3869_v42, %v12094_v40  ;;  %v14874_v26 = vld [vmem:[#allocation12_spill] sm:$0xff] }
 0x52b   : > { %v3039_v55 = vmul.f32 0.3275911, %v12247_v18  ;;  %v3294_v62 = vmul.f32 1.0614054, %v12257_v32  ;;  %v3040_v1 = vmul.f32 0.3275911, %v12254_v63  ;;  %v12286_v4 = vadd.f32 %v14874_v26, %v10490_v30 }
 0x52c   : > { %v14873_v43 = vrot.slane %v14870_v31, 2  ;;  %v8568_v9 = vpop.eup %8567  ;;  %v3738_v50 = vadd.f32 0.2548296, %v3674_v47  ;;  %v12282_v12 = vand.u32 2147483647, %v12264_v20  ;;  %v14875_v40 = vrot.slane %v14852_v8, 2 }
 0x52d   : > { %v8570_v42 = vpop.eup %8569  ;;  %v4185_v24 = vsub.f32 1.0, %v4121_v60  ;;  %v3870_v6 = vsub.f32 0.0, %v12141_v56  ;;  %v3675_v27 = vmul.f32 %v12137_v34, %v3611_v45  ;;  %v3548_v3 = vmul.f32 %v12178_v37, %v3484_v17 }
 0x52e   : > { %v4725_v25 = vsel %vm989_vm8, %v4709_v0, %v14873_v43  ;;  %v4727_v22 = vsel %vm989_vm8, %v14875_v40, %v4709_v0  ;;  %v14876_v43 = vld [vmem:[#allocation45_spill] sm:$0xff]  ;;  %v3485_v26 = vadd.f32 1.4214138, %v3421_v54  ;;  %v3103_v61 = vadd.f32 1.0, %v3039_v55 }
 0x52f   : > { %v5225_v5 = vpack.c.bf16 %v4725_v25, %v4727_v22  ;;  %v12295_v47 = vadd.f32 %v14876_v43, %v10492_v33  ;;  %v4248_v8 = vmul.f32 %v4184_v23, %v12099_v38  ;;  %vm2846_vm13 = vcmp.ge.f32.partialorder %v12120_v21, 0.0  ;;  %v14877_v43 = vld [vmem:[#allocation33_spill] sm:$0xff]  ;;  %v14878_v23 = vld [vmem:[#allocation44_spill] sm:$0xff] }
 0x530   : > { %v3358_v0 = vadd.f32 -1.4531521, %v3294_v62  ;;  %v3104_v40 = vadd.f32 1.0, %v3040_v1  ;;  %v3802_v60 = vmul.f32 %v12113_v16, %v3738_v50  ;;  %v3041_v25 = vmul.f32 0.3275911, %v12282_v12 }
 0x531   : > { %6689 = vmatprep.mubr.bf16.mxu0 %v5225_v5  ;;  %v12304_v22 = vmul.f32 0.70710677, %v12286_v4  ;;  %v4708_v45 = vrot.slane %v14877_v43, 2  ;;  %v4249_v17 = vmul.f32 %v4185_v24, %v12148_v49  ;;  %v3934_v54 = vmul.f32 %v3870_v6, %v12141_v56 }
 0x532   : > { %v12310_v38 = vmul.f32 0.70710677, %v12295_v47  ;;  %v14391_v62 = vrot.slane %v14878_v23, 2  ;;  %v3739_v1 = vadd.f32 0.2548296, %v3675_v27  ;;  %v3549_v16 = vmul.f32 %v12200_v52, %v3485_v26 }
 0x533   : > { %v3612_v5 = vadd.f32 -0.28449672, %v3548_v3  ;;  %8571 = vrcp.f32 %v3103_v61  ;;  %v3422_v55 = vmul.f32 %v12257_v32, %v3358_v0  ;;  %v14879_v56 = vrot.slane %v14856_v11, 2 }
 0x534   : > { %8573 = vrcp.f32 %v3104_v40  ;;  %v4724_v49 = vsel %vm989_vm8, %v4708_v45, %v14391_v62  ;;  %v4122_v24 = vmul.f32 %v8568_v9, %v3802_v60  ;;  %v3105_v50 = vadd.f32 1.0, %v3041_v25  ;;  %v14880_v40 = vld [vmem:[#allocation64_spill] sm:$0xff]  ;;  %v14881_v9 = vld [vmem:[#allocation65_spill] sm:$0xff] }
 0x535   : > { %v4726_v6 = vsel %vm989_vm8, %v14879_v56, %v4708_v45  ;;  %v12324_v27 = vand.u32 2147483647, %v12304_v22  ;;  %v4312_v61 = vadd.f32 1.0, %v4248_v8  ;;  %v4044_v26 = vmul.f32 1.442695, %v3933_v57 }
 0x536   : > { %v5224_v3 = vpack.c.bf16 %v4724_v49, %v4726_v6  ;;  %v12327_v0 = vand.u32 2147483647, %v12310_v38  ;;  %v12331_v43 = vadd.f32 %v14880_v40, %v10490_v30  ;;  %v4313_v62 = vadd.f32 1.0, %v4249_v17 }
 0x537   : > { %v3803_v11 = vmul.f32 %v12137_v34, %v3739_v1  ;;  %v3676_v45 = vmul.f32 %v12178_v37, %v3612_v5  ;;  %v12337_v60 = vadd.f32 %v14881_v9, %v10492_v33  ;;  %8575 = vpow2.f32 %v4042_v36 }
 0x538   : > { %6690 = vmatmul.mubr.bf16.gmra.mrb[84].mxu0 %v5224_v3  ;;  %v3613_v8 = vadd.f32 -0.28449672, %v3549_v16  ;;  %v3486_v57 = vadd.f32 1.4214138, %v3422_v55  ;;  %v4046_v25 = vmul.f32 1.442695, %v3934_v54  ;;  %8577 = vrcp.f32 %v3105_v50 }
 0x539   : > { %v4186_v49 = vsub.f32 1.0, %v4122_v24  ;;  %v3042_v56 = vmul.f32 0.3275911, %v12324_v27  ;;  %v12341_v6 = vmul.f32 0.70710677, %v12331_v43  ;;  %v12344_v34 = vmul.f32 0.5, %v12104_v7 }
 0x53a   : > { %v12349_v17 = vsel %vm2846_vm13, 1.0, %v14683_v53  ;;  %v3043_v36 = vmul.f32 0.3275911, %v12327_v0  ;;  %v12353_v1 = vmul.f32 0.70710677, %v12337_v60  ;;  %v12356_v54 = vmul.f32 %v4312_v61, %v12088_v59 }
 0x53b   : > { %v4123_v5 = vmul.f32 %v8570_v42, %v3803_v11  ;;  %v3740_v16 = vadd.f32 0.2548296, %v3676_v45  ;;  %8579 = vpow2.f32 %v4044_v26  ;;  %v3677_v55 = vmul.f32 %v12200_v52, %v3613_v8  ;;  %v14884_v45 = vld [vmem:[#allocation56_spill] sm:$0xff] }
 0x53c   : > { %14882 = vst [vmem:[#allocation12_spill] sm:$0xff] %v12356_v54  ;;  %v3550_v7 = vmul.f32 %v12257_v32, %v3486_v57  ;;  %v3871_v24 = vsub.f32 0.0, %v12247_v18  ;;  %v12362_v21 = vand.u32 2147483647, %v12341_v6  ;;  %v12367_v3 = vmul.f32 %v4313_v62, %v12109_v51 }
 0x53d   : > { %v12364_v50 = vpop.eup %8571  ;;  %v4250_v59 = vmul.f32 %v4186_v49, %v12183_v39  ;;  %8581 = vpow2.f32 %v4046_v25  ;;  %v3106_v11 = vadd.f32 1.0, %v3042_v56  ;;  %v3107_v61 = vadd.f32 1.0, %v3043_v36 }
 0x53e   : > { %14883 = vst [vmem:[#allocation45_spill] sm:$0xff] %v12367_v3  ;;  %v12370_v42 = vpop.eup %8573  ;;  %v3044_v26 = vmul.f32 0.3275911, %v12362_v21  ;;  %v12374_v40 = vand.u32 2147483647, %v12353_v1  ;;  %v12378_v9 = vadd.f32 %v14884_v45, %v10490_v30  ;;  %v4187_v8 = vsub.f32 1.0, %v4123_v5 }
 0x53f   : > { %v3804_v51 = vmul.f32 %v12178_v37, %v3740_v16  ;;  %v12382_v62 = vmul.f32 0.5, %v12198_v46  ;;  %vm2847_vm14 = vcmp.ge.f32.partialorder %v12219_v29, 0.0  ;;  %v3741_v39 = vadd.f32 0.2548296, %v3677_v55 }
 0x540   : > { %v3614_v57 = vadd.f32 -0.28449672, %v3550_v7  ;;  %v3935_v25 = vmul.f32 %v3871_v24, %v12247_v18  ;;  %v3045_v49 = vmul.f32 0.3275911, %v12374_v40  ;;  %v3295_v56 = vmul.f32 1.0614054, %v12364_v50 }
 0x541   : > { %14885 = vst [vmem:[#allocation64_spill] sm:$0xff] %v12382_v62  ;;  %v3296_v36 = vmul.f32 1.0614054, %v12370_v42  ;;  %8583 = vrcp.f32 %v3106_v11  ;;  %v3108_v45 = vadd.f32 1.0, %v3044_v26  ;;  %v8576_v5 = vpop.eup %8575  ;;  %v4314_v54 = vadd.f32 1.0, %v4250_v59 }
 0x542   : > { %vm2848_vm15 = vcmp.ge.f32.partialorder %v12228_v14, 0.0  ;;  %8585 = vrcp.f32 %v3107_v61  ;;  %v12391_v37 = vmul.f32 0.70710677, %v12378_v9  ;;  %v12393_v46 = vpop.eup %8577  ;;  %v4251_v18 = vmul.f32 %v4187_v8, %v12212_v44 }
 0x543   : > { %v4124_v16 = vmul.f32 %v8576_v5, %v3804_v51  ;;  %v3872_v55 = vsub.f32 0.0, %v12254_v63  ;;  %v3109_v7 = vadd.f32 1.0, %v3045_v49  ;;  %v3805_v24 = vmul.f32 %v12200_v52, %v3741_v39 }
 0x544   : > { %v12401_v59 = vsel %vm2847_vm14, 1.0, %v14683_v53  ;;  %v4048_v11 = vmul.f32 1.442695, %v3935_v25  ;;  %v12404_v61 = vmul.f32 0.5, %v12207_v2  ;;  %v3678_v3 = vmul.f32 %v12257_v32, %v3614_v57 }
 0x545   : > { %v8580_v26 = vpop.eup %8579  ;;  %v3359_v62 = vadd.f32 -1.4531521, %v3295_v56  ;;  %v3360_v44 = vadd.f32 -1.4531521, %v3296_v36  ;;  %8587 = vrcp.f32 %v3108_v45  ;;  %v12408_v8 = vmul.f32 %v4314_v54, %v12175_v13  ;;  %v14888_v45 = vld [vmem:[#allocation58_spill] sm:$0xff] }
 0x546   : > { %v12413_v52 = vsel %vm2848_vm15, 1.0, %v14683_v53  ;;  %v3297_v29 = vmul.f32 1.0614054, %v12393_v46  ;;  %v12417_v51 = vand.u32 2147483647, %v12391_v37  ;;  %v4315_v39 = vadd.f32 1.0, %v4251_v18 }
 0x547   : > { %14886 = vst [vmem:[#allocation65_spill] sm:$0xff] %v12408_v8  ;;  %v8582_v2 = vpop.eup %8581  ;;  %v4188_v25 = vsub.f32 1.0, %v4124_v16  ;;  %v3936_v57 = vmul.f32 %v3872_v55, %v12254_v63  ;;  %8589 = vrcp.f32 %v3109_v7  ;;  %v4125_v49 = vmul.f32 %v8580_v26, %v3805_v24  ;;  %v14890_v16 = vld [vmem:[#allocation50_spill] sm:$0xff] }
 0x548   : > { %8591 = vpow2.f32 %v4048_v11  ;;  %v12421_v13 = vmul.f32 0.5, %v12237_v48  ;;  %v3873_v14 = vsub.f32 0.0, %v12282_v12  ;;  %v3742_v54 = vadd.f32 0.2548296, %v3678_v3 }
 0x549   : > { %v3423_v56 = vmul.f32 %v12364_v50, %v3359_v62  ;;  %v3424_v36 = vmul.f32 %v12370_v42, %v3360_v44  ;;  %v4713_v5 = vrot.slane %v14888_v45, 2  ;;  %v3361_v8 = vadd.f32 -1.4531521, %v3297_v29  ;;  %v14892_v44 = vld [vmem:[#allocation30_spill] sm:$0xff] }
 0x54a   : > { %14887 = vst [vmem:[#allocation56_spill] sm:$0xff] %v12421_v13  ;;  %v12428_v18 = vmul.f32 0.5, %v12286_v4  ;;  %v3046_v63 = vmul.f32 0.3275911, %v12417_v51  ;;  %v14397_v55 = vrot.slane %v14890_v16, 2  ;;  %v12435_v48 = vmul.f32 %v4315_v39, %v12186_v41 }
 0x54b   : > { %v12432_v7 = vpop.eup %8583  ;;  %v4252_v3 = vmul.f32 %v4188_v25, %v12233_v19  ;;  %v4050_v62 = vmul.f32 1.442695, %v3936_v57  ;;  %vm2849_vm2 = vcmp.ge.f32.partialorder %v12264_v20, 0.0  ;;  %v4189_v11 = vsub.f32 1.0, %v4125_v49 }
 0x54c   : > { %14889 = vst [vmem:[#allocation70_spill] sm:$0xff] %v12428_v18  ;;  %14891 = vst [vmem:[#allocation71_spill] sm:$0xff] %v12435_v48  ;;  %v12439_v24 = vpop.eup %8585  ;;  %v3937_v4 = vmul.f32 %v3873_v14, %v12282_v12  ;;  %v4721_v26 = vsel %vm989_vm8, %v4713_v5, %v14397_v55  ;;  %v3806_v41 = vmul.f32 %v12257_v32, %v3742_v54  ;;  %v3487_v39 = vadd.f32 1.4214138, %v3423_v56  ;;  %v14894_v14 = vld [vmem:[#allocation19_spill] sm:$0xff] }
 0x54d   : > { %v3488_v45 = vadd.f32 1.4214138, %v3424_v36  ;;  %v14893_v19 = vrot.slane %v14870_v31, 2  ;;  %v3425_v57 = vmul.f32 %v12393_v46, %v3361_v8  ;;  %v3110_v49 = vadd.f32 1.0, %v3046_v63  ;;  %v14895_v8 = vld [vmem:[#allocation62_spill] sm:$0xff] }
 0x54e   : > { %v4712_v48 = vrot.slane %v14894_v14, 2  ;;  %v4316_v55 = vadd.f32 1.0, %v4252_v3  ;;  %v3298_v29 = vmul.f32 1.0614054, %v12432_v7  ;;  %v3874_v32 = vsub.f32 0.0, %v12324_v27 }
 0x54f   : > { %v4723_v25 = vsel %vm989_vm8, %v14893_v19, %v4713_v5  ;;  %v12454_v18 = vpop.eup %8587  ;;  %v3299_v54 = vmul.f32 1.0614054, %v12439_v24  ;;  %v4253_v56 = vmul.f32 %v4189_v11, %v12270_v58  ;;  %vm2850_vm4 = vcmp.ge.f32.partialorder %v12304_v22, 0.0 }
 0x550   : > { %v5235_v12 = vpack.c.bf16 %v4721_v26, %v4723_v25  ;;  %v12463_v36 = vadd.f32 %v14895_v8, %v10492_v33  ;;  %v14896_v5 = vrot.slane %v14892_v44, 2  ;;  %v4126_v26 = vmul.f32 %v8582_v2, %v3806_v41 }
 0x551   : > { %v12469_v3 = vpop.eup %8589  ;;  %v3551_v19 = vmul.f32 %v12364_v50, %v3487_v39  ;;  %v3552_v25 = vmul.f32 %v12370_v42, %v3488_v45  ;;  %v4052_v58 = vmul.f32 1.442695, %v3937_v4  ;;  %v3300_v14 = vmul.f32 1.0614054, %v12454_v18 }
 0x552   : > { %6697 = vmatprep.mubr.bf16.mxu0 %v5235_v12  ;;  %v4720_v63 = vsel %vm989_vm8, %v4712_v48, %v14896_v5  ;;  %v12473_v11 = vpop.eup %8591  ;;  %v3489_v12 = vadd.f32 1.4214138, %v3425_v57  ;;  %8593 = vrcp.f32 %v3110_v49  ;;  %v14897_v8 = vrot.slane %v14878_v23, 2 }
 0x553   : > { %v3362_v5 = vadd.f32 -1.4531521, %v3298_v29  ;;  %v3938_v13 = vmul.f32 %v3874_v32, %v12324_v27  ;;  %v3363_v2 = vadd.f32 -1.4531521, %v3299_v54  ;;  %v4317_v39 = vadd.f32 1.0, %v4253_v56 }
 0x554   : > { %v4722_v31 = vsel %vm989_vm8, %v14897_v8, %v4712_v48  ;;  %v12484_v45 = vsel %vm2849_vm2, 1.0, %v14683_v53  ;;  %v3301_v4 = vmul.f32 1.0614054, %v12469_v3  ;;  %v12488_v57 = vmul.f32 0.70710677, %v12463_v36 }
 0x555   : > { %v5234_v41 = vpack.c.bf16 %v4720_v63, %v4722_v31  ;;  %v4190_v49 = vsub.f32 1.0, %v4126_v26  ;;  %v3615_v23 = vadd.f32 -0.28449672, %v3551_v19  ;;  %v3616_v33 = vadd.f32 -0.28449672, %v3552_v25  ;;  %v14901_v19 = vld [vmem:[#allocation34_spill] sm:$0xff] }
 0x556   : > { %8595 = vpow2.f32 %v4050_v62  ;;  %v12491_v27 = vmul.f32 %v4316_v55, %v12225_v35  ;;  %v3553_v31 = vmul.f32 %v12393_v46, %v3489_v12  ;;  %v12497_v20 = vsel %vm2850_vm4, 1.0, %v14683_v53  ;;  %v14900_v55 = vld [vmem:[#allocation42_spill] sm:$0xff] }
 0x557   : > { %6698 = vmatmul.mubr.bf16.gmra.mrb[88].mxu0 %v5234_v41  ;;  %v3364_v48 = vadd.f32 -1.4531521, %v3300_v14  ;;  %8597 = vpow2.f32 %v4052_v58  ;;  %v3426_v29 = vmul.f32 %v12432_v7, %v3362_v5  ;;  %v4054_v32 = vmul.f32 1.442695, %v3938_v13  ;;  %v14903_v12 = vld [vmem:[#allocation38_spill] sm:$0xff] }
 0x558   : > { %14898 = vst [vmem:[#allocation62_spill] sm:$0xff] %v12491_v27  ;;  %v3427_v54 = vmul.f32 %v12439_v24, %v3363_v2  ;;  %v12502_v62 = vmul.f32 %v4317_v39, %v12250_v28  ;;  %v3365_v56 = vadd.f32 -1.4531521, %v3301_v4  ;;  %v12505_v35 = vand.u32 2147483647, %v12488_v57 }
 0x559   : > { %v14404_v63 = vrot.slane %v14900_v55, 6  ;;  %v4254_v22 = vmul.f32 %v4190_v49, %v12349_v17  ;;  %v3679_v26 = vmul.f32 %v12364_v50, %v3615_v23  ;;  %v3680_v14 = vmul.f32 %v12370_v42, %v3616_v33 }
 0x55a   : > { %14899 = vst [vmem:[#allocation72_spill] sm:$0xff] %v12502_v62  ;;  %v14405_v25 = vrot.slane %v14901_v19, 6  ;;  %v3617_v13 = vadd.f32 -0.28449672, %v3553_v31  ;;  %v12513_v58 = vmul.f32 0.5, %v12295_v47  ;;  %v3428_v28 = vmul.f32 %v12454_v18, %v3364_v48 }
 0x55b   : > { %v4399_v8 = vrot.slane %v14903_v12, 6  ;;  %v3490_v5 = vadd.f32 1.4214138, %v3426_v29  ;;  %vm2851_vm5 = vcmp.ge.f32.partialorder %v12310_v38, 0.0  ;;  %v3491_v2 = vadd.f32 1.4214138, %v3427_v54 }
 0x55c   : > { %14902 = vst [vmem:[#allocation73_spill] sm:$0xff] %v12513_v58  ;;  %v3875_v17 = vsub.f32 0.0, %v12327_v0  ;;  %v12519_v41 = vpop.eup %8593  ;;  %v3429_v33 = vmul.f32 %v12469_v3, %v3365_v56  ;;  %v3047_v23 = vmul.f32 0.3275911, %v12505_v35  ;;  %v12531_v4 = vadd.f32 1.0, %v4254_v22 }
 0x55d   : > { %v4459_v47 = vsel %vm602_vm0, %v4399_v8, %v14404_v63  ;;  %v4461_v39 = vsel %vm602_vm0, %v14405_v25, %v4399_v8  ;;  %v3743_v49 = vadd.f32 0.2548296, %v3679_v26  ;;  %v3744_v31 = vadd.f32 0.2548296, %v3680_v14 }
 0x55e   : > { %v7184_v48 = vpack.c.bf16 %v4459_v47, %v4461_v39  ;;  %v3681_v29 = vmul.f32 %v12393_v46, %v3617_v13  ;;  %v3492_v54 = vadd.f32 1.4214138, %v3428_v28  ;;  %v3876_v56 = vsub.f32 0.0, %v12362_v21 }
 0x55f   : > { %v4717_v27 = vrot.slane %v14901_v19, 2  ;;  %v3554_v63 = vmul.f32 %v12432_v7, %v3490_v5  ;;  %v12540_v58 = vsel %vm2851_vm5, 1.0, %v14683_v53  ;;  %v3555_v22 = vmul.f32 %v12439_v24, %v3491_v2 }
 0x560   : > { %v8596_v62 = vpop.eup %8595  ;;  %14904 = vst [vmem:[#allocation74_spill] sm:$0xff] %v12540_v58  ;;  %v3302_v26 = vmul.f32 1.0614054, %v12519_v41  ;;  %7185 = vmatprep.mubr.msk.bf16.mxu1 %vm9409_vm7, %v7184_v48  ;;  %v3939_v13 = vmul.f32 %v3875_v17, %v12327_v0  ;;  %v3493_v28 = vadd.f32 1.4214138, %v3429_v33  ;;  %v3111_v8 = vadd.f32 1.0, %v3047_v23 }
 0x561   : > { %v14906_v47 = vrot.slane %v14890_v16, 2  ;;  %v8598_v39 = vpop.eup %8597  ;;  %v3807_v38 = vmul.f32 %v12364_v50, %v3743_v49  ;;  %v3808_v25 = vmul.f32 %v12370_v42, %v3744_v31  ;;  %v3877_v2 = vsub.f32 0.0, %v12374_v40  ;;  %v14909_v49 = vld [vmem:[#allocation37_spill] sm:$0xff] }
 0x562   : > { %v14907_v19 = vrot.slane %v14903_v12, 2  ;;  %v3745_v0 = vadd.f32 0.2548296, %v3681_v29  ;;  %v3556_v17 = vmul.f32 %v12454_v18, %v3492_v54  ;;  %v3940_v33 = vmul.f32 %v3876_v56, %v12362_v21  ;;  %v14910_v12 = vld [vmem:[#allocation67_spill] sm:$0xff] }
 0x563   : > { %v4719_v5 = vsel %vm989_vm8, %v14906_v47, %v4717_v27  ;;  %v3618_v16 = vadd.f32 -0.28449672, %v3554_v63  ;;  %8599 = vpow2.f32 %v4054_v32  ;;  %v3619_v47 = vadd.f32 -0.28449672, %v3555_v22  ;;  %v14911_v54 = vld [vmem:[#allocation35_spill] sm:$0xff] }
 0x564   : > { %v4749_v48 = vsel %vm989_vm8, %v4717_v27, %v14907_v19  ;;  %v3366_v58 = vadd.f32 -1.4531521, %v3302_v26  ;;  %v3557_v50 = vmul.f32 %v12469_v3, %v3493_v28  ;;  %8601 = vrcp.f32 %v3111_v8 }
 0x565   : > { %v7220_v23 = vpack.c.bf16 %v4749_v48, %v4719_v5  ;;  %v4400_v31 = vrot.slane %v14909_v49, 6  ;;  %v14409_v27 = vrot.slane %v14910_v12, 6  ;;  %v4127_v19 = vmul.f32 %v12473_v11, %v3807_v38 }
 0x566   : > { %v4056_v29 = vmul.f32 1.442695, %v3939_v13  ;;  %v3941_v21 = vmul.f32 %v3877_v2, %v12374_v40  ;;  %v4398_v63 = vrot.slane %v14911_v54, 6  ;;  %v4128_v32 = vmul.f32 %v8596_v62, %v3808_v25  ;;  %v8270_v40 = vld [vmem:[#allocation7 + $0x80] sm:$0xff]   ;;  %v14912_v13 = vld [vmem:[#allocation41_spill] sm:$0xff] }
 0x567   : > { %7221 = vmatprep.mubr.msk.bf16.mxu0 %vm10450_vm12, %v7220_v23  ;;  %v3809_v56 = vmul.f32 %v12393_v46, %v3745_v0  ;;  %v3620_v22 = vadd.f32 -0.28449672, %v3556_v17  ;;  %v4058_v26 = vmul.f32 1.442695, %v3940_v33  ;;  %v3430_v28 = vmul.f32 %v12519_v41, %v3366_v58  ;;  %v8271_v58 = vld [vmem:[#allocation7 + $0xc8] sm:$0xff]   ;;  %v14913_v0 = vld [vmem:[#allocation47_spill] sm:$0xff] }
 0x568   : > { %v4458_v8 = vsel %vm602_vm0, %v4398_v63, %v4400_v31  ;;  %v4460_v11 = vsel %vm602_vm0, %v14409_v27, %v4398_v63  ;;  %v4403_v5 = vrot.slane %v14912_v13, 6  ;;  %v3682_v62 = vmul.f32 %v12432_v7, %v3618_v16 }
 0x569   : > { %v3683_v46 = vmul.f32 %v12439_v24, %v3619_v47  ;;  %v3621_v25 = vadd.f32 -0.28449672, %v3557_v50  ;;  %v7187_v38 = vpack.c.bf16 %v4458_v8, %v4460_v11  ;;  %v4191_v2 = vsub.f32 1.0, %v4127_v19 }
 0x56a   : > { %8603 = vpow2.f32 %v4056_v29  ;;  %v4060_v48 = vmul.f32 1.442695, %v3941_v21  ;;  %v14411_v17 = vrot.slane %v14913_v0, 6  ;;  %v4192_v33 = vsub.f32 1.0, %v4128_v32  ;;  %v8272_v29 = vld [vmem:[#allocation7 + $0x88] sm:$0xff]  }
 0x56b   : > { %v3684_v23 = vmul.f32 %v12454_v18, %v3620_v22  ;;  %8605 = vpow2.f32 %v4058_v26  ;;  %v3878_v63 = vsub.f32 0.0, %v12417_v51  ;;  %7188 = vmatmul.mubr.msk.bf16.vlgmr.msra.gmra.mrb[0].mxu1 %vm9409_vm7, %v7187_v38  ;;  %v4129_v16 = vmul.f32 %v8598_v39, %v3809_v56  ;;  %v8273_v39 = vld [vmem:[#allocation7 + $0xd0] sm:$0xff]  }
 0x56c   : > { %v3494_v27 = vadd.f32 1.4214138, %v3430_v28  ;;  %7386 = vmatpush3.bf16.msra.mxu1 %v8270_v40  ;;  %v4455_v47 = vsel %vm602_vm0, %v4403_v5, %v14411_v17  ;;  %v14914_v50 = vrot.slane %v14900_v55, 6  ;;  %v3746_v21 = vadd.f32 0.2548296, %v3682_v62  ;;  %v14933_v17 = vld [vmem:[#allocation61_spill] sm:$0xff] }
 0x56d   : > { %v3747_v32 = vadd.f32 0.2548296, %v3683_v46  ;;  %v3685_v22 = vmul.f32 %v12469_v3, %v3621_v25  ;;  %7387 = vmatprep.subr.bf16.mxu1 %v8271_v58  ;;  %v8600_v56 = vpop.eup %8599  ;;  %v12597_v28 = vmul.f32 %v12531_v4, %v12344_v34  ;;  %v12600_v8 = vmul.f32 0.5, %v12331_v43  ;;  %v8274_v4 = vld [vmem:[#allocation7 + $0x90] sm:$0xff]  }
 0x56e   : > { %v4457_v19 = vsel %vm602_vm0, %v14914_v50, %v4403_v5  ;;  %v12603_v11 = vmul.f32 0.5, %v12337_v60  ;;  %8607 = vpow2.f32 %v4060_v48  ;;  %v12605_v40 = vpop.eup %8601  ;;  %v4255_v5 = vmul.f32 %v4191_v2, %v12401_v59  ;;  %v8275_v2 = vld [vmem:[#allocation7 + $0xd8] sm:$0xff]  }
 0x56f   : > { %v5177_v26 = vpack.c.bf16 %v4455_v47, %v4457_v19  ;;  %14915 = vst [vmem:[#allocation15_spill] sm:$0xff] %v12597_v28  ;;  %v3748_v62 = vadd.f32 0.2548296, %v3684_v23  ;;  %v12609_v46 = vmul.f32 0.5, %v12378_v9  ;;  %v4716_v25 = vrot.slane %v14910_v12, 2 }
 0x570   : > { %v4256_v34 = vmul.f32 %v4192_v33, %v12413_v52  ;;  %vm2852_vm9 = vcmp.ge.f32.partialorder %v12341_v6, 0.0  ;;  %v3558_v43 = vmul.f32 %v12519_v41, %v3494_v27  ;;  %v3942_v60 = vmul.f32 %v3878_v63, %v12417_v51  ;;  %7388 = vmatpush3.bf16.msra.mxu1 %v8272_v29  ;;  %v14918_v63 = vld [vmem:[#allocation66_spill] sm:$0xff] }
 0x571   : > { %6013 = vmatprep.mubr.bf16.mxu1 %v5177_v26  ;;  %v4193_v38 = vsub.f32 1.0, %v4129_v16  ;;  %v3810_v59 = vmul.f32 %v12432_v7, %v3746_v21  ;;  %v3811_v58 = vmul.f32 %v12439_v24, %v3747_v32  ;;  %v3749_v9 = vadd.f32 0.2548296, %v3685_v22  ;;  %7389 = vmatprep.subr.bf16.mxu1 %v8273_v39  ;;  %v8276_v32 = vld [vmem:[#allocation7 + $0x98] sm:$0xff]  }
 0x572   : > { %v3303_v48 = vmul.f32 1.0614054, %v12605_v40  ;;  %v14916_v52 = vrot.slane %v14892_v44, 2  ;;  %v14917_v27 = vrot.slane %v14911_v54, 2  ;;  %v12629_v7 = vadd.f32 %v12193_v10, %v10490_v30 }
 0x573   : > { %v4319_v24 = vadd.f32 1.0, %v4255_v5  ;;  %v3812_v23 = vmul.f32 %v12454_v18, %v3748_v62  ;;  %vm2853_vm11 = vcmp.ge.f32.partialorder %v12353_v1, 0.0  ;;  %v12635_v16 = vadd.f32 %v14918_v63, %v10490_v30  ;;  %v8277_v18 = vld [vmem:[#allocation7 + $0xe0] sm:$0xff]  }
 0x574   : > { %v4718_v33 = vsel %vm989_vm8, %v14916_v52, %v4716_v25  ;;  %v4748_v51 = vsel %vm989_vm8, %v4716_v25, %v14917_v27  ;;  %v8604_v47 = vpop.eup %8603  ;;  %v4320_v50 = vadd.f32 1.0, %v4256_v34  ;;  %v3622_v19 = vadd.f32 -0.28449672, %v3558_v43  ;;  %7390 = vmatpush3.bf16.msra.mxu1 %v8274_v4  ;;  %v14924_v63 = vld [vmem:[#allocation24_spill] sm:$0xff] }
 0x575   : > { %14919 = vst [vmem:[#allocation66_spill] sm:$0xff] %v12635_v16  ;;  %v4062_v29 = vmul.f32 1.442695, %v3942_v60  ;;  %v7223_v21 = vpack.c.bf16 %v4748_v51, %v4718_v33  ;;  %v8606_v22 = vpop.eup %8605  ;;  %v4257_v10 = vmul.f32 %v4193_v38, %v12484_v45  ;;  %v4130_v26 = vmul.f32 %v8600_v56, %v3810_v59  ;;  %7391 = vmatprep.subr.bf16.mxu1 %v8275_v2  ;;  %v14920_v45 = vld [vmem:[#allocation64_spill] sm:$0xff] }
 0x576   : > { %v3813_v39 = vmul.f32 %v12469_v3, %v3749_v9  ;;  %vm2854_vm13 = vcmp.ge.f32.partialorder %v12391_v37, 0.0  ;;  %v4131_v5 = vmul.f32 %v8604_v47, %v3811_v58  ;;  %v2916_v62 = vsel %vm2852_vm9, 1.0, %v14683_v53  ;;  %v8278_v59 = vld [vmem:[#allocation7 + $0xa0] sm:$0xff]  }
 0x577   : > { %v3367_v25 = vadd.f32 -1.4531521, %v3303_v48  ;;  %7224 = vmatmul.mubr.msk.bf16.gmra.mrb[92].mxu0 %vm10450_vm12, %v7223_v21  ;;  %v12646_v34 = vmul.f32 0.70710677, %v12629_v7  ;;  %v12649_v56 = vmul.f32 %v4319_v24, %v14920_v45  ;;  %v4132_v3 = vmul.f32 %v8606_v22, %v3812_v23  ;;  %v8279_v48 = vld [vmem:[#allocation7 + $0xe8] sm:$0xff]   ;;  %v14925_v47 = vld [vmem:[#allocation60_spill] sm:$0xff] }
 0x578   : > { %v2917_v37 = vsel %vm2853_vm11, 1.0, %v14683_v53  ;;  %v12655_v43 = vmul.f32 0.70710677, %v12635_v16  ;;  %v8608_v6 = vpop.eup %8607  ;;  %v12658_v60 = vmul.f32 %v4320_v50, %v12404_v61  ;;  %v12661_v4 = vsel %vm2854_vm13, 1.0, %v14683_v53  ;;  %7392 = vmatpush3.bf16.msra.mxu1 %v8276_v32  ;;  %v14928_v21 = vld [vmem:[#allocation40_spill] sm:$0xff]  ;;  %v8280_v22 = vld [vmem:[#allocation7 + $0xa8] sm:$0xff]  }
 0x579   : > { %14921 = vst [vmem:[#allocation64_spill] sm:$0xff] %v12649_v56  ;;  %v3686_v38 = vmul.f32 %v12519_v41, %v3622_v19  ;;  %8609 = vpow2.f32 %v4062_v29  ;;  %v4321_v58 = vadd.f32 1.0, %v4257_v10  ;;  %v4194_v9 = vsub.f32 1.0, %v4130_v26  ;;  %7393 = vmatprep.subr.bf16.mxu1 %v8277_v18 }
 0x57a   : > { %14922 = vst [vmem:[#allocation75_spill] sm:$0xff] %v12655_v43  ;;  %14923 = vst [vmem:[#allocation76_spill] sm:$0xff] %v12658_v60  ;;  %v4133_v2 = vmul.f32 %v8608_v6, %v3813_v39  ;;  %v12665_v1 = vand.u32 2147483647, %v12646_v34  ;;  %v4195_v52 = vsub.f32 1.0, %v4131_v5  ;;  %v12668_v61 = vmul.f32 0.5, %v12463_v36 }
 0x57b   : > { %v3431_v33 = vmul.f32 %v12605_v40, %v3367_v25  ;;  %v3879_v27 = vsub.f32 0.0, %v12505_v35  ;;  %v4196_v51 = vsub.f32 1.0, %v4132_v3  ;;  %v12673_v24 = vand.u32 2147483647, %v12655_v43  ;;  %v14926_v36 = vld [vmem:[#allocation29_spill] sm:$0xff]  ;;  %v8281_v5 = vld [vmem:[#allocation7 + $0xf0] sm:$0xff]  }
 0x57c   : > { %v3052_v23 = vmul.f32 0.3275911, %v12665_v1  ;;  %v12678_v50 = vadd.f32 %v14925_v47, %v14924_v63  ;;  %v3750_v19 = vadd.f32 0.2548296, %v3686_v38  ;;  %vm2855_vm14 = vcmp.ge.f32.partialorder %v12488_v57, 0.0  ;;  %7394 = vmatpush3.bf16.msra.mxu1 %v8278_v59  ;;  %v14929_v25 = vld [vmem:[#allocation74_spill] sm:$0xff] }
 0x57d   : > { %v12683_v29 = vadd.f32 %v14926_v36, %v14924_v63  ;;  %v4402_v32 = vrot.slane %v14928_v21, 6  ;;  %v4258_v10 = vmul.f32 %v4194_v9, %v12497_v20  ;;  %v4197_v26 = vsub.f32 1.0, %v4133_v2  ;;  %7395 = vmatprep.subr.bf16.mxu1 %v8279_v48  ;;  %v14930_v38 = vld [vmem:[#allocation43_spill] sm:$0xff] }
 0x57e   : > { %v3116_v39 = vadd.f32 1.0, %v3052_v23  ;;  %v12688_v18 = vmul.f32 0.70710677, %v12678_v50  ;;  %v4259_v45 = vmul.f32 %v4195_v52, %v14929_v25  ;;  %v3495_v3 = vadd.f32 1.4214138, %v3431_v33  ;;  %v14932_v52 = vld [vmem:[#allocation56_spill] sm:$0xff] }
 0x57f   : > { %14927 = vst [vmem:[#allocation24_spill] sm:$0xff] %v12683_v29  ;;  %v3943_v6 = vmul.f32 %v3879_v27, %v12505_v35  ;;  %v14410_v47 = vrot.slane %v14930_v38, 6  ;;  %v4260_v36 = vmul.f32 %v4196_v51, %v2916_v62  ;;  %v3048_v59 = vmul.f32 0.3275911, %v12673_v24  ;;  %v8282_v62 = vld [vmem:[#allocation7 + $0xb0] sm:$0xff]   ;;  %v8283_v23 = vld [vmem:[#allocation7 + $0xf8] sm:$0xff]  }
 0x580   : > { %8611 = vrcp.f32 %v3116_v39  ;;  %v12695_v20 = vand.u32 2147483647, %v12688_v18  ;;  %v3814_v9 = vmul.f32 %v12519_v41, %v3750_v19  ;;  %v12699_v2 = vmul.f32 0.70710677, %v12683_v29  ;;  %7396 = vmatpush3.bf16.msra.mxu1 %v8280_v22 }
 0x581   : > { %v4454_v48 = vsel %vm602_vm0, %v4402_v32, %v14410_v47  ;;  %v4456_v35 = vsel %vm602_vm0, %v4400_v31, %v4402_v32  ;;  %v12710_v33 = vmul.f32 %v4321_v58, %v14932_v52  ;;  %v4261_v27 = vmul.f32 %v4197_v26, %v2917_v37  ;;  %7397 = vmatprep.subr.bf16.mxu1 %v8281_v5  ;;  %v14934_v37 = vld [vmem:[#allocation51_spill] sm:$0xff]  ;;  %v14937_v52 = vld [vmem:[#allocation73_spill] sm:$0xff] }
 0x582   : > { %14931 = vst [vmem:[#allocation60_spill] sm:$0xff] %v12699_v2  ;;  %v3053_v41 = vmul.f32 0.3275911, %v12695_v20  ;;  %v5176_v51 = vpack.c.bf16 %v4454_v48, %v4456_v35  ;;  %v4322_v39 = vadd.f32 1.0, %v4258_v10  ;;  %v3559_v25 = vmul.f32 %v12605_v40, %v3495_v3  ;;  %v8284_v3 = vld [vmem:[#allocation7 + $0xb8] sm:$0xff]  }
 0x583   : > { %v8610_v19 = vpop.eup %8609  ;;  %v4064_v47 = vmul.f32 1.442695, %v3943_v6  ;;  %v4407_v42 = vrot.slane %v14933_v17, 6  ;;  %v4323_v21 = vadd.f32 1.0, %v4259_v45  ;;  %v12718_v31 = vsel %vm2855_vm14, 1.0, %v14683_v53 }
 0x584   : > { %v3117_v58 = vadd.f32 1.0, %v3053_v41  ;;  %6014 = vmatmul.mubr.bf16.gmra.mrb[4].mxu1 %v5176_v51  ;;  %v14413_v32 = vrot.slane %v14934_v37, 6  ;;  %v4324_v22 = vadd.f32 1.0, %v4260_v36  ;;  %v4134_v26 = vmul.f32 %v8610_v19, %v3814_v9  ;;  %v8285_v36 = vld [vmem:[#allocation7 + $0x140] sm:$0xff]   ;;  %v14939_v41 = vld [vmem:[#allocation26_spill] sm:$0xff]  ;;  %v14940_v19 = vld [vmem:[#allocation13_spill] sm:$0xff] }
 0x585   : > { %v3112_v5 = vadd.f32 1.0, %v3048_v59  ;;  %v12722_v10 = vand.u32 2147483647, %v12699_v2  ;;  %7398 = vmatpush3.bf16.msra.mxu1 %v8282_v62  ;;  %v4325_v6 = vadd.f32 1.0, %v4261_v27  ;;  %v14935_v45 = vrot.slane %v14913_v0, 6  ;;  %v14936_v59 = vld [vmem:[#allocation70_spill] sm:$0xff] }
 0x586   : > { %8613 = vrcp.f32 %v3117_v58  ;;  %v4451_v57 = vsel %vm602_vm0, %v4407_v42, %v14413_v32  ;;  %7399 = vmatprep.subr.bf16.mxu1 %v8283_v23  ;;  %v12733_v9 = vmul.f32 %v4322_v39, %v14936_v59  ;;  %v3623_v35 = vadd.f32 -0.28449672, %v3559_v25  ;;  %v14941_v32 = vld [vmem:[#allocation25_spill] sm:$0xff]  ;;  %v14944_v25 = vld [vmem:[#allocation16_spill] sm:$0xff] }
 0x587   : > { %v4453_v48 = vsel %vm602_vm0, %v14935_v45, %v4407_v42  ;;  %8615 = vpow2.f32 %v4064_v47  ;;  %v12736_v27 = vmul.f32 %v4323_v21, %v14937_v52  ;;  %v14414_v51 = vrot.slane %v14939_v41, 2 }
 0x588   : > { %v5187_v62 = vpack.c.bf16 %v4451_v57, %v4453_v48  ;;  %v5073_v58 = vrot.slane %v14940_v19, 2  ;;  %v14415_v17 = vrot.slane %v14941_v32, 2  ;;  %v12742_v13 = vmul.f32 %v4324_v22, %v12600_v8  ;;  %v14947_v57 = vld [vmem:[#allocation69_spill] sm:$0xff]  ;;  %v14949_v48 = vld [vmem:[#allocation46_spill] sm:$0xff] }
 0x589   : > { %14938 = vst [vmem:[#allocation29_spill] sm:$0xff] %v12736_v27  ;;  %v4198_v42 = vsub.f32 1.0, %v4134_v26  ;;  %8617 = vrcp.f32 %v3112_v5  ;;  %v3049_v23 = vmul.f32 0.3275911, %v12722_v10  ;;  %7400 = vmatpush3.bf16.msra.mxu1 %v8284_v3  ;;  %v12748_v21 = vmul.f32 %v4325_v6, %v12603_v11  ;;  %v14945_v5 = vld [vmem:[#allocation48_spill] sm:$0xff] }
 0x58a   : > { %14942 = vst [vmem:[#allocation74_spill] sm:$0xff] %v12742_v13  ;;  %6021 = vmatprep.mubr.bf16.mxu1 %v5187_v62  ;;  %v12745_v47 = vpop.eup %8611  ;;  %v5129_v39 = vsel %vm989_vm8, %v5073_v58, %v14415_v17  ;;  %v5131_v8 = vsel %vm989_vm8, %v14414_v51, %v5073_v58  ;;  %v5072_v22 = vrot.slane %v14944_v25, 2  ;;  %7497 = vmatprep.subr.bf16.mxu1 %v8285_v36  ;;  %v14418_v59 = vrot.slane %v14949_v48, 2  ;;  %v14950_v62 = vld [vmem:[#allocation68_spill] sm:$0xff]  ;;  %v14951_v58 = vld [vmem:[#allocation49_spill] sm:$0xff] }
 0x58b   : > { %14943 = vst [vmem:[#allocation56_spill] sm:$0xff] %v12748_v21  ;;  %v3687_v26 = vmul.f32 %v12605_v40, %v3623_v35  ;;  %v12762_v3 = vadd.f32 %v14945_v5, %v10490_v30  ;;  %v3308_v11 = vmul.f32 1.0614054, %v12745_v47  ;;  %v5255_v6 = vpack.c.bf16 %v5129_v39, %v5131_v8  ;;  %v14952_v30 = vld [vmem:[#allocation22_spill] sm:$0xff] }
 0x58c   : > { %v12767_v45 = vadd.f32 %v14947_v57, %v14924_v63  ;;  %v5074_v52 = vrot.slane %v14950_v62, 2  ;;  %v4406_v51 = vrot.slane %v14951_v58, 6  ;;  %v12772_v36 = vadd.f32 1.0, %v3049_v23  ;;  %v14953_v57 = vld [vmem:[#allocation23_spill] sm:$0xff] }
 0x58d   : > { %14946 = vst [vmem:[#allocation70_spill] sm:$0xff] %v12762_v3  ;;  %v3372_v35 = vadd.f32 -1.4531521, %v3308_v11  ;;  %v3885_v17 = vsub.f32 0.0, %v12695_v20  ;;  %6713 = vmatprep.mubr.bf16.mxu0 %v5255_v6  ;;  %v4408_v5 = vrot.slane %v14952_v30, 6  ;;  %v4262_v39 = vmul.f32 %v4198_v42, %v12661_v4 }
 0x58e   : > { %14948 = vst [vmem:[#allocation73_spill] sm:$0xff] %v12767_v45  ;;  %v5128_v63 = vsel %vm989_vm8, %v5072_v22, %v5074_v52  ;;  %v5130_v8 = vsel %vm989_vm8, %v14418_v59, %v5072_v22  ;;  %v4411_v58 = vrot.slane %v14953_v57, 6  ;;  %v3751_v23 = vadd.f32 0.2548296, %v3687_v26  ;;  %v14957_v26 = vld [vmem:[#allocation21_spill] sm:$0xff] }
 0x58f   : > { %v12785_v11 = vmul.f32 0.70710677, %v12762_v3  ;;  %v3436_v6 = vmul.f32 %v12745_v47, %v3372_v35  ;;  %v5254_v49 = vpack.c.bf16 %v5128_v63, %v5130_v8  ;;  %v12791_v4 = vmul.f32 0.70710677, %v12767_v45 }
 0x590   : > { %v12788_v30 = vpop.eup %8613  ;;  %v4450_v42 = vsel %vm602_vm0, %v4406_v51, %v4408_v5  ;;  %v14956_v54 = vrot.slane %v14930_v38, 6  ;;  %v4413_v59 = vrot.slane %v14957_v26, 6  ;;  %v3884_v35 = vsub.f32 0.0, %v12665_v1 }
 0x591   : > { %14954 = vst [vmem:[#allocation48_spill] sm:$0xff] %v12785_v11  ;;  %14955 = vst [vmem:[#allocation69_spill] sm:$0xff] %v12791_v4  ;;  %v8616_v57 = vpop.eup %8615  ;;  %v3500_v0 = vadd.f32 1.4214138, %v3436_v6  ;;  %v3949_v63 = vmul.f32 %v3885_v17, %v12695_v20  ;;  %6714 = vmatmul.mubr.bf16.gmra.mrb[96].mxu0 %v5254_v49  ;;  %v3309_v55 = vmul.f32 1.0614054, %v12788_v30  ;;  %v3815_v20 = vmul.f32 %v12605_v40, %v3751_v23 }
 0x592   : > { %v4452_v22 = vsel %vm602_vm0, %v14956_v54, %v4406_v51  ;;  %v4447_v3 = vsel %vm602_vm0, %v4411_v58, %v4413_v59  ;;  %v14958_v38 = vrot.slane %v14934_v37, 6  ;;  %v14959_v51 = vld [vmem:[#allocation52_spill] sm:$0xff]  ;;  %v4326_v6 = vadd.f32 1.0, %v4262_v39  ;;  %v14960_v37 = vld [vmem:[#allocation31_spill] sm:$0xff]  ;;  %v14961_v39 = vld [vmem:[#allocation54_spill] sm:$0xff] }
 0x593   : > { %v5186_v8 = vpack.c.bf16 %v4450_v42, %v4452_v22  ;;  %v5077_v26 = vrot.slane %v14959_v51, 2  ;;  %v12810_v45 = vpop.eup %8617  ;;  %v12813_v16 = vand.u32 2147483647, %v12785_v11  ;;  %v3564_v49 = vmul.f32 %v12745_v47, %v3500_v0  ;;  %v14962_v11 = vld [vmem:[#allocation63_spill] sm:$0xff]  ;;  %v14964_v23 = vld [vmem:[#allocation32_spill] sm:$0xff] }
 0x594   : > { %v4449_v54 = vsel %vm602_vm0, %v14958_v38, %v4411_v58  ;;  %v12818_v42 = vand.u32 2147483647, %v12791_v4  ;;  %v3373_v22 = vadd.f32 -1.4531521, %v3309_v55  ;;  %v5079_v38 = vrot.slane %v14960_v37, 2 }
 0x595   : > { %6022 = vmatmul.mubr.bf16.gmra.mrb[8].mxu1 %v5186_v8  ;;  %v5197_v17 = vpack.c.bf16 %v4447_v3, %v4449_v54  ;;  %v3948_v58 = vmul.f32 %v3884_v35, %v12665_v1  ;;  %v4076_v29 = vmul.f32 1.442695, %v3949_v63  ;;  %v5076_v43 = vrot.slane %v14961_v39, 2 }
 0x596   : > { %v5078_v2 = vrot.slane %v14962_v11, 2  ;;  %v3437_v0 = vmul.f32 %v12788_v30, %v3373_v22  ;;  %v5125_v3 = vsel %vm989_vm8, %v5077_v26, %v5079_v38  ;;  %v14963_v40 = vrot.slane %v14941_v32, 2  ;;  %v14965_v11 = vld [vmem:[#allocation36_spill] sm:$0xff] }
 0x597   : > { %6029 = vmatprep.mubr.bf16.mxu1 %v5197_v17  ;;  %v4410_v8 = vrot.slane %v14964_v23, 6  ;;  %v3050_v1 = vmul.f32 0.3275911, %v12813_v16  ;;  %v3628_v35 = vadd.f32 -0.28449672, %v3564_v49  ;;  %v4135_v17 = vmul.f32 %v8616_v57, %v3815_v20  ;;  %v14966_v20 = vld [vmem:[#allocation28_spill] sm:$0xff] }
 0x598   : > { %v5127_v55 = vsel %vm989_vm8, %v14963_v40, %v5077_v26  ;;  %v5124_v54 = vsel %vm989_vm8, %v5076_v43, %v5078_v2  ;;  %v3501_v4 = vadd.f32 1.4214138, %v3437_v0  ;;  %v5126_v22 = vsel %vm989_vm8, %v5074_v52, %v5076_v43 }
 0x599   : > { %v5265_v63 = vpack.c.bf16 %v5125_v3, %v5127_v55  ;;  %v4412_v37 = vrot.slane %v14965_v11, 6  ;;  %v3051_v62 = vmul.f32 0.3275911, %v12818_v42  ;;  %v4074_v39 = vmul.f32 1.442695, %v3948_v58  ;;  %v14967_v58 = vld [vmem:[#allocation53_spill] sm:$0xff] }
 0x59a   : > { %8619 = vpow2.f32 %v4076_v29  ;;  %v5264_v26 = vpack.c.bf16 %v5124_v54, %v5126_v22  ;;  %v3565_v40 = vmul.f32 %v12788_v30, %v3501_v4  ;;  %v4448_v57 = vsel %vm602_vm0, %v4408_v5, %v4410_v8 }
 0x59b   : > { %6721 = vmatprep.mubr.bf16.mxu0 %v5265_v63  ;;  %v4446_v49 = vsel %vm602_vm0, %v4410_v8, %v4412_v37  ;;  %v4415_v0 = vrot.slane %v14966_v20, 6  ;;  %8621 = vrcp.f32 %v12772_v36  ;;  %v3692_v43 = vmul.f32 %v12745_v47, %v3628_v35  ;;  %v14968_v63 = vld [vmem:[#allocation45_spill] sm:$0xff]  ;;  %v14969_v8 = vld [vmem:[#allocation71_spill] sm:$0xff] }
 0x59c   : > { %6722 = vmatmul.mubr.bf16.gmra.mrb[100].mxu0 %v5264_v26  ;;  %v5196_v52 = vpack.c.bf16 %v4446_v49, %v4448_v57  ;;  %v4417_v29 = vrot.slane %v14967_v58, 6  ;;  %v12849_v3 = vmul.f32 %v4326_v6, %v12609_v46  ;;  %v4199_v4 = vsub.f32 1.0, %v4135_v17  ;;  %v14970_v49 = vld [vmem:[#allocation12_spill] sm:$0xff] }
 0x59d   : > { %v3629_v55 = vadd.f32 -0.28449672, %v3565_v40  ;;  %v5081_v54 = vrot.slane %v14968_v63, 2  ;;  %8623 = vpow2.f32 %v4074_v39  ;;  %v4445_v36 = vsel %vm602_vm0, %v4413_v59, %v4415_v0 }
 0x59e   : > { %6030 = vmatmul.mubr.bf16.gmra.mrb[12].mxu1 %v5196_v52  ;;  %v4443_v5 = vsel %vm602_vm0, %v4415_v0, %v4417_v29  ;;  %v5083_v35 = vrot.slane %v14969_v8, 2  ;;  %v12857_v22 = vadd.f32 1.0, %v3050_v1  ;;  %v3115_v26 = vadd.f32 1.0, %v3051_v62  ;;  %v14971_v1 = vld [vmem:[#allocation65_spill] sm:$0xff] }
 0x59f   : > { %v3693_v46 = vmul.f32 %v12788_v30, %v3629_v55  ;;  %v5207_v6 = vpack.c.bf16 %v4443_v5, %v4445_v36  ;;  %v3756_v17 = vadd.f32 0.2548296, %v3692_v43  ;;  %v5123_v39 = vsel %vm989_vm8, %v5079_v38, %v5081_v54  ;;  %v14972_v43 = vld [vmem:[#allocation27_spill] sm:$0xff] }
 0x5a0   : > { %v5121_v40 = vsel %vm989_vm8, %v5081_v54, %v5083_v35  ;;  %v5080_v57 = vrot.slane %v14970_v49, 2  ;;  %v4263_v52 = vmul.f32 %v4199_v4, %v12718_v31  ;;  %v5082_v20 = vrot.slane %v14971_v1, 2  ;;  %v14973_v5 = vld [vmem:[#allocation55_spill] sm:$0xff]  ;;  %v14974_v4 = vld [vmem:[#allocation20_spill] sm:$0xff] }
 0x5a1   : > { %v3757_v59 = vadd.f32 0.2548296, %v3693_v46  ;;  %6037 = vmatprep.mubr.bf16.mxu1 %v5207_v6  ;;  %v5275_v0 = vpack.c.bf16 %v5121_v40, %v5123_v39  ;;  %vm2861_vm15 = vcmp.ge.f32.partialorder %v12688_v18, 0.0  ;;  %v4414_v55 = vrot.slane %v14972_v43, 6  ;;  %v14975_v46 = vld [vmem:[#allocation39_spill] sm:$0xff]  ;;  %v12901_v18 = vpop.f32.mrb[64].mxu0 }
 0x5a2   : > { %v5122_v62 = vsel %vm989_vm8, %v5078_v2, %v5080_v57  ;;  %v4416_v36 = vrot.slane %v14973_v5, 6  ;;  %v5120_v31 = vsel %vm989_vm8, %v5080_v57, %v5082_v20  ;;  %v4419_v54 = vrot.slane %v14974_v4, 6  ;;  %v12905_v11 = vpop.f32.mrb[65].mxu0 }
 0x5a3   : > { %v3821_v38 = vmul.f32 %v12788_v30, %v3757_v59  ;;  %6729 = vmatprep.mubr.bf16.mxu0 %v5275_v0  ;;  %v4421_v6 = vrot.slane %v14975_v46, 6  ;;  %v3820_v39 = vmul.f32 %v12745_v47, %v3756_v17  ;;  %v5274_v23 = vpack.c.bf16 %v5120_v31, %v5122_v62  ;;  %v14976_v17 = vld [vmem:[#allocation72_spill] sm:$0xff] }
 0x5a4   : > { %v8620_v40 = vpop.eup %8619  ;;  %v4442_v2 = vsel %vm602_vm0, %v4414_v55, %v4416_v36  ;;  %v4444_v43 = vsel %vm602_vm0, %v4412_v37, %v4414_v55  ;;  %v4441_v57 = vsel %vm602_vm0, %v4417_v29, %v4419_v54  ;;  %v4327_v4 = vadd.f32 1.0, %v4263_v52  ;;  %v14977_v55 = vld [vmem:[#allocation62_spill] sm:$0xff] }
 0x5a5   : > { %v4141_v5 = vmul.f32 %v8620_v40, %v3821_v38  ;;  %v5206_v30 = vpack.c.bf16 %v4442_v2, %v4444_v43  ;;  %v4439_v59 = vsel %vm602_vm0, %v4419_v54, %v4421_v6  ;;  %v12886_v0 = vpop.eup %8621  ;;  %6730 = vmatmul.mubr.bf16.gmra.mrb[104].mxu0 %v5274_v23  ;;  %v5085_v62 = vrot.slane %v14976_v17, 2  ;;  %v14978_v54 = vld [vmem:[#allocation57_spill] sm:$0xff] }
 0x5a6   : > { %v5217_v47 = vpack.c.bf16 %v4439_v59, %v4441_v57  ;;  %v5087_v31 = vrot.slane %v12649_v56, 2  ;;  %v2925_v37 = vsel %vm2861_vm15, 1.0, %v14683_v53  ;;  %v5084_v38 = vrot.slane %v14977_v55, 2  ;;  %v14979_v59 = vld [vmem:[#allocation33_spill] sm:$0xff] }
 0x5a7   : > { %v4205_v43 = vsub.f32 1.0, %v4141_v5  ;;  %6038 = vmatmul.mubr.bf16.gmra.mrb[16].mxu1 %v5206_v30  ;;  %v5086_v40 = vrot.slane %v12597_v28, 2  ;;  %v8624_v29 = vpop.eup %8623  ;;  %v5119_v52 = vsel %vm989_vm8, %v5083_v35, %v5085_v62  ;;  %v4418_v2 = vrot.slane %v14978_v54, 6  ;;  %v12913_v54 = vpop.f32.mrb[66].mxu0 }
 0x5a8   : > { %6045 = vmatprep.mubr.bf16.mxu1 %v5217_v47  ;;  %v5117_v23 = vsel %vm989_vm8, %v5085_v62, %v5087_v31  ;;  %v4420_v57 = vrot.slane %v14979_v59, 6  ;;  %v4140_v5 = vmul.f32 %v8624_v29, %v3820_v39  ;;  %v3305_v47 = vmul.f32 1.0614054, %v12886_v0  ;;  %v14981_v59 = vld [vmem:[#allocation58_spill] sm:$0xff] }
 0x5a9   : > { %v4269_v30 = vmul.f32 %v4205_v43, %v2925_v37  ;;  %v5285_v46 = vpack.c.bf16 %v5117_v23, %v5119_v52  ;;  %v5116_v58 = vsel %vm989_vm8, %v5084_v38, %v5086_v40  ;;  %vm2860_vm2 = vcmp.ge.f32.partialorder %v12646_v34, 0.0  ;;  %v14980_v43 = vld [vmem:[#allocation59_spill] sm:$0xff]  ;;  %v12919_v23 = vpop.f32.mrb[67].mxu0 }
 0x5aa   : > { %v5118_v35 = vsel %vm989_vm8, %v5082_v20, %v5084_v38  ;;  %v4438_v62 = vsel %vm602_vm0, %v4418_v2, %v4420_v57  ;;  %v12916_v39 = vmul.f32 %v4327_v4, %v12668_v61  ;;  %8625 = vrcp.f32 %v3115_v26  ;;  %v12943_v26 = vpop.f32.mrb[68].mxu0 }
 0x5ab   : > { %6737 = vmatprep.mubr.bf16.mxu0 %v5285_v46  ;;  %v5284_v37 = vpack.c.bf16 %v5116_v58, %v5118_v35  ;;  %v4423_v29 = vrot.slane %v14980_v43, 6  ;;  %v4440_v52 = vsel %vm602_vm0, %v4416_v36, %v4418_v2  ;;  %v4425_v20 = vrot.slane %v14981_v59, 6 }
 0x5ac   : > { %v5089_v38 = vrot.slane %v12710_v33, 2  ;;  %v5091_v28 = vrot.slane %v12736_v27, 2  ;;  %v4204_v56 = vsub.f32 1.0, %v4140_v5  ;;  %v4333_v1 = vadd.f32 1.0, %v4269_v30 }
 0x5ad   : > { %v5216_v61 = vpack.c.bf16 %v4438_v62, %v4440_v52  ;;  %6738 = vmatmul.mubr.bf16.gmra.mrb[108].mxu0 %v5284_v37  ;;  %v4435_v58 = vsel %vm602_vm0, %v4423_v29, %v4425_v20  ;;  %v4437_v4 = vsel %vm602_vm0, %v4421_v6, %v4423_v29  ;;  %8627 = vrcp.f32 %v12857_v22  ;;  %v14982_v6 = vld [vmem:[#allocation44_spill] sm:$0xff]  ;;  %v14983_v29 = vld [vmem:[#allocation19_spill] sm:$0xff] }
 0x5ae   : > { %v5113_v36 = vsel %vm989_vm8, %v5089_v38, %v5091_v28  ;;  %v5115_v46 = vsel %vm989_vm8, %v5087_v31, %v5089_v38  ;;  %v5227_v2 = vpack.c.bf16 %v4435_v58, %v4437_v4  ;;  %v5088_v30 = vrot.slane %v12658_v60, 2  ;;  %v14985_v38 = vld [vmem:[#allocation50_spill] sm:$0xff] }
 0x5af   : > { %6046 = vmatmul.mubr.bf16.gmra.mrb[20].mxu1 %v5216_v61  ;;  %v5295_v5 = vpack.c.bf16 %v5113_v36, %v5115_v46  ;;  %v2924_v35 = vsel %vm2860_vm2, 1.0, %v14683_v53  ;;  %v2733_v62 = vmul.f32 0.5, %v12678_v50  ;;  %v4422_v37 = vrot.slane %v14982_v6, 6  ;;  %v12952_v50 = vpop.f32.mrb[69].mxu0  ;;  %v14987_v6 = vld [vmem:[#allocation34_spill] sm:$0xff] }
 0x5b0   : > { %v4424_v52 = vrot.slane %v14983_v29, 6  ;;  %6053 = vmatprep.mubr.bf16.mxu1 %v5227_v2  ;;  %v14984_v22 = vrot.slane %v12733_v9, 2  ;;  %v4427_v61 = vrot.slane %v14985_v38, 6  ;;  %v5093_v34 = vrot.slane %v12748_v21, 2 }
 0x5b1   : > { %6745 = vmatprep.mubr.bf16.mxu0 %v5295_v5  ;;  %v14436_v58 = vrot.slane %v12916_v39, 2  ;;  %v3369_v4 = vadd.f32 -1.4531521, %v3305_v47  ;;  %v4268_v36 = vmul.f32 %v4204_v56, %v2924_v35  ;;  %v12954_v46 = vmul.f32 %v4333_v1, %v2733_v62  ;;  %v12958_v5 = vpop.f32.mrb[70].mxu0 }
 0x5b2   : > { %v5112_v31 = vsel %vm989_vm8, %v5088_v30, %v14984_v22  ;;  %v4434_v2 = vsel %vm602_vm0, %v4422_v37, %v4424_v52  ;;  %v5114_v22 = vsel %vm989_vm8, %v5086_v40, %v5088_v30  ;;  %v14988_v38 = vrot.slane %v14987_v6, 6  ;;  %v12972_v47 = vpop.f32.mrb[71].mxu0 }
 0x5b3   : > { %14986 = vst [vmem:[#allocation71_spill] sm:$0xff] %v12954_v46  ;;  %v5109_v56 = vsel %vm989_vm8, %v5093_v34, %v14436_v58  ;;  %v5111_v1 = vsel %vm989_vm8, %v5091_v28, %v5093_v34  ;;  %v5294_v35 = vpack.c.bf16 %v5112_v31, %v5114_v22  ;;  %v4436_v62 = vsel %vm602_vm0, %v4420_v57, %v4422_v37 }
 0x5b4   : > { %v4431_v29 = vsel %vm602_vm0, %v4427_v61, %v14988_v38  ;;  %v5305_v40 = vpack.c.bf16 %v5109_v56, %v5111_v1  ;;  %v12976_v30 = vpop.eup %8625  ;;  %v3304_v43 = vmul.f32 1.0614054, %v12810_v45  ;;  %v5226_v38 = vpack.c.bf16 %v4434_v2, %v4436_v62 }
 0x5b5   : > { %v4433_v59 = vsel %vm602_vm0, %v4425_v20, %v4427_v61  ;;  %v14437_v58 = vrot.slane %v12849_v3, 2  ;;  %v4332_v6 = vadd.f32 1.0, %v4268_v36  ;;  %6746 = vmatmul.mubr.bf16.gmra.mrb[112].mxu0 %v5294_v35  ;;  %v14438_v34 = vrot.slane %v12954_v46, 6  ;;  %v12989_v61 = vpop.f32.mrb[72].mxu0 }
 0x5b6   : > { %v5237_v28 = vpack.c.bf16 %v4431_v29, %v4433_v59  ;;  %v3433_v31 = vmul.f32 %v12886_v0, %v3369_v4  ;;  %6753 = vmatprep.mubr.bf16.mxu0 %v5305_v40  ;;  %v5092_v57 = vrot.slane %v12742_v13, 2  ;;  %v4783_v37 = vrot.slane %v14939_v41, 6  ;;  %v13002_v56 = vpop.f32.mrb[73].mxu0 }
 0x5b7   : > { %6054 = vmatmul.mubr.bf16.gmra.mrb[24].mxu1 %v5226_v38  ;;  %v4785_v2 = vrot.slane %v14940_v19, 6  ;;  %v2732_v22 = vmul.f32 0.5, %v12629_v7  ;;  %v4426_v20 = vrot.slane %v14892_v44, 6  ;;  %v12991_v59 = vpop.eup %8627  ;;  %v3368_v29 = vadd.f32 -1.4531521, %v3304_v43  ;;  %v13010_v62 = vpop.f32.mrb[74].mxu0 }
 0x5b8   : > { %6061 = vmatprep.mubr.bf16.mxu1 %v5237_v28  ;;  %v3307_v4 = vmul.f32 1.0614054, %v12976_v30  ;;  %v5108_v36 = vsel %vm989_vm8, %v5092_v57, %v14437_v58  ;;  %v4845_v7 = vsel %vm602_vm0, %v14438_v34, %v4783_v37  ;;  %v14990_v35 = vrot.slane %v14910_v12, 6  ;;  %v13018_v34 = vpop.f32.mrb[75].mxu0 }
 0x5b9   : > { %v13004_v1 = vmul.f32 %v4332_v6, %v2732_v22  ;;  %v3497_v40 = vadd.f32 1.4214138, %v3433_v31  ;;  %v14991_v38 = vrot.slane %v12733_v9, 2  ;;  %v4843_v58 = vsel %vm602_vm0, %v4783_v37, %v4785_v2 }
 0x5ba   : > { %v4430_v43 = vsel %vm602_vm0, %v4426_v20, %v14990_v35  ;;  %v3881_v6 = vsub.f32 0.0, %v12722_v10  ;;  %v4432_v19 = vsel %vm602_vm0, %v4424_v52, %v4426_v20  ;;  %v7190_v35 = vpack.c.bf16 %v4843_v58, %v4845_v7 }
 0x5bb   : > { %14989 = vst [vmem:[#allocation77_spill] sm:$0xff] %v13004_v1  ;;  %v5110_v28 = vsel %vm989_vm8, %v14991_v38, %v5092_v57  ;;  %v3432_v41 = vmul.f32 %v12810_v45, %v3368_v29  ;;  %v3371_v31 = vadd.f32 -1.4531521, %v3307_v4  ;;  %v5236_v44 = vpack.c.bf16 %v4430_v43, %v4432_v19 }
 0x5bc   : > { %v5304_v22 = vpack.c.bf16 %v5108_v36, %v5110_v28  ;;  %v14443_v12 = vrot.slane %v13004_v1, 6  ;;  %v3561_v57 = vmul.f32 %v12886_v0, %v3497_v40  ;;  %v4789_v37 = vrot.slane %v14959_v51, 6 }
 0x5bd   : > { %v3945_v38 = vmul.f32 %v3881_v6, %v12722_v10  ;;  %v3306_v36 = vmul.f32 1.0614054, %v12991_v59  ;;  %v4782_v52 = vrot.slane %v14949_v48, 6  ;;  %v4784_v58 = vrot.slane %v14944_v25, 6 }
 0x5be   : > { %6754 = vmatmul.mubr.bf16.gmra.mrb[116].mxu0 %v5304_v22  ;;  %v3496_v19 = vadd.f32 1.4214138, %v3432_v41  ;;  %v3435_v20 = vmul.f32 %v12976_v30, %v3371_v31  ;;  %v4787_v29 = vrot.slane %v14941_v32, 6  ;;  %v3880_v10 = vsub.f32 0.0, %v12673_v24  ;;  %v14992_v32 = vld [vmem:[#allocation54_spill] sm:$0xff] }
 0x5bf   : > { %6062 = vmatmul.mubr.bf16.gmra.mrb[28].mxu1 %v5236_v44  ;;  %v4844_v44 = vsel %vm602_vm0, %v14443_v12, %v4782_v52  ;;  %v3625_v4 = vadd.f32 -0.28449672, %v3561_v57  ;;  %v4068_v43 = vmul.f32 1.442695, %v3945_v38  ;;  %v3370_v40 = vadd.f32 -1.4531521, %v3306_v36 }
 0x5c0   : > { %7191 = vmatprep.mubr.msk.bf16.mxu1 %vm9409_vm7, %v7190_v35  ;;  %v4839_v7 = vsel %vm602_vm0, %v4787_v29, %v4789_v37  ;;  %v4842_v41 = vsel %vm602_vm0, %v4782_v52, %v4784_v58  ;;  %v3560_v28 = vmul.f32 %v12810_v45, %v3496_v19  ;;  %v3499_v6 = vadd.f32 1.4214138, %v3435_v20  ;;  %v14993_v19 = vld [vmem:[#allocation68_spill] sm:$0xff] }
 0x5c1   : > { %v7193_v22 = vpack.c.bf16 %v4842_v41, %v4844_v44  ;;  %v4841_v35 = vsel %vm602_vm0, %v4785_v2, %v4787_v29  ;;  %v3883_v31 = vsub.f32 0.0, %v12818_v42  ;;  %v4788_v57 = vrot.slane %v14992_v32, 6  ;;  %v14994_v44 = vld [vmem:[#allocation31_spill] sm:$0xff] }
 0x5c2   : > { %v5257_v12 = vpack.c.bf16 %v4839_v7, %v4841_v35  ;;  %v3944_v25 = vmul.f32 %v3880_v10, %v12673_v24  ;;  %v3689_v38 = vmul.f32 %v12886_v0, %v3625_v4  ;;  %v4793_v36 = vrot.slane %v14968_v63, 6 }
 0x5c3   : > { %8629 = vpow2.f32 %v4068_v43  ;;  %v3434_v52 = vmul.f32 %v12991_v59, %v3370_v40  ;;  %v4786_v2 = vrot.slane %v14993_v19, 6  ;;  %v3624_v20 = vadd.f32 -0.28449672, %v3560_v28 }
 0x5c4   : > { %v3563_v29 = vmul.f32 %v12976_v30, %v3499_v6  ;;  %v4791_v7 = vrot.slane %v14994_v44, 6  ;;  %v3947_v24 = vmul.f32 %v3883_v31, %v12818_v42  ;;  %v4066_v14 = vmul.f32 1.442695, %v3944_v25 }
 0x5c5   : > { %v4838_v10 = vsel %vm602_vm0, %v4786_v2, %v4788_v57  ;;  %v3753_v4 = vadd.f32 0.2548296, %v3689_v38  ;;  %v3498_v41 = vadd.f32 1.4214138, %v3434_v52  ;;  %v4840_v40 = vsel %vm602_vm0, %v4784_v58, %v4786_v2  ;;  %v14995_v2 = vld [vmem:[#allocation63_spill] sm:$0xff] }
 0x5c6   : > { %v4835_v43 = vsel %vm602_vm0, %v4791_v7, %v4793_v36  ;;  %v3688_v28 = vmul.f32 %v12810_v45, %v3624_v20  ;;  %v3627_v6 = vadd.f32 -0.28449672, %v3563_v29  ;;  %v4837_v42 = vsel %vm602_vm0, %v4789_v37, %v4791_v7 }
 0x5c7   : > { %7194 = vmatmul.mubr.msk.bf16.gmra.mrb[32].mxu1 %vm9409_vm7, %v7193_v22  ;;  %v5256_v22 = vpack.c.bf16 %v4838_v10, %v4840_v40  ;;  %v4072_v35 = vmul.f32 1.442695, %v3947_v24  ;;  %v5267_v31 = vpack.c.bf16 %v4835_v43, %v4837_v42  ;;  %v4792_v25 = vrot.slane %v14970_v49, 6 }
 0x5c8   : > { %6077 = vmatprep.mubr.bf16.mxu1 %v5257_v12  ;;  %v3882_v12 = vsub.f32 0.0, %v12813_v16  ;;  %8631 = vpow2.f32 %v4066_v14  ;;  %v3817_v38 = vmul.f32 %v12886_v0, %v3753_v4  ;;  %v4797_v52 = vrot.slane %v14976_v17, 6  ;;  %v14996_v4 = vld [vmem:[#allocation60_spill] sm:$0xff] }
 0x5c9   : > { %v3562_v44 = vmul.f32 %v12991_v59, %v3498_v41  ;;  %v4790_v20 = vrot.slane %v14995_v2, 6  ;;  %v3752_v29 = vadd.f32 0.2548296, %v3688_v28  ;;  %v3691_v37 = vmul.f32 %v12976_v30, %v3627_v6 }
 0x5ca   : > { %v3946_v58 = vmul.f32 %v3882_v12, %v12813_v16  ;;  %v4795_v7 = vrot.slane %v14969_v8, 6  ;;  %8633 = vpow2.f32 %v4072_v35  ;;  %vm2857_vm7 = vcmp.ge.f32.partialorder %v14996_v4, 0.0 }
 0x5cb   : > { %v4834_v0 = vsel %vm602_vm0, %v4790_v20, %v4792_v25  ;;  %v3626_v16 = vadd.f32 -0.28449672, %v3562_v44  ;;  %v4836_v41 = vsel %vm602_vm0, %v4788_v57, %v4790_v20  ;;  %v3816_v40 = vmul.f32 %v12810_v45, %v3752_v29  ;;  %v14999_v29 = vld [vmem:[#allocation65_spill] sm:$0xff] }
 0x5cc   : > { %v4831_v14 = vsel %vm602_vm0, %v4795_v7, %v4797_v52  ;;  %v4070_v43 = vmul.f32 1.442695, %v3946_v58  ;;  %v3755_v28 = vadd.f32 0.2548296, %v3691_v37  ;;  %v5266_v6 = vpack.c.bf16 %v4834_v0, %v4836_v41 }
 0x5cd   : > { %v8630_v24 = vpop.eup %8629  ;;  %v13094_v44 = vadd.f32 %v12919_v23, %v12913_v54  ;;  %v4801_v45 = vrot.slane %v12710_v33, 6  ;;  %v4794_v37 = vrot.slane %v14999_v29, 6 }
 0x5ce   : > { %v4137_v10 = vmul.f32 %v8630_v24, %v3817_v38  ;;  %v13090_v38 = vadd.f32 %v12905_v11, %v12901_v18  ;;  %v2921_v11 = vsel %vm2857_vm7, 1.0, %v14683_v53  ;;  %8635 = vpow2.f32 %v4070_v43  ;;  %v15000_v18 = vld [vmem:[#allocation64_spill] sm:$0xff] }
 0x5cf   : > { %6078 = vmatmul.mubr.bf16.gmra.mrb[36].mxu1 %v5256_v22  ;;  %v4833_v22 = vsel %vm602_vm0, %v4793_v36, %v4795_v7  ;;  %14998 = vst [vmem:[#allocation68_spill] sm:$0xff] %v13094_v44  ;;  %v3690_v36 = vmul.f32 %v12991_v59, %v3626_v16  ;;  %v3819_v54 = vmul.f32 %v12976_v30, %v3755_v28  ;;  %v4799_v23 = vrot.slane %v15000_v18, 6  ;;  %v15003_v16 = vld [vmem:[#allocation75_spill] sm:$0xff] }
 0x5d0   : > { %6085 = vmatprep.mubr.bf16.mxu1 %v5267_v31  ;;  %v5277_v35 = vpack.c.bf16 %v4831_v14, %v4833_v22  ;;  %v4796_v31 = vrot.slane %v14977_v55, 6  ;;  %14997 = vst [vmem:[#allocation54_spill] sm:$0xff] %v13090_v38  ;;  %v4201_v58 = vsub.f32 1.0, %v4137_v10  ;;  %v13108_v10 = vadd.f32 %v12952_v50, %v12943_v26 }
 0x5d1   : > { %v13112_v14 = vadd.f32 %v12972_v47, %v12958_v5  ;;  %vm2856_vm4 = vcmp.ge.f32.partialorder %v15003_v16, 0.0  ;;  %v4827_v30 = vsel %vm602_vm0, %v4799_v23, %v4801_v45  ;;  %v3754_v41 = vadd.f32 0.2548296, %v3690_v36 }
 0x5d2   : > { %v7755_v12 = vpop.f32.mrb[76].mxu0  ;;  %v8632_v7 = vpop.eup %8631  ;;  %v4830_v0 = vsel %vm602_vm0, %v4794_v37, %v4796_v31  ;;  %15001 = vst [vmem:[#allocation63_spill] sm:$0xff] %v13108_v10  ;;  %v4265_v4 = vmul.f32 %v4201_v58, %v2921_v11  ;;  %v13121_v28 = vadd.f32 %v13002_v56, %v12989_v61  ;;  %v13125_v26 = vadd.f32 %v13018_v34, %v13010_v62  ;;  %v15006_v34 = vld [vmem:[#allocation15_spill] sm:$0xff]  ;;  %v15010_v11 = vld [vmem:[#allocation69_spill] sm:$0xff] }
 0x5d3   : > { %v7756_v42 = vpop.f32.mrb[77].mxu0  ;;  %v4136_v24 = vmul.f32 %v8632_v7, %v3816_v40  ;;  %15002 = vst [vmem:[#allocation60_spill] sm:$0xff] %v13112_v14  ;;  %v4832_v40 = vsel %vm602_vm0, %v4792_v25, %v4794_v37  ;;  %v4829_v47 = vsel %vm602_vm0, %v4797_v52, %v4799_v23  ;;  %v2920_v58 = vsel %vm2856_vm4, 1.0, %v14683_v53  ;;  %v15009_v52 = vld [vmem:[#allocation24_spill] sm:$0xff]  ;;  %v15034_v10 = vld [vmem:[#allocation21_spill] sm:$0xff] }
 0x5d4   : > { %v7758_v57 = vpop.f32.mrb[78].mxu0  ;;  %v8634_v43 = vpop.eup %8633  ;;  %15004 = vst [vmem:[#allocation65_spill] sm:$0xff] %v13121_v28  ;;  %15005 = vst [vmem:[#allocation64_spill] sm:$0xff] %v13125_v26  ;;  %v5276_v5 = vpack.c.bf16 %v4830_v0, %v4832_v40  ;;  %v5287_v22 = vpack.c.bf16 %v4827_v30, %v4829_v47  ;;  %v4329_v25 = vadd.f32 1.0, %v4265_v4  ;;  %v4805_v61 = vrot.slane %v12748_v21, 6  ;;  %v15012_v47 = vld [vmem:[#allocation66_spill] sm:$0xff] }
 0x5d5   : > { %v7759_v20 = vpop.f32.mrb[79].mxu0  ;;  %v4139_v50 = vmul.f32 %v8634_v43, %v3819_v54  ;;  %v3818_v56 = vmul.f32 %v12991_v59, %v3754_v41  ;;  %v4798_v62 = vrot.slane %v15006_v34, 6  ;;  %v13134_v36 = vadd.f32 %v7756_v42, %v7755_v12  ;;  %v15033_v26 = vld [vmem:[#allocation22_spill] sm:$0xff] }
 0x5d6   : > { %v13136_v37 = vadd.f32 %v7759_v20, %v7758_v57  ;;  %v2729_v7 = vmul.f32 0.5, %v15009_v52  ;;  %vm2859_vm5 = vcmp.ge.f32.partialorder %v15010_v11, 0.0  ;;  %v4803_v23 = vrot.slane %v12736_v27, 6 }
 0x5d7   : > { %6086 = vmatmul.mubr.bf16.gmra.mrb[40].mxu1 %v5266_v6  ;;  %v4200_v6 = vsub.f32 1.0, %v4136_v24  ;;  %15007 = vst [vmem:[#allocation75_spill] sm:$0xff] %v13134_v36  ;;  %v4203_v54 = vsub.f32 1.0, %v4139_v50  ;;  %v2923_v57 = vsel %vm2859_vm5, 1.0, %v14683_v53  ;;  %v4828_v20 = vsel %vm602_vm0, %v4796_v31, %v4798_v62 }
 0x5d8   : > { %6093 = vmatprep.mubr.bf16.mxu1 %v5277_v35  ;;  %v4800_v35 = vrot.slane %v12658_v60, 6  ;;  %15008 = vst [vmem:[#allocation15_spill] sm:$0xff] %v13136_v37  ;;  %v8636_v16 = vpop.eup %8635  ;;  %v13143_v59 = vmul.f32 %v4329_v25, %v2729_v7  ;;  %v4823_v12 = vsel %vm602_vm0, %v4803_v23, %v4805_v61  ;;  %v4825_v43 = vsel %vm602_vm0, %v4801_v45, %v4803_v23  ;;  %v15014_v7 = vld [vmem:[#allocation73_spill] sm:$0xff] }
 0x5d9   : > { %v4264_v24 = vmul.f32 %v4200_v6, %v2920_v58  ;;  %v4138_v42 = vmul.f32 %v8636_v16, %v3818_v56  ;;  %v4267_v4 = vmul.f32 %v4203_v54, %v2923_v57  ;;  %v5297_v40 = vpack.c.bf16 %v4823_v12, %v4825_v43  ;;  %v8288_v37 = vld [vmem:[#allocation7 + $0x108] sm:$0xff]  }
 0x5da   : > { %v4826_v0 = vsel %vm602_vm0, %v4798_v62, %v4800_v35  ;;  %15011 = vst [vmem:[#allocation24_spill] sm:$0xff] %v13143_v59  ;;  %v4804_v50 = vrot.slane %v12742_v13, 6  ;;  %v2728_v6 = vmul.f32 0.5, %v15012_v47  ;;  %v4802_v31 = vrot.slane %v12733_v9, 6 }
 0x5db   : > { %v5286_v30 = vpack.c.bf16 %v4826_v0, %v4828_v20  ;;  %v4328_v41 = vadd.f32 1.0, %v4264_v24  ;;  %v4202_v58 = vsub.f32 1.0, %v4138_v42  ;;  %v4331_v25 = vadd.f32 1.0, %v4267_v4 }
 0x5dc   : > { %v4807_v56 = vrot.slane %v12916_v39, 6  ;;  %v4822_v45 = vsel %vm602_vm0, %v4802_v31, %v4804_v50  ;;  %v2731_v11 = vmul.f32 0.5, %v15014_v7  ;;  %v4824_v24 = vsel %vm602_vm0, %v4800_v35, %v4802_v31 }
 0x5dd   : > { %v13158_v62 = vmul.f32 %v4328_v41, %v2728_v6  ;;  %v5296_v16 = vpack.c.bf16 %v4822_v45, %v4824_v24  ;;  %v4806_v20 = vrot.slane %v12849_v3, 6  ;;  %v15015_v41 = vld [vmem:[#allocation70_spill] sm:$0xff]  ;;  %v15017_v6 = vrot.slane %v12954_v46, 6 }
 0x5de   : > { %v13168_v0 = vmul.f32 %v4331_v25, %v2731_v11  ;;  %v4821_v12 = vsel %vm602_vm0, %v4805_v61, %v4807_v56  ;;  %v2730_v35 = vmul.f32 0.5, %v15015_v41  ;;  %v15019_v11 = vld [vmem:[#allocation34_spill] sm:$0xff]  ;;  %v4504_v28 = vrot.slane %v15033_v26, 7  ;;  %v8296_v26 = vld [vmem:[#allocation7 + $0x128] sm:$0xff]  }
 0x5df   : > { %6094 = vmatmul.mubr.bf16.gmra.mrb[44].mxu1 %v5276_v5  ;;  %v4809_v5 = vrot.slane %v13143_v59, 6  ;;  %v4808_v57 = vrot.slane %v13158_v62, 6  ;;  %v4820_v25 = vsel %vm602_vm0, %v4804_v50, %v4806_v20  ;;  %v15020_v24 = vld [vmem:[#allocation38_spill] sm:$0xff]  ;;  %v4509_v44 = vrot.slane %v15034_v10, 7  ;;  %v15041_v10 = vld [vmem:[#allocation32_spill] sm:$0xff] }
 0x5e0   : > { %6101 = vmatprep.mubr.bf16.mxu1 %v5287_v22  ;;  %v15013_v22 = vld [vmem:[#allocation48_spill] sm:$0xff] }
 0x5e1   : > { %vm2858_vm9 = vcmp.ge.f32.partialorder %v15013_v22, 0.0  ;;  %v4819_v54 = vsel %vm602_vm0, %v4807_v56, %v4809_v5 }
 0x5e2   : > { %v2922_v52 = vsel %vm2858_vm9, 1.0, %v14683_v53  ;;  %v5307_v42 = vpack.c.bf16 %v4819_v54, %v4821_v12  ;;  %v14446_v54 = vrot.slane %v15019_v11, 7  ;;  %v15021_v12 = vld [vmem:[#allocation42_spill] sm:$0xff] }
 0x5e3   : > { %v4266_v23 = vmul.f32 %v4202_v58, %v2922_v52 }
 0x5e5   : > { %v4330_v53 = vadd.f32 1.0, %v4266_v23 }
 0x5e7   : > { %6102 = vmatmul.mubr.bf16.gmra.mrb[48].mxu1 %v5286_v30  ;;  %v4811_v30 = vrot.slane %v13168_v0, 6  ;;  %v13184_v31 = vmul.f32 %v4330_v53, %v2730_v35  ;;  %v15022_v53 = vrot.slane %v13004_v1, 6 }
 0x5e8   : > { %6109 = vmatprep.mubr.bf16.mxu1 %v5297_v40  ;;  %v4818_v40 = vsel %vm602_vm0, %v4806_v20, %v4808_v57 }
 0x5e9   : > { %v4815_v22 = vsel %vm602_vm0, %v4811_v30, %v15017_v6  ;;  %v5306_v45 = vpack.c.bf16 %v4818_v40, %v4820_v25  ;;  %v4817_v52 = vsel %vm602_vm0, %v4809_v5, %v4811_v30  ;;  %v4810_v23 = vrot.slane %v13184_v31, 6  ;;  %v15024_v40 = vld [vmem:[#allocation47_spill] sm:$0xff] }
 0x5ea   : > { %v5317_v7 = vpack.c.bf16 %v4815_v22, %v4817_v52  ;;  %v15025_v6 = vld [vmem:[#allocation35_spill] sm:$0xff]  ;;  %v15028_v52 = vld [vmem:[#allocation41_spill] sm:$0xff] }
 0x5eb   : > { %v4814_v50 = vsel %vm602_vm0, %v4810_v23, %v15022_v53  ;;  %v4816_v20 = vsel %vm602_vm0, %v4808_v57, %v4810_v23  ;;  %v4494_v22 = vrot.slane %v15025_v6, 7  ;;  %v8286_v53 = vld [vmem:[#allocation7 + $0x100] sm:$0xff]  }
 0x5ee   : > { %v7761_v4 = vpop.f32.mrb[80].mxu0 }
 0x5ef   : > { %6110 = vmatmul.mubr.bf16.gmra.mrb[52].mxu1 %v5296_v16  ;;  %v7762_v43 = vpop.f32.mrb[81].mxu0  ;;  %v4495_v16 = vrot.slane %v15020_v24, 7 }
 0x5f0   : > { %6117 = vmatprep.mubr.bf16.mxu1 %v5307_v42  ;;  %v13178_v47 = vadd.f32 %v7762_v43, %v7761_v4  ;;  %v7764_v61 = vpop.f32.mrb[82].mxu0  ;;  %v4497_v42 = vrot.slane %v15021_v12, 7  ;;  %v5316_v4 = vpack.c.bf16 %v4814_v50, %v4816_v20  ;;  %v15023_v43 = vld [vmem:[#allocation67_spill] sm:$0xff]  ;;  %v8287_v20 = vld [vmem:[#allocation7 + $0x148] sm:$0xff]  }
 0x5f1   : > { %v7765_v58 = vpop.f32.mrb[83].mxu0  ;;  %v4557_v5 = vsel %vm731_vm1, %v14446_v54, %v4495_v16  ;;  %v14447_v41 = vrot.slane %v15023_v43, 7  ;;  %v15030_v54 = vld [vmem:[#allocation51_spill] sm:$0xff] }
 0x5f2   : > { %15016 = vst [vmem:[#allocation69_spill] sm:$0xff] %v13178_v47  ;;  %v13188_v56 = vadd.f32 %v7765_v58, %v7764_v61  ;;  %v4555_v30 = vsel %vm731_vm1, %v4495_v16, %v4497_v42  ;;  %v4501_v61 = vrot.slane %v15024_v40, 7  ;;  %v15026_v58 = vld [vmem:[#allocation37_spill] sm:$0xff] }
 0x5f3   : > { %v7196_v35 = vpack.c.bf16 %v4555_v30, %v4557_v5  ;;  %v4496_v25 = vrot.slane %v15026_v58, 7  ;;  %v4556_v57 = vsel %vm731_vm1, %v14447_v41, %v4494_v22  ;;  %v15029_v30 = vld [vmem:[#allocation43_spill] sm:$0xff]  ;;  %v4505_v41 = vrot.slane %v15030_v54, 7 }
 0x5f4   : > { %15018 = vst [vmem:[#allocation66_spill] sm:$0xff] %v13188_v56  ;;  %v15031_v56 = vld [vmem:[#allocation40_spill] sm:$0xff] }
 0x5f5   : > { %v4554_v16 = vsel %vm731_vm1, %v4494_v22, %v4496_v25  ;;  %v4498_v47 = vrot.slane %v15031_v56, 7  ;;  %v15032_v22 = vld [vmem:[#allocation61_spill] sm:$0xff] }
 0x5f6   : > { %v7199_v50 = vpack.c.bf16 %v4554_v16, %v4556_v57  ;;  %v4503_v36 = vrot.slane %v15032_v22, 7  ;;  %v8289_v57 = vld [vmem:[#allocation7 + $0x150] sm:$0xff]  }
 0x5f7   : > { %6118 = vmatmul.mubr.bf16.gmra.mrb[56].mxu1 %v5306_v45  ;;  %v8290_v16 = vld [vmem:[#allocation7 + $0x110] sm:$0xff]  }
 0x5f8   : > { %6125 = vmatprep.mubr.bf16.mxu1 %v5317_v7  ;;  %v4499_v7 = vrot.slane %v15028_v52, 7 }
 0x5fa   : > { %v4551_v23 = vsel %vm731_vm1, %v4499_v7, %v4501_v61  ;;  %v4553_v5 = vsel %vm731_vm1, %v4497_v42, %v4499_v7  ;;  %v4547_v7 = vsel %vm731_vm1, %v4503_v36, %v4505_v41 }
 0x5ff   : > { %6126 = vmatmul.mubr.bf16.gmra.mrb[60].mxu1 %v5316_v4  ;;  %v5179_v4 = vpack.c.bf16 %v4551_v23, %v4553_v5  ;;  %v4552_v23 = vsel %vm731_vm1, %v4496_v25, %v4498_v47  ;;  %v8291_v5 = vld [vmem:[#allocation7 + $0x158] sm:$0xff]  }
 0x600   : > { %7197 = vmatprep.mubr.msk.bf16.mxu1 %vm9397_vm6, %v7196_v35  ;;  %v4500_v35 = vrot.slane %v15029_v30, 7  ;;  %v8292_v25 = vld [vmem:[#allocation7 + $0x118] sm:$0xff]  }
 0x602   : > { %v4550_v42 = vsel %vm731_vm1, %v4498_v47, %v4500_v35 }
 0x607   : > { %7200 = vmatmul.mubr.msk.bf16.vlgmr.msra.gmra.mrb[64].mxu1 %vm9397_vm6, %v7199_v50  ;;  %v4549_v50 = vsel %vm731_vm1, %v4501_v61, %v4503_v36  ;;  %v15037_v36 = vld [vmem:[#allocation23_spill] sm:$0xff] }
 0x608   : > { %7498 = vmatpush3.bf16.msra.mxu1 %v8286_v53  ;;  %6174 = vmatprep.mubr.bf16.mxu1 %v5179_v4  ;;  %v5178_v53 = vpack.c.bf16 %v4550_v42, %v4552_v23  ;;  %v4507_v61 = vrot.slane %v15037_v36, 7  ;;  %v4506_v36 = vrot.slane %v15041_v10, 7  ;;  %v8300_v10 = vld [vmem:[#allocation7 + $0x138] sm:$0xff]  }
 0x609   : > { %7499 = vmatprep.subr.bf16.mxu1 %v8287_v20  ;;  %v5189_v20 = vpack.c.bf16 %v4547_v7, %v4549_v50  ;;  %v8294_v50 = vld [vmem:[#allocation7 + $0x120] sm:$0xff]  }
 0x60b   : > { %v7767_v4 = vpop.f32.mrb[84].mxu0 }
 0x60c   : > { %7500 = vmatpush3.bf16.msra.mxu1 %v8288_v37  ;;  %v7768_v14 = vpop.f32.mrb[85].mxu0  ;;  %v15036_v37 = vld [vmem:[#allocation49_spill] sm:$0xff] }
 0x60d   : > { %7501 = vmatprep.subr.bf16.mxu1 %v8289_v57  ;;  %v13241_v38 = vadd.f32 %v7768_v14, %v7767_v4  ;;  %v7770_v54 = vpop.f32.mrb[86].mxu0  ;;  %v4502_v47 = vrot.slane %v15036_v37, 7  ;;  %v8293_v57 = vld [vmem:[#allocation7 + $0x160] sm:$0xff]   ;;  %v4543_v14 = vsel %vm731_vm1, %v4507_v61, %v4509_v44  ;;  %v4545_v4 = vsel %vm731_vm1, %v4505_v41, %v4507_v61 }
 0x60e   : > { %v7771_v42 = vpop.f32.mrb[87].mxu0 }
 0x60f   : > { %6175 = vmatmul.mubr.bf16.gmra.mrb[68].mxu1 %v5178_v53  ;;  %15035 = vst [vmem:[#allocation48_spill] sm:$0xff] %v13241_v38  ;;  %v13245_v7 = vadd.f32 %v7771_v42, %v7770_v54  ;;  %v4546_v23 = vsel %vm731_vm1, %v4502_v47, %v4504_v28  ;;  %v4548_v53 = vsel %vm731_vm1, %v4500_v35, %v4502_v47  ;;  %v15039_v54 = vld [vmem:[#allocation36_spill] sm:$0xff] }
 0x610   : > { %6182 = vmatprep.mubr.bf16.mxu1 %v5189_v20  ;;  %7502 = vmatpush3.bf16.msra.mxu1 %v8290_v16  ;;  %v5188_v16 = vpack.c.bf16 %v4546_v23, %v4548_v53  ;;  %v5199_v20 = vpack.c.bf16 %v4543_v14, %v4545_v4  ;;  %v4508_v42 = vrot.slane %v15039_v54, 7  ;;  %v15042_v35 = vld [vmem:[#allocation28_spill] sm:$0xff]  ;;  %v8298_v23 = vld [vmem:[#allocation7 + $0x130] sm:$0xff]   ;;  %v15043_v4 = vld [vmem:[#allocation55_spill] sm:$0xff] }
 0x611   : > { %7503 = vmatprep.subr.bf16.mxu1 %v8291_v5  ;;  %15038 = vst [vmem:[#allocation73_spill] sm:$0xff] %v13245_v7  ;;  %v8295_v5 = vld [vmem:[#allocation7 + $0x168] sm:$0xff]   ;;  %v4511_v47 = vrot.slane %v15042_v35, 7  ;;  %v15045_v35 = vld [vmem:[#allocation27_spill] sm:$0xff] }
 0x612   : > { %v15040_v7 = vld [vmem:[#allocation53_spill] sm:$0xff]  ;;  %v4542_v41 = vsel %vm731_vm1, %v4506_v36, %v4508_v42  ;;  %v4510_v54 = vrot.slane %v15045_v35, 7  ;;  %v15055_v35 = vld [vmem:[#allocation50_spill] sm:$0xff] }
 0x613   : > { %v4513_v38 = vrot.slane %v15040_v7, 7  ;;  %v4541_v53 = vsel %vm731_vm1, %v4509_v44, %v4511_v47 }
 0x614   : > { %7504 = vmatpush3.bf16.msra.mxu1 %v8292_v25  ;;  %v8297_v25 = vld [vmem:[#allocation7 + $0x170] sm:$0xff]  }
 0x615   : > { %7505 = vmatprep.subr.bf16.mxu1 %v8293_v57  ;;  %v4539_v61 = vsel %vm731_vm1, %v4511_v47, %v4513_v38  ;;  %v4544_v57 = vsel %vm731_vm1, %v4504_v28, %v4506_v36  ;;  %v15046_v28 = vld [vmem:[#allocation20_spill] sm:$0xff] }
 0x616   : > { %v5198_v14 = vpack.c.bf16 %v4542_v41, %v4544_v57  ;;  %v8301_v36 = vld [vmem:[#allocation7 + $0x1c0] sm:$0xff]  }
 0x617   : > { %6183 = vmatmul.mubr.bf16.gmra.mrb[72].mxu1 %v5188_v16  ;;  %v5209_v16 = vpack.c.bf16 %v4539_v61, %v4541_v53  ;;  %v15048_v53 = vld [vmem:[#allocation58_spill] sm:$0xff] }
 0x618   : > { %6190 = vmatprep.mubr.bf16.mxu1 %v5199_v20  ;;  %7506 = vmatpush3.bf16.msra.mxu1 %v8294_v50  ;;  %v8299_v50 = vld [vmem:[#allocation7 + $0x178] sm:$0xff]  }
 0x619   : > { %7507 = vmatprep.subr.bf16.mxu1 %v8295_v5  ;;  %v4512_v5 = vrot.slane %v15043_v4, 7  ;;  %v15044_v20 = vld [vmem:[#allocation39_spill] sm:$0xff] }
 0x61a   : > { %v4517_v7 = vrot.slane %v15044_v20, 7 }
 0x61b   : > { %v4538_v44 = vsel %vm731_vm1, %v4510_v54, %v4512_v5 }
 0x61c   : > { %7508 = vmatpush3.bf16.msra.mxu1 %v8296_v26  ;;  %v4515_v26 = vrot.slane %v15046_v28, 7  ;;  %v15050_v28 = vld [vmem:[#allocation59_spill] sm:$0xff] }
 0x61d   : > { %7509 = vmatprep.subr.bf16.mxu1 %v8297_v25  ;;  %v4540_v25 = vsel %vm731_vm1, %v4508_v42, %v4510_v54  ;;  %v4519_v4 = vrot.slane %v15050_v28, 7 }
 0x61e   : > { %v4535_v47 = vsel %vm731_vm1, %v4515_v26, %v4517_v7  ;;  %v5208_v41 = vpack.c.bf16 %v4538_v44, %v4540_v25  ;;  %v4537_v61 = vsel %vm731_vm1, %v4513_v38, %v4515_v26 }
 0x61f   : > { %6191 = vmatmul.mubr.bf16.gmra.mrb[76].mxu1 %v5198_v14  ;;  %v5219_v57 = vpack.c.bf16 %v4535_v47, %v4537_v61  ;;  %v4533_v44 = vsel %vm731_vm1, %v4517_v7, %v4519_v4  ;;  %v15052_v61 = vld [vmem:[#allocation19_spill] sm:$0xff]  ;;  %v15056_v7 = vrot.slane %v15019_v11, 7 }
 0x620   : > { %6198 = vmatprep.mubr.bf16.mxu1 %v5209_v16  ;;  %7510 = vmatpush3.bf16.msra.mxu1 %v8298_v23  ;;  %v15047_v23 = vld [vmem:[#allocation33_spill] sm:$0xff] }
 0x621   : > { %7511 = vmatprep.subr.bf16.mxu1 %v8299_v50  ;;  %v4516_v14 = vrot.slane %v15047_v23, 7  ;;  %v4521_v50 = vrot.slane %v15048_v53, 7  ;;  %v15049_v16 = vld [vmem:[#allocation57_spill] sm:$0xff]  ;;  %v15054_v23 = vld [vmem:[#allocation44_spill] sm:$0xff] }
 0x622   : > { %v4514_v20 = vrot.slane %v15049_v16, 7  ;;  %v4518_v16 = vrot.slane %v15054_v23, 7 }
 0x624   : > { %7512 = vmatpush3.bf16.msra.mxu1 %v8300_v10  ;;  %v4534_v54 = vsel %vm731_vm1, %v4514_v20, %v4516_v14  ;;  %v4531_v10 = vsel %vm731_vm1, %v4519_v4, %v4521_v50  ;;  %v4536_v38 = vsel %vm731_vm1, %v4512_v5, %v4514_v20  ;;  %v4523_v5 = vrot.slane %v15055_v35, 7 }
 0x625   : > { %7609 = vmatprep.subr.bf16.mxu1 %v8301_v36  ;;  %v5218_v36 = vpack.c.bf16 %v4534_v54, %v4536_v38  ;;  %v4532_v54 = vsel %vm731_vm1, %v4516_v14, %v4518_v16  ;;  %v14448_v38 = vrot.slane %v12954_v46, 7 }
 0x626   : > { %v4527_v4 = vsel %vm731_vm1, %v4523_v5, %v15056_v7  ;;  %v15060_v7 = vrot.slane %v15023_v43, 7 }
 0x627   : > { %6199 = vmatmul.mubr.bf16.gmra.mrb[80].mxu1 %v5208_v41  ;;  %v5229_v41 = vpack.c.bf16 %v4531_v10, %v4533_v44  ;;  %v15058_v44 = vld [vmem:[#allocation26_spill] sm:$0xff] }
 0x628   : > { %6206 = vmatprep.mubr.bf16.mxu1 %v5219_v57  ;;  %v4520_v57 = vrot.slane %v15052_v61, 7 }
 0x62a   : > { %v7773_v42 = vpop.f32.mrb[88].mxu0  ;;  %v4530_v20 = vsel %vm731_vm1, %v4518_v16, %v4520_v57 }
 0x62b   : > { %v7774_v26 = vpop.f32.mrb[89].mxu0  ;;  %v5228_v10 = vpack.c.bf16 %v4530_v20, %v4532_v54  ;;  %v14451_v54 = vrot.slane %v13004_v1, 7 }
 0x62c   : > { %v13291_v47 = vadd.f32 %v7774_v26, %v7773_v42  ;;  %v7776_v25 = vpop.f32.mrb[90].mxu0  ;;  %v15057_v26 = vld [vmem:[#allocation30_spill] sm:$0xff] }
 0x62d   : > { %v7777_v53 = vpop.f32.mrb[91].mxu0 }
 0x62e   : > { %15051 = vst [vmem:[#allocation70_spill] sm:$0xff] %v13291_v47  ;;  %v13294_v28 = vadd.f32 %v7777_v53, %v7776_v25  ;;  %v4529_v53 = vsel %vm731_vm1, %v4521_v50, %v4523_v5  ;;  %v4879_v25 = vrot.slane %v15058_v44, 7  ;;  %v15062_v47 = vld [vmem:[#allocation25_spill] sm:$0xff] }
 0x62f   : > { %6207 = vmatmul.mubr.bf16.gmra.mrb[84].mxu1 %v5218_v36  ;;  %v5239_v42 = vpack.c.bf16 %v4527_v4, %v4529_v53  ;;  %v4522_v36 = vrot.slane %v15057_v26, 7  ;;  %v4878_v53 = vrot.slane %v14949_v48, 7  ;;  %v4884_v48 = vrot.slane %v14992_v32, 7 }
 0x630   : > { %15053 = vst [vmem:[#allocation38_spill] sm:$0xff] %v13294_v28  ;;  %6214 = vmatprep.mubr.bf16.mxu1 %v5229_v41  ;;  %v15059_v41 = vld [vmem:[#allocation13_spill] sm:$0xff]  ;;  %v4941_v50 = vsel %vm731_vm1, %v14448_v38, %v4879_v25 }
 0x631   : > { %v4881_v28 = vrot.slane %v15059_v41, 7  ;;  %v4526_v14 = vsel %vm731_vm1, %v4522_v36, %v15060_v7  ;;  %v4528_v16 = vsel %vm731_vm1, %v4520_v57, %v4522_v36  ;;  %v4883_v57 = vrot.slane %v15062_v47, 7 }
 0x632   : > { %v5238_v5 = vpack.c.bf16 %v4526_v14, %v4528_v16 }
 0x633   : > { %v4939_v20 = vsel %vm731_vm1, %v4879_v25, %v4881_v28  ;;  %v4940_v25 = vsel %vm731_vm1, %v14451_v54, %v4878_v53  ;;  %v4937_v47 = vsel %vm731_vm1, %v4881_v28, %v4883_v57  ;;  %v15065_v54 = vld [vmem:[#allocation31_spill] sm:$0xff] }
 0x634   : > { %v7202_v4 = vpack.c.bf16 %v4939_v20, %v4941_v50 }
 0x637   : > { %6215 = vmatmul.mubr.bf16.gmra.mrb[88].mxu1 %v5228_v10  ;;  %v4885_v10 = vrot.slane %v14959_v51, 7 }
 0x638   : > { %6222 = vmatprep.mubr.bf16.mxu1 %v5239_v42  ;;  %v15061_v42 = vld [vmem:[#allocation16_spill] sm:$0xff] }
 0x639   : > { %v4880_v7 = vrot.slane %v15061_v42, 7  ;;  %v4935_v16 = vsel %vm731_vm1, %v4883_v57, %v4885_v10 }
 0x63a   : > { %v5259_v42 = vpack.c.bf16 %v4935_v16, %v4937_v47 }
 0x63b   : > { %v4938_v20 = vsel %vm731_vm1, %v4878_v53, %v4880_v7 }
 0x63c   : > { %v7205_v51 = vpack.c.bf16 %v4938_v20, %v4940_v25 }
 0x63e   : > { %v7289_v38 = vpop.f32.mrb[0].mxu1 }
 0x63f   : > { %6223 = vmatmul.mubr.bf16.gmra.mrb[92].mxu1 %v5238_v5  ;;  %v7290_v36 = vpop.f32.mrb[1].mxu1 }
 0x640   : > { %7203 = vmatprep.mubr.msk.bf16.mxu1 %vm9397_vm6, %v7202_v4  ;;  %v13335_v14 = vadd.f32 %v7290_v36, %v7289_v38  ;;  %v7292_v50 = vpop.f32.mrb[2].mxu1  ;;  %v4889_v38 = vrot.slane %v14968_v63, 7  ;;  %v4882_v36 = vrot.slane %v14993_v19, 7 }
 0x641   : > { %v7293_v5 = vpop.f32.mrb[3].mxu1 }
 0x642   : > { %15063 = vst [vmem:[#allocation42_spill] sm:$0xff] %v13335_v14  ;;  %v13341_v4 = vadd.f32 %v7293_v5, %v7292_v50  ;;  %v4887_v14 = vrot.slane %v15065_v54, 7  ;;  %v4934_v53 = vsel %vm731_vm1, %v4882_v36, %v4884_v48  ;;  %v4936_v47 = vsel %vm731_vm1, %v4880_v7, %v4882_v36 }
 0x643   : > { %v5258_v45 = vpack.c.bf16 %v4934_v53, %v4936_v47  ;;  %v4888_v5 = vrot.slane %v14970_v49, 7  ;;  %v4886_v7 = vrot.slane %v14995_v2, 7  ;;  %v4891_v36 = vrot.slane %v14969_v8, 7 }
 0x644   : > { %15064 = vst [vmem:[#allocation47_spill] sm:$0xff] %v13341_v4  ;;  %v4931_v25 = vsel %vm731_vm1, %v4887_v14, %v4889_v38  ;;  %v4893_v4 = vrot.slane %v14976_v17, 7 }
 0x645   : > { %v4932_v53 = vsel %vm731_vm1, %v4884_v48, %v4886_v7 }
 0x647   : > { %7206 = vmatmul.mubr.msk.bf16.gmra.mrb[96].mxu1 %vm9397_vm6, %v7205_v51  ;;  %v4933_v51 = vsel %vm731_vm1, %v4885_v10, %v4887_v14  ;;  %v4930_v10 = vsel %vm731_vm1, %v4886_v7, %v4888_v5  ;;  %v4927_v14 = vsel %vm731_vm1, %v4891_v36, %v4893_v4 }
 0x648   : > { %6238 = vmatprep.mubr.bf16.mxu1 %v5259_v42  ;;  %v5269_v16 = vpack.c.bf16 %v4931_v25, %v4933_v51  ;;  %v5268_v25 = vpack.c.bf16 %v4930_v10, %v4932_v53  ;;  %v4890_v51 = vrot.slane %v14999_v29, 7 }
 0x64a   : > { %v7779_v28 = vpop.f32.mrb[92].mxu0 }
 0x64b   : > { %v7780_v57 = vpop.f32.mrb[93].mxu0 }
 0x64c   : > { %v13359_v42 = vadd.f32 %v7780_v57, %v7779_v28  ;;  %v7782_v50 = vpop.f32.mrb[94].mxu0  ;;  %v4929_v28 = vsel %vm731_vm1, %v4889_v38, %v4891_v36  ;;  %v4892_v57 = vrot.slane %v14977_v55, 7 }
 0x64d   : > { %v7783_v20 = vpop.f32.mrb[95].mxu0  ;;  %v5279_v47 = vpack.c.bf16 %v4927_v14, %v4929_v28  ;;  %v4928_v14 = vsel %vm731_vm1, %v4888_v5, %v4890_v51 }
 0x64e   : > { %15066 = vst [vmem:[#allocation35_spill] sm:$0xff] %v13359_v42  ;;  %v13363_v63 = vadd.f32 %v7783_v20, %v7782_v50  ;;  %v4926_v48 = vsel %vm731_vm1, %v4890_v51, %v4892_v57  ;;  %v4899_v42 = vrot.slane %v12736_v27, 7 }
 0x64f   : > { %6239 = vmatmul.mubr.bf16.gmra.mrb[100].mxu1 %v5258_v45  ;;  %v4897_v45 = vrot.slane %v12710_v33, 7 }
 0x650   : > { %15067 = vst [vmem:[#allocation37_spill] sm:$0xff] %v13363_v63  ;;  %6246 = vmatprep.mubr.bf16.mxu1 %v5269_v16  ;;  %v4895_v16 = vrot.slane %v15000_v18, 7  ;;  %v4896_v63 = vrot.slane %v12658_v60, 7 }
 0x652   : > { %v4923_v38 = vsel %vm731_vm1, %v4895_v16, %v4897_v45  ;;  %v4925_v28 = vsel %vm731_vm1, %v4893_v4, %v4895_v16 }
 0x657   : > { %6247 = vmatmul.mubr.bf16.gmra.mrb[104].mxu1 %v5268_v25  ;;  %v7295_v50 = vpop.f32.mrb[4].mxu1  ;;  %v5278_v25 = vpack.c.bf16 %v4926_v48, %v4928_v14  ;;  %v4921_v48 = vsel %vm731_vm1, %v4897_v45, %v4899_v42  ;;  %v4900_v14 = vrot.slane %v12742_v13, 7 }
 0x658   : > { %6254 = vmatprep.mubr.bf16.mxu1 %v5279_v47  ;;  %v7296_v20 = vpop.f32.mrb[5].mxu1  ;;  %v5289_v47 = vpack.c.bf16 %v4923_v38, %v4925_v28 }
 0x659   : > { %v13381_v7 = vadd.f32 %v7296_v20, %v7295_v50  ;;  %v7298_v10 = vpop.f32.mrb[6].mxu1  ;;  %v4901_v50 = vrot.slane %v12748_v21, 7  ;;  %v4894_v20 = vrot.slane %v15006_v34, 7  ;;  %v4905_v21 = vrot.slane %v13143_v59, 7 }
 0x65a   : > { %v7299_v36 = vpop.f32.mrb[7].mxu1  ;;  %v4907_v59 = vrot.slane %v13168_v0, 7 }
 0x65b   : > { %v13387_v53 = vadd.f32 %v7299_v36, %v7298_v10  ;;  %v4922_v5 = vsel %vm731_vm1, %v4894_v20, %v4896_v63  ;;  %v4919_v51 = vsel %vm731_vm1, %v4899_v42, %v4901_v50  ;;  %v4924_v4 = vsel %vm731_vm1, %v4892_v57, %v4894_v20 }
 0x65c   : > { %v5288_v16 = vpack.c.bf16 %v4922_v5, %v4924_v4  ;;  %v5299_v38 = vpack.c.bf16 %v4919_v51, %v4921_v48  ;;  %v4898_v57 = vrot.slane %v12733_v9, 7  ;;  %v4903_v5 = vrot.slane %v12916_v39, 7 }
 0x65d   : > { %15068 = vst [vmem:[#allocation14_spill] sm:$0xff] %v13387_v53 }
 0x65e   : > { %v4918_v4 = vsel %vm731_vm1, %v4898_v57, %v4900_v14  ;;  %v4915_v48 = vsel %vm731_vm1, %v4903_v5, %v4905_v21 }
 0x65f   : > { %6255 = vmatmul.mubr.bf16.gmra.mrb[108].mxu1 %v5278_v25 }
 0x660   : > { %6262 = vmatprep.mubr.bf16.mxu1 %v5289_v47 }
 0x664   : > { %v7785_v10 = vpop.f32.mrb[96].mxu0 }
 0x665   : > { %v7786_v36 = vpop.f32.mrb[97].mxu0 }
 0x666   : > { %v13404_v25 = vadd.f32 %v7786_v36, %v7785_v10  ;;  %v7788_v47 = vpop.f32.mrb[98].mxu0  ;;  %v4920_v10 = vsel %vm731_vm1, %v4896_v63, %v4898_v57  ;;  %v4904_v36 = vrot.slane %v13158_v62, 7 }
 0x667   : > { %6263 = vmatmul.mubr.bf16.gmra.mrb[112].mxu1 %v5288_v16  ;;  %v7789_v53 = vpop.f32.mrb[99].mxu0 }
 0x668   : > { %15069 = vst [vmem:[#allocation41_spill] sm:$0xff] %v13404_v25  ;;  %v7301_v28 = vpop.f32.mrb[8].mxu1  ;;  %6270 = vmatprep.mubr.bf16.mxu1 %v5299_v38  ;;  %v13410_v42 = vadd.f32 %v7789_v53, %v7788_v47  ;;  %v5298_v38 = vpack.c.bf16 %v4918_v4, %v4920_v10  ;;  %v15073_v10 = vrot.slane %v12954_v46, 7 }
 0x669   : > { %v7302_v27 = vpop.f32.mrb[9].mxu1 }
 0x66a   : > { %v13408_v20 = vadd.f32 %v7302_v27, %v7301_v28  ;;  %15070 = vst [vmem:[#allocation40_spill] sm:$0xff] %v13410_v42  ;;  %v7304_v45 = vpop.f32.mrb[10].mxu1  ;;  %v4917_v27 = vsel %vm731_vm1, %v4901_v50, %v4903_v5 }
 0x66b   : > { %v7305_v51 = vpop.f32.mrb[11].mxu1  ;;  %v5309_v53 = vpack.c.bf16 %v4915_v48, %v4917_v27 }
 0x66c   : > { %v13415_v16 = vadd.f32 %v7305_v51, %v7304_v45  ;;  %v4902_v45 = vrot.slane %v12849_v3, 7 }
 0x66e   : > { %v4914_v50 = vsel %vm731_vm1, %v4902_v45, %v4904_v36 }
 0x66f   : > { %6271 = vmatmul.mubr.bf16.gmra.mrb[116].mxu1 %v5298_v38  ;;  %v7791_v28 = vpop.f32.mrb[100].mxu0  ;;  %v4911_v38 = vsel %vm731_vm1, %v4907_v59, %v15073_v10  ;;  %v15074_v10 = vrot.slane %v13004_v1, 7 }
 0x670   : > { %6278 = vmatprep.mubr.bf16.mxu1 %v5309_v53  ;;  %v7792_v47 = vpop.f32.mrb[101].mxu0  ;;  %v4916_v53 = vsel %vm731_vm1, %v4900_v14, %v4902_v45 }
 0x671   : > { %v13425_v51 = vadd.f32 %v7792_v47, %v7791_v28  ;;  %v7307_v42 = vpop.f32.mrb[12].mxu1  ;;  %v7794_v25 = vpop.f32.mrb[102].mxu0  ;;  %v5308_v47 = vpack.c.bf16 %v4914_v50, %v4916_v53 }
 0x672   : > { %v7308_v63 = vpop.f32.mrb[13].mxu1  ;;  %v7795_v57 = vpop.f32.mrb[103].mxu0 }
 0x673   : > { %15071 = vst [vmem:[#allocation61_spill] sm:$0xff] %v13425_v51  ;;  %v13430_v5 = vadd.f32 %v7308_v63, %v7307_v42  ;;  %v13432_v4 = vadd.f32 %v7795_v57, %v7794_v25  ;;  %v7310_v48 = vpop.f32.mrb[14].mxu1  ;;  %v4913_v51 = vsel %vm731_vm1, %v4905_v21, %v4907_v59  ;;  %v4906_v25 = vrot.slane %v13184_v31, 7 }
 0x674   : > { %v7311_v27 = vpop.f32.mrb[15].mxu1  ;;  %v5319_v42 = vpack.c.bf16 %v4911_v38, %v4913_v51 }
 0x675   : > { %15072 = vst [vmem:[#allocation44_spill] sm:$0xff] %v13432_v4  ;;  %v13440_v28 = vadd.f32 %v7311_v27, %v7310_v48  ;;  %v4910_v46 = vsel %vm731_vm1, %v4906_v25, %v15074_v10  ;;  %v4912_v51 = vsel %vm731_vm1, %v4904_v36, %v4906_v25 }
 0x676   : > { %v5318_v53 = vpack.c.bf16 %v4910_v46, %v4912_v51  ;;  %v8303_v51 = vld [vmem:[#allocation7 + $0x1c8] sm:$0xff]  }
 0x677   : > { %6279 = vmatmul.mubr.bf16.gmra.mrb[120].mxu1 %v5308_v47 }
 0x678   : > { %6286 = vmatprep.mubr.bf16.mxu1 %v5319_v42  ;;  %v7797_v63 = vpop.f32.mrb[104].mxu0  ;;  %v5171_v42 = vpack.c.bf16 %v15021_v12, %v15020_v24 }
 0x679   : > { %v7798_v57 = vpop.f32.mrb[105].mxu0 }
 0x67a   : > { %v7313_v4 = vpop.f32.mrb[16].mxu1  ;;  %v13449_v14 = vadd.f32 %v7798_v57, %v7797_v63  ;;  %v7800_v45 = vpop.f32.mrb[106].mxu0 }
 0x67b   : > { %v7314_v50 = vpop.f32.mrb[17].mxu1  ;;  %v7801_v21 = vpop.f32.mrb[107].mxu0 }
 0x67c   : > { %15075 = vst [vmem:[#allocation50_spill] sm:$0xff] %v13449_v14  ;;  %v13451_v48 = vadd.f32 %v7314_v50, %v7313_v4  ;;  %v7316_v59 = vpop.f32.mrb[18].mxu1  ;;  %v13455_v38 = vadd.f32 %v7801_v21, %v7800_v45  ;;  %v8302_v45 = vld [vmem:[#allocation7 + $0x180] sm:$0xff]  }
 0x67d   : > { %v7317_v27 = vpop.f32.mrb[19].mxu1 }
 0x67e   : > { %15076 = vst [vmem:[#allocation30_spill] sm:$0xff] %v13455_v38  ;;  %v13457_v47 = vadd.f32 %v7317_v27, %v7316_v59  ;;  %v5170_v59 = vpack.c.bf16 %v15026_v58, %v15025_v6  ;;  %v8306_v38 = vld [vmem:[#allocation7 + $0x190] sm:$0xff]  }
 0x67f   : > { %6287 = vmatmul.mubr.bf16.gmra.mrb[124].mxu1 %v5318_v53  ;;  %v5181_v53 = vpack.c.bf16 %v15024_v40, %v15028_v52 }
 0x680   : > { %6327 = vmatprep.mubr.bf16.mxu1 %v5171_v42  ;;  %v7803_v63 = vpop.f32.mrb[108].mxu0 }
 0x681   : > { %v7804_v57 = vpop.f32.mrb[109].mxu0 }
 0x682   : > { %v7319_v4 = vpop.f32.mrb[20].mxu1  ;;  %v13461_v10 = vadd.f32 %v7804_v57, %v7803_v63  ;;  %v7806_v50 = vpop.f32.mrb[110].mxu0  ;;  %v8305_v63 = vld [vmem:[#allocation7 + $0x1d0] sm:$0xff]  }
 0x683   : > { %v7320_v14 = vpop.f32.mrb[21].mxu1  ;;  %v7807_v36 = vpop.f32.mrb[111].mxu0 }
 0x684   : > { %15077 = vst [vmem:[#allocation13_spill] sm:$0xff] %v13461_v10  ;;  %v13463_v1 = vadd.f32 %v7320_v14, %v7319_v4  ;;  %v7322_v25 = vpop.f32.mrb[22].mxu1  ;;  %v13465_v46 = vadd.f32 %v7807_v36, %v7806_v50  ;;  %v8304_v14 = vld [vmem:[#allocation7 + $0x188] sm:$0xff]  }
 0x685   : > { %v7323_v21 = vpop.f32.mrb[23].mxu1 }
 0x686   : > { %15078 = vst [vmem:[#allocation31_spill] sm:$0xff] %v13465_v46  ;;  %v13469_v27 = vadd.f32 %v7323_v21, %v7322_v25 }
 0x687   : > { %6328 = vmatmul.mubr.bf16.vlgmr.msra.gmra.mrb[128].mxu1 %v5170_v59  ;;  %v5180_v59 = vpack.c.bf16 %v15029_v30, %v15031_v56 }
 0x688   : > { %15079 = vst [vmem:[#allocation78_spill] sm:$0xff] %v13469_v27  ;;  %7610 = vmatpush3.bf16.msra.mxu1 %v8302_v45  ;;  %6335 = vmatprep.mubr.bf16.mxu1 %v5181_v53  ;;  %v7809_v42 = vpop.f32.mrb[112].mxu0 }
 0x689   : > { %7611 = vmatprep.subr.bf16.mxu1 %v8303_v51  ;;  %v7810_v57 = vpop.f32.mrb[113].mxu0  ;;  %v8307_v51 = vld [vmem:[#allocation7 + $0x1d8] sm:$0xff]  }
 0x68a   : > { %v7325_v4 = vpop.f32.mrb[24].mxu1  ;;  %v13473_v50 = vadd.f32 %v7810_v57, %v7809_v42  ;;  %v7812_v36 = vpop.f32.mrb[114].mxu0  ;;  %v15084_v42 = vld [vmem:[#allocation51_spill] sm:$0xff] }
 0x68b   : > { %v7326_v46 = vpop.f32.mrb[25].mxu1  ;;  %v7813_v25 = vpop.f32.mrb[115].mxu0  ;;  %v5191_v57 = vpack.c.bf16 %v15084_v42, %v15032_v22 }
 0x68c   : > { %15080 = vst [vmem:[#allocation79_spill] sm:$0xff] %v13473_v50  ;;  %v13475_v10 = vadd.f32 %v7326_v46, %v7325_v4  ;;  %v7328_v21 = vpop.f32.mrb[26].mxu1  ;;  %7612 = vmatpush3.bf16.msra.mxu1 %v8304_v14  ;;  %v13477_v27 = vadd.f32 %v7813_v25, %v7812_v36  ;;  %v8308_v46 = vld [vmem:[#allocation7 + $0x198] sm:$0xff]   ;;  %v8309_v14 = vld [vmem:[#allocation7 + $0x1e0] sm:$0xff]  }
 0x68d   : > { %v7329_v45 = vpop.f32.mrb[27].mxu1  ;;  %7613 = vmatprep.subr.bf16.mxu1 %v8305_v63 }
 0x68e   : > { %15081 = vst [vmem:[#allocation80_spill] sm:$0xff] %v13475_v10  ;;  %15082 = vst [vmem:[#allocation81_spill] sm:$0xff] %v13477_v27  ;;  %v13481_v53 = vadd.f32 %v7329_v45, %v7328_v21 }
 0x68f   : > { %6336 = vmatmul.mubr.bf16.gmra.mrb[132].mxu1 %v5180_v59 }
 0x690   : > { %15083 = vst [vmem:[#allocation82_spill] sm:$0xff] %v13481_v53  ;;  %6343 = vmatprep.mubr.bf16.mxu1 %v5191_v57  ;;  %7614 = vmatpush3.bf16.msra.mxu1 %v8306_v38  ;;  %v8310_v53 = vld [vmem:[#allocation7 + $0x1a0] sm:$0xff]   ;;  %v15088_v38 = vld [vmem:[#allocation22_spill] sm:$0xff] }
 0x691   : > { %v7815_v4 = vpop.f32.mrb[116].mxu0  ;;  %7615 = vmatprep.subr.bf16.mxu1 %v8307_v51  ;;  %v5190_v57 = vpack.c.bf16 %v15088_v38, %v15036_v37  ;;  %v8311_v51 = vld [vmem:[#allocation7 + $0x1e8] sm:$0xff]   ;;  %v15093_v38 = vld [vmem:[#allocation32_spill] sm:$0xff] }
 0x692   : > { %v7816_v36 = vpop.f32.mrb[117].mxu0  ;;  %v7331_v25 = vpop.f32.mrb[28].mxu1 }
 0x693   : > { %v13485_v27 = vadd.f32 %v7816_v36, %v7815_v4  ;;  %v7818_v50 = vpop.f32.mrb[118].mxu0  ;;  %v7332_v10 = vpop.f32.mrb[29].mxu1  ;;  %v15090_v4 = vld [vmem:[#allocation23_spill] sm:$0xff]  ;;  %v15091_v36 = vld [vmem:[#allocation21_spill] sm:$0xff] }
 0x694   : > { %v13487_v63 = vadd.f32 %v7332_v10, %v7331_v25  ;;  %v7819_v21 = vpop.f32.mrb[119].mxu0  ;;  %v7334_v45 = vpop.f32.mrb[30].mxu1  ;;  %7616 = vmatpush3.bf16.msra.mxu1 %v8308_v46  ;;  %v8312_v10 = vld [vmem:[#allocation7 + $0x1a8] sm:$0xff]   ;;  %v8313_v46 = vld [vmem:[#allocation7 + $0x1f0] sm:$0xff]  }
 0x695   : > { %15085 = vst [vmem:[#allocation83_spill] sm:$0xff] %v13485_v27  ;;  %v13489_v42 = vadd.f32 %v7819_v21, %v7818_v50  ;;  %v7335_v59 = vpop.f32.mrb[31].mxu1  ;;  %7617 = vmatprep.subr.bf16.mxu1 %v8309_v14  ;;  %v5201_v27 = vpack.c.bf16 %v15091_v36, %v15090_v4 }
 0x696   : > { %15086 = vst [vmem:[#allocation84_spill] sm:$0xff] %v13487_v63  ;;  %v13493_v30 = vadd.f32 %v7335_v59, %v7334_v45  ;;  %v8314_v63 = vld [vmem:[#allocation7 + $0x1b0] sm:$0xff]   ;;  %v15094_v45 = vld [vmem:[#allocation36_spill] sm:$0xff] }
 0x697   : > { %15087 = vst [vmem:[#allocation85_spill] sm:$0xff] %v13489_v42  ;;  %6344 = vmatmul.mubr.bf16.gmra.mrb[136].mxu1 %v5190_v57  ;;  %v5200_v59 = vpack.c.bf16 %v15094_v45, %v15093_v38  ;;  %v15099_v45 = vld [vmem:[#allocation27_spill] sm:$0xff] }
 0x698   : > { %15089 = vst [vmem:[#allocation86_spill] sm:$0xff] %v13493_v30  ;;  %6351 = vmatprep.mubr.bf16.mxu1 %v5201_v27  ;;  %7618 = vmatpush3.bf16.msra.mxu1 %v8310_v53  ;;  %v8315_v30 = vld [vmem:[#allocation7 + $0x1f8] sm:$0xff]   ;;  %v15096_v27 = vld [vmem:[#allocation28_spill] sm:$0xff]  ;;  %v15097_v53 = vld [vmem:[#allocation53_spill] sm:$0xff] }
 0x699   : > { %7619 = vmatprep.subr.bf16.mxu1 %v8311_v51  ;;  %v5211_v57 = vpack.c.bf16 %v15097_v53, %v15096_v27  ;;  %v8316_v51 = vld [vmem:[#allocation7 + $0x1b8] sm:$0xff]  }
 0x69a   : > { %v7337_v25 = vpop.f32.mrb[32].mxu1 }
 0x69b   : > { %v7338_v50 = vpop.f32.mrb[33].mxu1 }
 0x69c   : > { %v13497_v21 = vadd.f32 %v7338_v50, %v7337_v25  ;;  %v7340_v42 = vpop.f32.mrb[34].mxu1  ;;  %7620 = vmatpush3.bf16.msra.mxu1 %v8312_v10 }
 0x69d   : > { %v7341_v14 = vpop.f32.mrb[35].mxu1  ;;  %7621 = vmatprep.subr.bf16.mxu1 %v8313_v46  ;;  %v15100_v46 = vld [vmem:[#allocation55_spill] sm:$0xff] }
 0x69e   : > { %15092 = vst [vmem:[#allocation87_spill] sm:$0xff] %v13497_v21  ;;  %v13501_v36 = vadd.f32 %v7341_v14, %v7340_v42  ;;  %v5210_v38 = vpack.c.bf16 %v15100_v46, %v15099_v45  ;;  %v8639_v42 = vld [vmem:[#allocation7 + $0x240] sm:$0xff]   ;;  %v15108_v46 = vld [vmem:[#allocation59_spill] sm:$0xff] }
 0x69f   : > { %6352 = vmatmul.mubr.bf16.gmra.mrb[140].mxu1 %v5200_v59  ;;  %v15103_v59 = vld [vmem:[#allocation39_spill] sm:$0xff] }
 0x6a0   : > { %15095 = vst [vmem:[#allocation88_spill] sm:$0xff] %v13501_v36  ;;  %6359 = vmatprep.mubr.bf16.mxu1 %v5211_v57  ;;  %7622 = vmatpush3.bf16.msra.mxu1 %v8314_v63  ;;  %v15102_v36 = vld [vmem:[#allocation20_spill] sm:$0xff] }
 0x6a1   : > { %7623 = vmatprep.subr.bf16.mxu1 %v8315_v30  ;;  %v5221_v57 = vpack.c.bf16 %v15103_v59, %v15102_v36 }
 0x6a2   : > { %v7343_v25 = vpop.f32.mrb[36].mxu1 }
 0x6a3   : > { %v7344_v50 = vpop.f32.mrb[37].mxu1 }
 0x6a4   : > { %v13505_v10 = vadd.f32 %v7344_v50, %v7343_v25  ;;  %v7346_v21 = vpop.f32.mrb[38].mxu1  ;;  %7624 = vmatpush3.bf16.msra.mxu1 %v8316_v51  ;;  %v15105_v51 = vld [vmem:[#allocation57_spill] sm:$0xff] }
 0x6a5   : > { %v7347_v4 = vpop.f32.mrb[39].mxu1  ;;  %7833 = vmatprep.subr.bf16.mxu1 %v8639_v42  ;;  %v15109_v42 = vld [vmem:[#allocation58_spill] sm:$0xff] }
 0x6a6   : > { %15098 = vst [vmem:[#allocation89_spill] sm:$0xff] %v13505_v10  ;;  %v13509_v14 = vadd.f32 %v7347_v4, %v7346_v21  ;;  %v15106_v10 = vld [vmem:[#allocation33_spill] sm:$0xff]  ;;  %v5231_v4 = vpack.c.bf16 %v15109_v42, %v15108_v46 }
 0x6a7   : > { %6360 = vmatmul.mubr.bf16.gmra.mrb[144].mxu1 %v5210_v38  ;;  %v5220_v27 = vpack.c.bf16 %v15106_v10, %v15105_v51 }
 0x6a8   : > { %15101 = vst [vmem:[#allocation27_spill] sm:$0xff] %v13509_v14  ;;  %6367 = vmatprep.mubr.bf16.mxu1 %v5221_v57 }
 0x6aa   : > { %v7349_v30 = vpop.f32.mrb[40].mxu1 }
 0x6ab   : > { %v7350_v63 = vpop.f32.mrb[41].mxu1 }
 0x6ac   : > { %v13513_v53 = vadd.f32 %v7350_v63, %v7349_v30  ;;  %v7352_v25 = vpop.f32.mrb[42].mxu1  ;;  %v5230_v30 = vpack.c.bf16 %v15052_v61, %v15054_v23 }
 0x6ad   : > { %v7353_v50 = vpop.f32.mrb[43].mxu1 }
 0x6ae   : > { %15104 = vst [vmem:[#allocation20_spill] sm:$0xff] %v13513_v53  ;;  %v13517_v37 = vadd.f32 %v7353_v50, %v7352_v25  ;;  %v5241_v25 = vpack.c.bf16 %v15019_v11, %v15055_v35  ;;  %v15118_v11 = vld [vmem:[#allocation25_spill] sm:$0xff] }
 0x6af   : > { %6368 = vmatmul.mubr.bf16.gmra.mrb[148].mxu1 %v5220_v27 }
 0x6b0   : > { %15107 = vst [vmem:[#allocation57_spill] sm:$0xff] %v13517_v37  ;;  %6375 = vmatprep.mubr.bf16.mxu1 %v5231_v4 }
 0x6b2   : > { %v7355_v21 = vpop.f32.mrb[44].mxu1 }
 0x6b3   : > { %v7356_v14 = vpop.f32.mrb[45].mxu1 }
 0x6b4   : > { %v13521_v38 = vadd.f32 %v7356_v14, %v7355_v21  ;;  %v7358_v57 = vpop.f32.mrb[46].mxu1  ;;  %v5240_v14 = vpack.c.bf16 %v15023_v43, %v15057_v26  ;;  %v15119_v43 = vld [vmem:[#allocation52_spill] sm:$0xff] }
 0x6b5   : > { %v7359_v59 = vpop.f32.mrb[47].mxu1 }
 0x6b6   : > { %15110 = vst [vmem:[#allocation33_spill] sm:$0xff] %v13521_v38  ;;  %v13525_v63 = vadd.f32 %v7359_v59, %v7358_v57  ;;  %v5251_v59 = vpack.c.bf16 %v15059_v41, %v15058_v44 }
 0x6b7   : > { %6376 = vmatmul.mubr.bf16.gmra.mrb[152].mxu1 %v5230_v30 }
 0x6b8   : > { %15111 = vst [vmem:[#allocation59_spill] sm:$0xff] %v13525_v63  ;;  %6383 = vmatprep.mubr.bf16.mxu1 %v5241_v25 }
 0x6ba   : > { %v7361_v50 = vpop.f32.mrb[48].mxu1 }
 0x6bb   : > { %v7362_v37 = vpop.f32.mrb[49].mxu1 }
 0x6bc   : > { %v13529_v27 = vadd.f32 %v7362_v37, %v7361_v50  ;;  %v7364_v4 = vpop.f32.mrb[50].mxu1  ;;  %v15115_v37 = vld [vmem:[#allocation46_spill] sm:$0xff]  ;;  %v15116_v50 = vld [vmem:[#allocation16_spill] sm:$0xff] }
 0x6bd   : > { %v7365_v53 = vpop.f32.mrb[51].mxu1 }
 0x6be   : > { %15112 = vst [vmem:[#allocation58_spill] sm:$0xff] %v13529_v27  ;;  %v13533_v21 = vadd.f32 %v7365_v53, %v7364_v4  ;;  %v5250_v27 = vpack.c.bf16 %v15116_v50, %v15115_v37  ;;  %v5261_v53 = vpack.c.bf16 %v15119_v43, %v15118_v11 }
 0x6bf   : > { %6384 = vmatmul.mubr.bf16.gmra.mrb[156].mxu1 %v5240_v14 }
 0x6c0   : > { %15113 = vst [vmem:[#allocation90_spill] sm:$0xff] %v13533_v21  ;;  %6391 = vmatprep.mubr.bf16.mxu1 %v5251_v59 }
 0x6c2   : > { %v7367_v57 = vpop.f32.mrb[52].mxu1 }
 0x6c3   : > { %v7368_v63 = vpop.f32.mrb[53].mxu1 }
 0x6c4   : > { %v13537_v30 = vadd.f32 %v7368_v63, %v7367_v57  ;;  %v7370_v25 = vpop.f32.mrb[54].mxu1  ;;  %v5260_v63 = vpack.c.bf16 %v14992_v32, %v14993_v19 }
 0x6c5   : > { %v7371_v38 = vpop.f32.mrb[55].mxu1 }
 0x6c6   : > { %15114 = vst [vmem:[#allocation91_spill] sm:$0xff] %v13537_v30  ;;  %v13541_v61 = vadd.f32 %v7371_v38, %v7370_v25  ;;  %v15122_v30 = vld [vmem:[#allocation45_spill] sm:$0xff] }
 0x6c7   : > { %6392 = vmatmul.mubr.bf16.gmra.mrb[160].mxu1 %v5250_v27  ;;  %v5271_v38 = vpack.c.bf16 %v15122_v30, %v15065_v54 }
 0x6c8   : > { %15117 = vst [vmem:[#allocation16_spill] sm:$0xff] %v13541_v61  ;;  %6399 = vmatprep.mubr.bf16.mxu1 %v5261_v53 }
 0x6ca   : > { %v7373_v4 = vpop.f32.mrb[56].mxu1 }
 0x6cb   : > { %v7374_v21 = vpop.f32.mrb[57].mxu1 }
 0x6cc   : > { %v13545_v14 = vadd.f32 %v7374_v21, %v7373_v4  ;;  %v7376_v59 = vpop.f32.mrb[58].mxu1  ;;  %v5270_v21 = vpack.c.bf16 %v14970_v49, %v14995_v2 }
 0x6cd   : > { %v7377_v44 = vpop.f32.mrb[59].mxu1 }
 0x6ce   : > { %15120 = vst [vmem:[#allocation25_spill] sm:$0xff] %v13545_v14  ;;  %v13549_v57 = vadd.f32 %v7377_v44, %v7376_v59  ;;  %v5281_v44 = vpack.c.bf16 %v14976_v17, %v14969_v8  ;;  %v13564_v59 = vld [vmem:[%s14243_s6] ss:$0 sm:$0xff]  ;;  %v5291_v17 = vpack.c.bf16 %v12710_v33, %v15000_v18 }
 0x6cf   : > { %6400 = vmatmul.mubr.bf16.gmra.mrb[164].mxu1 %v5260_v63 }
 0x6d0   : > { %15121 = vst [vmem:[#allocation52_spill] sm:$0xff] %v13549_v57  ;;  %6407 = vmatprep.mubr.bf16.mxu1 %v5271_v38  ;;  %v15125_v38 = vld [vmem:[#allocation42_spill] sm:$0xff] }
 0x6d2   : > { %v7379_v25 = vpop.f32.mrb[60].mxu1 }
 0x6d3   : > { %v7380_v61 = vpop.f32.mrb[61].mxu1 }
 0x6d4   : > { %v13553_v27 = vadd.f32 %v7380_v61, %v7379_v25  ;;  %v7382_v53 = vpop.f32.mrb[62].mxu1  ;;  %v6008_v25 = vadd.f32 %v15125_v38, %v13564_v59 }
 0x6d5   : > { %v7383_v37 = vpop.f32.mrb[63].mxu1 }
 0x6d6   : > { %15123 = vst [vmem:[#allocation92_spill] sm:$0xff] %v13553_v27  ;;  %v13557_v4 = vadd.f32 %v7383_v37, %v7382_v53  ;;  %v5280_v37 = vpack.c.bf16 %v14977_v55, %v14999_v29 }
 0x6d7   : > { %6408 = vmatmul.mubr.bf16.gmra.mrb[168].mxu1 %v5270_v21  ;;  %v15127_v21 = vld [vmem:[#allocation47_spill] sm:$0xff] }
 0x6d8   : > { %15124 = vst [vmem:[#allocation93_spill] sm:$0xff] %v13557_v4  ;;  %6415 = vmatprep.mubr.bf16.mxu1 %v5281_v44  ;;  %v6011_v44 = vadd.f32 %v15127_v21, %v13564_v59 }
 0x6da   : > { %v7401_v63 = vpop.f32.mrb[64].mxu1 }
 0x6db   : > { %v7402_v61 = vpop.f32.mrb[65].mxu1 }
 0x6dc   : > { %v7403_v27 = vadd.f32 %v7402_v61, %v7401_v63  ;;  %v7404_v57 = vpop.f32.mrb[66].mxu1  ;;  %v6016_v61 = vadd.f32 %v13381_v7, %v13564_v59 }
 0x6dd   : > { %v7405_v49 = vpop.f32.mrb[67].mxu1 }
 0x6de   : > { %v13570_v53 = vadd.f32 %v7403_v27, %v6008_v25  ;;  %v7406_v4 = vadd.f32 %v7405_v49, %v7404_v57  ;;  %v5290_v25 = vpack.c.bf16 %v12658_v60, %v15006_v34  ;;  %v15129_v49 = vld [vmem:[#allocation14_spill] sm:$0xff] }
 0x6df   : > { %6416 = vmatmul.mubr.bf16.gmra.mrb[172].mxu1 %v5280_v37  ;;  %v6019_v57 = vadd.f32 %v15129_v49, %v13564_v59  ;;  %v15133_v49 = vld [vmem:[#allocation24_spill] sm:$0xff] }
 0x6e0   : > { %15126 = vst [vmem:[#allocation42_spill] sm:$0xff] %v13570_v53  ;;  %v13576_v14 = vadd.f32 %v7406_v4, %v6011_v44  ;;  %6423 = vmatprep.mubr.bf16.mxu1 %v5291_v17  ;;  %v15130_v4 = vld [vmem:[#allocation29_spill] sm:$0xff]  ;;  %v15131_v44 = vld [vmem:[#allocation56_spill] sm:$0xff] }
 0x6e1   : > { %v5301_v17 = vpack.c.bf16 %v15131_v44, %v15130_v4 }
 0x6e2   : > { %15128 = vst [vmem:[#allocation47_spill] sm:$0xff] %v13576_v14  ;;  %v7407_v38 = vpop.f32.mrb[68].mxu1 }
 0x6e3   : > { %v7408_v63 = vpop.f32.mrb[69].mxu1 }
 0x6e4   : > { %v7409_v30 = vadd.f32 %v7408_v63, %v7407_v38  ;;  %v7410_v55 = vpop.f32.mrb[70].mxu1  ;;  %v6024_v63 = vadd.f32 %v13408_v20, %v13564_v59 }
 0x6e5   : > { %v7411_v27 = vpop.f32.mrb[71].mxu1 }
 0x6e6   : > { %v13582_v21 = vadd.f32 %v7409_v30, %v6016_v61  ;;  %v7412_v37 = vadd.f32 %v7411_v27, %v7410_v55  ;;  %v5300_v61 = vpack.c.bf16 %v12742_v13, %v12733_v9  ;;  %v6027_v55 = vadd.f32 %v13415_v16, %v13564_v59 }
 0x6e7   : > { %6424 = vmatmul.mubr.bf16.gmra.mrb[176].mxu1 %v5290_v25  ;;  %v5310_v16 = vpack.c.bf16 %v13158_v62, %v12849_v3 }
 0x6e8   : > { %v13588_v14 = vadd.f32 %v7412_v37, %v6019_v57  ;;  %6431 = vmatprep.mubr.bf16.mxu1 %v5301_v17  ;;  %v5311_v57 = vpack.c.bf16 %v15133_v49, %v12916_v39 }
 0x6ea   : > { %15132 = vst [vmem:[#allocation14_spill] sm:$0xff] %v13588_v14  ;;  %v7413_v7 = vpop.f32.mrb[72].mxu1 }
 0x6eb   : > { %v7414_v38 = vpop.f32.mrb[73].mxu1 }
 0x6ec   : > { %v7415_v53 = vadd.f32 %v7414_v38, %v7413_v7  ;;  %v7416_v60 = vpop.f32.mrb[74].mxu1  ;;  %v6032_v7 = vadd.f32 %v13430_v5, %v13564_v59  ;;  %v4593_v5 = vrot.slane %v15021_v12, 1 }
 0x6ed   : > { %v7417_v30 = vpop.f32.mrb[75].mxu1 }
 0x6ee   : > { %v13596_v27 = vadd.f32 %v7415_v53, %v6024_v63  ;;  %v7418_v25 = vadd.f32 %v7417_v30, %v7416_v60  ;;  %v6035_v60 = vadd.f32 %v13440_v28, %v13564_v59  ;;  %v15135_v30 = vld [vmem:[#allocation71_spill] sm:$0xff] }
 0x6ef   : > { %6432 = vmatmul.mubr.bf16.gmra.mrb[180].mxu1 %v5300_v61  ;;  %v5321_v61 = vpack.c.bf16 %v15135_v30, %v13168_v0 }
 0x6f0   : > { %v13600_v37 = vadd.f32 %v7418_v25, %v6027_v55  ;;  %6439 = vmatprep.mubr.bf16.mxu1 %v5311_v57  ;;  %v4595_v55 = vrot.slane %v15028_v52, 1 }
 0x6f2   : > { %v7419_v20 = vpop.f32.mrb[76].mxu1  ;;  %v4649_v28 = vsel %vm860_vm3, %v4593_v5, %v4595_v55 }
 0x6f3   : > { %v7420_v17 = vpop.f32.mrb[77].mxu1 }
 0x6f4   : > { %v7421_v38 = vadd.f32 %v7420_v17, %v7419_v20  ;;  %v7422_v13 = vpop.f32.mrb[78].mxu1  ;;  %v14474_v17 = vrot.slane %v15020_v24, 1 }
 0x6f5   : > { %v7423_v14 = vpop.f32.mrb[79].mxu1 }
 0x6f6   : > { %v13608_v53 = vadd.f32 %v7421_v38, %v6032_v7  ;;  %v7424_v63 = vadd.f32 %v7423_v14, %v7422_v13  ;;  %v6040_v13 = vadd.f32 %v13451_v48, %v13564_v59  ;;  %v4594_v38 = vrot.slane %v15031_v56, 1 }
 0x6f7   : > { %6440 = vmatmul.mubr.bf16.gmra.mrb[184].mxu1 %v5310_v16  ;;  %v15137_v16 = vld [vmem:[#allocation77_spill] sm:$0xff]  ;;  %v4651_v12 = vsel %vm860_vm3, %v14474_v17, %v4593_v5  ;;  %v4592_v56 = vrot.slane %v15026_v58, 1 }
 0x6f8   : > { %15134 = vst [vmem:[#allocation29_spill] sm:$0xff] %v13608_v53  ;;  %v13613_v25 = vadd.f32 %v7424_v63, %v6035_v60  ;;  %6447 = vmatprep.mubr.bf16.mxu1 %v5321_v61  ;;  %v5320_v60 = vpack.c.bf16 %v15137_v16, %v13184_v31  ;;  %v6043_v63 = vadd.f32 %v13457_v47, %v13564_v59  ;;  %v4597_v16 = vrot.slane %v15024_v40, 1 }
 0x6f9   : > { %v5173_v48 = vpack.c.bf16 %v4649_v28, %v4651_v12  ;;  %v14475_v53 = vrot.slane %v15025_v6, 1  ;;  %v4648_v47 = vsel %vm860_vm3, %v4592_v56, %v4594_v38 }
 0x6fa   : > { %15136 = vst [vmem:[#allocation56_spill] sm:$0xff] %v13613_v25  ;;  %v7425_v57 = vpop.f32.mrb[80].mxu1 }
 0x6fb   : > { %v7426_v20 = vpop.f32.mrb[81].mxu1  ;;  %v4650_v40 = vsel %vm860_vm3, %v14475_v53, %v4592_v56  ;;  %v8640_v56 = vld [vmem:[#allocation7 + $0x200] sm:$0xff]  }
 0x6fc   : > { %v7427_v14 = vadd.f32 %v7426_v20, %v7425_v57  ;;  %v7428_v7 = vpop.f32.mrb[82].mxu1  ;;  %v4599_v57 = vrot.slane %v15032_v22, 1  ;;  %v6048_v22 = vadd.f32 %v13463_v1, %v13564_v59 }
 0x6fd   : > { %v7429_v52 = vpop.f32.mrb[83].mxu1 }
 0x6fe   : > { %v13630_v61 = vadd.f32 %v7427_v14, %v6040_v13  ;;  %v7430_v25 = vadd.f32 %v7429_v52, %v7428_v7  ;;  %v4645_v28 = vsel %vm860_vm3, %v4597_v16, %v4599_v57  ;;  %v5172_v7 = vpack.c.bf16 %v4648_v47, %v4650_v40  ;;  %v15145_v47 = vld [vmem:[#allocation43_spill] sm:$0xff] }
 0x6ff   : > { %6448 = vmatmul.mubr.bf16.gmra.mrb[188].mxu1 %v5320_v60  ;;  %v4647_v52 = vsel %vm860_vm3, %v4595_v55, %v4597_v16  ;;  %v15140_v60 = vld [vmem:[#allocation49_spill] sm:$0xff]  ;;  %v4596_v40 = vrot.slane %v15145_v47, 1  ;;  %v15146_v55 = vld [vmem:[#allocation51_spill] sm:$0xff] }
 0x700   : > { %15138 = vst [vmem:[#allocation24_spill] sm:$0xff] %v13630_v61  ;;  %v13634_v20 = vadd.f32 %v7430_v25, %v6043_v63  ;;  %6488 = vmatprep.mubr.bf16.mxu1 %v5173_v48  ;;  %v4598_v12 = vrot.slane %v15140_v60, 1  ;;  %v15141_v63 = vld [vmem:[#allocation78_spill] sm:$0xff]  ;;  %v4601_v16 = vrot.slane %v15146_v55, 1  ;;  %v8641_v60 = vld [vmem:[#allocation7 + $0x248] sm:$0xff]  }
 0x701   : > { %v6051_v48 = vadd.f32 %v15141_v63, %v13564_v59  ;;  %v4646_v63 = vsel %vm860_vm3, %v4594_v38, %v4596_v40  ;;  %v8643_v55 = vld [vmem:[#allocation7 + $0x250] sm:$0xff]   ;;  %v15150_v38 = vld [vmem:[#allocation28_spill] sm:$0xff] }
 0x702   : > { %15139 = vst [vmem:[#allocation71_spill] sm:$0xff] %v13634_v20  ;;  %v7431_v5 = vpop.f32.mrb[84].mxu1 }
 0x703   : > { %v7432_v13 = vpop.f32.mrb[85].mxu1 }
 0x704   : > { %v7433_v14 = vadd.f32 %v7432_v13, %v7431_v5  ;;  %v7434_v58 = vpop.f32.mrb[86].mxu1  ;;  %v5183_v5 = vpack.c.bf16 %v4645_v28, %v4647_v52  ;;  %v15143_v13 = vld [vmem:[#allocation23_spill] sm:$0xff] }
 0x705   : > { %v7435_v25 = vpop.f32.mrb[87].mxu1  ;;  %v4603_v20 = vrot.slane %v15143_v13, 1  ;;  %v4643_v13 = vsel %vm860_vm3, %v4599_v57, %v4601_v16  ;;  %v8644_v57 = vld [vmem:[#allocation7 + $0x210] sm:$0xff]  }
 0x706   : > { %v13653_v17 = vadd.f32 %v7433_v14, %v6048_v22  ;;  %v7436_v1 = vadd.f32 %v7435_v25, %v7434_v58  ;;  %v4644_v22 = vsel %vm860_vm3, %v4596_v40, %v4598_v12  ;;  %v15147_v58 = vld [vmem:[#allocation80_spill] sm:$0xff]  ;;  %v4607_v40 = vrot.slane %v15150_v38, 1 }
 0x707   : > { %6489 = vmatmul.mubr.bf16.vlgmr.msra.gmra.mrb[192].mxu1 %v5172_v7  ;;  %v4641_v28 = vsel %vm860_vm3, %v4601_v16, %v4603_v20  ;;  %v6056_v25 = vadd.f32 %v15147_v58, %v13564_v59  ;;  %v15152_v16 = vld [vmem:[#allocation21_spill] sm:$0xff] }
 0x708   : > { %15142 = vst [vmem:[#allocation49_spill] sm:$0xff] %v13653_v17  ;;  %v13656_v61 = vadd.f32 %v7436_v1, %v6051_v48  ;;  %7841 = vmatpush3.bf16.msra.mxu1 %v8640_v56  ;;  %6496 = vmatprep.mubr.bf16.mxu1 %v5183_v5  ;;  %v8642_v48 = vld [vmem:[#allocation7 + $0x208] sm:$0xff]   ;;  %v5182_v5 = vpack.c.bf16 %v4644_v22, %v4646_v63  ;;  %v15148_v56 = vld [vmem:[#allocation32_spill] sm:$0xff]  ;;  %v15151_v22 = vld [vmem:[#allocation22_spill] sm:$0xff] }
 0x709   : > { %7834 = vmatprep.subr.bf16.mxu1 %v8641_v60  ;;  %v4602_v47 = vrot.slane %v15148_v56, 1  ;;  %v15149_v60 = vld [vmem:[#allocation82_spill] sm:$0xff]  ;;  %v4600_v63 = vrot.slane %v15151_v22, 1  ;;  %v4605_v56 = vrot.slane %v15152_v16, 1  ;;  %v4606_v22 = vrot.slane %v15099_v45, 1  ;;  %v15156_v45 = vld [vmem:[#allocation53_spill] sm:$0xff] }
 0x70a   : > { %15144 = vst [vmem:[#allocation78_spill] sm:$0xff] %v13656_v61  ;;  %v7437_v53 = vpop.f32.mrb[88].mxu1  ;;  %v6059_v61 = vadd.f32 %v15149_v60, %v13564_v59  ;;  %v8646_v60 = vld [vmem:[#allocation7 + $0x218] sm:$0xff]   ;;  %v15154_v16 = vld [vmem:[#allocation86_spill] sm:$0xff] }
 0x70b   : > { %v7438_v14 = vpop.f32.mrb[89].mxu1  ;;  %v4639_v38 = vsel %vm860_vm3, %v4603_v20, %v4605_v56  ;;  %v8648_v20 = vld [vmem:[#allocation7 + $0x220] sm:$0xff]  }
 0x70c   : > { %v7439_v7 = vadd.f32 %v7438_v14, %v7437_v53  ;;  %v7440_v52 = vpop.f32.mrb[90].mxu1  ;;  %7842 = vmatpush3.bf16.msra.mxu1 %v8642_v48  ;;  %v5193_v14 = vpack.c.bf16 %v4641_v28, %v4643_v13  ;;  %v4637_v28 = vsel %vm860_vm3, %v4605_v56, %v4607_v40  ;;  %v4642_v13 = vsel %vm860_vm3, %v4598_v12, %v4600_v63 }
 0x70d   : > { %v7441_v1 = vpop.f32.mrb[91].mxu1  ;;  %7835 = vmatprep.subr.bf16.mxu1 %v8643_v55  ;;  %v8645_v55 = vld [vmem:[#allocation7 + $0x258] sm:$0xff]   ;;  %v4611_v12 = vrot.slane %v15102_v36, 1  ;;  %v4609_v56 = vrot.slane %v15156_v45, 1  ;;  %v15158_v45 = vld [vmem:[#allocation88_spill] sm:$0xff] }
 0x70e   : > { %v13673_v58 = vadd.f32 %v7439_v7, %v6056_v25  ;;  %v7442_v53 = vadd.f32 %v7441_v1, %v7440_v52  ;;  %v4640_v25 = vsel %vm860_vm3, %v4600_v63, %v4602_v47  ;;  %v15157_v36 = vld [vmem:[#allocation87_spill] sm:$0xff] }
 0x70f   : > { %6497 = vmatmul.mubr.bf16.gmra.mrb[196].mxu1 %v5182_v5 }
 0x710   : > { %v13676_v48 = vadd.f32 %v7442_v53, %v6059_v61  ;;  %6504 = vmatprep.mubr.bf16.mxu1 %v5193_v14  ;;  %7843 = vmatpush3.bf16.msra.mxu1 %v8644_v57  ;;  %v15153_v61 = vld [vmem:[#allocation84_spill] sm:$0xff]  ;;  %v5192_v14 = vpack.c.bf16 %v4640_v25, %v4642_v13 }
 0x711   : > { %7836 = vmatprep.subr.bf16.mxu1 %v8645_v55  ;;  %v6064_v52 = vadd.f32 %v15153_v61, %v13564_v59  ;;  %v8647_v57 = vld [vmem:[#allocation7 + $0x260] sm:$0xff]   ;;  %v6067_v55 = vadd.f32 %v15154_v16, %v13564_v59  ;;  %v8650_v16 = vld [vmem:[#allocation7 + $0x228] sm:$0xff]  }
 0x712   : > { %v7443_v17 = vpop.f32.mrb[92].mxu1  ;;  %v15155_v25 = vld [vmem:[#allocation36_spill] sm:$0xff] }
 0x713   : > { %v7444_v7 = vpop.f32.mrb[93].mxu1  ;;  %v4604_v13 = vrot.slane %v15155_v25, 1  ;;  %v4610_v25 = vrot.slane %v15105_v51, 1  ;;  %v15160_v51 = vld [vmem:[#allocation39_spill] sm:$0xff] }
 0x714   : > { %v7445_v1 = vadd.f32 %v7444_v7, %v7443_v17  ;;  %v7446_v5 = vpop.f32.mrb[94].mxu1  ;;  %7844 = vmatpush3.bf16.msra.mxu1 %v8646_v60  ;;  %v5203_v7 = vpack.c.bf16 %v4637_v28, %v4639_v38  ;;  %v8649_v60 = vld [vmem:[#allocation7 + $0x268] sm:$0xff]   ;;  %v4633_v28 = vsel %vm860_vm3, %v4609_v56, %v4611_v12 }
 0x715   : > { %v7447_v53 = vpop.f32.mrb[95].mxu1  ;;  %7837 = vmatprep.subr.bf16.mxu1 %v8647_v57  ;;  %v4638_v38 = vsel %vm860_vm3, %v4602_v47, %v4604_v13  ;;  %v4615_v47 = vrot.slane %v15108_v46, 1  ;;  %v15161_v46 = vld [vmem:[#allocation89_spill] sm:$0xff] }
 0x716   : > { %v13693_v61 = vadd.f32 %v7445_v1, %v6064_v52  ;;  %v7448_v17 = vadd.f32 %v7447_v53, %v7446_v5  ;;  %v4636_v52 = vsel %vm860_vm3, %v4604_v13, %v4606_v22  ;;  %v6072_v5 = vadd.f32 %v15157_v36, %v13564_v59 }
 0x717   : > { %6505 = vmatmul.mubr.bf16.gmra.mrb[200].mxu1 %v5192_v14 }
 0x718   : > { %v13696_v63 = vadd.f32 %v7448_v17, %v6067_v55  ;;  %6512 = vmatprep.mubr.bf16.mxu1 %v5203_v7  ;;  %7845 = vmatpush3.bf16.msra.mxu1 %v8648_v20  ;;  %v5202_v17 = vpack.c.bf16 %v4636_v52, %v4638_v38  ;;  %v4635_v7 = vsel %vm860_vm3, %v4607_v40, %v4609_v56  ;;  %v8651_v20 = vld [vmem:[#allocation7 + $0x270] sm:$0xff]   ;;  %v15159_v52 = vld [vmem:[#allocation55_spill] sm:$0xff]  ;;  %v4613_v56 = vrot.slane %v15160_v51, 1 }
 0x719   : > { %7838 = vmatprep.subr.bf16.mxu1 %v8649_v60  ;;  %v6075_v60 = vadd.f32 %v15158_v45, %v13564_v59  ;;  %v4608_v38 = vrot.slane %v15159_v52, 1  ;;  %v8652_v40 = vld [vmem:[#allocation7 + $0x230] sm:$0xff]   ;;  %v8654_v45 = vld [vmem:[#allocation7 + $0x238] sm:$0xff]   ;;  %v4614_v52 = vrot.slane %v15054_v23, 1 }
 0x71a   : > { %v7449_v57 = vpop.f32.mrb[96].mxu1 }
 0x71b   : > { %v7450_v1 = vpop.f32.mrb[97].mxu1 }
 0x71c   : > { %v7451_v53 = vadd.f32 %v7450_v1, %v7449_v57  ;;  %v7452_v14 = vpop.f32.mrb[98].mxu1  ;;  %7846 = vmatpush3.bf16.msra.mxu1 %v8650_v16  ;;  %v5213_v1 = vpack.c.bf16 %v4633_v28, %v4635_v7  ;;  %v8653_v16 = vld [vmem:[#allocation7 + $0x278] sm:$0xff]   ;;  %v4629_v28 = vsel %vm860_vm3, %v4613_v56, %v4615_v47  ;;  %v4634_v7 = vsel %vm860_vm3, %v4606_v22, %v4608_v38 }
 0x71d   : > { %v7453_v55 = vpop.f32.mrb[99].mxu1  ;;  %7839 = vmatprep.subr.bf16.mxu1 %v8651_v20 }
 0x71e   : > { %v13713_v36 = vadd.f32 %v7451_v53, %v6072_v5  ;;  %v7454_v57 = vadd.f32 %v7453_v55, %v7452_v14  ;;  %v4632_v5 = vsel %vm860_vm3, %v4608_v38, %v4610_v25  ;;  %v6080_v14 = vadd.f32 %v15161_v46, %v13564_v59 }
 0x71f   : > { %6513 = vmatmul.mubr.bf16.gmra.mrb[204].mxu1 %v5202_v17  ;;  %v4612_v38 = vrot.slane %v15106_v10, 1 }
 0x720   : > { %v13716_v13 = vadd.f32 %v7454_v57, %v6075_v60  ;;  %6520 = vmatprep.mubr.bf16.mxu1 %v5213_v1  ;;  %7847 = vmatpush3.bf16.msra.mxu1 %v8652_v40  ;;  %v5212_v57 = vpack.c.bf16 %v4632_v5, %v4634_v7  ;;  %v4631_v1 = vsel %vm860_vm3, %v4611_v12, %v4613_v56  ;;  %v15162_v40 = vld [vmem:[#allocation27_spill] sm:$0xff]  ;;  %v4617_v5 = vrot.slane %v15109_v42, 1 }
 0x721   : > { %7840 = vmatprep.subr.bf16.mxu1 %v8653_v16  ;;  %v6083_v51 = vadd.f32 %v15162_v40, %v13564_v59  ;;  %v4628_v23 = vsel %vm860_vm3, %v4612_v38, %v4614_v52  ;;  %v4630_v7 = vsel %vm860_vm3, %v4610_v25, %v4612_v38  ;;  %v15166_v25 = vld [vmem:[#allocation19_spill] sm:$0xff] }
 0x722   : > { %v7455_v20 = vpop.f32.mrb[100].mxu1  ;;  %v5222_v10 = vpack.c.bf16 %v4628_v23, %v4630_v7  ;;  %v4627_v42 = vsel %vm860_vm3, %v4615_v47, %v4617_v5  ;;  %v4616_v38 = vrot.slane %v15166_v25, 1 }
 0x723   : > { %v7456_v53 = vpop.f32.mrb[101].mxu1 }
 0x724   : > { %v7457_v55 = vadd.f32 %v7456_v53, %v7455_v20  ;;  %v7458_v17 = vpop.f32.mrb[102].mxu1  ;;  %7848 = vmatpush3.bf16.msra.mxu1 %v8654_v45  ;;  %v5223_v20 = vpack.c.bf16 %v4629_v28, %v4631_v1  ;;  %v4619_v53 = vrot.slane %v15055_v35, 1  ;;  %v15163_v28 = vld [vmem:[#allocation20_spill] sm:$0xff] }
 0x725   : > { %v7459_v60 = vpop.f32.mrb[103].mxu1 }
 0x726   : > { %v13733_v16 = vadd.f32 %v7457_v55, %v6080_v14  ;;  %v7460_v46 = vadd.f32 %v7459_v60, %v7458_v17  ;;  %v4625_v14 = vsel %vm860_vm3, %v4617_v5, %v4619_v53  ;;  %v6088_v55 = vadd.f32 %v15163_v28, %v13564_v59 }
 0x727   : > { %6521 = vmatmul.mubr.bf16.gmra.mrb[208].mxu1 %v5212_v57  ;;  %v4618_v60 = vrot.slane %v15057_v26, 1  ;;  %v15164_v57 = vld [vmem:[#allocation57_spill] sm:$0xff]  ;;  %v15167_v28 = vrot.slane %v15020_v24, 1 }
 0x728   : > { %v13736_v22 = vadd.f32 %v7460_v46, %v6083_v51  ;;  %6528 = vmatprep.mubr.bf16.mxu1 %v5223_v20  ;;  %v6091_v1 = vadd.f32 %v15164_v57, %v13564_v59  ;;  %v5233_v46 = vpack.c.bf16 %v4625_v14, %v4627_v42  ;;  %v15165_v20 = vld [vmem:[#allocation34_spill] sm:$0xff]  ;;  %v15169_v57 = vld [vmem:[#allocation67_spill] sm:$0xff] }
 0x729   : > { %v4624_v47 = vsel %vm860_vm3, %v4616_v38, %v4618_v60 }
 0x72a   : > { %v7461_v12 = vpop.f32.mrb[104].mxu1 }
 0x72b   : > { %v7462_v56 = vpop.f32.mrb[105].mxu1 }
 0x72c   : > { %v7463_v17 = vadd.f32 %v7462_v56, %v7461_v12  ;;  %v7464_v35 = vpop.f32.mrb[106].mxu1  ;;  %v4621_v12 = vrot.slane %v15165_v20, 1 }
 0x72d   : > { %v7465_v45 = vpop.f32.mrb[107].mxu1 }
 0x72e   : > { %v13753_v40 = vadd.f32 %v7463_v17, %v6088_v55  ;;  %v7466_v51 = vadd.f32 %v7465_v45, %v7464_v35  ;;  %v4623_v5 = vsel %vm860_vm3, %v4619_v53, %v4621_v12  ;;  %v4653_v14 = vsel %vm860_vm3, %v4621_v12, %v15167_v28  ;;  %v15168_v55 = vld [vmem:[#allocation33_spill] sm:$0xff] }
 0x72f   : > { %6529 = vmatmul.mubr.bf16.gmra.mrb[212].mxu1 %v5222_v10  ;;  %v6096_v17 = vadd.f32 %v15168_v55, %v13564_v59  ;;  %v4626_v45 = vsel %vm860_vm3, %v4614_v52, %v4616_v38  ;;  %v7208_v20 = vpack.c.bf16 %v4653_v14, %v4623_v5  ;;  %v4979_v12 = vrot.slane %v15118_v11, 1  ;;  %v15173_v14 = vld [vmem:[#allocation26_spill] sm:$0xff] }
 0x730   : > { %v13756_v56 = vadd.f32 %v7466_v51, %v6091_v1  ;;  %6536 = vmatprep.mubr.bf16.mxu1 %v5233_v46  ;;  %v5232_v42 = vpack.c.bf16 %v4624_v47, %v4626_v45  ;;  %v4620_v1 = vrot.slane %v15169_v57, 1  ;;  %v15170_v51 = vld [vmem:[#allocation59_spill] sm:$0xff]  ;;  %v4977_v52 = vrot.slane %v15059_v41, 1 }
 0x731   : > { %v6099_v53 = vadd.f32 %v15170_v51, %v13564_v59  ;;  %v4975_v55 = vrot.slane %v15173_v14, 1 }
 0x732   : > { %v7467_v23 = vpop.f32.mrb[108].mxu1  ;;  %v4622_v47 = vsel %vm860_vm3, %v4618_v60, %v4620_v1  ;;  %v5033_v11 = vsel %vm860_vm3, %v4977_v52, %v4979_v12  ;;  %v4978_v60 = vrot.slane %v14993_v19, 1 }
 0x733   : > { %v7468_v26 = vpop.f32.mrb[109].mxu1 }
 0x734   : > { %v7469_v35 = vadd.f32 %v7468_v26, %v7467_v23  ;;  %v7470_v7 = vpop.f32.mrb[110].mxu1  ;;  %v15172_v26 = vrot.slane %v15025_v6, 1  ;;  %v5035_v6 = vsel %vm860_vm3, %v4975_v55, %v4977_v52  ;;  %v4981_v52 = vrot.slane %v15119_v43, 1 }
 0x735   : > { %v7471_v10 = vpop.f32.mrb[111].mxu1 }
 0x736   : > { %v13774_v46 = vadd.f32 %v7469_v35, %v6096_v17  ;;  %v7472_v24 = vadd.f32 %v7471_v10, %v7470_v7  ;;  %v4652_v28 = vsel %vm860_vm3, %v4620_v1, %v15172_v26  ;;  %v15174_v17 = vld [vmem:[#allocation58_spill] sm:$0xff] }
 0x737   : > { %6537 = vmatmul.mubr.bf16.gmra.mrb[216].mxu1 %v5232_v42  ;;  %v6104_v35 = vadd.f32 %v15174_v17, %v13564_v59  ;;  %v7211_v10 = vpack.c.bf16 %v4652_v28, %v4622_v47  ;;  %v15175_v42 = vld [vmem:[#allocation90_spill] sm:$0xff]  ;;  %v15177_v17 = vld [vmem:[#allocation91_spill] sm:$0xff] }
 0x738   : > { %v13777_v25 = vadd.f32 %v7472_v24, %v6099_v53  ;;  %7209 = vmatprep.mubr.msk.bf16.mxu1 %vm10365_vm10, %v7208_v20  ;;  %v6107_v57 = vadd.f32 %v15175_v42, %v13564_v59  ;;  %v5253_v53 = vpack.c.bf16 %v5033_v11, %v5035_v6  ;;  %v4983_v24 = vrot.slane %v15065_v54, 1  ;;  %v15176_v47 = vld [vmem:[#allocation46_spill] sm:$0xff]  ;;  %v15178_v6 = vld [vmem:[#allocation16_spill] sm:$0xff] }
 0x739   : > { %v4974_v26 = vrot.slane %v15176_v47, 1  ;;  %v6112_v54 = vadd.f32 %v15177_v17, %v13564_v59  ;;  %v6115_v42 = vadd.f32 %v15178_v6, %v13564_v59  ;;  %v15181_v6 = vld [vmem:[#allocation52_spill] sm:$0xff] }
 0x73a   : > { %v7473_v38 = vpop.f32.mrb[112].mxu1  ;;  %v5029_v11 = vsel %vm860_vm3, %v4981_v52, %v4983_v24 }
 0x73b   : > { %v7474_v5 = vpop.f32.mrb[113].mxu1 }
 0x73c   : > { %v7475_v7 = vadd.f32 %v7474_v5, %v7473_v38  ;;  %v7476_v41 = vpop.f32.mrb[114].mxu1  ;;  %v4976_v38 = vrot.slane %v15116_v50, 1 }
 0x73d   : > { %v7477_v45 = vpop.f32.mrb[115].mxu1 }
 0x73e   : > { %v13800_v1 = vadd.f32 %v7475_v7, %v6104_v35  ;;  %v7478_v51 = vadd.f32 %v7477_v45, %v7476_v41  ;;  %v5032_v28 = vsel %vm860_vm3, %v4976_v38, %v4978_v60  ;;  %v5034_v43 = vsel %vm860_vm3, %v4974_v26, %v4976_v38 }
 0x73f   : > { %7212 = vmatmul.mubr.msk.bf16.gmra.mrb[220].mxu1 %vm10365_vm10, %v7211_v10  ;;  %v5252_v41 = vpack.c.bf16 %v5032_v28, %v5034_v43  ;;  %v5031_v45 = vsel %vm860_vm3, %v4979_v12, %v4981_v52  ;;  %v4982_v10 = vrot.slane %v14995_v2, 1  ;;  %v4980_v38 = vrot.slane %v14992_v32, 1  ;;  %v15179_v28 = vld [vmem:[#allocation45_spill] sm:$0xff] }
 0x740   : > { %v13805_v20 = vadd.f32 %v7478_v51, %v6107_v57  ;;  %6552 = vmatprep.mubr.bf16.mxu1 %v5253_v53  ;;  %v5263_v53 = vpack.c.bf16 %v5029_v11, %v5031_v45  ;;  %v4985_v17 = vrot.slane %v15179_v28, 1  ;;  %v15180_v11 = vld [vmem:[#allocation25_spill] sm:$0xff]  ;;  %v4986_v45 = vrot.slane %v14999_v29, 1 }
 0x741   : > { %v5028_v2 = vsel %vm860_vm3, %v4980_v38, %v4982_v10  ;;  %v5030_v43 = vsel %vm860_vm3, %v4978_v60, %v4980_v38  ;;  %v15182_v60 = vld [vmem:[#allocation12_spill] sm:$0xff] }
 0x742   : > { %v7479_v19 = vpop.f32.mrb[116].mxu1  ;;  %v5262_v32 = vpack.c.bf16 %v5028_v2, %v5030_v43  ;;  %v4984_v38 = vrot.slane %v15182_v60, 1  ;;  %v15183_v2 = vld [vmem:[#allocation72_spill] sm:$0xff] }
 0x743   : > { %v7480_v5 = vpop.f32.mrb[117].mxu1 }
 0x744   : > { %v7481_v35 = vadd.f32 %v7480_v5, %v7479_v19  ;;  %v7482_v7 = vpop.f32.mrb[118].mxu1  ;;  %v4987_v19 = vrot.slane %v14969_v8, 1  ;;  %v5024_v29 = vsel %vm860_vm3, %v4984_v38, %v4986_v45  ;;  %v5026_v43 = vsel %vm860_vm3, %v4982_v10, %v4984_v38  ;;  %v15186_v10 = vld [vmem:[#allocation62_spill] sm:$0xff] }
 0x745   : > { %v7483_v50 = vpop.f32.mrb[119].mxu1  ;;  %v4988_v38 = vrot.slane %v15186_v10, 1  ;;  %v4997_v10 = vrot.slane %v15131_v44, 1 }
 0x746   : > { %v13825_v57 = vadd.f32 %v7481_v35, %v6112_v54  ;;  %v7484_v51 = vadd.f32 %v7483_v50, %v7482_v7  ;;  %v5025_v54 = vsel %vm860_vm3, %v4985_v17, %v4987_v19  ;;  %v6120_v35 = vadd.f32 %v15180_v11, %v13564_v59 }
 0x747   : > { %6553 = vmatmul.mubr.bf16.gmra.mrb[224].mxu1 %v5252_v41  ;;  %v5027_v41 = vsel %vm860_vm3, %v4983_v24, %v4985_v17  ;;  %v4989_v11 = vrot.slane %v15183_v2, 1 }
 0x748   : > { %v13828_v5 = vadd.f32 %v7484_v51, %v6115_v42  ;;  %6560 = vmatprep.mubr.bf16.mxu1 %v5263_v53  ;;  %v6123_v42 = vadd.f32 %v15181_v6, %v13564_v59  ;;  %v5273_v28 = vpack.c.bf16 %v5025_v54, %v5027_v41  ;;  %v15184_v54 = vld [vmem:[#allocation92_spill] sm:$0xff]  ;;  %v4990_v6 = vrot.slane %v15006_v34, 1 }
 0x749   : > { %v5023_v41 = vsel %vm860_vm3, %v4987_v19, %v4989_v11 }
 0x74a   : > { %v7485_v12 = vpop.f32.mrb[120].mxu1  ;;  %v5020_v34 = vsel %vm860_vm3, %v4988_v38, %v4990_v6 }
 0x74b   : > { %v7486_v52 = vpop.f32.mrb[121].mxu1 }
 0x74c   : > { %v7487_v7 = vadd.f32 %v7486_v52, %v7485_v12  ;;  %v7488_v8 = vpop.f32.mrb[122].mxu1  ;;  %v4991_v12 = vrot.slane %v15000_v18, 1 }
 0x74d   : > { %v7489_v50 = vpop.f32.mrb[123].mxu1 }
 0x74e   : > { %v13845_v51 = vadd.f32 %v7487_v7, %v6120_v35  ;;  %v7490_v53 = vadd.f32 %v7489_v50, %v7488_v8  ;;  %v5021_v35 = vsel %vm860_vm3, %v4989_v11, %v4991_v12  ;;  %v6128_v7 = vadd.f32 %v15184_v54, %v13564_v59 }
 0x74f   : > { %6561 = vmatmul.mubr.bf16.gmra.mrb[228].mxu1 %v5262_v32  ;;  %v5272_v32 = vpack.c.bf16 %v5024_v29, %v5026_v43  ;;  %v5283_v2 = vpack.c.bf16 %v5021_v35, %v5023_v41  ;;  %v4993_v29 = vrot.slane %v12710_v33, 1  ;;  %v15187_v43 = vld [vmem:[#allocation42_spill] sm:$0xff]  ;;  %v4994_v41 = vrot.slane %v12733_v9, 1 }
 0x750   : > { %v13848_v52 = vadd.f32 %v7490_v53, %v6123_v42  ;;  %6568 = vmatprep.mubr.bf16.mxu1 %v5273_v28  ;;  %v15185_v42 = vld [vmem:[#allocation93_spill] sm:$0xff] }
 0x751   : > { %v6131_v53 = vadd.f32 %v15185_v42, %v13564_v59  ;;  %v4999_v42 = vrot.slane %v12916_v39, 1 }
 0x752   : > { %v7491_v24 = vpop.f32.mrb[124].mxu1 }
 0x753   : > { %v7492_v17 = vpop.f32.mrb[125].mxu1 }
 0x754   : > { %v7493_v8 = vadd.f32 %v7492_v17, %v7491_v24  ;;  %v7494_v18 = vpop.f32.mrb[126].mxu1  ;;  %v4995_v24 = vrot.slane %v15130_v4, 1  ;;  %v5022_v4 = vsel %vm860_vm3, %v4986_v45, %v4988_v38  ;;  %v15189_v45 = vld [vmem:[#allocation76_spill] sm:$0xff] }
 0x755   : > { %v7495_v50 = vpop.f32.mrb[127].mxu1 }
 0x756   : > { %v13865_v28 = vadd.f32 %v7493_v8, %v6128_v7  ;;  %v7496_v60 = vadd.f32 %v7495_v50, %v7494_v18  ;;  %v5017_v59 = vsel %vm860_vm3, %v4993_v29, %v4995_v24  ;;  %v5282_v8 = vpack.c.bf16 %v5020_v34, %v5022_v4 }
 0x757   : > { %6569 = vmatmul.mubr.bf16.gmra.mrb[232].mxu1 %v5272_v32  ;;  %v5019_v18 = vsel %vm860_vm3, %v4991_v12, %v4993_v29 }
 0x758   : > { %v13868_v17 = vadd.f32 %v7496_v60, %v6131_v53  ;;  %6576 = vmatprep.mubr.bf16.mxu1 %v5283_v2  ;;  %v5293_v32 = vpack.c.bf16 %v5017_v59, %v5019_v18  ;;  %v15188_v53 = vld [vmem:[#allocation47_spill] sm:$0xff]  ;;  %v4992_v2 = vrot.slane %v15189_v45, 1  ;;  %v5003_v18 = vrot.slane %v13168_v0, 1 }
 0x75a   : > { %v7513_v19 = vpop.f32.mrb[128].mxu1  ;;  %v5016_v12 = vsel %vm860_vm3, %v4992_v2, %v4994_v41 }
 0x75b   : > { %v7514_v11 = vpop.f32.mrb[129].mxu1 }
 0x75c   : > { %v7515_v54 = vadd.f32 %v7514_v11, %v7513_v19  ;;  %v7516_v35 = vpop.f32.mrb[130].mxu1  ;;  %v5013_v19 = vsel %vm860_vm3, %v4997_v10, %v4999_v42  ;;  %v5018_v11 = vsel %vm860_vm3, %v4990_v6, %v4992_v2  ;;  %v15191_v6 = vld [vmem:[#allocation74_spill] sm:$0xff] }
 0x75d   : > { %v7517_v7 = vpop.f32.mrb[131].mxu1 }
 0x75e   : > { %v13881_v33 = vadd.f32 %v7515_v54, %v15187_v43  ;;  %v7518_v50 = vadd.f32 %v7517_v7, %v7516_v35  ;;  %v5292_v54 = vpack.c.bf16 %v5016_v12, %v5018_v11  ;;  %v5015_v35 = vsel %vm860_vm3, %v4995_v24, %v4997_v10  ;;  %v15190_v43 = vld [vmem:[#allocation14_spill] sm:$0xff] }
 0x75f   : > { %6577 = vmatmul.mubr.bf16.gmra.mrb[236].mxu1 %v5282_v8  ;;  %v5303_v7 = vpack.c.bf16 %v5013_v19, %v5015_v35  ;;  %v4998_v8 = vrot.slane %v12849_v3, 1  ;;  %v5005_v35 = vrot.slane %v15135_v30, 1 }
 0x760   : > { %v13886_v60 = vadd.f32 %v7518_v50, %v15188_v53  ;;  %6584 = vmatprep.mubr.bf16.mxu1 %v5293_v32  ;;  %v4996_v32 = vrot.slane %v15191_v6, 1  ;;  %v5001_v53 = vrot.slane %v15133_v49, 1 }
 0x761   : > { %v5037_v6 = vsel %vm860_vm3, %v5005_v35, %v4975_v55  ;;  %v5097_v55 = vrot.slane %v15133_v49, 2 }
 0x762   : > { %v7519_v38 = vpop.f32.mrb[132].mxu1  ;;  %v5009_v2 = vsel %vm860_vm3, %v5001_v53, %v5003_v18  ;;  %v5014_v12 = vsel %vm860_vm3, %v4994_v41, %v4996_v32  ;;  %v5000_v41 = vrot.slane %v13158_v62, 1 }
 0x763   : > { %v7520_v29 = vpop.f32.mrb[133].mxu1 }
 0x764   : > { %v7521_v9 = vadd.f32 %v7520_v29, %v7519_v38  ;;  %v7522_v34 = vpop.f32.mrb[134].mxu1 }
 0x765   : > { %v7523_v59 = vpop.f32.mrb[135].mxu1 }
 0x766   : > { %v13899_v44 = vadd.f32 %v7521_v9, %v13582_v21  ;;  %v7524_v4 = vadd.f32 %v7523_v59, %v7522_v34  ;;  %v5012_v21 = vsel %vm860_vm3, %v4996_v32, %v4998_v8  ;;  %v5011_v9 = vsel %vm860_vm3, %v4999_v42, %v5001_v53 }
 0x767   : > { %6585 = vmatmul.mubr.bf16.gmra.mrb[240].mxu1 %v5292_v54  ;;  %v5302_v19 = vpack.c.bf16 %v5012_v21, %v5014_v12  ;;  %v5313_v59 = vpack.c.bf16 %v5009_v2, %v5011_v9  ;;  %v5002_v54 = vrot.slane %v13184_v31, 1  ;;  %v15193_v12 = vld [vmem:[#allocation77_spill] sm:$0xff] }
 0x768   : > { %v13904_v50 = vadd.f32 %v7524_v4, %v15190_v43  ;;  %6592 = vmatprep.mubr.bf16.mxu1 %v5303_v7 }
 0x769   : > { %v5008_v42 = vsel %vm860_vm3, %v5000_v41, %v5002_v54 }
 0x76a   : > { %v7525_v45 = vpop.f32.mrb[136].mxu1 }
 0x76b   : > { %v7526_v24 = vpop.f32.mrb[137].mxu1 }
 0x76c   : > { %v7527_v10 = vadd.f32 %v7526_v24, %v7525_v45  ;;  %v7528_v38 = vpop.f32.mrb[138].mxu1  ;;  %v15192_v24 = vld [vmem:[#allocation29_spill] sm:$0xff] }
 0x76d   : > { %v7529_v29 = vpop.f32.mrb[139].mxu1 }
 0x76e   : > { %v13917_v34 = vadd.f32 %v7527_v10, %v13596_v27  ;;  %v7530_v11 = vadd.f32 %v7529_v29, %v7528_v38  ;;  %v5007_v27 = vsel %vm860_vm3, %v5003_v18, %v5005_v35  ;;  %v5004_v29 = vrot.slane %v15193_v12, 1 }
 0x76f   : > { %6593 = vmatmul.mubr.bf16.gmra.mrb[244].mxu1 %v5302_v19  ;;  %v7214_v38 = vpack.c.bf16 %v5037_v6, %v5007_v27  ;;  %v5099_v18 = vrot.slane %v13168_v0, 2  ;;  %v15194_v19 = vld [vmem:[#allocation56_spill] sm:$0xff]  ;;  %v15195_v27 = vrot.slane %v12916_v39, 2 }
 0x770   : > { %v13922_v4 = vadd.f32 %v7530_v11, %v13600_v37  ;;  %6600 = vmatprep.mubr.bf16.mxu1 %v5313_v59  ;;  %v5010_v37 = vsel %vm860_vm3, %v4998_v8, %v5000_v41  ;;  %v5006_v11 = vsel %vm860_vm3, %v5002_v54, %v5004_v29  ;;  %v5036_v59 = vsel %vm860_vm3, %v5004_v29, %v4974_v26  ;;  %v15196_v6 = vld [vmem:[#allocation24_spill] sm:$0xff] }
 0x771   : > { %v5312_v21 = vpack.c.bf16 %v5008_v42, %v5010_v37  ;;  %v5105_v0 = vsel %vm989_vm8, %v5097_v55, %v5099_v18  ;;  %v5107_v49 = vsel %vm989_vm8, %v15195_v27, %v5097_v55  ;;  %v5098_v54 = vrot.slane %v13184_v31, 2 }
 0x772   : > { %v7531_v7 = vpop.f32.mrb[140].mxu1  ;;  %v5315_v26 = vpack.c.bf16 %v5105_v0, %v5107_v49  ;;  %v5101_v37 = vrot.slane %v15135_v30, 2  ;;  %v15198_v29 = vrot.slane %v15173_v14, 2  ;;  %v15199_v30 = vrot.slane %v12849_v3, 2  ;;  %v15201_v14 = vld [vmem:[#allocation78_spill] sm:$0xff] }
 0x773   : > { %v7532_v43 = vpop.f32.mrb[141].mxu1 }
 0x774   : > { %v7533_v32 = vadd.f32 %v7532_v43, %v7531_v7  ;;  %v7534_v53 = vpop.f32.mrb[142].mxu1  ;;  %v7217_v43 = vpack.c.bf16 %v5036_v59, %v5006_v11  ;;  %v5133_v23 = vsel %vm989_vm8, %v5101_v37, %v15198_v29  ;;  %v5100_v59 = vrot.slane %v15193_v12, 2 }
 0x775   : > { %v7535_v45 = vpop.f32.mrb[143].mxu1 }
 0x776   : > { %v13936_v2 = vadd.f32 %v7533_v32, %v15192_v24  ;;  %v7536_v10 = vadd.f32 %v7535_v45, %v7534_v53  ;;  %v5096_v45 = vrot.slane %v13158_v62, 2  ;;  %v5102_v3 = vsel %vm989_vm8, %v5098_v54, %v5100_v59 }
 0x777   : > { %6601 = vmatmul.mubr.bf16.gmra.mrb[248].mxu1 %v5312_v21  ;;  %v15197_v21 = vld [vmem:[#allocation71_spill] sm:$0xff] }
 0x778   : > { %v13941_v9 = vadd.f32 %v7536_v10, %v15194_v19  ;;  %7215 = vmatprep.mubr.msk.bf16.mxu1 %vm10365_vm10, %v7214_v38  ;;  %v5104_v39 = vsel %vm989_vm8, %v5096_v45, %v5098_v54  ;;  %v5103_v38 = vsel %vm989_vm8, %v5099_v18, %v5101_v37  ;;  %v5106_v62 = vsel %vm989_vm8, %v15199_v30, %v5096_v45 }
 0x77a   : > { %v7537_v8 = vpop.f32.mrb[144].mxu1 }
 0x77b   : > { %v7538_v35 = vpop.f32.mrb[145].mxu1 }
 0x77c   : > { %v7539_v41 = vadd.f32 %v7538_v35, %v7537_v8  ;;  %v7540_v7 = vpop.f32.mrb[146].mxu1  ;;  %v5314_v8 = vpack.c.bf16 %v5104_v39, %v5106_v62  ;;  %v15200_v35 = vld [vmem:[#allocation49_spill] sm:$0xff] }
 0x77d   : > { %v7541_v42 = vpop.f32.mrb[147].mxu1 }
 0x77e   : > { %v13960_v32 = vadd.f32 %v7539_v41, %v15196_v6  ;;  %v7542_v53 = vadd.f32 %v7541_v42, %v7540_v7  ;;  %v7226_v41 = vpack.c.bf16 %v5133_v23, %v5103_v38 }
 0x77f   : > { %7218 = vmatmul.mubr.msk.bf16.gmra.mrb[252].mxu1 %vm10365_vm10, %v7217_v43  ;;  %v15203_v43 = vrot.slane %v15176_v47, 2 }
 0x780   : > { %v13967_v24 = vadd.f32 %v7542_v53, %v15197_v21  ;;  %6761 = vmatprep.mubr.bf16.mxu1 %v5315_v26 }
 0x781   : > { %v5132_v12 = vsel %vm989_vm8, %v5100_v59, %v15203_v43 }
 0x782   : > { %v7543_v31 = vpop.f32.mrb[148].mxu1  ;;  %v7229_v26 = vpack.c.bf16 %v5132_v12, %v5102_v3 }
 0x783   : > { %v7544_v10 = vpop.f32.mrb[149].mxu1 }
 0x784   : > { %v7545_v19 = vadd.f32 %v7544_v10, %v7543_v31  ;;  %v7546_v55 = vpop.f32.mrb[150].mxu1 }
 0x785   : > { %v7547_v11 = vpop.f32.mrb[151].mxu1 }
 0x786   : > { %v13983_v0 = vadd.f32 %v7545_v19, %v15200_v35  ;;  %v7548_v18 = vadd.f32 %v7547_v11, %v7546_v55 }
 0x787   : > { %6762 = vmatmul.mubr.bf16.vlgmr.msra.gmra.mrb[0].mxu1 %v5314_v8 }
 0x788   : > { %v13986_v7 = vadd.f32 %v7548_v18, %v15201_v14  ;;  %7227 = vmatprep.mubr.msk.bf16.mxu1 %vm10450_vm12, %v7226_v41 }
 0x78a   : > { %v7549_v27 = vpop.f32.mrb[152].mxu1 }
 0x78b   : > { %v7550_v49 = vpop.f32.mrb[153].mxu1 }
 0x78c   : > { %v7551_v6 = vadd.f32 %v7550_v49, %v7549_v27  ;;  %v7552_v53 = vpop.f32.mrb[154].mxu1 }
 0x78d   : > { %v7553_v37 = vpop.f32.mrb[155].mxu1 }
 0x78e   : > { %v13997_v45 = vadd.f32 %v7551_v6, %v13673_v58  ;;  %v7554_v21 = vadd.f32 %v7553_v37, %v7552_v53 }
 0x78f   : > { %7230 = vmatmul.mubr.msk.bf16.gmra.mrb[4].mxu1 %vm10450_vm12, %v7229_v26 }
 0x790   : > { %v14002_v54 = vadd.f32 %v7554_v21, %v13676_v48 }
 0x792   : > { %v7555_v47 = vpop.f32.mrb[156].mxu1 }
 0x793   : > { %v7556_v39 = vpop.f32.mrb[157].mxu1 }
 0x794   : > { %v7557_v15 = vadd.f32 %v7556_v39, %v7555_v47  ;;  %v7558_v31 = vpop.f32.mrb[158].mxu1 }
 0x795   : > { %v7559_v10 = vpop.f32.mrb[159].mxu1 }
 0x796   : > { %v14005_v38 = vadd.f32 %v7557_v15, %v13693_v61  ;;  %v7560_v29 = vadd.f32 %v7559_v10, %v7558_v31 }
 0x798   : > { %v14008_v23 = vadd.f32 %v7560_v29, %v13696_v63 }
 0x79a   : > { %v7561_v58 = vpop.f32.mrb[160].mxu1 }
 0x79b   : > { %v7562_v30 = vpop.f32.mrb[161].mxu1 }
 0x79c   : > { %v7563_v62 = vadd.f32 %v7562_v30, %v7561_v58  ;;  %v7564_v19 = vpop.f32.mrb[162].mxu1 }
 0x79d   : > { %v7565_v55 = vpop.f32.mrb[163].mxu1 }
 0x79e   : > { %v14011_v48 = vadd.f32 %v7563_v62, %v13713_v36  ;;  %v7566_v8 = vadd.f32 %v7565_v55, %v7564_v19 }
 0x7a0   : > { %v14014_v11 = vadd.f32 %v7566_v8, %v13716_v13 }
 0x7a2   : > { %v7567_v59 = vpop.f32.mrb[164].mxu1 }
 0x7a3   : > { %v7568_v35 = vpop.f32.mrb[165].mxu1 }
 0x7a4   : > { %v7569_v61 = vadd.f32 %v7568_v35, %v7567_v59  ;;  %v7570_v18 = vpop.f32.mrb[166].mxu1 }
 0x7a5   : > { %v7571_v41 = vpop.f32.mrb[167].mxu1 }
 0x7a6   : > { %v14017_v63 = vadd.f32 %v7569_v61, %v13733_v16  ;;  %v7572_v14 = vadd.f32 %v7571_v41, %v7570_v18 }
 0x7a8   : > { %v14020_v42 = vadd.f32 %v7572_v14, %v13736_v22 }
 0x7aa   : > { %v7573_v3 = vpop.f32.mrb[168].mxu1 }
 0x7ab   : > { %v7574_v43 = vpop.f32.mrb[169].mxu1 }
 0x7ac   : > { %v7575_v36 = vadd.f32 %v7574_v43, %v7573_v3  ;;  %v7576_v12 = vpop.f32.mrb[170].mxu1 }
 0x7ad   : > { %v7577_v27 = vpop.f32.mrb[171].mxu1 }
 0x7ae   : > { %v14023_v13 = vadd.f32 %v7575_v36, %v13753_v40  ;;  %v7578_v49 = vadd.f32 %v7577_v27, %v7576_v12 }
 0x7b0   : > { %v14026_v6 = vadd.f32 %v7578_v49, %v13756_v56 }
 0x7b2   : > { %v7579_v53 = vpop.f32.mrb[172].mxu1 }
 0x7b3   : > { %v7580_v26 = vpop.f32.mrb[173].mxu1 }
 0x7b4   : > { %v7581_v16 = vadd.f32 %v7580_v26, %v7579_v53  ;;  %v7582_v37 = vpop.f32.mrb[174].mxu1 }
 0x7b5   : > { %v7583_v21 = vpop.f32.mrb[175].mxu1 }
 0x7b6   : > { %v14029_v22 = vadd.f32 %v7581_v16, %v13774_v46  ;;  %v7584_v47 = vadd.f32 %v7583_v21, %v7582_v37 }
 0x7b8   : > { %v14032_v39 = vadd.f32 %v7584_v47, %v13777_v25 }
 0x7ba   : > { %v7585_v15 = vpop.f32.mrb[176].mxu1 }
 0x7bb   : > { %v7586_v31 = vpop.f32.mrb[177].mxu1 }
 0x7bc   : > { %v7587_v40 = vadd.f32 %v7586_v31, %v7585_v15  ;;  %v7588_v10 = vpop.f32.mrb[178].mxu1  ;;  %v15204_v31 = vld [vmem:[#allocation54_spill] sm:$0xff] }
 0x7bd   : > { %v7589_v29 = vpop.f32.mrb[179].mxu1 }
 0x7be   : > { %v14035_v56 = vadd.f32 %v7587_v40, %v13800_v1  ;;  %v7590_v58 = vadd.f32 %v7589_v29, %v7588_v10 }
 0x7c0   : > { %v14038_v30 = vadd.f32 %v7590_v58, %v13805_v20  ;;  %v15205_v58 = vld [vmem:[#allocation68_spill] sm:$0xff] }
 0x7c2   : > { %v7591_v62 = vpop.f32.mrb[180].mxu1 }
 0x7c3   : > { %v7592_v19 = vpop.f32.mrb[181].mxu1 }
 0x7c4   : > { %v7593_v46 = vadd.f32 %v7592_v19, %v7591_v62  ;;  %v7594_v55 = vpop.f32.mrb[182].mxu1 }
 0x7c5   : > { %v7595_v8 = vpop.f32.mrb[183].mxu1 }
 0x7c6   : > { %v14041_v25 = vadd.f32 %v7593_v46, %v13825_v57  ;;  %v7596_v59 = vadd.f32 %v7595_v8, %v7594_v55 }
 0x7c8   : > { %v14044_v35 = vadd.f32 %v7596_v59, %v13828_v5 }
 0x7ca   : > { %v7597_v61 = vpop.f32.mrb[184].mxu1 }
 0x7cb   : > { %v7598_v18 = vpop.f32.mrb[185].mxu1 }
 0x7cc   : > { %v7599_v1 = vadd.f32 %v7598_v18, %v7597_v61  ;;  %v7600_v41 = vpop.f32.mrb[186].mxu1  ;;  %v15206_v18 = vld [vmem:[#allocation63_spill] sm:$0xff] }
 0x7cd   : > { %v7601_v14 = vpop.f32.mrb[187].mxu1 }
 0x7ce   : > { %v14047_v20 = vadd.f32 %v7599_v1, %v13845_v51  ;;  %v7602_v3 = vadd.f32 %v7601_v14, %v7600_v41  ;;  %v8657_v14 = vld [vmem:[%s9066_s17 + $0x10] sm:$0xff] }
 0x7d0   : > { %v14050_v43 = vadd.f32 %v7602_v3, %v13848_v52 }
 0x7d2   : > { %v7603_v36 = vpop.f32.mrb[188].mxu1 }
 0x7d3   : > { %v7604_v12 = vpop.f32.mrb[189].mxu1 }
 0x7d4   : > { %v7605_v57 = vadd.f32 %v7604_v12, %v7603_v36  ;;  %v7606_v27 = vpop.f32.mrb[190].mxu1  ;;  %v15207_v36 = vld [vmem:[#allocation60_spill] sm:$0xff] }
 0x7d5   : > { %v7607_v49 = vpop.f32.mrb[191].mxu1 }
 0x7d6   : > { %v14053_v5 = vadd.f32 %v7605_v57, %v13865_v28  ;;  %v7608_v53 = vadd.f32 %v7607_v49, %v7606_v27  ;;  %v8655_v28 = vld [vmem:[%s9066_s17] sm:$0xff]  ;;  %v8658_v49 = vld [vmem:[%s9066_s17 + $0x18] sm:$0xff] }
 0x7d8   : > { %v14056_v26 = vadd.f32 %v7608_v53, %v13868_v17 }
 0x7da   : > { %v7625_v51 = vpop.f32.mrb[192].mxu1 }
 0x7db   : > { %v7626_v16 = vpop.f32.mrb[193].mxu1 }
 0x7dc   : > { %v7627_v37 = vadd.f32 %v7626_v16, %v7625_v51  ;;  %v7628_v52 = vpop.f32.mrb[194].mxu1 }
 0x7dd   : > { %v7629_v21 = vpop.f32.mrb[195].mxu1 }
 0x7de   : > { %v6491_v47 = vadd.f32 %v7627_v37, %v13881_v33  ;;  %v7630_v15 = vadd.f32 %v7629_v21, %v7628_v52  ;;  %v8656_v33 = vld [vmem:[%s9066_s17 + $0x8] sm:$0xff] }
 0x7df   : > { %v15208_v52 = vld [vmem:[#allocation65_spill] sm:$0xff] }
 0x7e0   : > { %v6652_v40 = vadd.f32 %v15204_v31, %v6491_v47  ;;  %v6494_v10 = vadd.f32 %v7630_v15, %v13886_v60  ;;  %v8659_v15 = vld [vmem:[%s9066_s17 + $0x20] sm:$0xff] }
 0x7e2   : > { %v6778_v29 = vadd.f32 %v8655_v28, %v6652_v40  ;;  %v6655_v62 = vadd.f32 %v15205_v58, %v6494_v10  ;;  %v7631_v17 = vpop.f32.mrb[196].mxu1  ;;  %v15209_v40 = vld [vmem:[#allocation64_spill] sm:$0xff]  ;;  %v8660_v58 = vld [vmem:[%s9066_s17 + $0x28] sm:$0xff] }
 0x7e3   : > { %v7632_v19 = vpop.f32.mrb[197].mxu1 }
 0x7e4   : > { %6794 = vst [vmem:[%s14065_s9] sm:$0xff] %v6778_v29  ;;  %v6779_v46 = vadd.f32 %v8656_v33, %v6655_v62  ;;  %v7633_v55 = vadd.f32 %v7632_v19, %v7631_v17  ;;  %v7634_v8 = vpop.f32.mrb[198].mxu1 }
 0x7e5   : > { %v7635_v60 = vpop.f32.mrb[199].mxu1 }
 0x7e6   : > { %6795 = vst [vmem:[%s14065_s9 + $0x8] sm:$0xff] %v6779_v46  ;;  %v6499_v59 = vadd.f32 %v7633_v55, %v13899_v44  ;;  %v7636_v61 = vadd.f32 %v7635_v60, %v7634_v8  ;;  %v15210_v46 = vld [vmem:[#allocation75_spill] sm:$0xff]  ;;  %v8661_v60 = vld [vmem:[%s9066_s17 + $0x30] sm:$0xff] }
 0x7e8   : > { %v6660_v1 = vadd.f32 %v15206_v18, %v6499_v59  ;;  %v6502_v41 = vadd.f32 %v7636_v61, %v13904_v50  ;;  %v15211_v61 = vld [vmem:[#allocation15_spill] sm:$0xff] }
 0x7ea   : > { %v6780_v3 = vadd.f32 %v8657_v14, %v6660_v1  ;;  %v6663_v12 = vadd.f32 %v15207_v36, %v6502_v41  ;;  %v7637_v57 = vpop.f32.mrb[200].mxu1  ;;  %v8662_v14 = vld [vmem:[%s9066_s17 + $0x38] sm:$0xff] }
 0x7eb   : > { %v7638_v27 = vpop.f32.mrb[201].mxu1 }
 0x7ec   : > { %6796 = vst [vmem:[%s14065_s9 + $0x10] sm:$0xff] %v6780_v3  ;;  %v6781_v53 = vadd.f32 %v8658_v49, %v6663_v12  ;;  %v7639_v51 = vadd.f32 %v7638_v27, %v7637_v57  ;;  %v7640_v16 = vpop.f32.mrb[202].mxu1  ;;  %v15212_v27 = vld [vmem:[#allocation69_spill] sm:$0xff] }
 0x7ed   : > { %v7641_v44 = vpop.f32.mrb[203].mxu1 }
 0x7ee   : > { %6797 = vst [vmem:[%s14065_s9 + $0x18] sm:$0xff] %v6781_v53  ;;  %v6507_v37 = vadd.f32 %v7639_v51, %v13917_v34  ;;  %v7642_v50 = vadd.f32 %v7641_v44, %v7640_v16  ;;  %v8663_v51 = vld [vmem:[%s9066_s17 + $0x40] sm:$0xff]  ;;  %v15213_v44 = vld [vmem:[#allocation66_spill] sm:$0xff] }
 0x7f0   : > { %v6668_v21 = vadd.f32 %v15208_v52, %v6507_v37  ;;  %v6510_v47 = vadd.f32 %v7642_v50, %v13922_v4 }
 0x7f2   : > { %v6782_v31 = vadd.f32 %v8659_v15, %v6668_v21  ;;  %v6671_v10 = vadd.f32 %v15209_v40, %v6510_v47  ;;  %v7643_v28 = vpop.f32.mrb[204].mxu1  ;;  %v8664_v21 = vld [vmem:[%s9066_s17 + $0x48] sm:$0xff] }
 0x7f3   : > { %v7644_v29 = vpop.f32.mrb[205].mxu1 }
 0x7f4   : > { %6798 = vst [vmem:[%s14065_s9 + $0x20] sm:$0xff] %v6782_v31  ;;  %v6783_v62 = vadd.f32 %v8660_v58, %v6671_v10  ;;  %v7645_v17 = vadd.f32 %v7644_v29, %v7643_v28  ;;  %v7646_v19 = vpop.f32.mrb[206].mxu1  ;;  %v15214_v10 = vld [vmem:[#allocation48_spill] sm:$0xff]  ;;  %v8665_v58 = vld [vmem:[%s9066_s17 + $0x50] sm:$0xff] }
 0x7f5   : > { %v7647_v34 = vpop.f32.mrb[207].mxu1 }
 0x7f6   : > { %6799 = vst [vmem:[%s14065_s9 + $0x28] sm:$0xff] %v6783_v62  ;;  %v6515_v33 = vadd.f32 %v7645_v17, %v13936_v2  ;;  %v7648_v4 = vadd.f32 %v7647_v34, %v7646_v19  ;;  %v15215_v17 = vld [vmem:[#allocation73_spill] sm:$0xff] }
 0x7f8   : > { %v6676_v55 = vadd.f32 %v15210_v46, %v6515_v33  ;;  %v6518_v8 = vadd.f32 %v7648_v4, %v13941_v9  ;;  %v8666_v4 = vld [vmem:[%s9066_s17 + $0x58] sm:$0xff] }
 0x7fa   : > { %v6784_v59 = vadd.f32 %v8661_v60, %v6676_v55  ;;  %v6679_v18 = vadd.f32 %v15211_v61, %v6518_v8  ;;  %v7649_v1 = vpop.f32.mrb[208].mxu1 }
 0x7fb   : > { %v7650_v41 = vpop.f32.mrb[209].mxu1 }
 0x7fc   : > { %6800 = vst [vmem:[%s14065_s9 + $0x30] sm:$0xff] %v6784_v59  ;;  %v6785_v3 = vadd.f32 %v8662_v14, %v6679_v18  ;;  %v7651_v36 = vadd.f32 %v7650_v41, %v7649_v1  ;;  %v7652_v12 = vpop.f32.mrb[210].mxu1  ;;  %v15216_v59 = vld [vmem:[#allocation70_spill] sm:$0xff]  ;;  %v8667_v1 = vld [vmem:[%s9066_s17 + $0x60] sm:$0xff] }
 0x7fd   : > { %v7653_v2 = vpop.f32.mrb[211].mxu1  ;;  %v15217_v14 = vld [vmem:[#allocation38_spill] sm:$0xff] }
 0x7fe   : > { %6801 = vst [vmem:[%s14065_s9 + $0x38] sm:$0xff] %v6785_v3  ;;  %v6523_v57 = vadd.f32 %v7651_v36, %v13960_v32  ;;  %v7654_v9 = vadd.f32 %v7653_v2, %v7652_v12  ;;  %v8668_v2 = vld [vmem:[%s9066_s17 + $0x68] sm:$0xff] }
 0x800   : > { %v6684_v49 = vadd.f32 %v15212_v27, %v6523_v57  ;;  %v6526_v53 = vadd.f32 %v7654_v9, %v13967_v24 }
 0x802   : > { %v6786_v16 = vadd.f32 %v8663_v51, %v6684_v49  ;;  %v6687_v37 = vadd.f32 %v15213_v44, %v6526_v53  ;;  %v7655_v50 = vpop.f32.mrb[212].mxu1  ;;  %v15218_v53 = vld [vmem:[#allocation35_spill] sm:$0xff]  ;;  %v8669_v44 = vld [vmem:[%s9066_s17 + $0x70] sm:$0xff] }
 0x803   : > { %v7656_v52 = vpop.f32.mrb[213].mxu1 }
 0x804   : > { %6802 = vst [vmem:[%s14065_s9 + $0x40] sm:$0xff] %v6786_v16  ;;  %v6787_v47 = vadd.f32 %v8664_v21, %v6687_v37  ;;  %v7657_v15 = vadd.f32 %v7656_v52, %v7655_v50  ;;  %v7658_v31 = vpop.f32.mrb[214].mxu1  ;;  %v15219_v50 = vld [vmem:[#allocation37_spill] sm:$0xff] }
 0x805   : > { %v7659_v32 = vpop.f32.mrb[215].mxu1 }
 0x806   : > { %6803 = vst [vmem:[%s14065_s9 + $0x48] sm:$0xff] %v6787_v47  ;;  %v6531_v40 = vadd.f32 %v7657_v15, %v13983_v0  ;;  %v7660_v24 = vadd.f32 %v7659_v32, %v7658_v31  ;;  %v8670_v15 = vld [vmem:[%s9066_s17 + $0x78] sm:$0xff] }
 0x808   : > { %v6692_v28 = vadd.f32 %v15214_v10, %v6531_v40  ;;  %v6534_v29 = vadd.f32 %v7660_v24, %v13986_v7 }
 0x80a   : > { %v6788_v62 = vadd.f32 %v8665_v58, %v6692_v28  ;;  %v6695_v19 = vadd.f32 %v15215_v17, %v6534_v29  ;;  %v7661_v34 = vpop.f32.mrb[216].mxu1  ;;  %v15220_v28 = vld [vmem:[#allocation41_spill] sm:$0xff] }
 0x80b   : > { %v7662_v33 = vpop.f32.mrb[217].mxu1 }
 0x80c   : > { %6804 = vst [vmem:[%s14065_s9 + $0x50] sm:$0xff] %v6788_v62  ;;  %v6789_v46 = vadd.f32 %v8666_v4, %v6695_v19  ;;  %v7663_v55 = vadd.f32 %v7662_v33, %v7661_v34  ;;  %v7664_v8 = vpop.f32.mrb[218].mxu1  ;;  %v7232_v62 = vld [vmem:[%s9066_s17 + $0x88] sm:$0xff]  ;;  %v15221_v19 = vld [vmem:[#allocation40_spill] sm:$0xff] }
 0x80d   : > { %v7665_v0 = vpop.f32.mrb[219].mxu1 }
 0x80e   : > { %6805 = vst [vmem:[%s14065_s9 + $0x58] sm:$0xff] %v6789_v46  ;;  %v6539_v60 = vadd.f32 %v7663_v55, %v13997_v45  ;;  %v7666_v7 = vadd.f32 %v7665_v0, %v7664_v8 }
 0x810   : > { %v6700_v61 = vadd.f32 %v15216_v59, %v6539_v60  ;;  %v6542_v18 = vadd.f32 %v7666_v7, %v14002_v54  ;;  %v7233_v7 = vld [vmem:[%s9066_s17 + $0x90] sm:$0xff] }
 0x812   : > { %v6790_v41 = vadd.f32 %v8667_v1, %v6700_v61  ;;  %v6703_v3 = vadd.f32 %v15217_v14, %v6542_v18  ;;  %v7667_v36 = vpop.f32.mrb[220].mxu1  ;;  %v7234_v18 = vld [vmem:[%s9066_s17 + $0x98] sm:$0xff] }
 0x813   : > { %v7668_v12 = vpop.f32.mrb[221].mxu1 }
 0x814   : > { %6806 = vst [vmem:[%s14065_s9 + $0x60] sm:$0xff] %v6790_v41  ;;  %v6791_v57 = vadd.f32 %v8668_v2, %v6703_v3  ;;  %v7669_v9 = vadd.f32 %v7668_v12, %v7667_v36  ;;  %v7670_v27 = vpop.f32.mrb[222].mxu1  ;;  %v15223_v41 = vld [vmem:[#allocation44_spill] sm:$0xff] }
 0x815   : > { %v7671_v45 = vpop.f32.mrb[223].mxu1 }
 0x816   : > { %6807 = vst [vmem:[%s14065_s9 + $0x68] sm:$0xff] %v6791_v57  ;;  %v6547_v49 = vadd.f32 %v7669_v9, %v14005_v38  ;;  %v7672_v54 = vadd.f32 %v7671_v45, %v7670_v27  ;;  %v7235_v45 = vld [vmem:[%s9066_s17 + $0xa0] sm:$0xff] }
 0x818   : > { %v6708_v51 = vadd.f32 %v15218_v53, %v6547_v49  ;;  %v6550_v16 = vadd.f32 %v7672_v54, %v14008_v23  ;;  %v7231_v23 = vld [vmem:[%s9066_s17 + $0x80] sm:$0xff]  ;;  %v7236_v53 = vld [vmem:[%s9066_s17 + $0xa8] sm:$0xff] }
 0x81a   : > { %v6792_v37 = vadd.f32 %v8669_v44, %v6708_v51  ;;  %v6711_v52 = vadd.f32 %v15219_v50, %v6550_v16  ;;  %v7673_v21 = vpop.f32.mrb[224].mxu1  ;;  %v15225_v16 = vld [vmem:[#allocation30_spill] sm:$0xff] }
 0x81b   : > { %v7674_v47 = vpop.f32.mrb[225].mxu1 }
 0x81c   : > { %6808 = vst [vmem:[%s14065_s9 + $0x70] sm:$0xff] %v6792_v37  ;;  %v6793_v31 = vadd.f32 %v8670_v15, %v6711_v52  ;;  %v7675_v32 = vadd.f32 %v7674_v47, %v7673_v21  ;;  %v7676_v40 = vpop.f32.mrb[226].mxu1 }
 0x81d   : > { %v7677_v38 = vpop.f32.mrb[227].mxu1 }
 0x81e   : > { %6809 = vst [vmem:[%s14065_s9 + $0x78] sm:$0xff] %v6793_v31  ;;  %v6555_v24 = vadd.f32 %v7675_v32, %v14011_v48  ;;  %v7678_v10 = vadd.f32 %v7677_v38, %v7676_v40  ;;  %v7237_v32 = vld [vmem:[%s9066_s17 + $0xb0] sm:$0xff] }
 0x820   : > { %v6716_v29 = vadd.f32 %v15220_v28, %v6555_v24  ;;  %v6558_v58 = vadd.f32 %v7678_v10, %v14014_v11  ;;  %v15222_v11 = vld [vmem:[#allocation61_spill] sm:$0xff]  ;;  %v7238_v24 = vld [vmem:[%s9066_s17 + $0xb8] sm:$0xff] }
 0x822   : > { %v6826_v17 = vadd.f32 %v7231_v23, %v6716_v29  ;;  %v6719_v34 = vadd.f32 %v15221_v19, %v6558_v58  ;;  %v7679_v33 = vpop.f32.mrb[228].mxu1  ;;  %v15227_v23 = vld [vmem:[#allocation31_spill] sm:$0xff] }
 0x823   : > { %v7680_v4 = vpop.f32.mrb[229].mxu1 }
 0x824   : > { %7247 = vst [vmem:[%s14065_s9 + $0x80] sm:$0xff] %v6826_v17  ;;  %v6827_v46 = vadd.f32 %v7232_v62, %v6719_v34  ;;  %v7681_v55 = vadd.f32 %v7680_v4, %v7679_v33  ;;  %v7682_v8 = vpop.f32.mrb[230].mxu1  ;;  %v7239_v4 = vld [vmem:[%s9066_s17 + $0xc0] sm:$0xff] }
 0x825   : > { %v7683_v48 = vpop.f32.mrb[231].mxu1 }
 0x826   : > { %7248 = vst [vmem:[%s14065_s9 + $0x88] sm:$0xff] %v6827_v46  ;;  %v6563_v0 = vadd.f32 %v7681_v55, %v14017_v63  ;;  %v7684_v60 = vadd.f32 %v7683_v48, %v7682_v8  ;;  %v7240_v8 = vld [vmem:[%s9066_s17 + $0xc8] sm:$0xff] }
 0x828   : > { %v6724_v59 = vadd.f32 %v15222_v11, %v6563_v0  ;;  %v6566_v61 = vadd.f32 %v7684_v60, %v14020_v42  ;;  %v15224_v42 = vld [vmem:[#allocation50_spill] sm:$0xff]  ;;  %v15229_v0 = vld [vmem:[#allocation81_spill] sm:$0xff] }
 0x82a   : > { %v6828_v1 = vadd.f32 %v7233_v7, %v6724_v59  ;;  %v6727_v14 = vadd.f32 %v15223_v41, %v6566_v61  ;;  %v7685_v3 = vpop.f32.mrb[232].mxu1 }
 0x82b   : > { %v7686_v36 = vpop.f32.mrb[233].mxu1 }
 0x82c   : > { %7249 = vst [vmem:[%s14065_s9 + $0x90] sm:$0xff] %v6828_v1  ;;  %v6829_v12 = vadd.f32 %v7234_v18, %v6727_v14  ;;  %v7687_v2 = vadd.f32 %v7686_v36, %v7685_v3  ;;  %v7688_v57 = vpop.f32.mrb[234].mxu1  ;;  %v7241_v14 = vld [vmem:[%s9066_s17 + $0xd0] sm:$0xff] }
 0x82d   : > { %v7689_v63 = vpop.f32.mrb[235].mxu1 }
 0x82e   : > { %7250 = vst [vmem:[%s14065_s9 + $0x98] sm:$0xff] %v6829_v12  ;;  %v6571_v9 = vadd.f32 %v7687_v2, %v14023_v13  ;;  %v7690_v27 = vadd.f32 %v7689_v63, %v7688_v57  ;;  %v7242_v12 = vld [vmem:[%s9066_s17 + $0xd8] sm:$0xff]  ;;  %v15231_v57 = vld [vmem:[#allocation85_spill] sm:$0xff] }
 0x830   : > { %v6732_v49 = vadd.f32 %v15224_v42, %v6571_v9  ;;  %v6574_v54 = vadd.f32 %v7690_v27, %v14026_v6  ;;  %v15226_v6 = vld [vmem:[#allocation13_spill] sm:$0xff] }
 0x832   : > { %v6830_v51 = vadd.f32 %v7235_v45, %v6732_v49  ;;  %v6735_v44 = vadd.f32 %v15225_v16, %v6574_v54  ;;  %v7691_v37 = vpop.f32.mrb[236].mxu1 }
 0x833   : > { %v7692_v50 = vpop.f32.mrb[237].mxu1 }
 0x834   : > { %7251 = vst [vmem:[%s14065_s9 + $0xa0] sm:$0xff] %v6830_v51  ;;  %v6831_v52 = vadd.f32 %v7236_v53, %v6735_v44  ;;  %v7693_v21 = vadd.f32 %v7692_v50, %v7691_v37  ;;  %v7694_v47 = vpop.f32.mrb[238].mxu1 }
 0x835   : > { %v7695_v13 = vpop.f32.mrb[239].mxu1 }
 0x836   : > { %7252 = vst [vmem:[%s14065_s9 + $0xa8] sm:$0xff] %v6831_v52  ;;  %v6579_v15 = vadd.f32 %v7693_v21, %v14029_v22  ;;  %v7696_v31 = vadd.f32 %v7695_v13, %v7694_v47 }
 0x838   : > { %v6740_v40 = vadd.f32 %v15226_v6, %v6579_v15  ;;  %v6582_v38 = vadd.f32 %v7696_v31, %v14032_v39  ;;  %v15228_v39 = vld [vmem:[#allocation79_spill] sm:$0xff] }
 0x83a   : > { %v6832_v10 = vadd.f32 %v7237_v32, %v6740_v40  ;;  %v6743_v28 = vadd.f32 %v15227_v23, %v6582_v38  ;;  %v7697_v29 = vpop.f32.mrb[240].mxu1  ;;  %v7243_v32 = vld [vmem:[%s9066_s17 + $0xe0] sm:$0xff]  ;;  %v7244_v38 = vld [vmem:[%s9066_s17 + $0xe8] sm:$0xff] }
 0x83b   : > { %v7698_v58 = vpop.f32.mrb[241].mxu1 }
 0x83c   : > { %7253 = vst [vmem:[%s14065_s9 + $0xb0] sm:$0xff] %v6832_v10  ;;  %v6833_v62 = vadd.f32 %v7238_v24, %v6743_v28  ;;  %v7699_v17 = vadd.f32 %v7698_v58, %v7697_v29  ;;  %v7700_v19 = vpop.f32.mrb[242].mxu1  ;;  %v7245_v58 = vld [vmem:[%s9066_s17 + $0xf0] sm:$0xff] }
 0x83d   : > { %v7701_v22 = vpop.f32.mrb[243].mxu1 }
 0x83e   : > { %7254 = vst [vmem:[%s14065_s9 + $0xb8] sm:$0xff] %v6833_v62  ;;  %v6587_v34 = vadd.f32 %v7699_v17, %v14035_v56  ;;  %v7702_v33 = vadd.f32 %v7701_v22, %v7700_v19  ;;  %v7246_v22 = vld [vmem:[%s9066_s17 + $0xf8] sm:$0xff]  ;;  %s8761_s17 = sshll.u32 %s8839_s28, 4  ;;  %s8762_s17 = int_to_ptr.vmem [resolvable:$false] %s8761_s17 }
 0x83f   : > { %s8763_s22 = scalar_lea.vmem %s8762_s17, 8192  ;;  %p8764_p5 = scmp.lt.s32.totalorder %s14191_s29, %s8762_s17 }
 0x840   : > { %v6748_v46 = vadd.f32 %v15228_v39, %v6587_v34  ;;  %v6590_v55 = vadd.f32 %v7702_v33, %v14038_v30  ;;  %v15230_v30 = vld [vmem:[#allocation83_spill] sm:$0xff]  ;;  %p8765_p9 = scmp.lt.s32.totalorder %s8763_s22, %s8757_s14 }
 0x842   : > { %v6834_v48 = vadd.f32 %v7239_v4, %v6748_v46  ;;  %v6751_v60 = vadd.f32 %v15229_v0, %v6590_v55  ;;  %v7703_v7 = vpop.f32.mrb[244].mxu1  ;;  %p8766_p12 = por %p8765_p9, %p8764_p5 }
 0x843   : > { %v7704_v11 = vpop.f32.mrb[245].mxu1 }
 0x844   : > { %7255 = vst [vmem:[%s14065_s9 + $0xc0] sm:$0xff] %v6834_v48  ;;  %v6835_v59 = vadd.f32 %v7240_v8, %v6751_v60  ;;  %v7705_v61 = vadd.f32 %v7704_v11, %v7703_v7  ;;  %v7706_v18 = vpop.f32.mrb[246].mxu1  ;;  %p8767_p1 = pnand %p8766_p12, %p8760_p3 }
 0x845   : > { %v7707_v56 = vpop.f32.mrb[247].mxu1 }
 0x846   : > { %7256 = vst [vmem:[%s14065_s9 + $0xc8] sm:$0xff] %v6835_v59  ;;  %v6595_v1 = vadd.f32 %v7705_v61, %v14041_v25  ;;  %v7708_v41 = vadd.f32 %v7707_v56, %v7706_v18 }
 0x848   : > { %v6756_v3 = vadd.f32 %v15230_v30, %v6595_v1  ;;  %v6598_v36 = vadd.f32 %v7708_v41, %v14044_v35 }
 0x84a   : > { %v6836_v2 = vadd.f32 %v7241_v14, %v6756_v3  ;;  %v6759_v63 = vadd.f32 %v15231_v57, %v6598_v36  ;;  %v7709_v9 = vpop.f32.mrb[248].mxu1 }
 0x84b   : > { %v7710_v27 = vpop.f32.mrb[249].mxu1 }
 0x84c   : > { %7257 = vst [vmem:[%s14065_s9 + $0xd0] sm:$0xff] %v6836_v2  ;;  %v6837_v45 = vadd.f32 %v7242_v12, %v6759_v63  ;;  %v7711_v42 = vadd.f32 %v7710_v27, %v7709_v9  ;;  %v7712_v49 = vpop.f32.mrb[250].mxu1 }
 0x84d   : > { %v7713_v54 = vpop.f32.mrb[251].mxu1 }
 0x84e   : > { %7258 = vst [vmem:[%s14065_s9 + $0xd8] sm:$0xff] %v6837_v45  ;;  %v6603_v25 = vadd.f32 %v7711_v42, %v14047_v20  ;;  %v7714_v53 = vadd.f32 %v7713_v54, %v7712_v49 }
 0x850   : > { %v6606_v51 = vadd.f32 %v7714_v53, %v14050_v43 }
 0x852   : > { %v7715_v16 = vpop.f32.mrb[252].mxu1 }
 0x853   : > { %v7716_v35 = vpop.f32.mrb[253].mxu1 }
 0x854   : > { %v7717_v44 = vadd.f32 %v7716_v35, %v7715_v16  ;;  %v7718_v37 = vpop.f32.mrb[254].mxu1 }
 0x855   : > { %v7719_v50 = vpop.f32.mrb[255].mxu1 }
 0x856   : > { %v6611_v52 = vadd.f32 %v7717_v44, %v14053_v5  ;;  %v7720_v21 = vadd.f32 %v7719_v50, %v7718_v37 }
 0x858   : > { %v6614_v47 = vadd.f32 %v7720_v21, %v14056_v26 }
 0x85a   : > { %v7821_v13 = vpop.f32.mrb[0].mxu1 }
 0x85b   : > { %v7822_v15 = vpop.f32.mrb[1].mxu1 }
 0x85c   : > { %v7823_v31 = vadd.f32 %v7822_v15, %v7821_v13  ;;  %v7824_v20 = vpop.f32.mrb[2].mxu1 }
 0x85d   : > { %v7825_v43 = vpop.f32.mrb[3].mxu1 }
 0x85e   : > { %v6764_v6 = vadd.f32 %v7823_v31, %v6603_v25  ;;  %v7826_v40 = vadd.f32 %v7825_v43, %v7824_v20 }
 0x860   : > { %v6838_v24 = vadd.f32 %v7243_v32, %v6764_v6  ;;  %v6767_v10 = vadd.f32 %v7826_v40, %v6606_v51 }
 0x862   : > { %7259 = vst [vmem:[%s14065_s9 + $0xe0] sm:$0xff] %v6838_v24  ;;  %v6839_v5 = vadd.f32 %v7244_v38, %v6767_v10  ;;  %v7827_v23 = vpop.f32.mrb[4].mxu1 }
 0x863   : > { %v7828_v26 = vpop.f32.mrb[5].mxu1 }
 0x864   : > { %7260 = vst [vmem:[%s14065_s9 + $0xe8] sm:$0xff] %v6839_v5  ;;  %v7829_v28 = vadd.f32 %v7828_v26, %v7827_v23  ;;  %v7830_v29 = vpop.f32.mrb[6].mxu1 }
 0x865   : > { %v7831_v62 = vpop.f32.mrb[7].mxu1 }
 0x866   : > { %v6772_v17 = vadd.f32 %v7829_v28, %v6611_v52  ;;  %v7832_v19 = vadd.f32 %v7831_v62, %v7830_v29 }
 0x868   : > { %v6840_v34 = vadd.f32 %v7245_v58, %v6772_v17  ;;  %v6775_v33 = vadd.f32 %v7832_v19, %v6614_v47 }
 0x86a   : > { %7261 = vst [vmem:[%s14065_s9 + $0xf0] sm:$0xff] %v6840_v34  ;;  %v6841_v4 = vadd.f32 %v7246_v22, %v6775_v33 }
 0x86c   : > { %7262 = vst [vmem:[%s14065_s9 + $0xf8] sm:$0xff] %v6841_v4 }
 0x86d   : > { %8770 = shalt.err (!%p8767_p1)
}
 0x86e   : > { %s8771_s23 = scalar_lea.hbm %s14189_s18, 4096  ;;  %s8775_s9 = scalar_lea.hbm %s14244_s7, 8192 }
 0x86f   : > { %p8772_p13 = scmp.ne.s32.totalorder %s14189_s18, %s8771_s23  ;;  %p8776_p4 = scmp.lt.u32.totalorder %s14189_s18, %s14244_s7 }
 0x870   : > { %p8777_p7 = scmp.lt.u32.totalorder %s8775_s9, %s8771_s23  ;;  %p8779_p11 = scmp.lt.u32.totalorder %s8771_s23, %s14189_s18 }
 0x871   : > { %p8773_p6 = pnand %p8772_p13, %p15232_p0 }
 0x872   : > { %p8778_p8 = por %p8777_p7, %p8776_p4 }
 0x873   : > { %p8774_p10 = pneg %p8773_p6 }
 0x874   : > { %p8780_p2 = por %p8779_p11, %p8778_p8 }
 0x876   : > { %p8781_p3 = pnand %p8780_p2, %p8774_p10 }
 0x878   : > { %8784 = shalt.err (!%p8781_p3)
}
 0x879   : > { %s8840_s15 = smov 128   ;;  %s8841_s14 = smov 8  }
 0x87a   : > { %8051 = dma.vmem_to_hbm [thread:$0]  (%p15232_p0), %s14191_s29, 4096, %s14189_s18, %s6860_s21, %s8840_s15, %s8840_s15, %s8841_s14  }
 0x87b PF: > { %s6889_s28 = sand.u32 1, %s8815_s24   ;;  %p15233_p5 = scmp.ne.s32.totalorder %s14477_s8, 0 }
 0x87c   : > { %p15234_p9 = scmp.ge.s32.totalorder %s8827_s27, 2  ;;  %s6890_s17 = scalar_lea.sflag [#allocation4], %s6889_s28 }
 0x87e   : > { %p8065_p12 = pnand %p15234_p9, %p15233_p5 }
 0x880   : > { %8810 = dma.done.wait (!%p8065_p12), %s6890_s17, 4096  }
 0x881   : > { %8812 = vsyncadd (!%p8065_p12), %s6890_s17, 4294963200  ;;  %p21_p1 = scmp.ge.s32.totalorder %s8995_s16, 4   ;;  %s15235_s24 = smov %s8819_s25 }
 0x882   : > { %s15236_s25 = smov %s8823_s26  ;;  %s15237_s26 = smov %s9004_s19 }
 0x883   : > { %s15238_s27 = smov %s8995_s16  ;;  %23 = sbr.rel (!%p21_p1) target bundleno = 6 (0x6), region = 103 }
 0x88a   :  { %6895 = vsyncpa [#allocation3], 1 }
 0x88b   :  { %6897 = vsyncpa [#allocation3 + $0x1], 1 }
 0x88c   :  { %6898 = vsyncpa [#allocation6], 1 }
 0x88d   :  { %6899 = vsyncpa [#allocation4], 1 }
 0x88e   :  { %6901 = vsyncpa [#allocation4 + $0x1], 1 }

</bundles_post_ra>
